<compile_context>
chip_gen: v7x
topology: tpu7x:2x2x1
jax: 0.10.0
libtpu: 0.0.40
codegen_flags: <defaults>
</compile_context>

<pallas_src>
import functools

import jax
import jax.numpy as jnp
import numpy as np
from jax.experimental import pallas as pl
from jax.experimental.pallas import tpu as pltpu

HP = 128          # lane-padded hidden width (real hidden H = 100)
GP = 3 * HP       # concatenated gates [r | z | n], each padded to 128 lanes


# ----------------------------------------------------------------------------
# Fused GRU stack kernel: grid over the 6 layer applications. The activation
# lives in the resident output block (constant index map); each grid step does
#   gi = act @ Wi + bi            (one big hoisted MXU matmul)
#   for t: gh = h @ Wh + bh; gates; h' ; act[t] = h'   (lax.fori_loop, in VMEM)
# Gate order is PyTorch's [r, z, n]. Zero padding (lanes 100:128, extra batch
# rows) is constructed so padded values stay zero / never leak into real lanes.
# ----------------------------------------------------------------------------
def _gru_stack_kernel(x_ref, wi_ref, wh_ref, bi_ref, bh_ref, o_ref, gi_ref, *, T, B):
    a = pl.program_id(0)

    @pl.when(a == 0)
    def _():
        o_ref[...] = x_ref[...]          # layer-0 input (padded embedding)

    # Hoisted input projection for the entire sequence: one MXU matmul.
    gi_ref[...] = (
        jnp.dot(o_ref[...], wi_ref[0], preferred_element_type=jnp.float32)
        + bi_ref[0]
    )

    def step(t, h):
        row = pl.multiple_of(t * B, B)                     # B = 8 -> sublane aligned
        g_i = gi_ref[pl.ds(row, B), :]                     # (B, GP)
        g_h = jnp.dot(h, wh_ref[0], preferred_element_type=jnp.float32) + bh_ref[0]
        r = jax.nn.sigmoid(g_i[:, 0:HP] + g_h[:, 0:HP])
        z = jax.nn.sigmoid(g_i[:, HP:2 * HP] + g_h[:, HP:2 * HP])
        n = jnp.tanh(g_i[:, 2 * HP:3 * HP] + r * g_h[:, 2 * HP:3 * HP])
        h_new = (1.0 - z) * n + z * h
        o_ref[pl.ds(row, B), :] = h_new                    # overwrite in place (gi already built)
        return h_new

    jax.lax.fori_loop(0, T, step, jnp.zeros((B, HP), jnp.float32))


def pallas_gru_stack(x_flat, wi_all, wh_all, bi_all, bh_all, *, T, B):
    """x_flat: (T*B, 128) f32 -> (T*B, 128) f32 after all 6 GRU layer applications."""
    L = wi_all.shape[0]
    kernel = functools.partial(_gru_stack_kernel, T=T, B=B)
    return pl.pallas_call(
        kernel,
        out_shape=jax.ShapeDtypeStruct((T * B, HP), jnp.float32),
        grid=(L,),
        in_specs=[
            pl.BlockSpec((T * B, HP), lambda a: (0, 0)),
            pl.BlockSpec((1, HP, GP), lambda a: (a, 0, 0)),
            pl.BlockSpec((1, HP, GP), lambda a: (a, 0, 0)),
            pl.BlockSpec((1, 1, GP), lambda a: (a, 0, 0)),
            pl.BlockSpec((1, 1, GP), lambda a: (a, 0, 0)),
        ],
        out_specs=pl.BlockSpec((T * B, HP), lambda a: (0, 0)),
        scratch_shapes=[pltpu.VMEM((T * B, GP), jnp.float32)],
        compiler_params=pltpu.CompilerParams(dimension_semantics=("arbitrary",)),
    )(x_flat, wi_all, wh_all, bi_all, bh_all)


# ----------------------------------------------------------------------------
# Tiled linear kernel: y = act(x @ W + b). Grid = (N tiles [parallel], K tiles
# [arbitrary]). The output block is the accumulator (constant over k); bias and
# activation are fused in the last-k epilogue. Weights are bf16 (f32 accumulate).
# ----------------------------------------------------------------------------
def _linear_kernel(x_ref, w_ref, b_ref, o_ref, *, activation):
    k = pl.program_id(1)

    @pl.when(k == 0)
    def _():
        o_ref[...] = jnp.zeros_like(o_ref)

    o_ref[...] += jnp.dot(x_ref[...].astype(w_ref.dtype), w_ref[...],
                          preferred_element_type=jnp.float32)

    @pl.when(k == pl.num_programs(1) - 1)
    def _():
        y = o_ref[...] + b_ref[...]
        if activation == "relu":
            y = jnp.maximum(y, 0.0)
        elif activation == "softmax":
            y = jax.nn.softmax(y, axis=-1)
        o_ref[...] = y


def pallas_linear(x, w, b, activation=None, tk=None, tn=None):
    """x: (B, K) f32, w: (K, N) bf16 (pre-padded/cast), b: (N,) f32 -> (B, N) f32."""
    B, K = x.shape
    Kw, N = w.shape
    assert K == Kw, (K, Kw)
    tk = K if tk is None else min(tk, K)
    tn = N if tn is None else min(tn, N)
    assert K % tk == 0 and N % tn == 0, (K, tk, N, tn)
    nk, nn = K // tk, N // tn
    if activation == "softmax":
        assert nn == 1  # softmax needs the full row in one output tile
    b2 = b.reshape(1, N).astype(jnp.float32)

    kernel = functools.partial(_linear_kernel, activation=activation)
    return pl.pallas_call(
        kernel,
        out_shape=jax.ShapeDtypeStruct((B, N), jnp.float32),
        grid=(nn, nk),
        in_specs=[
            pl.BlockSpec((B, tk), lambda j, k: (0, k)),
            pl.BlockSpec((tk, tn), lambda j, k: (k, j)),
            pl.BlockSpec((1, tn), lambda j, k: (0, j)),
        ],
        out_specs=pl.BlockSpec((B, tn), lambda j, k: (0, j)),
        compiler_params=pltpu.CompilerParams(
            dimension_semantics=("parallel", "arbitrary")),
    )(x, w, b2)


# ----------------------------------------------------------------------------
# Parameter init (deterministic, PyTorch-like uniform(-1/sqrt(fan), 1/sqrt(fan)))
# ----------------------------------------------------------------------------
def _gru_layer_params(key, D, H):
    s = 1.0 / np.sqrt(H)
    k1, k2, k3, k4 = jax.random.split(key, 4)
    wi = jax.random.uniform(k1, (3, D, H), jnp.float32, -s, s)   # gate order [r, z, n]
    wh = jax.random.uniform(k2, (3, H, H), jnp.float32, -s, s)
    bi = jax.random.uniform(k3, (3, 1, H), jnp.float32, -s, s)
    bh = jax.random.uniform(k4, (3, 1, H), jnp.float32, -s, s)
    return (wi, wh, bi, bh)


def _linear_params(key, K, N):
    s = 1.0 / np.sqrt(K)
    k1, k2 = jax.random.split(key)
    w = jax.random.uniform(k1, (K, N), jnp.float32, -s, s)
    b = jax.random.uniform(k2, (N,), jnp.float32, -s, s)
    return w, b


def init_params(key, vocab=50, emb_dim=64, hidden=100, T=116):
    keys = jax.random.split(key, 10)
    params = {}
    params["embedding"] = jax.random.normal(keys[0], (vocab, emb_dim), jnp.float32)
    # self.lstm: GRU(emb_dim -> hidden, num_layers=2)
    params["gru1"] = [
        _gru_layer_params(keys[1], emb_dim, hidden),
        _gru_layer_params(keys[2], hidden, hidden),
    ]
    # self.lstm2: GRU(100 -> 100, num_layers=2)
    params["gru2"] = [
        _gru_layer_params(keys[3], 100, 100),
        _gru_layer_params(keys[4], 100, 100),
    ]
    params["w1"], params["b1"] = _linear_params(keys[5], 100 * T, 2048)
    params["w2"], params["b2"] = _linear_params(keys[6], 2048, 256)
    params["w3"], params["b3"] = _linear_params(keys[7], 256, 32)
    params["w4"], params["b4"] = _linear_params(keys[8], 32, 2)
    return params


# ----------------------------------------------------------------------------
# One-time parameter preparation for the kernels (padding / gate packing / bf16).
# ----------------------------------------------------------------------------
def _pack_gru_layer(layer):
    wi, wh, bi, bh = layer                         # (3,D,H), (3,H,H), (3,1,H), (3,1,H)
    D, H = wi.shape[1], wi.shape[2]
    wi_p = jnp.concatenate([jnp.pad(wi[g], ((0, HP - D), (0, HP - H))) for g in range(3)], axis=1)
    wh_p = jnp.concatenate([jnp.pad(wh[g], ((0, HP - H), (0, HP - H))) for g in range(3)], axis=1)
    bi_p = jnp.concatenate([jnp.pad(bi[g], ((0, 0), (0, HP - H))) for g in range(3)], axis=1)
    bh_p = jnp.concatenate([jnp.pad(bh[g], ((0, 0), (0, HP - H))) for g in range(3)], axis=1)
    return wi_p, wh_p, bi_p, bh_p                  # (128,384), (128,384), (1,384), (1,384)


def prepare_params(raw, tk1=1024):
    prep = {}
    V, E = raw["embedding"].shape
    assert E <= HP, "embedding dim must fit in one 128-lane block"
    prep["embedding"] = jnp.pad(raw["embedding"], ((0, 0), (0, HP - E)))   # (V, 128)

    # Layer application order of the module: lstm(l0,l1), lstm2(l0,l1), lstm2(l0,l1)
    seq = [raw["gru1"][0], raw["gru1"][1],
           raw["gru2"][0], raw["gru2"][1],
           raw["gru2"][0], raw["gru2"][1]]
    packed = [_pack_gru_layer(l) for l in seq]
    prep["gru_wi"] = jnp.stack([p[0] for p in packed])    # (6, 128, 384)
    prep["gru_wh"] = jnp.stack([p[1] for p in packed])    # (6, 128, 384)
    prep["gru_bi"] = jnp.stack([p[2] for p in packed])    # (6, 1, 384)
    prep["gru_bh"] = jnp.stack([p[3] for p in packed])    # (6, 1, 384)

    # Classifier: K-pad w1 ONCE (zeros are inert) and cast weights to bf16.
    K1 = raw["w1"].shape[0]
    K1p = ((K1 + tk1 - 1) // tk1) * tk1
    prep["w1"] = jnp.pad(raw["w1"], ((0, K1p - K1), (0, 0))).astype(jnp.bfloat16)
    prep["b1"] = raw["b1"]
    prep["w2"] = raw["w2"].astype(jnp.bfloat16)
    prep["b2"] = raw["b2"]
    prep["w3"] = raw["w3"].astype(jnp.bfloat16)
    prep["b3"] = raw["b3"]
    prep["w4"] = raw["w4"].astype(jnp.bfloat16)
    prep["b4"] = raw["b4"]
    return prep


# ----------------------------------------------------------------------------
# Forward passes
# ----------------------------------------------------------------------------
def lstm_net_forward(prep, tokens):
    """tokens: (B, T) int32 -> (B, 2) softmax probabilities (Pallas kernels)."""
    B, T = tokens.shape
    Bp = max(8, ((B + 7) // 8) * 8)                 # sublane-pad the batch
    H = 100

    emb = prep["embedding"][tokens]                 # (B, T, 128) gather (glue)
    x = jnp.transpose(emb, (1, 0, 2))               # time-major (T, B, 128)
    if Bp != B:
        x = jnp.pad(x, ((0, 0), (0, Bp - B), (0, 0)))
    x = x.reshape(T * Bp, HP)

    y = pallas_gru_stack(x, prep["gru_wi"], prep["gru_wh"],
                         prep["gru_bi"], prep["gru_bh"], T=T, B=Bp)   # (T*Bp, 128)

    y = y.reshape(T, Bp, HP)[:, :, :H]              # drop lane padding
    feat = jnp.transpose(y, (1, 0, 2)).reshape(Bp, T * H)   # (Bp, 11600), torch reshape order

    K1p = prep["w1"].shape[0]
    if K1p != feat.shape[1]:                        # pad reduction axis to the tile multiple
        feat = jnp.pad(feat, ((0, 0), (0, K1p - feat.shape[1])))

    # classifier (dropout = identity at inference)
    z = pallas_linear(feat, prep["w1"], prep["b1"], activation="relu", tk=1024, tn=1024)
    z = pallas_linear(z, prep["w2"], prep["b2"], activation="relu")
    z = pallas_linear(z, prep["w3"], prep["b3"], activation="relu")
    z = pallas_linear(z, prep["w4"], prep["b4"], activation="softmax")
    return z[:B]                                    # drop batch padding


def _gru_layer_ref(x, wi, wh, bi, bh):
    T_, B_, _ = x.shape
    H_ = wh.shape[-1]

    def step(h, x_t):
        r = jax.nn.sigmoid(x_t @ wi[0] + bi[0] + h @ wh[0] + bh[0])
        z = jax.nn.sigmoid(x_t @ wi[1] + bi[1] + h @ wh[1] + bh[1])
        n = jnp.tanh(x_t @ wi[2] + bi[2] + r * (h @ wh[2] + bh[2]))
        h_new = (1.0 - z) * n + z * h
        return h_new, h_new

    _, ys = jax.lax.scan(step, jnp.zeros((B_, H_), jnp.float32), x)
    return ys


def _linear_ref(x, w, b, activation):
    # Mirrors the kernel's bf16-operand / f32-accumulate math.
    y = jnp.dot(x.astype(jnp.bfloat16), w.astype(jnp.bfloat16),
                preferred_element_type=jnp.float32) + b
    if activation == "relu":
        return jnp.maximum(y, 0.0)
    return jax.nn.softmax(y, axis=-1)


def lstm_net_forward_ref(raw, tokens):
    """Pure-JAX reference of the same forward (for correctness check)."""
    B, T = tokens.shape
    x = jnp.transpose(raw["embedding"][tokens], (1, 0, 2))
    for layer in raw["gru1"]:
        x = _gru_layer_ref(x, *layer)
    for _ in range(2):
        for layer in raw["gru2"]:
            x = _gru_layer_ref(x, *layer)
    x = jnp.transpose(x, (1, 0, 2)).reshape(B, -1)
    x = _linear_ref(x, raw["w1"], raw["b1"], "relu")
    x = _linear_ref(x, raw["w2"], raw["b2"], "relu")
    x = _linear_ref(x, raw["w3"], raw["b3"], "relu")
    x = _linear_ref(x, raw["w4"], raw["b4"], "softmax")
    return x


if __name__ == "__main__":
    VOCAB, EMB, HIDDEN, T, B = 50, 64, 100, 116, 2  # T=116, HIDDEN=100 forced by module

    key = jax.random.PRNGKey(0)
    kp, ki = jax.random.split(key)
    raw = init_params(kp, vocab=VOCAB, emb_dim=EMB, hidden=HIDDEN, T=T)
    prep = prepare_params(raw)
    tokens = jax.random.randint(ki, (B, T), 0, VOCAB, dtype=jnp.int32)

    out = jax.block_until_ready(jax.jit(lstm_net_forward)(prep, tokens))
    ref = jax.block_until_ready(jax.jit(lstm_net_forward_ref)(raw, tokens))

    assert out.shape == (B, 2), out.shape
    assert bool(jnp.all(jnp.isfinite(out)))
    assert bool(jnp.allclose(jnp.sum(out, axis=1), 1.0, atol=1e-4))
    assert bool(jnp.allclose(out, ref, atol=5e-3, rtol=5e-3)), (out, ref)

    print("KERNEL_OK")
</pallas_src>

<mosaic_0001>
module attributes {stable_mosaic.version = 11 : i64} {
  func.func @_gru_stack_kernel(%arg0: i32, %arg1: memref<928x128xf32, #tpu.memory_space<vmem>>, %arg2: memref<1x128x384xf32, #tpu.memory_space<vmem>>, %arg3: memref<1x128x384xf32, #tpu.memory_space<vmem>>, %arg4: memref<1x1x384xf32, #tpu.memory_space<vmem>>, %arg5: memref<1x1x384xf32, #tpu.memory_space<vmem>>, %arg6: memref<928x128xf32, #tpu.memory_space<vmem>>, %arg7: memref<928x384xf32, #tpu.memory_space<vmem>>) attributes {dimension_semantics = [#tpu.dimension_semantics<arbitrary>], iteration_bounds = array<i64: 6>, scalar_prefetch = 0 : i64, scratch_operands = 1 : i64, tpu.core_type = #tpu.core_type<tc>, window_params = [{pipeline_mode = #tpu.pipeline_mode<synchronous>, transform_indices = @transform_0, window_bounds = array<i64: 928, 128>}, {transform_indices = @transform_1, window_bounds = array<i64: 1, 128, 384>}, {transform_indices = @transform_2, window_bounds = array<i64: 1, 128, 384>}, {transform_indices = @transform_3, window_bounds = array<i64: 1, 1, 384>}, {transform_indices = @transform_4, window_bounds = array<i64: 1, 1, 384>}, {pipeline_mode = #tpu.pipeline_mode<synchronous>, transform_indices = @transform_5, window_bounds = array<i64: 928, 128>}]} {
    %c0_i32 = arith.constant 0 : i32
    %0 = arith.cmpi eq, %arg0, %c0_i32 : i32
    %1 = arith.extui %0 : i1 to i32
    %c0_i32_0 = arith.constant 0 : i32
    %2 = arith.cmpi ne, %1, %c0_i32_0 : i32
    scf.if %2 {
      %c0_13 = arith.constant 0 : index
      %c0_14 = arith.constant 0 : index
      %15 = vector.load %arg1[%c0_13, %c0_14] : memref<928x128xf32, #tpu.memory_space<vmem>>, vector<928x128xf32>
      %c0_15 = arith.constant 0 : index
      %c0_16 = arith.constant 0 : index
      %16 = vector.load %arg6[%c0_15, %c0_16] : memref<928x128xf32, #tpu.memory_space<vmem>>, vector<928x128xf32>
      tpu.vector_store %arg6[%c0_15, %c0_16], %15 {strides = array<i32>} : memref<928x128xf32, #tpu.memory_space<vmem>>, vector<928x128xf32>,
    } else {
    }
    %c0 = arith.constant 0 : index
    %c0_1 = arith.constant 0 : index
    %3 = vector.load %arg6[%c0, %c0_1] : memref<928x128xf32, #tpu.memory_space<vmem>>, vector<928x128xf32>
    %c0_2 = arith.constant 0 : index
    %c0_3 = arith.constant 0 : index
    %c0_4 = arith.constant 0 : index
    %4 = vector.load %arg2[%c0_2, %c0_3, %c0_4] : memref<1x128x384xf32, #tpu.memory_space<vmem>>, vector<1x128x384xf32>
    %5 = vector.shape_cast %4 : vector<1x128x384xf32> to vector<128x384xf32>
    %cst = arith.constant dense<0.000000e+00> : vector<928x384xf32>
    %6 = tpu.matmul %3, %5, %cst {dimension_numbers = #tpu.dot_dimension_numbers<[1], [0], [0], [1], [0, 0, 1, 1], [], []>} : vector<928x128xf32>, vector<128x384xf32>, vector<928x384xf32> -> vector<928x384xf32>
    %c0_5 = arith.constant 0 : index
    %c0_6 = arith.constant 0 : index
    %c0_7 = arith.constant 0 : index
    %7 = vector.load %arg4[%c0_5, %c0_6, %c0_7] : memref<1x1x384xf32, #tpu.memory_space<vmem>>, vector<1x1x384xf32>
    %8 = vector.shape_cast %7 : vector<1x1x384xf32> to vector<1x384xf32>
    %9 = vector.broadcast %8 : vector<1x384xf32> to vector<928x384xf32>
    %10 = arith.addf %6, %9 : vector<928x384xf32>
    %c0_8 = arith.constant 0 : index
    %c0_9 = arith.constant 0 : index
    %11 = vector.load %arg7[%c0_8, %c0_9] : memref<928x384xf32, #tpu.memory_space<vmem>>, vector<928x384xf32>
    tpu.vector_store %arg7[%c0_8, %c0_9], %10 {strides = array<i32>} : memref<928x384xf32, #tpu.memory_space<vmem>>, vector<928x384xf32>,
    %cst_10 = arith.constant 0.000000e+00 : f32
    %12 = vector.broadcast %cst_10 : f32 to vector<8x128xf32>
    %c0_i32_11 = arith.constant 0 : i32
    %c116_i32 = arith.constant 116 : i32
    %13 = arith.addi %c0_i32_11, %c116_i32 : i32
    %c1_i32 = arith.constant 1 : i32
    %14 = scf.for %arg8 = %c0_i32_11 to %13 step %c1_i32 iter_args(%arg9 = %12) -> (vector<8x128xf32>)  : i32 {
      %c8_i32 = arith.constant 8 : i32
      %15 = arith.muli %arg8, %c8_i32 : i32
      %16 = tpu.assume_multiple %15, 8 : i32
      %17 = arith.index_cast %16 : i32 to index
      %c0_13 = arith.constant 0 : index
      %18 = vector.load %arg7[%17, %c0_13] : memref<928x384xf32, #tpu.memory_space<vmem>>, vector<8x384xf32>
      %c0_14 = arith.constant 0 : index
      %c0_15 = arith.constant 0 : index
      %c0_16 = arith.constant 0 : index
      %19 = vector.load %arg3[%c0_14, %c0_15, %c0_16] : memref<1x128x384xf32, #tpu.memory_space<vmem>>, vector<1x128x384xf32>
      %20 = vector.shape_cast %19 : vector<1x128x384xf32> to vector<128x384xf32>
      %cst_17 = arith.constant dense<0.000000e+00> : vector<8x384xf32>
      %21 = tpu.matmul %arg9, %20, %cst_17 {dimension_numbers = #tpu.dot_dimension_numbers<[1], [0], [0], [1], [0, 0, 1, 1], [], []>} : vector<8x128xf32>, vector<128x384xf32>, vector<8x384xf32> -> vector<8x384xf32>
      %c0_18 = arith.constant 0 : index
      %c0_19 = arith.constant 0 : index
      %c0_20 = arith.constant 0 : index
      %22 = vector.load %arg5[%c0_18, %c0_19, %c0_20] : memref<1x1x384xf32, #tpu.memory_space<vmem>>, vector<1x1x384xf32>
      %23 = vector.shape_cast %22 : vector<1x1x384xf32> to vector<1x384xf32>
      %24 = vector.broadcast %23 : vector<1x384xf32> to vector<8x384xf32>
      %25 = arith.addf %21, %24 : vector<8x384xf32>
      %26 = vector.extract_strided_slice %18 {offsets = [0, 0], sizes = [8, 128], strides = [1, 1]} : vector<8x384xf32> to vector<8x128xf32>
      %27 = vector.extract_strided_slice %25 {offsets = [0, 0], sizes = [8, 128], strides = [1, 1]} : vector<8x384xf32> to vector<8x128xf32>
      %28 = arith.addf %26, %27 : vector<8x128xf32>
      %29 = arith.negf %28 : vector<8x128xf32>
      %30 = math.exp %29 : vector<8x128xf32>
      %cst_21 = arith.constant 1.000000e+00 : f32
      %31 = vector.broadcast %cst_21 : f32 to vector<8x128xf32>
      %32 = arith.addf %31, %30 : vector<8x128xf32>
      %33 = arith.divf %31, %32 : vector<8x128xf32>
      %34 = vector.extract_strided_slice %18 {offsets = [0, 128], sizes = [8, 128], strides = [1, 1]} : vector<8x384xf32> to vector<8x128xf32>
      %35 = vector.extract_strided_slice %25 {offsets = [0, 128], sizes = [8, 128], strides = [1, 1]} : vector<8x384xf32> to vector<8x128xf32>
      %36 = arith.addf %34, %35 : vector<8x128xf32>
      %37 = arith.negf %36 : vector<8x128xf32>
      %38 = math.exp %37 : vector<8x128xf32>
      %cst_22 = arith.constant 1.000000e+00 : f32
      %39 = vector.broadcast %cst_22 : f32 to vector<8x128xf32>
      %40 = arith.addf %39, %38 : vector<8x128xf32>
      %41 = arith.divf %39, %40 : vector<8x128xf32>
      %42 = vector.extract_strided_slice %18 {offsets = [0, 256], sizes = [8, 128], strides = [1, 1]} : vector<8x384xf32> to vector<8x128xf32>
      %43 = vector.extract_strided_slice %25 {offsets = [0, 256], sizes = [8, 128], strides = [1, 1]} : vector<8x384xf32> to vector<8x128xf32>
      %44 = arith.mulf %33, %43 : vector<8x128xf32>
      %45 = arith.addf %42, %44 : vector<8x128xf32>
      %46 = math.tanh %45 : vector<8x128xf32>
      %cst_23 = arith.constant 1.000000e+00 : f32
      %47 = vector.broadcast %cst_23 : f32 to vector<8x128xf32>
      %48 = arith.subf %47, %41 : vector<8x128xf32>
      %49 = arith.mulf %48, %46 : vector<8x128xf32>
      %50 = arith.mulf %41, %arg9 : vector<8x128xf32>
      %51 = arith.addf %49, %50 : vector<8x128xf32>
      %52 = arith.index_cast %16 : i32 to index
      %c0_24 = arith.constant 0 : index
      %53 = vector.load %arg6[%52, %c0_24] : memref<928x128xf32, #tpu.memory_space<vmem>>, vector<8x128xf32>
      tpu.vector_store %arg6[%52, %c0_24], %51 {strides = array<i32>} : memref<928x128xf32, #tpu.memory_space<vmem>>, vector<8x128xf32>,
      scf.yield %51 : vector<8x128xf32>
    }
    %c116_i32_12 = arith.constant 116 : i32
    return
  }
  func.func @transform_0(%arg0: i32) -> (i32, i32) {
    %c0_i32 = arith.constant 0 : i32
    %c0_i32_0 = arith.constant 0 : i32
    %c0_i32_1 = arith.constant 0 : i32
    return %c0_i32, %c0_i32_0 : i32, i32
  }
  func.func @transform_1(%arg0: i32) -> (i32, i32, i32) {
    %c0_i32 = arith.constant 0 : i32
    %c0_i32_0 = arith.constant 0 : i32
    %c0_i32_1 = arith.constant 0 : i32
    return %arg0, %c0_i32, %c0_i32_0 : i32, i32, i32
  }
  func.func @transform_2(%arg0: i32) -> (i32, i32, i32) {
    %c0_i32 = arith.constant 0 : i32
    %c0_i32_0 = arith.constant 0 : i32
    %c0_i32_1 = arith.constant 0 : i32
    return %arg0, %c0_i32, %c0_i32_0 : i32, i32, i32
  }
  func.func @transform_3(%arg0: i32) -> (i32, i32, i32) {
    %c0_i32 = arith.constant 0 : i32
    %c0_i32_0 = arith.constant 0 : i32
    %c0_i32_1 = arith.constant 0 : i32
    return %arg0, %c0_i32, %c0_i32_0 : i32, i32, i32
  }
  func.func @transform_4(%arg0: i32) -> (i32, i32, i32) {
    %c0_i32 = arith.constant 0 : i32
    %c0_i32_0 = arith.constant 0 : i32
    %c0_i32_1 = arith.constant 0 : i32
    return %arg0, %c0_i32, %c0_i32_0 : i32, i32, i32
  }
  func.func @transform_5(%arg0: i32) -> (i32, i32) {
    %c0_i32 = arith.constant 0 : i32
    %c0_i32_0 = arith.constant 0 : i32
    %c0_i32_1 = arith.constant 0 : i32
    return %c0_i32, %c0_i32_0 : i32, i32
  }
}

module attributes {stable_mosaic.version = 11 : i64} {
  func.func @_linear_kernel(%arg0: i32, %arg1: i32, %arg2: memref<8x1024xf32, #tpu.memory_space<vmem>>, %arg3: memref<1024x1024xbf16, #tpu.memory_space<vmem>>, %arg4: memref<1x1024xf32, #tpu.memory_space<vmem>>, %arg5: memref<8x1024xf32, #tpu.memory_space<vmem>>) attributes {dimension_semantics = [#tpu.dimension_semantics<parallel>, #tpu.dimension_semantics<arbitrary>], iteration_bounds = array<i64: 2, 12>, scalar_prefetch = 0 : i64, scratch_operands = 0 : i64, tpu.core_type = #tpu.core_type<tc>, window_params = [{transform_indices = @transform_0, window_bounds = array<i64: 8, 1024>}, {transform_indices = @transform_1, window_bounds = array<i64: 1024, 1024>}, {transform_indices = @transform_2, window_bounds = array<i64: 1, 1024>}, {transform_indices = @transform_3, window_bounds = array<i64: 8, 1024>}]} {
    %c0_i32 = arith.constant 0 : i32
    %0 = arith.cmpi eq, %arg1, %c0_i32 : i32
    %1 = arith.extui %0 : i1 to i32
    %c0_i32_0 = arith.constant 0 : i32
    %2 = arith.cmpi ne, %1, %c0_i32_0 : i32
    scf.if %2 {
      %cst_9 = arith.constant 0.000000e+00 : f32
      %13 = vector.broadcast %cst_9 : f32 to vector<8x1024xf32>
      %c0_10 = arith.constant 0 : index
      %c0_11 = arith.constant 0 : index
      %14 = vector.load %arg5[%c0_10, %c0_11] : memref<8x1024xf32, #tpu.memory_space<vmem>>, vector<8x1024xf32>
      tpu.vector_store %arg5[%c0_10, %c0_11], %13 {strides = array<i32>} : memref<8x1024xf32, #tpu.memory_space<vmem>>, vector<8x1024xf32>,
    } else {
    }
    %c0 = arith.constant 0 : index
    %c0_1 = arith.constant 0 : index
    %3 = vector.load %arg5[%c0, %c0_1] : memref<8x1024xf32, #tpu.memory_space<vmem>>, vector<8x1024xf32>
    %c0_2 = arith.constant 0 : index
    %c0_3 = arith.constant 0 : index
    %4 = vector.load %arg2[%c0_2, %c0_3] : memref<8x1024xf32, #tpu.memory_space<vmem>>, vector<8x1024xf32>
    %5 = arith.truncf %4 : vector<8x1024xf32> to vector<8x1024xbf16>
    %c0_4 = arith.constant 0 : index
    %c0_5 = arith.constant 0 : index
    %6 = vector.load %arg3[%c0_4, %c0_5] : memref<1024x1024xbf16, #tpu.memory_space<vmem>>, vector<1024x1024xbf16>
    %cst = arith.constant dense<0.000000e+00> : vector<8x1024xf32>
    %7 = tpu.matmul %5, %6, %cst {dimension_numbers = #tpu.dot_dimension_numbers<[1], [0], [0], [1], [0, 0, 1, 1], [], []>} : vector<8x1024xbf16>, vector<1024x1024xbf16>, vector<8x1024xf32> -> vector<8x1024xf32>
    %8 = arith.addf %3, %7 : vector<8x1024xf32>
    %c0_6 = arith.constant 0 : index
    %c0_7 = arith.constant 0 : index
    %9 = vector.load %arg5[%c0_6, %c0_7] : memref<8x1024xf32, #tpu.memory_space<vmem>>, vector<8x1024xf32>
    tpu.vector_store %arg5[%c0_6, %c0_7], %8 {strides = array<i32>} : memref<8x1024xf32, #tpu.memory_space<vmem>>, vector<8x1024xf32>,
    %c11_i32 = arith.constant 11 : i32
    %10 = arith.cmpi eq, %arg1, %c11_i32 : i32
    %11 = arith.extui %10 : i1 to i32
    %c0_i32_8 = arith.constant 0 : i32
    %12 = arith.cmpi ne, %11, %c0_i32_8 : i32
    scf.if %12 {
      %c0_9 = arith.constant 0 : index
      %c0_10 = arith.constant 0 : index
      %13 = vector.load %arg5[%c0_9, %c0_10] : memref<8x1024xf32, #tpu.memory_space<vmem>>, vector<8x1024xf32>
      %c0_11 = arith.constant 0 : index
      %c0_12 = arith.constant 0 : index
      %14 = vector.load %arg4[%c0_11, %c0_12] : memref<1x1024xf32, #tpu.memory_space<vmem>>, vector<1x1024xf32>
      %15 = vector.broadcast %14 : vector<1x1024xf32> to vector<8x1024xf32>
      %16 = arith.addf %13, %15 : vector<8x1024xf32>
      %cst_13 = arith.constant 0.000000e+00 : f32
      %17 = vector.broadcast %cst_13 : f32 to vector<8x1024xf32>
      %18 = arith.maximumf %16, %17 : vector<8x1024xf32>
      %c0_14 = arith.constant 0 : index
      %c0_15 = arith.constant 0 : index
      %19 = vector.load %arg5[%c0_14, %c0_15] : memref<8x1024xf32, #tpu.memory_space<vmem>>, vector<8x1024xf32>
      tpu.vector_store %arg5[%c0_14, %c0_15], %18 {strides = array<i32>} : memref<8x1024xf32, #tpu.memory_space<vmem>>, vector<8x1024xf32>,
    } else {
    }
    return
  }
  func.func @transform_0(%arg0: i32, %arg1: i32) -> (i32, i32) {
    %c0_i32 = arith.constant 0 : i32
    %c0_i32_0 = arith.constant 0 : i32
    return %c0_i32, %arg1 : i32, i32
  }
  func.func @transform_1(%arg0: i32, %arg1: i32) -> (i32, i32) {
    %c0_i32 = arith.constant 0 : i32
    return %arg1, %arg0 : i32, i32
  }
  func.func @transform_2(%arg0: i32, %arg1: i32) -> (i32, i32) {
    %c0_i32 = arith.constant 0 : i32
    %c0_i32_0 = arith.constant 0 : i32
    return %c0_i32, %arg0 : i32, i32
  }
  func.func @transform_3(%arg0: i32, %arg1: i32) -> (i32, i32) {
    %c0_i32 = arith.constant 0 : i32
    %c0_i32_0 = arith.constant 0 : i32
    return %c0_i32, %arg0 : i32, i32
  }
}

module attributes {stable_mosaic.version = 11 : i64} {
  func.func @_linear_kernel(%arg0: i32, %arg1: i32, %arg2: memref<8x2048xf32, #tpu.memory_space<vmem>>, %arg3: memref<2048x256xbf16, #tpu.memory_space<vmem>>, %arg4: memref<1x256xf32, #tpu.memory_space<vmem>>, %arg5: memref<8x256xf32, #tpu.memory_space<vmem>>) attributes {dimension_semantics = [#tpu.dimension_semantics<parallel>, #tpu.dimension_semantics<arbitrary>], iteration_bounds = array<i64: 1, 1>, scalar_prefetch = 0 : i64, scratch_operands = 0 : i64, tpu.core_type = #tpu.core_type<tc>, window_params = [{transform_indices = @transform_0, window_bounds = array<i64: 8, 2048>}, {transform_indices = @transform_1, window_bounds = array<i64: 2048, 256>}, {transform_indices = @transform_2, window_bounds = array<i64: 1, 256>}, {transform_indices = @transform_3, window_bounds = array<i64: 8, 256>}]} {
    %c0_i32 = arith.constant 0 : i32
    %0 = arith.cmpi eq, %arg1, %c0_i32 : i32
    %1 = arith.extui %0 : i1 to i32
    %c0_i32_0 = arith.constant 0 : i32
    %2 = arith.cmpi ne, %1, %c0_i32_0 : i32
    scf.if %2 {
      %cst_10 = arith.constant 0.000000e+00 : f32
      %13 = vector.broadcast %cst_10 : f32 to vector<8x256xf32>
      %c0_11 = arith.constant 0 : index
      %c0_12 = arith.constant 0 : index
      %14 = vector.load %arg5[%c0_11, %c0_12] : memref<8x256xf32, #tpu.memory_space<vmem>>, vector<8x256xf32>
      tpu.vector_store %arg5[%c0_11, %c0_12], %13 {strides = array<i32>} : memref<8x256xf32, #tpu.memory_space<vmem>>, vector<8x256xf32>,
    } else {
    }
    %c0 = arith.constant 0 : index
    %c0_1 = arith.constant 0 : index
    %3 = vector.load %arg5[%c0, %c0_1] : memref<8x256xf32, #tpu.memory_space<vmem>>, vector<8x256xf32>
    %c0_2 = arith.constant 0 : index
    %c0_3 = arith.constant 0 : index
    %4 = vector.load %arg2[%c0_2, %c0_3] : memref<8x2048xf32, #tpu.memory_space<vmem>>, vector<8x2048xf32>
    %5 = arith.truncf %4 : vector<8x2048xf32> to vector<8x2048xbf16>
    %c0_4 = arith.constant 0 : index
    %c0_5 = arith.constant 0 : index
    %6 = vector.load %arg3[%c0_4, %c0_5] : memref<2048x256xbf16, #tpu.memory_space<vmem>>, vector<2048x256xbf16>
    %cst = arith.constant dense<0.000000e+00> : vector<8x256xf32>
    %7 = tpu.matmul %5, %6, %cst {dimension_numbers = #tpu.dot_dimension_numbers<[1], [0], [0], [1], [0, 0, 1, 1], [], []>} : vector<8x2048xbf16>, vector<2048x256xbf16>, vector<8x256xf32> -> vector<8x256xf32>
    %8 = arith.addf %3, %7 : vector<8x256xf32>
    %c0_6 = arith.constant 0 : index
    %c0_7 = arith.constant 0 : index
    %9 = vector.load %arg5[%c0_6, %c0_7] : memref<8x256xf32, #tpu.memory_space<vmem>>, vector<8x256xf32>
    tpu.vector_store %arg5[%c0_6, %c0_7], %8 {strides = array<i32>} : memref<8x256xf32, #tpu.memory_space<vmem>>, vector<8x256xf32>,
    %c0_i32_8 = arith.constant 0 : i32
    %10 = arith.cmpi eq, %arg1, %c0_i32_8 : i32
    %11 = arith.extui %10 : i1 to i32
    %c0_i32_9 = arith.constant 0 : i32
    %12 = arith.cmpi ne, %11, %c0_i32_9 : i32
    scf.if %12 {
      %c0_10 = arith.constant 0 : index
      %c0_11 = arith.constant 0 : index
      %13 = vector.load %arg5[%c0_10, %c0_11] : memref<8x256xf32, #tpu.memory_space<vmem>>, vector<8x256xf32>
      %c0_12 = arith.constant 0 : index
      %c0_13 = arith.constant 0 : index
      %14 = vector.load %arg4[%c0_12, %c0_13] : memref<1x256xf32, #tpu.memory_space<vmem>>, vector<1x256xf32>
      %15 = vector.broadcast %14 : vector<1x256xf32> to vector<8x256xf32>
      %16 = arith.addf %13, %15 : vector<8x256xf32>
      %cst_14 = arith.constant 0.000000e+00 : f32
      %17 = vector.broadcast %cst_14 : f32 to vector<8x256xf32>
      %18 = arith.maximumf %16, %17 : vector<8x256xf32>
      %c0_15 = arith.constant 0 : index
      %c0_16 = arith.constant 0 : index
      %19 = vector.load %arg5[%c0_15, %c0_16] : memref<8x256xf32, #tpu.memory_space<vmem>>, vector<8x256xf32>
      tpu.vector_store %arg5[%c0_15, %c0_16], %18 {strides = array<i32>} : memref<8x256xf32, #tpu.memory_space<vmem>>, vector<8x256xf32>,
    } else {
    }
    return
  }
  func.func @transform_0(%arg0: i32, %arg1: i32) -> (i32, i32) {
    %c0_i32 = arith.constant 0 : i32
    %c0_i32_0 = arith.constant 0 : i32
    return %c0_i32, %arg1 : i32, i32
  }
  func.func @transform_1(%arg0: i32, %arg1: i32) -> (i32, i32) {
    %c0_i32 = arith.constant 0 : i32
    return %arg1, %arg0 : i32, i32
  }
  func.func @transform_2(%arg0: i32, %arg1: i32) -> (i32, i32) {
    %c0_i32 = arith.constant 0 : i32
    %c0_i32_0 = arith.constant 0 : i32
    return %c0_i32, %arg0 : i32, i32
  }
  func.func @transform_3(%arg0: i32, %arg1: i32) -> (i32, i32) {
    %c0_i32 = arith.constant 0 : i32
    %c0_i32_0 = arith.constant 0 : i32
    return %c0_i32, %arg0 : i32, i32
  }
}

module attributes {stable_mosaic.version = 11 : i64} {
  func.func @_linear_kernel(%arg0: i32, %arg1: i32, %arg2: memref<8x256xf32, #tpu.memory_space<vmem>>, %arg3: memref<256x32xbf16, #tpu.memory_space<vmem>>, %arg4: memref<1x32xf32, #tpu.memory_space<vmem>>, %arg5: memref<8x32xf32, #tpu.memory_space<vmem>>) attributes {dimension_semantics = [#tpu.dimension_semantics<parallel>, #tpu.dimension_semantics<arbitrary>], iteration_bounds = array<i64: 1, 1>, scalar_prefetch = 0 : i64, scratch_operands = 0 : i64, tpu.core_type = #tpu.core_type<tc>, window_params = [{transform_indices = @transform_0, window_bounds = array<i64: 8, 256>}, {transform_indices = @transform_1, window_bounds = array<i64: 256, 32>}, {transform_indices = @transform_2, window_bounds = array<i64: 1, 32>}, {transform_indices = @transform_3, window_bounds = array<i64: 8, 32>}]} {
    %c0_i32 = arith.constant 0 : i32
    %0 = arith.cmpi eq, %arg1, %c0_i32 : i32
    %1 = arith.extui %0 : i1 to i32
    %c0_i32_0 = arith.constant 0 : i32
    %2 = arith.cmpi ne, %1, %c0_i32_0 : i32
    scf.if %2 {
      %cst_10 = arith.constant 0.000000e+00 : f32
      %13 = vector.broadcast %cst_10 : f32 to vector<8x32xf32>
      %c0_11 = arith.constant 0 : index
      %c0_12 = arith.constant 0 : index
      %14 = vector.load %arg5[%c0_11, %c0_12] : memref<8x32xf32, #tpu.memory_space<vmem>>, vector<8x32xf32>
      tpu.vector_store %arg5[%c0_11, %c0_12], %13 {strides = array<i32>} : memref<8x32xf32, #tpu.memory_space<vmem>>, vector<8x32xf32>,
    } else {
    }
    %c0 = arith.constant 0 : index
    %c0_1 = arith.constant 0 : index
    %3 = vector.load %arg5[%c0, %c0_1] : memref<8x32xf32, #tpu.memory_space<vmem>>, vector<8x32xf32>
    %c0_2 = arith.constant 0 : index
    %c0_3 = arith.constant 0 : index
    %4 = vector.load %arg2[%c0_2, %c0_3] : memref<8x256xf32, #tpu.memory_space<vmem>>, vector<8x256xf32>
    %5 = arith.truncf %4 : vector<8x256xf32> to vector<8x256xbf16>
    %c0_4 = arith.constant 0 : index
    %c0_5 = arith.constant 0 : index
    %6 = vector.load %arg3[%c0_4, %c0_5] : memref<256x32xbf16, #tpu.memory_space<vmem>>, vector<256x32xbf16>
    %cst = arith.constant dense<0.000000e+00> : vector<8x32xf32>
    %7 = tpu.matmul %5, %6, %cst {dimension_numbers = #tpu.dot_dimension_numbers<[1], [0], [0], [1], [0, 0, 1, 1], [], []>} : vector<8x256xbf16>, vector<256x32xbf16>, vector<8x32xf32> -> vector<8x32xf32>
    %8 = arith.addf %3, %7 : vector<8x32xf32>
    %c0_6 = arith.constant 0 : index
    %c0_7 = arith.constant 0 : index
    %9 = vector.load %arg5[%c0_6, %c0_7] : memref<8x32xf32, #tpu.memory_space<vmem>>, vector<8x32xf32>
    tpu.vector_store %arg5[%c0_6, %c0_7], %8 {strides = array<i32>} : memref<8x32xf32, #tpu.memory_space<vmem>>, vector<8x32xf32>,
    %c0_i32_8 = arith.constant 0 : i32
    %10 = arith.cmpi eq, %arg1, %c0_i32_8 : i32
    %11 = arith.extui %10 : i1 to i32
    %c0_i32_9 = arith.constant 0 : i32
    %12 = arith.cmpi ne, %11, %c0_i32_9 : i32
    scf.if %12 {
      %c0_10 = arith.constant 0 : index
      %c0_11 = arith.constant 0 : index
      %13 = vector.load %arg5[%c0_10, %c0_11] : memref<8x32xf32, #tpu.memory_space<vmem>>, vector<8x32xf32>
      %c0_12 = arith.constant 0 : index
      %c0_13 = arith.constant 0 : index
      %14 = vector.load %arg4[%c0_12, %c0_13] : memref<1x32xf32, #tpu.memory_space<vmem>>, vector<1x32xf32>
      %15 = vector.broadcast %14 : vector<1x32xf32> to vector<8x32xf32>
      %16 = arith.addf %13, %15 : vector<8x32xf32>
      %cst_14 = arith.constant 0.000000e+00 : f32
      %17 = vector.broadcast %cst_14 : f32 to vector<8x32xf32>
      %18 = arith.maximumf %16, %17 : vector<8x32xf32>
      %c0_15 = arith.constant 0 : index
      %c0_16 = arith.constant 0 : index
      %19 = vector.load %arg5[%c0_15, %c0_16] : memref<8x32xf32, #tpu.memory_space<vmem>>, vector<8x32xf32>
      tpu.vector_store %arg5[%c0_15, %c0_16], %18 {strides = array<i32>} : memref<8x32xf32, #tpu.memory_space<vmem>>, vector<8x32xf32>,
    } else {
    }
    return
  }
  func.func @transform_0(%arg0: i32, %arg1: i32) -> (i32, i32) {
    %c0_i32 = arith.constant 0 : i32
    %c0_i32_0 = arith.constant 0 : i32
    return %c0_i32, %arg1 : i32, i32
  }
  func.func @transform_1(%arg0: i32, %arg1: i32) -> (i32, i32) {
    %c0_i32 = arith.constant 0 : i32
    return %arg1, %arg0 : i32, i32
  }
  func.func @transform_2(%arg0: i32, %arg1: i32) -> (i32, i32) {
    %c0_i32 = arith.constant 0 : i32
    %c0_i32_0 = arith.constant 0 : i32
    return %c0_i32, %arg0 : i32, i32
  }
  func.func @transform_3(%arg0: i32, %arg1: i32) -> (i32, i32) {
    %c0_i32 = arith.constant 0 : i32
    %c0_i32_0 = arith.constant 0 : i32
    return %c0_i32, %arg0 : i32, i32
  }
}

module attributes {stable_mosaic.version = 11 : i64} {
  func.func @_linear_kernel(%arg0: i32, %arg1: i32, %arg2: memref<8x32xf32, #tpu.memory_space<vmem>>, %arg3: memref<32x2xbf16, #tpu.memory_space<vmem>>, %arg4: memref<1x2xf32, #tpu.memory_space<vmem>>, %arg5: memref<8x2xf32, #tpu.memory_space<vmem>>) attributes {dimension_semantics = [#tpu.dimension_semantics<parallel>, #tpu.dimension_semantics<arbitrary>], iteration_bounds = array<i64: 1, 1>, scalar_prefetch = 0 : i64, scratch_operands = 0 : i64, tpu.core_type = #tpu.core_type<tc>, window_params = [{transform_indices = @transform_0, window_bounds = array<i64: 8, 32>}, {transform_indices = @transform_1, window_bounds = array<i64: 32, 2>}, {transform_indices = @transform_2, window_bounds = array<i64: 1, 2>}, {transform_indices = @transform_3, window_bounds = array<i64: 8, 2>}]} {
    %c0_i32 = arith.constant 0 : i32
    %0 = arith.cmpi eq, %arg1, %c0_i32 : i32
    %1 = arith.extui %0 : i1 to i32
    %c0_i32_0 = arith.constant 0 : i32
    %2 = arith.cmpi ne, %1, %c0_i32_0 : i32
    scf.if %2 {
      %cst_10 = arith.constant 0.000000e+00 : f32
      %13 = vector.broadcast %cst_10 : f32 to vector<8x2xf32>
      %c0_11 = arith.constant 0 : index
      %c0_12 = arith.constant 0 : index
      %14 = vector.load %arg5[%c0_11, %c0_12] : memref<8x2xf32, #tpu.memory_space<vmem>>, vector<8x2xf32>
      tpu.vector_store %arg5[%c0_11, %c0_12], %13 {strides = array<i32>} : memref<8x2xf32, #tpu.memory_space<vmem>>, vector<8x2xf32>,
    } else {
    }
    %c0 = arith.constant 0 : index
    %c0_1 = arith.constant 0 : index
    %3 = vector.load %arg5[%c0, %c0_1] : memref<8x2xf32, #tpu.memory_space<vmem>>, vector<8x2xf32>
    %c0_2 = arith.constant 0 : index
    %c0_3 = arith.constant 0 : index
    %4 = vector.load %arg2[%c0_2, %c0_3] : memref<8x32xf32, #tpu.memory_space<vmem>>, vector<8x32xf32>
    %5 = arith.truncf %4 : vector<8x32xf32> to vector<8x32xbf16>
    %c0_4 = arith.constant 0 : index
    %c0_5 = arith.constant 0 : index
    %6 = vector.load %arg3[%c0_4, %c0_5] : memref<32x2xbf16, #tpu.memory_space<vmem>>, vector<32x2xbf16>
    %cst = arith.constant dense<0.000000e+00> : vector<8x2xf32>
    %7 = tpu.matmul %5, %6, %cst {dimension_numbers = #tpu.dot_dimension_numbers<[1], [0], [0], [1], [0, 0, 1, 1], [], []>} : vector<8x32xbf16>, vector<32x2xbf16>, vector<8x2xf32> -> vector<8x2xf32>
    %8 = arith.addf %3, %7 : vector<8x2xf32>
    %c0_6 = arith.constant 0 : index
    %c0_7 = arith.constant 0 : index
    %9 = vector.load %arg5[%c0_6, %c0_7] : memref<8x2xf32, #tpu.memory_space<vmem>>, vector<8x2xf32>
    tpu.vector_store %arg5[%c0_6, %c0_7], %8 {strides = array<i32>} : memref<8x2xf32, #tpu.memory_space<vmem>>, vector<8x2xf32>,
    %c0_i32_8 = arith.constant 0 : i32
    %10 = arith.cmpi eq, %arg1, %c0_i32_8 : i32
    %11 = arith.extui %10 : i1 to i32
    %c0_i32_9 = arith.constant 0 : i32
    %12 = arith.cmpi ne, %11, %c0_i32_9 : i32
    scf.if %12 {
      %c0_10 = arith.constant 0 : index
      %c0_11 = arith.constant 0 : index
      %13 = vector.load %arg5[%c0_10, %c0_11] : memref<8x2xf32, #tpu.memory_space<vmem>>, vector<8x2xf32>
      %c0_12 = arith.constant 0 : index
      %c0_13 = arith.constant 0 : index
      %14 = vector.load %arg4[%c0_12, %c0_13] : memref<1x2xf32, #tpu.memory_space<vmem>>, vector<1x2xf32>
      %15 = vector.broadcast %14 : vector<1x2xf32> to vector<8x2xf32>
      %16 = arith.addf %13, %15 : vector<8x2xf32>
      %cst_14 = arith.constant dense<0xFF800000> : vector<8xf32>
      %17 = vector.multi_reduction <maximumf>, %16, %cst_14 [1] : vector<8x2xf32> to vector<8xf32>
      %cst_15 = arith.constant 0xFF800000 : f32
      %18 = vector.broadcast %cst_15 : f32 to vector<8xf32>
      %19 = arith.maximumf %18, %17 : vector<8xf32>
      %20 = vector.shape_cast %19 : vector<8xf32> to vector<8x1xf32>
      %21 = vector.broadcast %20 : vector<8x1xf32> to vector<8x2xf32>
      %22 = arith.subf %16, %21 : vector<8x2xf32>
      %23 = math.exp %22 : vector<8x2xf32>
      %cst_16 = arith.constant dense<0.000000e+00> : vector<8xf32>
      %24 = vector.multi_reduction <add>, %23, %cst_16 [1] : vector<8x2xf32> to vector<8xf32>
      %25 = vector.shape_cast %24 : vector<8xf32> to vector<8x1xf32>
      %26 = vector.broadcast %25 : vector<8x1xf32> to vector<8x2xf32>
      %27 = arith.divf %23, %26 : vector<8x2xf32>
      %c0_17 = arith.constant 0 : index
      %c0_18 = arith.constant 0 : index
      %28 = vector.load %arg5[%c0_17, %c0_18] : memref<8x2xf32, #tpu.memory_space<vmem>>, vector<8x2xf32>
      tpu.vector_store %arg5[%c0_17, %c0_18], %27 {strides = array<i32>} : memref<8x2xf32, #tpu.memory_space<vmem>>, vector<8x2xf32>,
    } else {
    }
    return
  }
  func.func @transform_0(%arg0: i32, %arg1: i32) -> (i32, i32) {
    %c0_i32 = arith.constant 0 : i32
    %c0_i32_0 = arith.constant 0 : i32
    return %c0_i32, %arg1 : i32, i32
  }
  func.func @transform_1(%arg0: i32, %arg1: i32) -> (i32, i32) {
    %c0_i32 = arith.constant 0 : i32
    return %arg1, %arg0 : i32, i32
  }
  func.func @transform_2(%arg0: i32, %arg1: i32) -> (i32, i32) {
    %c0_i32 = arith.constant 0 : i32
    %c0_i32_0 = arith.constant 0 : i32
    return %c0_i32, %arg0 : i32, i32
  }
  func.func @transform_3(%arg0: i32, %arg1: i32) -> (i32, i32) {
    %c0_i32 = arith.constant 0 : i32
    %c0_i32_0 = arith.constant 0 : i32
    return %c0_i32, %arg0 : i32, i32
  }
}

</mosaic_0001>

<bundles_post_ra>
// kernel: lstm_net_forward.7
= control target key start
LH: loop header
LB: loop body
LE: loop exit
PB: predicated region body
PF: predicated region fallthrough
CT: control target
= control target key end

     0   :  { %s3435_s1 = inlined_call_operand.vmem [shape: bf16[2048,256], index: 1, kind: input, shape index: {}]   ;;  %s3436_s0 = inlined_call_operand.vmem [shape: f32[8,2048], index: 0, kind: input, shape index: {}]   ;;  %s3437_s2 = inlined_call_operand.vmem [shape: f32[1,256], index: 2, kind: input, shape index: {}]   ;;  %s3438_s3 = inlined_call_operand.vmem [shape: f32[8,256], index: 3, kind: output, shape index: {}]  }
   0x1   :  { %v2206_v0 = vld [vmem:[%s3435_s1 + $0x4] ss:$8 sps:$4 sm:$0xff]   ;;  %v2210_v2 = vld [vmem:[%s3435_s1] ss:$8 sps:$4 sm:$0xff]   ;;  %v2212_v4 = vld [vmem:[%s3435_s1 + $0x14] ss:$8 sps:$4 sm:$0xff]  }
   0x2   :  { %v2208_v1 = vld [vmem:[%s3435_s1 + $0x104] ss:$8 sps:$4 sm:$0xff]   ;;  %1590 = vmatprep.subr.bf16.mxu0 %v2206_v0  ;;  %v2211_v3 = vld [vmem:[%s3435_s1 + $0x100] ss:$8 sps:$4 sm:$0xff]   ;;  %v2214_v5 = vld [vmem:[%s3435_s1 + $0x114] ss:$8 sps:$4 sm:$0xff]  }
   0x3   :  { %1631 = vmatprep.subr.bf16.mxu1 %v2208_v1  ;;  %1591 = vmatpush1.bf16.msra.mxu0 %v2210_v2  ;;  %v2216_v6 = vld [vmem:[%s3435_s1 + $0x10] ss:$8 sps:$4 sm:$0xff]   ;;  %v2218_v8 = vld [vmem:[%s3435_s1 + $0x24] ss:$8 sps:$4 sm:$0xff]   ;;  %v2222_v10 = vld [vmem:[%s3435_s1 + $0x20] ss:$8 sps:$4 sm:$0xff]  }
   0x4   :  { %1632 = vmatpush1.bf16.msra.mxu1 %v2211_v3  ;;  %1592 = vmatprep.subr.bf16.mxu0 %v2212_v4  ;;  %v2217_v7 = vld [vmem:[%s3435_s1 + $0x110] ss:$8 sps:$4 sm:$0xff]   ;;  %v2220_v9 = vld [vmem:[%s3435_s1 + $0x124] ss:$8 sps:$4 sm:$0xff]   ;;  %v2223_v11 = vld [vmem:[%s3435_s1 + $0x120] ss:$8 sps:$4 sm:$0xff]  }
   0x5   :  { %1633 = vmatprep.subr.bf16.mxu1 %v2214_v5  ;;  %v2224_v12 = vld [vmem:[%s3435_s1 + $0x34] ss:$8 sps:$4 sm:$0xff]   ;;  %v2228_v14 = vld [vmem:[%s3435_s1 + $0x30] ss:$8 sps:$4 sm:$0xff]   ;;  %v2230_v16 = vld [vmem:[%s3435_s1 + $0x44] ss:$8 sps:$4 sm:$0xff]  }
   0x6   :  { %v2226_v13 = vld [vmem:[%s3435_s1 + $0x134] ss:$8 sps:$4 sm:$0xff]   ;;  %v2229_v15 = vld [vmem:[%s3435_s1 + $0x130] ss:$8 sps:$4 sm:$0xff]   ;;  %v2232_v17 = vld [vmem:[%s3435_s1 + $0x144] ss:$8 sps:$4 sm:$0xff]  }
   0x7   :  { %1593 = vmatpush1.bf16.msra.mxu0 %v2216_v6  ;;  %v2234_v18 = vld [vmem:[%s3435_s1 + $0x40] ss:$8 sps:$4 sm:$0xff]   ;;  %v2236_v20 = vld [vmem:[%s3435_s1 + $0x54] ss:$8 sps:$4 sm:$0xff]   ;;  %v2240_v22 = vld [vmem:[%s3435_s1 + $0x50] ss:$8 sps:$4 sm:$0xff]  }
   0x8   :  { %1634 = vmatpush1.bf16.msra.mxu1 %v2217_v7  ;;  %1594 = vmatprep.subr.bf16.mxu0 %v2218_v8  ;;  %v2235_v19 = vld [vmem:[%s3435_s1 + $0x140] ss:$8 sps:$4 sm:$0xff]   ;;  %v2238_v21 = vld [vmem:[%s3435_s1 + $0x154] ss:$8 sps:$4 sm:$0xff]   ;;  %v2241_v23 = vld [vmem:[%s3435_s1 + $0x150] ss:$8 sps:$4 sm:$0xff]  }
   0x9   :  { %1635 = vmatprep.subr.bf16.mxu1 %v2220_v9  ;;  %v2242_v24 = vld [vmem:[%s3435_s1 + $0x64] ss:$8 sps:$4 sm:$0xff]   ;;  %v2246_v26 = vld [vmem:[%s3435_s1 + $0x60] ss:$8 sps:$4 sm:$0xff]   ;;  %v2248_v28 = vld [vmem:[%s3435_s1 + $0x74] ss:$8 sps:$4 sm:$0xff]  }
   0xa   :  { %v2244_v25 = vld [vmem:[%s3435_s1 + $0x164] ss:$8 sps:$4 sm:$0xff]   ;;  %v2247_v27 = vld [vmem:[%s3435_s1 + $0x160] ss:$8 sps:$4 sm:$0xff]   ;;  %v2250_v29 = vld [vmem:[%s3435_s1 + $0x174] ss:$8 sps:$4 sm:$0xff]  }
   0xb   :  { %1595 = vmatpush1.bf16.msra.mxu0 %v2222_v10  ;;  %v2252_v30 = vld [vmem:[%s3435_s1 + $0x70] ss:$8 sps:$4 sm:$0xff]   ;;  %v2254_v32 = vld [vmem:[%s3435_s1 + $0x84] ss:$8 sps:$4 sm:$0xff]   ;;  %v2258_v34 = vld [vmem:[%s3435_s1 + $0x80] ss:$8 sps:$4 sm:$0xff]  }
   0xc   :  { %1636 = vmatpush1.bf16.msra.mxu1 %v2223_v11  ;;  %1596 = vmatprep.subr.bf16.mxu0 %v2224_v12  ;;  %v2253_v31 = vld [vmem:[%s3435_s1 + $0x170] ss:$8 sps:$4 sm:$0xff]   ;;  %v2256_v33 = vld [vmem:[%s3435_s1 + $0x184] ss:$8 sps:$4 sm:$0xff]   ;;  %v2259_v35 = vld [vmem:[%s3435_s1 + $0x180] ss:$8 sps:$4 sm:$0xff]  }
   0xd   :  { %1637 = vmatprep.subr.bf16.mxu1 %v2226_v13  ;;  %v2260_v36 = vld [vmem:[%s3435_s1 + $0x94] ss:$8 sps:$4 sm:$0xff]   ;;  %v2264_v38 = vld [vmem:[%s3435_s1 + $0x90] ss:$8 sps:$4 sm:$0xff]   ;;  %v2266_v40 = vld [vmem:[%s3435_s1 + $0xa4] ss:$8 sps:$4 sm:$0xff]  }
   0xe   :  { %v2262_v37 = vld [vmem:[%s3435_s1 + $0x194] ss:$8 sps:$4 sm:$0xff]   ;;  %v2265_v39 = vld [vmem:[%s3435_s1 + $0x190] ss:$8 sps:$4 sm:$0xff]   ;;  %v2268_v41 = vld [vmem:[%s3435_s1 + $0x1a4] ss:$8 sps:$4 sm:$0xff]  }
   0xf   :  { %1597 = vmatpush1.bf16.msra.mxu0 %v2228_v14  ;;  %v2270_v42 = vld [vmem:[%s3435_s1 + $0xa0] ss:$8 sps:$4 sm:$0xff]   ;;  %v2272_v44 = vld [vmem:[%s3435_s1 + $0xb4] ss:$8 sps:$4 sm:$0xff]   ;;  %v2276_v47 = vld [vmem:[%s3435_s1 + $0xb0] ss:$8 sps:$4 sm:$0xff]  }
  0x10   :  { %1638 = vmatpush1.bf16.msra.mxu1 %v2229_v15  ;;  %1598 = vmatprep.subr.bf16.mxu0 %v2230_v16  ;;  %v2271_v43 = vld [vmem:[%s3435_s1 + $0x1a0] ss:$8 sps:$4 sm:$0xff]   ;;  %v2274_v45 = vld [vmem:[%s3435_s1 + $0x1b4] ss:$8 sps:$4 sm:$0xff]   ;;  %v2277_v48 = vld [vmem:[%s3435_s1 + $0x1b0] ss:$8 sps:$4 sm:$0xff]  }
  0x11   :  { %1639 = vmatprep.subr.bf16.mxu1 %v2232_v17  ;;  %v23_v46 = vld [vmem:[%s3436_s0 + $0x8] sm:$0xff]  ;;  %v25_v50 = vld [vmem:[%s3436_s0 + $0x18] sm:$0xff]  ;;  %v22_v4 = vld [vmem:[%s3436_s0] sm:$0xff] }
  0x12   :  { %v39_v49 = vpack.c.bf16 %v23_v46, %v23_v46  ;;  %v2278_v51 = vld [vmem:[%s3435_s1 + $0xc4] ss:$8 sps:$4 sm:$0xff]   ;;  %v41_v52 = vpack.c.bf16 %v25_v50, %v25_v50  ;;  %v2282_v54 = vld [vmem:[%s3435_s1 + $0xc0] ss:$8 sps:$4 sm:$0xff]   ;;  %v2284_v56 = vld [vmem:[%s3435_s1 + $0xd4] ss:$8 sps:$4 sm:$0xff]   ;;  %v38_v8 = vpack.c.bf16 %v22_v4, %v22_v4 }
  0x13   :  { %1599 = vmatpush1.bf16.msra.mxu0 %v2234_v18  ;;  %v2280_v53 = vld [vmem:[%s3435_s1 + $0x1c4] ss:$8 sps:$4 sm:$0xff]   ;;  %v2283_v55 = vld [vmem:[%s3435_s1 + $0x1c0] ss:$8 sps:$4 sm:$0xff]   ;;  %v2286_v57 = vld [vmem:[%s3435_s1 + $0x1d4] ss:$8 sps:$4 sm:$0xff]  }
  0x14   :  { %1640 = vmatpush1.bf16.msra.mxu1 %v2235_v19  ;;  %1600 = vmatprep.subr.bf16.mxu0 %v2236_v20  ;;  %v2288_v58 = vld [vmem:[%s3435_s1 + $0xd0] ss:$8 sps:$4 sm:$0xff]   ;;  %v2290_v60 = vld [vmem:[%s3435_s1 + $0xe4] ss:$8 sps:$4 sm:$0xff]   ;;  %v2294_v62 = vld [vmem:[%s3435_s1 + $0xe0] ss:$8 sps:$4 sm:$0xff]  }
  0x15   :  { %1641 = vmatprep.subr.bf16.mxu1 %v2238_v21  ;;  %1622 = vmatprep.mubr.bf16.mxu0 %v39_v49  ;;  %v2289_v59 = vld [vmem:[%s3435_s1 + $0x1d0] ss:$8 sps:$4 sm:$0xff]   ;;  %v2292_v61 = vld [vmem:[%s3435_s1 + $0x1e4] ss:$8 sps:$4 sm:$0xff]   ;;  %v2295_v63 = vld [vmem:[%s3435_s1 + $0x1e0] ss:$8 sps:$4 sm:$0xff]  }
  0x16   :  { %1663 = vmatprep.mubr.bf16.mxu1 %v41_v52  ;;  %v2296_v0 = vld [vmem:[%s3435_s1 + $0xf4] ss:$8 sps:$4 sm:$0xff]   ;;  %v2300_v2 = vld [vmem:[%s3435_s1 + $0xf0] ss:$8 sps:$4 sm:$0xff]   ;;  %v2304_v6 = vld [vmem:[%s3435_s1 + $0x204] ss:$8 sps:$4 sm:$0xff]  }
  0x17   :  { %1601 = vmatpush1.bf16.msra.mxu0 %v2240_v22  ;;  %v2298_v1 = vld [vmem:[%s3435_s1 + $0x1f4] ss:$8 sps:$4 sm:$0xff]   ;;  %v2301_v3 = vld [vmem:[%s3435_s1 + $0x1f0] ss:$8 sps:$4 sm:$0xff]   ;;  %v2307_v7 = vld [vmem:[%s3435_s1 + $0x304] ss:$8 sps:$4 sm:$0xff]  }
  0x18   :  { %1642 = vmatpush1.bf16.msra.mxu1 %v2241_v23  ;;  %1602 = vmatprep.subr.bf16.mxu0 %v2242_v24  ;;  %v24_v5 = vld [vmem:[%s3436_s0 + $0x10] sm:$0xff]  ;;  %v2302_v10 = vld [vmem:[%s3435_s1 + $0x200] ss:$8 sps:$4 sm:$0xff]   ;;  %v2316_v16 = vld [vmem:[%s3435_s1 + $0x224] ss:$8 sps:$4 sm:$0xff]  }
  0x19   :  { %1643 = vmatprep.subr.bf16.mxu1 %v2244_v25  ;;  %v40_v9 = vpack.c.bf16 %v24_v5, %v24_v5  ;;  %v2305_v11 = vld [vmem:[%s3435_s1 + $0x300] ss:$8 sps:$4 sm:$0xff]   ;;  %v2310_v12 = vld [vmem:[%s3435_s1 + $0x214] ss:$8 sps:$4 sm:$0xff]   ;;  %v2308_v14 = vld [vmem:[%s3435_s1 + $0x210] ss:$8 sps:$4 sm:$0xff]  }
  0x1a   :  { %v2313_v13 = vld [vmem:[%s3435_s1 + $0x314] ss:$8 sps:$4 sm:$0xff]   ;;  %v2311_v15 = vld [vmem:[%s3435_s1 + $0x310] ss:$8 sps:$4 sm:$0xff]   ;;  %v2319_v17 = vld [vmem:[%s3435_s1 + $0x324] ss:$8 sps:$4 sm:$0xff]  }
  0x1b   :  { %1603 = vmatpush1.bf16.msra.mxu0 %v2246_v26  ;;  %v2314_v18 = vld [vmem:[%s3435_s1 + $0x220] ss:$8 sps:$4 sm:$0xff]   ;;  %v2322_v20 = vld [vmem:[%s3435_s1 + $0x234] ss:$8 sps:$4 sm:$0xff]   ;;  %v2320_v22 = vld [vmem:[%s3435_s1 + $0x230] ss:$8 sps:$4 sm:$0xff]  }
  0x1c   :  { %1644 = vmatpush1.bf16.msra.mxu1 %v2247_v27  ;;  %1604 = vmatprep.subr.bf16.mxu0 %v2248_v28  ;;  %v2317_v19 = vld [vmem:[%s3435_s1 + $0x320] ss:$8 sps:$4 sm:$0xff]   ;;  %v2325_v21 = vld [vmem:[%s3435_s1 + $0x334] ss:$8 sps:$4 sm:$0xff]   ;;  %v2323_v23 = vld [vmem:[%s3435_s1 + $0x330] ss:$8 sps:$4 sm:$0xff]  }
  0x1d   :  { %1645 = vmatprep.subr.bf16.mxu1 %v2250_v29  ;;  %v2328_v24 = vld [vmem:[%s3435_s1 + $0x244] ss:$8 sps:$4 sm:$0xff]   ;;  %v2326_v26 = vld [vmem:[%s3435_s1 + $0x240] ss:$8 sps:$4 sm:$0xff]   ;;  %v2334_v28 = vld [vmem:[%s3435_s1 + $0x254] ss:$8 sps:$4 sm:$0xff]  }
  0x1e   :  { %v2331_v25 = vld [vmem:[%s3435_s1 + $0x344] ss:$8 sps:$4 sm:$0xff]   ;;  %v2329_v27 = vld [vmem:[%s3435_s1 + $0x340] ss:$8 sps:$4 sm:$0xff]   ;;  %v2337_v29 = vld [vmem:[%s3435_s1 + $0x354] ss:$8 sps:$4 sm:$0xff]  }
  0x1f   :  { %1605 = vmatpush1.bf16.msra.mxu0 %v2252_v30  ;;  %v2332_v30 = vld [vmem:[%s3435_s1 + $0x250] ss:$8 sps:$4 sm:$0xff]   ;;  %v2350_v46 = vld [vmem:[%s3435_s1 + $0x280] ss:$8 sps:$4 sm:$0xff]   ;;  %v2361_v49 = vld [vmem:[%s3435_s1 + $0x394] ss:$8 sps:$4 sm:$0xff]  }
  0x20   :  { %1646 = vmatpush1.bf16.msra.mxu1 %v2253_v31  ;;  %1606 = vmatprep.subr.bf16.mxu0 %v2254_v32  ;;  %v2335_v31 = vld [vmem:[%s3435_s1 + $0x350] ss:$8 sps:$4 sm:$0xff]   ;;  %v2340_v32 = vld [vmem:[%s3435_s1 + $0x264] ss:$8 sps:$4 sm:$0xff]  }
  0x21   :  { %1647 = vmatprep.subr.bf16.mxu1 %v2256_v33  ;;  %v2343_v33 = vld [vmem:[%s3435_s1 + $0x364] ss:$8 sps:$4 sm:$0xff]   ;;  %v2356_v50 = vld [vmem:[%s3435_s1 + $0x290] ss:$8 sps:$4 sm:$0xff]  }
  0x22   :  { %v2364_v52 = vld [vmem:[%s3435_s1 + $0x2a4] ss:$8 sps:$4 sm:$0xff]  }
  0x23   :  { %1607 = vmatpush1.bf16.msra.mxu0 %v2258_v34  ;;  %v27_v34 = vld [vmem:[%s3436_s0 + $0x28] sm:$0xff] }
  0x24   :  { %1648 = vmatpush1.bf16.msra.mxu1 %v2259_v35  ;;  %1608 = vmatprep.subr.bf16.mxu0 %v2260_v36  ;;  %v2338_v35 = vld [vmem:[%s3435_s1 + $0x260] ss:$8 sps:$4 sm:$0xff]   ;;  %v2388_v4 = vld [vmem:[%s3435_s1 + $0x2e4] ss:$8 sps:$4 sm:$0xff]  }
  0x25   :  { %1649 = vmatprep.subr.bf16.mxu1 %v2262_v37  ;;  %v2341_v36 = vld [vmem:[%s3435_s1 + $0x360] ss:$8 sps:$4 sm:$0xff]   ;;  %v43_v37 = vpack.c.bf16 %v27_v34, %v27_v34  ;;  %v2391_v5 = vld [vmem:[%s3435_s1 + $0x3e4] ss:$8 sps:$4 sm:$0xff]   ;;  %v2416_v34 = vld [vmem:[%s3435_s1 + $0x430] ss:$8 sps:$4 sm:$0xff]  }
  0x27   :  { %1609 = vmatpush1.bf16.msra.mxu0 %v2264_v38  ;;  %v29_v38 = vld [vmem:[%s3436_s0 + $0x38] sm:$0xff] }
  0x28   :  { %1650 = vmatpush1.bf16.msra.mxu1 %v2265_v39  ;;  %1610 = vmatprep.subr.bf16.mxu0 %v2266_v40  ;;  %v2346_v39 = vld [vmem:[%s3435_s1 + $0x274] ss:$8 sps:$4 sm:$0xff]   ;;  %v45_v40 = vpack.c.bf16 %v29_v38, %v29_v38  ;;  %v2422_v38 = vld [vmem:[%s3435_s1 + $0x440] ss:$8 sps:$4 sm:$0xff]  }
  0x29   :  { %1651 = vmatprep.subr.bf16.mxu1 %v2268_v41  ;;  %v2349_v41 = vld [vmem:[%s3435_s1 + $0x374] ss:$8 sps:$4 sm:$0xff]  }
  0x2b   :  { %1611 = vmatpush1.bf16.msra.mxu0 %v2270_v42  ;;  %v2344_v42 = vld [vmem:[%s3435_s1 + $0x270] ss:$8 sps:$4 sm:$0xff]  }
  0x2c   :  { %1652 = vmatpush1.bf16.msra.mxu1 %v2271_v43  ;;  %1612 = vmatprep.subr.bf16.mxu0 %v2272_v44  ;;  %v2347_v43 = vld [vmem:[%s3435_s1 + $0x370] ss:$8 sps:$4 sm:$0xff]   ;;  %v2352_v44 = vld [vmem:[%s3435_s1 + $0x284] ss:$8 sps:$4 sm:$0xff]  }
  0x2d   :  { %1653 = vmatprep.subr.bf16.mxu1 %v2274_v45  ;;  %v2355_v45 = vld [vmem:[%s3435_s1 + $0x384] ss:$8 sps:$4 sm:$0xff]  }
  0x2f   :  { %1613 = vmatpush1.bf16.msra.mxu0 %v2276_v47  ;;  %v2353_v47 = vld [vmem:[%s3435_s1 + $0x380] ss:$8 sps:$4 sm:$0xff]  }
  0x30   :  { %1654 = vmatpush1.bf16.msra.mxu1 %v2277_v48  ;;  %1614 = vmatprep.subr.bf16.mxu0 %v2278_v51  ;;  %v2358_v48 = vld [vmem:[%s3435_s1 + $0x294] ss:$8 sps:$4 sm:$0xff]   ;;  %v2359_v51 = vld [vmem:[%s3435_s1 + $0x390] ss:$8 sps:$4 sm:$0xff]  }
  0x31   :  { %1655 = vmatprep.subr.bf16.mxu1 %v2280_v53  ;;  %v2367_v53 = vld [vmem:[%s3435_s1 + $0x3a4] ss:$8 sps:$4 sm:$0xff]  }
  0x33   :  { %1615 = vmatpush1.bf16.msra.mxu0 %v2282_v54  ;;  %v2362_v54 = vld [vmem:[%s3435_s1 + $0x2a0] ss:$8 sps:$4 sm:$0xff]  }
  0x34   :  { %1656 = vmatpush1.bf16.msra.mxu1 %v2283_v55  ;;  %1616 = vmatprep.subr.bf16.mxu0 %v2284_v56  ;;  %v2365_v55 = vld [vmem:[%s3435_s1 + $0x3a0] ss:$8 sps:$4 sm:$0xff]   ;;  %v2370_v56 = vld [vmem:[%s3435_s1 + $0x2b4] ss:$8 sps:$4 sm:$0xff]  }
  0x35   :  { %1657 = vmatprep.subr.bf16.mxu1 %v2286_v57  ;;  %v2373_v57 = vld [vmem:[%s3435_s1 + $0x3b4] ss:$8 sps:$4 sm:$0xff]  }
  0x37   :  { %1617 = vmatpush1.bf16.msra.mxu0 %v2288_v58  ;;  %v2368_v58 = vld [vmem:[%s3435_s1 + $0x2b0] ss:$8 sps:$4 sm:$0xff]  }
  0x38   :  { %1658 = vmatpush1.bf16.msra.mxu1 %v2289_v59  ;;  %1618 = vmatprep.subr.bf16.mxu0 %v2290_v60  ;;  %v2371_v59 = vld [vmem:[%s3435_s1 + $0x3b0] ss:$8 sps:$4 sm:$0xff]   ;;  %v2376_v60 = vld [vmem:[%s3435_s1 + $0x2c4] ss:$8 sps:$4 sm:$0xff]  }
  0x39   :  { %1659 = vmatprep.subr.bf16.mxu1 %v2292_v61  ;;  %v2379_v61 = vld [vmem:[%s3435_s1 + $0x3c4] ss:$8 sps:$4 sm:$0xff]  }
  0x3b   :  { %1619 = vmatpush1.bf16.msra.mxu0 %v2294_v62  ;;  %v2374_v62 = vld [vmem:[%s3435_s1 + $0x2c0] ss:$8 sps:$4 sm:$0xff]  }
  0x3c   :  { %1660 = vmatpush1.bf16.msra.mxu1 %v2295_v63  ;;  %1620 = vmatprep.subr.bf16.mxu0 %v2296_v0  ;;  %v2377_v63 = vld [vmem:[%s3435_s1 + $0x3c0] ss:$8 sps:$4 sm:$0xff]   ;;  %v2382_v0 = vld [vmem:[%s3435_s1 + $0x2d4] ss:$8 sps:$4 sm:$0xff]  }
  0x3d   :  { %1661 = vmatprep.subr.bf16.mxu1 %v2298_v1  ;;  %v2385_v1 = vld [vmem:[%s3435_s1 + $0x3d4] ss:$8 sps:$4 sm:$0xff]  }
  0x3f   :  { %1621 = vmatpush1.bf16.msra.mxu0 %v2300_v2  ;;  %v2380_v2 = vld [vmem:[%s3435_s1 + $0x2d0] ss:$8 sps:$4 sm:$0xff]  }
  0x40   :  { %1662 = vmatpush1.bf16.msra.mxu1 %v2301_v3  ;;  %1672 = vmatprep.subr.bf16.mxu0 %v2304_v6  ;;  %v2383_v3 = vld [vmem:[%s3435_s1 + $0x3d0] ss:$8 sps:$4 sm:$0xff]   ;;  %v2386_v6 = vld [vmem:[%s3435_s1 + $0x2e0] ss:$8 sps:$4 sm:$0xff]  }
  0x41   :  { %1713 = vmatprep.subr.bf16.mxu1 %v2307_v7  ;;  %v2389_v7 = vld [vmem:[%s3435_s1 + $0x3e0] ss:$8 sps:$4 sm:$0xff]  }
  0x42   :  { %1623 = vmatmul.mubr.bf16.vlgmr.msra.gmra.mrb[0].mxu0 %v38_v8  ;;  %v2394_v8 = vld [vmem:[%s3435_s1 + $0x2f4] ss:$8 sps:$4 sm:$0xff]  }
  0x43   :  { %1664 = vmatmul.mubr.bf16.vlgmr.msra.gmra.mrb[0].mxu1 %v40_v9  ;;  %1673 = vmatpush1.bf16.msra.mxu0 %v2302_v10  ;;  %v2397_v9 = vld [vmem:[%s3435_s1 + $0x3f4] ss:$8 sps:$4 sm:$0xff]   ;;  %v2392_v10 = vld [vmem:[%s3435_s1 + $0x2f0] ss:$8 sps:$4 sm:$0xff]  }
  0x44   :  { %1714 = vmatpush1.bf16.msra.mxu1 %v2305_v11  ;;  %1674 = vmatprep.subr.bf16.mxu0 %v2310_v12  ;;  %v2395_v11 = vld [vmem:[%s3435_s1 + $0x3f0] ss:$8 sps:$4 sm:$0xff]   ;;  %v26_v12 = vld [vmem:[%s3436_s0 + $0x20] sm:$0xff] }
  0x45   :  { %1715 = vmatprep.subr.bf16.mxu1 %v2313_v13  ;;  %1704 = vmatprep.mubr.bf16.mxu0 %v43_v37  ;;  %v28_v13 = vld [vmem:[%s3436_s0 + $0x30] sm:$0xff]  ;;  %v2427_v37 = vld [vmem:[%s3435_s1 + $0x544] ss:$8 sps:$4 sm:$0xff]  }
  0x46   :  { %1745 = vmatprep.mubr.bf16.mxu1 %v45_v40  ;;  %v2430_v40 = vld [vmem:[%s3435_s1 + $0x454] ss:$8 sps:$4 sm:$0xff]  }
  0x47   :  { %1675 = vmatpush1.bf16.msra.mxu0 %v2308_v14  ;;  %v2400_v14 = vld [vmem:[%s3435_s1 + $0x404] ss:$8 sps:$4 sm:$0xff]  }
  0x48   :  { %1716 = vmatpush1.bf16.msra.mxu1 %v2311_v15  ;;  %1676 = vmatprep.subr.bf16.mxu0 %v2316_v16  ;;  %v2403_v15 = vld [vmem:[%s3435_s1 + $0x504] ss:$8 sps:$4 sm:$0xff]   ;;  %v42_v16 = vpack.c.bf16 %v26_v12, %v26_v12 }
  0x49   :  { %1717 = vmatprep.subr.bf16.mxu1 %v2319_v17  ;;  %v44_v17 = vpack.c.bf16 %v28_v13, %v28_v13  ;;  %v2484_v12 = vld [vmem:[%s3435_s1 + $0x4e4] ss:$8 sps:$4 sm:$0xff]  }
  0x4a   :  { %v2487_v13 = vld [vmem:[%s3435_s1 + $0x5e4] ss:$8 sps:$4 sm:$0xff]  }
  0x4b   :  { %1677 = vmatpush1.bf16.msra.mxu0 %v2314_v18  ;;  %v2398_v18 = vld [vmem:[%s3435_s1 + $0x400] ss:$8 sps:$4 sm:$0xff]  }
  0x4c   :  { %1718 = vmatpush1.bf16.msra.mxu1 %v2317_v19  ;;  %1678 = vmatprep.subr.bf16.mxu0 %v2322_v20  ;;  %v2401_v19 = vld [vmem:[%s3435_s1 + $0x500] ss:$8 sps:$4 sm:$0xff]   ;;  %v2406_v20 = vld [vmem:[%s3435_s1 + $0x414] ss:$8 sps:$4 sm:$0xff]  }
  0x4d   :  { %1719 = vmatprep.subr.bf16.mxu1 %v2325_v21  ;;  %v2409_v21 = vld [vmem:[%s3435_s1 + $0x514] ss:$8 sps:$4 sm:$0xff]  }
  0x4f   :  { %1679 = vmatpush1.bf16.msra.mxu0 %v2320_v22  ;;  %v31_v22 = vld [vmem:[%s3436_s0 + $0x48] sm:$0xff] }
  0x50   :  { %1720 = vmatpush1.bf16.msra.mxu1 %v2323_v23  ;;  %1680 = vmatprep.subr.bf16.mxu0 %v2328_v24  ;;  %v2404_v23 = vld [vmem:[%s3435_s1 + $0x410] ss:$8 sps:$4 sm:$0xff]  }
  0x51   :  { %1721 = vmatprep.subr.bf16.mxu1 %v2331_v25  ;;  %v2407_v24 = vld [vmem:[%s3435_s1 + $0x510] ss:$8 sps:$4 sm:$0xff]   ;;  %v47_v25 = vpack.c.bf16 %v31_v22, %v31_v22  ;;  %v2496_v22 = vld [vmem:[%s3435_s1 + $0x604] ss:$8 sps:$4 sm:$0xff]  }
  0x53   :  { %1681 = vmatpush1.bf16.msra.mxu0 %v2326_v26  ;;  %v33_v26 = vld [vmem:[%s3436_s0 + $0x58] sm:$0xff] }
  0x54   :  { %1722 = vmatpush1.bf16.msra.mxu1 %v2329_v27  ;;  %1682 = vmatprep.subr.bf16.mxu0 %v2334_v28  ;;  %v2412_v27 = vld [vmem:[%s3435_s1 + $0x424] ss:$8 sps:$4 sm:$0xff]   ;;  %v49_v28 = vpack.c.bf16 %v33_v26, %v33_v26 }
  0x55   :  { %1723 = vmatprep.subr.bf16.mxu1 %v2337_v29  ;;  %v2415_v29 = vld [vmem:[%s3435_s1 + $0x524] ss:$8 sps:$4 sm:$0xff]  }
  0x56   :  { %v35_v26 = vld [vmem:[%s3436_s0 + $0x68] sm:$0xff] }
  0x57   :  { %1683 = vmatpush1.bf16.msra.mxu0 %v2332_v30  ;;  %v2410_v30 = vld [vmem:[%s3435_s1 + $0x420] ss:$8 sps:$4 sm:$0xff]  }
  0x58   :  { %1724 = vmatpush1.bf16.msra.mxu1 %v2335_v31  ;;  %1684 = vmatprep.subr.bf16.mxu0 %v2340_v32  ;;  %v2413_v31 = vld [vmem:[%s3435_s1 + $0x520] ss:$8 sps:$4 sm:$0xff]   ;;  %v2418_v32 = vld [vmem:[%s3435_s1 + $0x434] ss:$8 sps:$4 sm:$0xff]  }
  0x59   :  { %1725 = vmatprep.subr.bf16.mxu1 %v2343_v33  ;;  %v2421_v33 = vld [vmem:[%s3435_s1 + $0x534] ss:$8 sps:$4 sm:$0xff]  }
  0x5b   :  { %1685 = vmatpush1.bf16.msra.mxu0 %v2338_v35  ;;  %v2419_v35 = vld [vmem:[%s3435_s1 + $0x530] ss:$8 sps:$4 sm:$0xff]  }
  0x5c   :  { %1726 = vmatpush1.bf16.msra.mxu1 %v2341_v36  ;;  %1686 = vmatprep.subr.bf16.mxu0 %v2346_v39  ;;  %v2424_v36 = vld [vmem:[%s3435_s1 + $0x444] ss:$8 sps:$4 sm:$0xff]   ;;  %v2425_v39 = vld [vmem:[%s3435_s1 + $0x540] ss:$8 sps:$4 sm:$0xff]  }
  0x5d   :  { %1727 = vmatprep.subr.bf16.mxu1 %v2349_v41  ;;  %v2433_v41 = vld [vmem:[%s3435_s1 + $0x554] ss:$8 sps:$4 sm:$0xff]  }
  0x5f   :  { %1687 = vmatpush1.bf16.msra.mxu0 %v2344_v42  ;;  %v2428_v42 = vld [vmem:[%s3435_s1 + $0x450] ss:$8 sps:$4 sm:$0xff]  }
  0x60   :  { %1728 = vmatpush1.bf16.msra.mxu1 %v2347_v43  ;;  %1688 = vmatprep.subr.bf16.mxu0 %v2352_v44  ;;  %v2431_v43 = vld [vmem:[%s3435_s1 + $0x550] ss:$8 sps:$4 sm:$0xff]   ;;  %v2436_v44 = vld [vmem:[%s3435_s1 + $0x464] ss:$8 sps:$4 sm:$0xff]  }
  0x61   :  { %1729 = vmatprep.subr.bf16.mxu1 %v2355_v45  ;;  %v2439_v45 = vld [vmem:[%s3435_s1 + $0x564] ss:$8 sps:$4 sm:$0xff]  }
  0x63   :  { %1689 = vmatpush1.bf16.msra.mxu0 %v2350_v46  ;;  %v2434_v46 = vld [vmem:[%s3435_s1 + $0x460] ss:$8 sps:$4 sm:$0xff]  }
  0x64   :  { %1730 = vmatpush1.bf16.msra.mxu1 %v2353_v47  ;;  %1690 = vmatprep.subr.bf16.mxu0 %v2358_v48  ;;  %v2437_v47 = vld [vmem:[%s3435_s1 + $0x560] ss:$8 sps:$4 sm:$0xff]   ;;  %v2442_v48 = vld [vmem:[%s3435_s1 + $0x474] ss:$8 sps:$4 sm:$0xff]  }
  0x65   :  { %1731 = vmatprep.subr.bf16.mxu1 %v2361_v49  ;;  %v2445_v49 = vld [vmem:[%s3435_s1 + $0x574] ss:$8 sps:$4 sm:$0xff]  }
  0x67   :  { %1691 = vmatpush1.bf16.msra.mxu0 %v2356_v50  ;;  %v2440_v50 = vld [vmem:[%s3435_s1 + $0x470] ss:$8 sps:$4 sm:$0xff]  }
  0x68   :  { %1732 = vmatpush1.bf16.msra.mxu1 %v2359_v51  ;;  %1692 = vmatprep.subr.bf16.mxu0 %v2364_v52  ;;  %v2443_v51 = vld [vmem:[%s3435_s1 + $0x570] ss:$8 sps:$4 sm:$0xff]   ;;  %v2448_v52 = vld [vmem:[%s3435_s1 + $0x484] ss:$8 sps:$4 sm:$0xff]  }
  0x69   :  { %1733 = vmatprep.subr.bf16.mxu1 %v2367_v53  ;;  %v2451_v53 = vld [vmem:[%s3435_s1 + $0x584] ss:$8 sps:$4 sm:$0xff]  }
  0x6b   :  { %1693 = vmatpush1.bf16.msra.mxu0 %v2362_v54  ;;  %v2446_v54 = vld [vmem:[%s3435_s1 + $0x480] ss:$8 sps:$4 sm:$0xff]  }
  0x6c   :  { %1734 = vmatpush1.bf16.msra.mxu1 %v2365_v55  ;;  %1694 = vmatprep.subr.bf16.mxu0 %v2370_v56  ;;  %v2449_v55 = vld [vmem:[%s3435_s1 + $0x580] ss:$8 sps:$4 sm:$0xff]   ;;  %v2454_v56 = vld [vmem:[%s3435_s1 + $0x494] ss:$8 sps:$4 sm:$0xff]  }
  0x6d   :  { %1735 = vmatprep.subr.bf16.mxu1 %v2373_v57  ;;  %v2457_v57 = vld [vmem:[%s3435_s1 + $0x594] ss:$8 sps:$4 sm:$0xff]  }
  0x6f   :  { %1695 = vmatpush1.bf16.msra.mxu0 %v2368_v58  ;;  %v2452_v58 = vld [vmem:[%s3435_s1 + $0x490] ss:$8 sps:$4 sm:$0xff]  }
  0x70   :  { %1736 = vmatpush1.bf16.msra.mxu1 %v2371_v59  ;;  %1696 = vmatprep.subr.bf16.mxu0 %v2376_v60  ;;  %v2455_v59 = vld [vmem:[%s3435_s1 + $0x590] ss:$8 sps:$4 sm:$0xff]   ;;  %v2460_v60 = vld [vmem:[%s3435_s1 + $0x4a4] ss:$8 sps:$4 sm:$0xff]  }
  0x71   :  { %1737 = vmatprep.subr.bf16.mxu1 %v2379_v61  ;;  %v2463_v61 = vld [vmem:[%s3435_s1 + $0x5a4] ss:$8 sps:$4 sm:$0xff]  }
  0x73   :  { %1697 = vmatpush1.bf16.msra.mxu0 %v2374_v62  ;;  %v2458_v62 = vld [vmem:[%s3435_s1 + $0x4a0] ss:$8 sps:$4 sm:$0xff]  }
  0x74   :  { %1738 = vmatpush1.bf16.msra.mxu1 %v2377_v63  ;;  %1698 = vmatprep.subr.bf16.mxu0 %v2382_v0  ;;  %v2461_v63 = vld [vmem:[%s3435_s1 + $0x5a0] ss:$8 sps:$4 sm:$0xff]   ;;  %v2466_v0 = vld [vmem:[%s3435_s1 + $0x4b4] ss:$8 sps:$4 sm:$0xff]  }
  0x75   :  { %1739 = vmatprep.subr.bf16.mxu1 %v2385_v1  ;;  %v2469_v1 = vld [vmem:[%s3435_s1 + $0x5b4] ss:$8 sps:$4 sm:$0xff]  }
  0x77   :  { %1699 = vmatpush1.bf16.msra.mxu0 %v2380_v2  ;;  %v2464_v2 = vld [vmem:[%s3435_s1 + $0x4b0] ss:$8 sps:$4 sm:$0xff]  }
  0x78   :  { %1740 = vmatpush1.bf16.msra.mxu1 %v2383_v3  ;;  %1700 = vmatprep.subr.bf16.mxu0 %v2388_v4  ;;  %v2467_v3 = vld [vmem:[%s3435_s1 + $0x5b0] ss:$8 sps:$4 sm:$0xff]   ;;  %v2472_v4 = vld [vmem:[%s3435_s1 + $0x4c4] ss:$8 sps:$4 sm:$0xff]  }
  0x79   :  { %1741 = vmatprep.subr.bf16.mxu1 %v2391_v5  ;;  %v2475_v5 = vld [vmem:[%s3435_s1 + $0x5c4] ss:$8 sps:$4 sm:$0xff]  }
  0x7b   :  { %1701 = vmatpush1.bf16.msra.mxu0 %v2386_v6  ;;  %v2470_v6 = vld [vmem:[%s3435_s1 + $0x4c0] ss:$8 sps:$4 sm:$0xff]  }
  0x7c   :  { %1742 = vmatpush1.bf16.msra.mxu1 %v2389_v7  ;;  %1702 = vmatprep.subr.bf16.mxu0 %v2394_v8  ;;  %v2473_v7 = vld [vmem:[%s3435_s1 + $0x5c0] ss:$8 sps:$4 sm:$0xff]   ;;  %v2478_v8 = vld [vmem:[%s3435_s1 + $0x4d4] ss:$8 sps:$4 sm:$0xff]  }
  0x7d   :  { %1743 = vmatprep.subr.bf16.mxu1 %v2397_v9  ;;  %v2481_v9 = vld [vmem:[%s3435_s1 + $0x5d4] ss:$8 sps:$4 sm:$0xff]  }
  0x7f   :  { %1703 = vmatpush1.bf16.msra.mxu0 %v2392_v10  ;;  %v2476_v10 = vld [vmem:[%s3435_s1 + $0x4d0] ss:$8 sps:$4 sm:$0xff]  }
  0x80   :  { %1744 = vmatpush1.bf16.msra.mxu1 %v2395_v11  ;;  %1754 = vmatprep.subr.bf16.mxu0 %v2400_v14  ;;  %v2479_v11 = vld [vmem:[%s3435_s1 + $0x5d0] ss:$8 sps:$4 sm:$0xff]   ;;  %v2482_v14 = vld [vmem:[%s3435_s1 + $0x4e0] ss:$8 sps:$4 sm:$0xff]  }
  0x81   :  { %1795 = vmatprep.subr.bf16.mxu1 %v2403_v15  ;;  %v2485_v15 = vld [vmem:[%s3435_s1 + $0x5e0] ss:$8 sps:$4 sm:$0xff]  }
  0x82   :  { %1705 = vmatmul.mubr.bf16.vlgmr.msra.gmra.mrb[4].mxu0 %v42_v16  ;;  %v2490_v16 = vld [vmem:[%s3435_s1 + $0x4f4] ss:$8 sps:$4 sm:$0xff]  }
  0x83   :  { %1746 = vmatmul.mubr.bf16.vlgmr.msra.gmra.mrb[4].mxu1 %v44_v17  ;;  %1755 = vmatpush1.bf16.msra.mxu0 %v2398_v18  ;;  %v2493_v17 = vld [vmem:[%s3435_s1 + $0x5f4] ss:$8 sps:$4 sm:$0xff]   ;;  %v2488_v18 = vld [vmem:[%s3435_s1 + $0x4f0] ss:$8 sps:$4 sm:$0xff]  }
  0x84   :  { %1796 = vmatpush1.bf16.msra.mxu1 %v2401_v19  ;;  %1756 = vmatprep.subr.bf16.mxu0 %v2406_v20  ;;  %v2491_v19 = vld [vmem:[%s3435_s1 + $0x5f0] ss:$8 sps:$4 sm:$0xff]   ;;  %v30_v20 = vld [vmem:[%s3436_s0 + $0x40] sm:$0xff] }
  0x85   :  { %1797 = vmatprep.subr.bf16.mxu1 %v2409_v21  ;;  %1786 = vmatprep.mubr.bf16.mxu0 %v47_v25  ;;  %v32_v21 = vld [vmem:[%s3436_s0 + $0x50] sm:$0xff] }
  0x86   :  { %1827 = vmatprep.mubr.bf16.mxu1 %v49_v28  ;;  %v48_v25 = vpack.c.bf16 %v32_v21, %v32_v21  ;;  %v2494_v28 = vld [vmem:[%s3435_s1 + $0x600] ss:$8 sps:$4 sm:$0xff]   ;;  %v2583_v21 = vld [vmem:[%s3435_s1 + $0x7e4] ss:$8 sps:$4 sm:$0xff]  }
  0x87   :  { %1757 = vmatpush1.bf16.msra.mxu0 %v2404_v23  ;;  %v2499_v23 = vld [vmem:[%s3435_s1 + $0x704] ss:$8 sps:$4 sm:$0xff]  }
  0x88   :  { %1798 = vmatpush1.bf16.msra.mxu1 %v2407_v24  ;;  %1758 = vmatprep.subr.bf16.mxu0 %v2412_v27  ;;  %v46_v24 = vpack.c.bf16 %v30_v20, %v30_v20  ;;  %v37_v27 = vld [vmem:[%s3436_s0 + $0x78] sm:$0xff]  ;;  %v2580_v20 = vld [vmem:[%s3435_s1 + $0x6e4] ss:$8 sps:$4 sm:$0xff]  }
  0x89   :  { %1799 = vmatprep.subr.bf16.mxu1 %v2415_v29  ;;  %v2497_v29 = vld [vmem:[%s3435_s1 + $0x700] ss:$8 sps:$4 sm:$0xff]  }
  0x8b   :  { %1759 = vmatpush1.bf16.msra.mxu0 %v2410_v30  ;;  %v2502_v30 = vld [vmem:[%s3435_s1 + $0x614] ss:$8 sps:$4 sm:$0xff]  }
  0x8c   :  { %1800 = vmatpush1.bf16.msra.mxu1 %v2413_v31  ;;  %1760 = vmatprep.subr.bf16.mxu0 %v2418_v32  ;;  %v2505_v31 = vld [vmem:[%s3435_s1 + $0x714] ss:$8 sps:$4 sm:$0xff]   ;;  %v51_v32 = vpack.c.bf16 %v35_v26, %v35_v26  ;;  %v2584_v26 = vld [vmem:[%s3435_s1 + $0x6f0] ss:$8 sps:$4 sm:$0xff]  }
  0x8d   :  { %1801 = vmatprep.subr.bf16.mxu1 %v2421_v33  ;;  %v53_v33 = vpack.c.bf16 %v37_v27, %v37_v27  ;;  %v2587_v27 = vld [vmem:[%s3435_s1 + $0x7f0] ss:$8 sps:$4 sm:$0xff]  }
  0x8f   :  { %1761 = vmatpush1.bf16.msra.mxu0 %v2416_v34  ;;  %v2500_v34 = vld [vmem:[%s3435_s1 + $0x610] ss:$8 sps:$4 sm:$0xff]  }
  0x90   :  { %1802 = vmatpush1.bf16.msra.mxu1 %v2419_v35  ;;  %1762 = vmatprep.subr.bf16.mxu0 %v2424_v36  ;;  %v2503_v35 = vld [vmem:[%s3435_s1 + $0x710] ss:$8 sps:$4 sm:$0xff]   ;;  %v2508_v36 = vld [vmem:[%s3435_s1 + $0x624] ss:$8 sps:$4 sm:$0xff]  }
  0x91   :  { %1803 = vmatprep.subr.bf16.mxu1 %v2427_v37  ;;  %v2511_v37 = vld [vmem:[%s3435_s1 + $0x724] ss:$8 sps:$4 sm:$0xff]  }
  0x93   :  { %1763 = vmatpush1.bf16.msra.mxu0 %v2422_v38  ;;  %v2506_v38 = vld [vmem:[%s3435_s1 + $0x620] ss:$8 sps:$4 sm:$0xff]  }
  0x94   :  { %1804 = vmatpush1.bf16.msra.mxu1 %v2425_v39  ;;  %1764 = vmatprep.subr.bf16.mxu0 %v2430_v40  ;;  %v2509_v39 = vld [vmem:[%s3435_s1 + $0x720] ss:$8 sps:$4 sm:$0xff]   ;;  %v2514_v40 = vld [vmem:[%s3435_s1 + $0x634] ss:$8 sps:$4 sm:$0xff]  }
  0x95   :  { %1805 = vmatprep.subr.bf16.mxu1 %v2433_v41  ;;  %v2517_v41 = vld [vmem:[%s3435_s1 + $0x734] ss:$8 sps:$4 sm:$0xff]  }
  0x97   :  { %1765 = vmatpush1.bf16.msra.mxu0 %v2428_v42  ;;  %v2512_v42 = vld [vmem:[%s3435_s1 + $0x630] ss:$8 sps:$4 sm:$0xff]  }
  0x98   :  { %1806 = vmatpush1.bf16.msra.mxu1 %v2431_v43  ;;  %1766 = vmatprep.subr.bf16.mxu0 %v2436_v44  ;;  %v2515_v43 = vld [vmem:[%s3435_s1 + $0x730] ss:$8 sps:$4 sm:$0xff]   ;;  %v2520_v44 = vld [vmem:[%s3435_s1 + $0x644] ss:$8 sps:$4 sm:$0xff]  }
  0x99   :  { %1807 = vmatprep.subr.bf16.mxu1 %v2439_v45  ;;  %v2523_v45 = vld [vmem:[%s3435_s1 + $0x744] ss:$8 sps:$4 sm:$0xff]  }
  0x9b   :  { %1767 = vmatpush1.bf16.msra.mxu0 %v2434_v46  ;;  %v2518_v46 = vld [vmem:[%s3435_s1 + $0x640] ss:$8 sps:$4 sm:$0xff]  }
  0x9c   :  { %1808 = vmatpush1.bf16.msra.mxu1 %v2437_v47  ;;  %1768 = vmatprep.subr.bf16.mxu0 %v2442_v48  ;;  %v2521_v47 = vld [vmem:[%s3435_s1 + $0x740] ss:$8 sps:$4 sm:$0xff]   ;;  %v2526_v48 = vld [vmem:[%s3435_s1 + $0x654] ss:$8 sps:$4 sm:$0xff]  }
  0x9d   :  { %1809 = vmatprep.subr.bf16.mxu1 %v2445_v49  ;;  %v2529_v49 = vld [vmem:[%s3435_s1 + $0x754] ss:$8 sps:$4 sm:$0xff]  }
  0x9f   :  { %1769 = vmatpush1.bf16.msra.mxu0 %v2440_v50  ;;  %v2524_v50 = vld [vmem:[%s3435_s1 + $0x650] ss:$8 sps:$4 sm:$0xff]  }
  0xa0   :  { %1810 = vmatpush1.bf16.msra.mxu1 %v2443_v51  ;;  %1770 = vmatprep.subr.bf16.mxu0 %v2448_v52  ;;  %v2527_v51 = vld [vmem:[%s3435_s1 + $0x750] ss:$8 sps:$4 sm:$0xff]   ;;  %v2532_v52 = vld [vmem:[%s3435_s1 + $0x664] ss:$8 sps:$4 sm:$0xff]  }
  0xa1   :  { %1811 = vmatprep.subr.bf16.mxu1 %v2451_v53  ;;  %v2535_v53 = vld [vmem:[%s3435_s1 + $0x764] ss:$8 sps:$4 sm:$0xff]  }
  0xa3   :  { %1771 = vmatpush1.bf16.msra.mxu0 %v2446_v54  ;;  %v2530_v54 = vld [vmem:[%s3435_s1 + $0x660] ss:$8 sps:$4 sm:$0xff]  }
  0xa4   :  { %1812 = vmatpush1.bf16.msra.mxu1 %v2449_v55  ;;  %1772 = vmatprep.subr.bf16.mxu0 %v2454_v56  ;;  %v2533_v55 = vld [vmem:[%s3435_s1 + $0x760] ss:$8 sps:$4 sm:$0xff]   ;;  %v2538_v56 = vld [vmem:[%s3435_s1 + $0x674] ss:$8 sps:$4 sm:$0xff]  }
  0xa5   :  { %1813 = vmatprep.subr.bf16.mxu1 %v2457_v57  ;;  %v2541_v57 = vld [vmem:[%s3435_s1 + $0x774] ss:$8 sps:$4 sm:$0xff]  }
  0xa7   :  { %1773 = vmatpush1.bf16.msra.mxu0 %v2452_v58  ;;  %v2536_v58 = vld [vmem:[%s3435_s1 + $0x670] ss:$8 sps:$4 sm:$0xff]  }
  0xa8   :  { %1814 = vmatpush1.bf16.msra.mxu1 %v2455_v59  ;;  %1774 = vmatprep.subr.bf16.mxu0 %v2460_v60  ;;  %v2539_v59 = vld [vmem:[%s3435_s1 + $0x770] ss:$8 sps:$4 sm:$0xff]   ;;  %v2544_v60 = vld [vmem:[%s3435_s1 + $0x684] ss:$8 sps:$4 sm:$0xff]  }
  0xa9   :  { %1815 = vmatprep.subr.bf16.mxu1 %v2463_v61  ;;  %v2547_v61 = vld [vmem:[%s3435_s1 + $0x784] ss:$8 sps:$4 sm:$0xff]  }
  0xab   :  { %1775 = vmatpush1.bf16.msra.mxu0 %v2458_v62  ;;  %v2542_v62 = vld [vmem:[%s3435_s1 + $0x680] ss:$8 sps:$4 sm:$0xff]  }
  0xac   :  { %1816 = vmatpush1.bf16.msra.mxu1 %v2461_v63  ;;  %1776 = vmatprep.subr.bf16.mxu0 %v2466_v0  ;;  %v2545_v63 = vld [vmem:[%s3435_s1 + $0x780] ss:$8 sps:$4 sm:$0xff]   ;;  %v2550_v0 = vld [vmem:[%s3435_s1 + $0x694] ss:$8 sps:$4 sm:$0xff]  }
  0xad   :  { %1817 = vmatprep.subr.bf16.mxu1 %v2469_v1  ;;  %v2553_v1 = vld [vmem:[%s3435_s1 + $0x794] ss:$8 sps:$4 sm:$0xff]  }
  0xaf   :  { %1777 = vmatpush1.bf16.msra.mxu0 %v2464_v2  ;;  %v2548_v2 = vld [vmem:[%s3435_s1 + $0x690] ss:$8 sps:$4 sm:$0xff]  }
  0xb0   :  { %1818 = vmatpush1.bf16.msra.mxu1 %v2467_v3  ;;  %1778 = vmatprep.subr.bf16.mxu0 %v2472_v4  ;;  %v2551_v3 = vld [vmem:[%s3435_s1 + $0x790] ss:$8 sps:$4 sm:$0xff]   ;;  %v2556_v4 = vld [vmem:[%s3435_s1 + $0x6a4] ss:$8 sps:$4 sm:$0xff]  }
  0xb1   :  { %1819 = vmatprep.subr.bf16.mxu1 %v2475_v5  ;;  %v2559_v5 = vld [vmem:[%s3435_s1 + $0x7a4] ss:$8 sps:$4 sm:$0xff]  }
  0xb3   :  { %1779 = vmatpush1.bf16.msra.mxu0 %v2470_v6  ;;  %v2554_v6 = vld [vmem:[%s3435_s1 + $0x6a0] ss:$8 sps:$4 sm:$0xff]  }
  0xb4   :  { %1820 = vmatpush1.bf16.msra.mxu1 %v2473_v7  ;;  %1780 = vmatprep.subr.bf16.mxu0 %v2478_v8  ;;  %v2557_v7 = vld [vmem:[%s3435_s1 + $0x7a0] ss:$8 sps:$4 sm:$0xff]   ;;  %v2562_v8 = vld [vmem:[%s3435_s1 + $0x6b4] ss:$8 sps:$4 sm:$0xff]  }
  0xb5   :  { %1821 = vmatprep.subr.bf16.mxu1 %v2481_v9  ;;  %v2565_v9 = vld [vmem:[%s3435_s1 + $0x7b4] ss:$8 sps:$4 sm:$0xff]  }
  0xb7   :  { %1781 = vmatpush1.bf16.msra.mxu0 %v2476_v10  ;;  %v2560_v10 = vld [vmem:[%s3435_s1 + $0x6b0] ss:$8 sps:$4 sm:$0xff]  }
  0xb8   :  { %1822 = vmatpush1.bf16.msra.mxu1 %v2479_v11  ;;  %1782 = vmatprep.subr.bf16.mxu0 %v2484_v12  ;;  %v2563_v11 = vld [vmem:[%s3435_s1 + $0x7b0] ss:$8 sps:$4 sm:$0xff]   ;;  %v2568_v12 = vld [vmem:[%s3435_s1 + $0x6c4] ss:$8 sps:$4 sm:$0xff]  }
  0xb9   :  { %1823 = vmatprep.subr.bf16.mxu1 %v2487_v13  ;;  %v2571_v13 = vld [vmem:[%s3435_s1 + $0x7c4] ss:$8 sps:$4 sm:$0xff]  }
  0xbb   :  { %1783 = vmatpush1.bf16.msra.mxu0 %v2482_v14  ;;  %v2566_v14 = vld [vmem:[%s3435_s1 + $0x6c0] ss:$8 sps:$4 sm:$0xff]  }
  0xbc   :  { %1824 = vmatpush1.bf16.msra.mxu1 %v2485_v15  ;;  %1784 = vmatprep.subr.bf16.mxu0 %v2490_v16  ;;  %v2569_v15 = vld [vmem:[%s3435_s1 + $0x7c0] ss:$8 sps:$4 sm:$0xff]   ;;  %v2574_v16 = vld [vmem:[%s3435_s1 + $0x6d4] ss:$8 sps:$4 sm:$0xff]  }
  0xbd   :  { %1825 = vmatprep.subr.bf16.mxu1 %v2493_v17  ;;  %v2577_v17 = vld [vmem:[%s3435_s1 + $0x7d4] ss:$8 sps:$4 sm:$0xff]  }
  0xbf   :  { %1785 = vmatpush1.bf16.msra.mxu0 %v2488_v18  ;;  %v2572_v18 = vld [vmem:[%s3435_s1 + $0x6d0] ss:$8 sps:$4 sm:$0xff]  }
  0xc0   :  { %1826 = vmatpush1.bf16.msra.mxu1 %v2491_v19  ;;  %1836 = vmatprep.subr.bf16.mxu0 %v2496_v22  ;;  %v2575_v19 = vld [vmem:[%s3435_s1 + $0x7d0] ss:$8 sps:$4 sm:$0xff]   ;;  %v2578_v22 = vld [vmem:[%s3435_s1 + $0x6e0] ss:$8 sps:$4 sm:$0xff]  }
  0xc1   :  { %1877 = vmatprep.subr.bf16.mxu1 %v2499_v23  ;;  %v2581_v23 = vld [vmem:[%s3435_s1 + $0x7e0] ss:$8 sps:$4 sm:$0xff]  }
  0xc2   :  { %1787 = vmatmul.mubr.bf16.vlgmr.msra.gmra.mrb[8].mxu0 %v46_v24  ;;  %v2586_v24 = vld [vmem:[%s3435_s1 + $0x6f4] ss:$8 sps:$4 sm:$0xff]  }
  0xc3   :  { %1828 = vmatmul.mubr.bf16.vlgmr.msra.gmra.mrb[8].mxu1 %v48_v25  ;;  %1837 = vmatpush1.bf16.msra.mxu0 %v2494_v28  ;;  %v2589_v25 = vld [vmem:[%s3435_s1 + $0x7f4] ss:$8 sps:$4 sm:$0xff]   ;;  %v34_v28 = vld [vmem:[%s3436_s0 + $0x60] sm:$0xff] }
  0xc4   :  { %1878 = vmatpush1.bf16.msra.mxu1 %v2497_v29  ;;  %1838 = vmatprep.subr.bf16.mxu0 %v2502_v30  ;;  %v36_v29 = vld [vmem:[%s3436_s0 + $0x70] sm:$0xff]  ;;  %v50_v30 = vpack.c.bf16 %v34_v28, %v34_v28 }
  0xc5   :  { %1879 = vmatprep.subr.bf16.mxu1 %v2505_v31  ;;  %1868 = vmatprep.mubr.bf16.mxu0 %v51_v32  ;;  %v52_v31 = vpack.c.bf16 %v36_v29, %v36_v29 }
  0xc6   :  { %1909 = vmatprep.mubr.bf16.mxu1 %v53_v33 }
  0xc7   :  { %1839 = vmatpush1.bf16.msra.mxu0 %v2500_v34 }
  0xc8   :  { %1880 = vmatpush1.bf16.msra.mxu1 %v2503_v35  ;;  %1840 = vmatprep.subr.bf16.mxu0 %v2508_v36 }
  0xc9   :  { %1881 = vmatprep.subr.bf16.mxu1 %v2511_v37 }
  0xcb   :  { %1841 = vmatpush1.bf16.msra.mxu0 %v2506_v38 }
  0xcc   :  { %1882 = vmatpush1.bf16.msra.mxu1 %v2509_v39  ;;  %1842 = vmatprep.subr.bf16.mxu0 %v2514_v40 }
  0xcd   :  { %1883 = vmatprep.subr.bf16.mxu1 %v2517_v41 }
  0xcf   :  { %1843 = vmatpush1.bf16.msra.mxu0 %v2512_v42 }
  0xd0   :  { %1884 = vmatpush1.bf16.msra.mxu1 %v2515_v43  ;;  %1844 = vmatprep.subr.bf16.mxu0 %v2520_v44 }
  0xd1   :  { %1885 = vmatprep.subr.bf16.mxu1 %v2523_v45 }
  0xd3   :  { %1845 = vmatpush1.bf16.msra.mxu0 %v2518_v46 }
  0xd4   :  { %1886 = vmatpush1.bf16.msra.mxu1 %v2521_v47  ;;  %1846 = vmatprep.subr.bf16.mxu0 %v2526_v48 }
  0xd5   :  { %1887 = vmatprep.subr.bf16.mxu1 %v2529_v49 }
  0xd7   :  { %1847 = vmatpush1.bf16.msra.mxu0 %v2524_v50 }
  0xd8   :  { %1888 = vmatpush1.bf16.msra.mxu1 %v2527_v51  ;;  %1848 = vmatprep.subr.bf16.mxu0 %v2532_v52 }
  0xd9   :  { %1889 = vmatprep.subr.bf16.mxu1 %v2535_v53 }
  0xdb   :  { %1849 = vmatpush1.bf16.msra.mxu0 %v2530_v54 }
  0xdc   :  { %1890 = vmatpush1.bf16.msra.mxu1 %v2533_v55  ;;  %1850 = vmatprep.subr.bf16.mxu0 %v2538_v56 }
  0xdd   :  { %1891 = vmatprep.subr.bf16.mxu1 %v2541_v57 }
  0xdf   :  { %1851 = vmatpush1.bf16.msra.mxu0 %v2536_v58 }
  0xe0   :  { %1892 = vmatpush1.bf16.msra.mxu1 %v2539_v59  ;;  %1852 = vmatprep.subr.bf16.mxu0 %v2544_v60 }
  0xe1   :  { %1893 = vmatprep.subr.bf16.mxu1 %v2547_v61 }
  0xe3   :  { %1853 = vmatpush1.bf16.msra.mxu0 %v2542_v62 }
  0xe4   :  { %1894 = vmatpush1.bf16.msra.mxu1 %v2545_v63  ;;  %1854 = vmatprep.subr.bf16.mxu0 %v2550_v0 }
  0xe5   :  { %1895 = vmatprep.subr.bf16.mxu1 %v2553_v1 }
  0xe7   :  { %1855 = vmatpush1.bf16.msra.mxu0 %v2548_v2  ;;  %v1929_v2 = vlaneseq }
  0xe8   :  { %1896 = vmatpush1.bf16.msra.mxu1 %v2551_v3  ;;  %1856 = vmatprep.subr.bf16.mxu0 %v2556_v4 }
  0xe9   :  { %1897 = vmatprep.subr.bf16.mxu1 %v2559_v5  ;;  %v1930_v3 = vshrl.u32 %v1929_v2, 7 }
  0xeb   :  { %1857 = vmatpush1.bf16.msra.mxu0 %v2554_v6  ;;  %v1931_v4 = vsub.s32 0, %v1930_v3 }
  0xec   :  { %1898 = vmatpush1.bf16.msra.mxu1 %v2557_v7  ;;  %1858 = vmatprep.subr.bf16.mxu0 %v2562_v8  ;;  %v1927_v7 = vld [vmem:[%s3437_s2] sm:$0x3]  ;;  %v1935_v8 = vsub.s32 1, %v1930_v3 }
  0xed   :  { %1899 = vmatprep.subr.bf16.mxu1 %v2565_v9 }
  0xef   :  { %1859 = vmatpush1.bf16.msra.mxu0 %v2560_v10 }
  0xf0   :  { %1900 = vmatpush1.bf16.msra.mxu1 %v2563_v11  ;;  %1860 = vmatprep.subr.bf16.mxu0 %v2568_v12 }
  0xf1   :  { %1901 = vmatprep.subr.bf16.mxu1 %v2571_v13 }
  0xf3   :  { %1861 = vmatpush1.bf16.msra.mxu0 %v2566_v14 }
  0xf4   :  { %1902 = vmatpush1.bf16.msra.mxu1 %v2569_v15  ;;  %1862 = vmatprep.subr.bf16.mxu0 %v2574_v16  ;;  %v1932_v16 = vrot.slane %v1927_v7, %v1931_v4 }
  0xf5   :  { %1903 = vmatprep.subr.bf16.mxu1 %v2577_v17 }
  0xf7   :  { %1863 = vmatpush1.bf16.msra.mxu0 %v2572_v18 }
  0xf8   :  { %1904 = vmatpush1.bf16.msra.mxu1 %v2575_v19  ;;  %1864 = vmatprep.subr.bf16.mxu0 %v2580_v20  ;;  %v1936_v20 = vrot.slane %v1927_v7, %v1935_v8 }
  0xf9   :  { %1905 = vmatprep.subr.bf16.mxu1 %v2583_v21 }
  0xfb   :  { %1865 = vmatpush1.bf16.msra.mxu0 %v2578_v22 }
  0xfc   :  { %1906 = vmatpush1.bf16.msra.mxu1 %v2581_v23  ;;  %1866 = vmatprep.subr.bf16.mxu0 %v2586_v24 }
  0xfd   :  { %1907 = vmatprep.subr.bf16.mxu1 %v2589_v25 }
  0xff   :  { %1867 = vmatpush1.bf16.msra.mxu0 %v2584_v26 }
 0x100   :  { %1908 = vmatpush1.bf16.msra.mxu1 %v2587_v27 }
 0x102   :  { %1869 = vmatmul.mubr.bf16.vlgmr.msra.gmra.mrb[12].mxu0 %v50_v30 }
 0x103   :  { %1910 = vmatmul.mubr.bf16.vlgmr.msra.gmra.mrb[12].mxu1 %v52_v31 }
 0x115   :  { %v1624_v32 = vpop.f32.mrb[0].mxu0 }
 0x116   :  { %v1665_v33 = vpop.f32.mrb[0].mxu1  ;;  %v1626_v35 = vpop.f32.mrb[1].mxu0 }
 0x117   :  { %v1666_v34 = vadd.f32 %v1665_v33, %v1624_v32  ;;  %v1667_v36 = vpop.f32.mrb[1].mxu1  ;;  %v1628_v38 = vpop.f32.mrb[2].mxu0 }
 0x118   :  { %v1668_v37 = vadd.f32 %v1667_v36, %v1626_v35  ;;  %v1669_v39 = vpop.f32.mrb[2].mxu1  ;;  %v1629_v40 = vpop.f32.mrb[3].mxu0 }
 0x119   :  { %v1670_v41 = vpop.f32.mrb[3].mxu1 }
 0x155   :  { %v1706_v42 = vpop.f32.mrb[4].mxu0 }
 0x156   :  { %v1747_v43 = vpop.f32.mrb[4].mxu1  ;;  %v1707_v44 = vadd.f32 %v1706_v42, %v1666_v34  ;;  %v1708_v45 = vpop.f32.mrb[5].mxu0 }
 0x157   :  { %v1749_v46 = vpop.f32.mrb[5].mxu1  ;;  %v1709_v47 = vadd.f32 %v1708_v45, %v1668_v37  ;;  %v1710_v48 = vpop.f32.mrb[6].mxu0 }
 0x158   :  { %v1751_v49 = vpop.f32.mrb[6].mxu1  ;;  %v1748_v50 = vadd.f32 %v1747_v43, %v1707_v44  ;;  %v1711_v51 = vpop.f32.mrb[7].mxu0 }
 0x159   :  { %v1752_v52 = vpop.f32.mrb[7].mxu1  ;;  %v1750_v53 = vadd.f32 %v1749_v46, %v1709_v47 }
 0x195   :  { %v1788_v54 = vpop.f32.mrb[8].mxu0 }
 0x196   :  { %v1829_v55 = vpop.f32.mrb[8].mxu1  ;;  %v1789_v56 = vadd.f32 %v1788_v54, %v1748_v50  ;;  %v1790_v57 = vpop.f32.mrb[9].mxu0 }
 0x197   :  { %v1831_v58 = vpop.f32.mrb[9].mxu1  ;;  %v1791_v59 = vadd.f32 %v1790_v57, %v1750_v53  ;;  %v1792_v60 = vpop.f32.mrb[10].mxu0 }
 0x198   :  { %v1833_v61 = vpop.f32.mrb[10].mxu1  ;;  %v1830_v62 = vadd.f32 %v1829_v55, %v1789_v56  ;;  %v1793_v63 = vpop.f32.mrb[11].mxu0 }
 0x199   :  { %v1834_v0 = vpop.f32.mrb[11].mxu1  ;;  %v1832_v1 = vadd.f32 %v1831_v58, %v1791_v59 }
 0x1d5   :  { %v1870_v5 = vpop.f32.mrb[12].mxu0 }
 0x1d6   :  { %v1911_v6 = vpop.f32.mrb[12].mxu1  ;;  %v1871_v9 = vadd.f32 %v1870_v5, %v1830_v62  ;;  %v1872_v10 = vpop.f32.mrb[13].mxu0 }
 0x1d7   :  { %v1913_v11 = vpop.f32.mrb[13].mxu1  ;;  %v1873_v12 = vadd.f32 %v1872_v10, %v1832_v1  ;;  %v1874_v13 = vpop.f32.mrb[14].mxu0 }
 0x1d8   :  { %v1915_v14 = vpop.f32.mrb[14].mxu1  ;;  %v1912_v15 = vadd.f32 %v1911_v6, %v1871_v9  ;;  %v1875_v17 = vpop.f32.mrb[15].mxu0 }
 0x1d9   :  { %v1916_v18 = vpop.f32.mrb[15].mxu1  ;;  %v1914_v19 = vadd.f32 %v1913_v11, %v1873_v12 }
 0x1da   :  { %v1939_v21 = vadd.f32 %v1932_v16, %v1912_v15 }
 0x1db   :  { %v1940_v22 = vadd.f32 %v1936_v20, %v1914_v19 }
 0x1dc   :  { %v1941_v23 = vmax.f32 %v1939_v21, 0.0 }
 0x1dd   :  { %v1942_v24 = vmax.f32 %v1940_v22, 0.0 }
 0x1de   :  { %1943 = vst [vmem:[%s3438_s3] sm:$0xff] %v1941_v23 }
 0x1df   :  { %1944 = vst [vmem:[%s3438_s3 + $0x8] sm:$0xff] %v1942_v24 }

// kernel: lstm_net_forward.5
= control target key start
LH: loop header
LB: loop body
LE: loop exit
PB: predicated region body
PF: predicated region fallthrough
CT: control target
= control target key end

     0   :  { %10 = vsyncpa [#allocation4], 0  ;;  %s5657_s0 = inlined_call_operand.vmem [shape: f32[928,128], index: 0, kind: input, shape index: {}]   ;;  %s5658_s1 = inlined_call_operand.vmem [shape: f32[6,128,384], index: 1, kind: input, shape index: {}]   ;;  %s5659_s2 = inlined_call_operand.hbm [shape: f32[6,128,384], index: 2, kind: input, shape index: {}]   ;;  %s5660_s3 = inlined_call_operand.vmem [shape: f32[6,1,384], index: 3, kind: input, shape index: {}]   ;;  %s5661_s4 = inlined_call_operand.vmem [shape: f32[6,1,384], index: 4, kind: input, shape index: {}]   ;;  %s5662_s5 = inlined_call_operand.vmem [shape: f32[928,128], index: 5, kind: output, shape index: {}]  }
   0x1   :  { %12 = vsyncpa [#allocation4 + $0x1], 0  ;;  %s3551_s18 = smov 0   ;;  %s3553_s19 = smov 0  }
   0x2   :  { %s3555_s20 = smov 0   ;;  %s3557_s21 = smov 0  }
   0x3 LB: > { %s3570_s22 = sadd.s32 4294967295, %s3504_s21   ;;  %s3573_s23 = sadd.s32 1, %s3504_s21   ;;  %s3504_s21 = sphi %s3557_s21, %s5669_s21   ;;  %s3500_s20 = sphi %s3555_s20, %s5668_s20   ;;  %s3496_s19 = sphi %s3553_s19, %s5667_s19   ;;  %s3492_s18 = sphi %s3551_s18, %s5666_s18  }
   0x4   : > { %s69_s24 = ssub.s32 %s3504_s21, %s3573_s23  ;;  %s72_s25 = sadd.s32 1, %s3500_s20 }
   0x5   : > { %p70_p0 = scmp.eq.s32.totalorder %s69_s24, 0  ;;  %p79_p1 = scmp.ne.s32.totalorder %s3500_s20, %s3496_s19 }
   0x6   : > { %p80_p2 = scmp.eq.s32.totalorder %s3504_s21, 0  ;;  %p85_p3 = scmp.ne.s32.totalorder %s3496_s19, %s3492_s18 }
   0x7   : > { %s3583_s26 = scalar_select %p70_p0, %s3500_s20, %s72_s25  }
   0x8   : > { %p81_p4 = por %p80_p2, %p79_p1  ;;  %p86_p5 = scmp.eq.s32.totalorder %s3570_s22, 0 }
   0x9   : > { %p3338_p6 = scmp.lt.s32.totalorder %s3504_s21, 6  ;;  %s193_s28 = sand.u32 1, %s3500_s20  }
   0xa   : > { %p3587_p7 = por %p86_p5, %p85_p3  ;;  %s3327_s29 = smul.u32 384, %s193_s28 }
   0xb   : > { %s3328_s30 = smul.u32 6144, %s3504_s21  ;;  %p3593_p8 = pnand %p3338_p6, %p81_p4 }
   0xc   : > { %s197_s10 = scalar_lea.vmem [#allocation3], %s3327_s29  ;;  %s3605_s12 = scalar_lea.sflag [#allocation4], %s193_s28 }
   0xd   : > { %s3600_s9 = scalar_lea.hbm %s5659_s2, %s3328_s30  ;;  %s204_s11 = sshll.u32 %s197_s10, 4  ;;  %s3602_s11 = int_to_ptr.vmem [resolvable:$true] %s204_s11 }
   0xe   : > { %s3432_s13 = scalar_lea.hbm %s3600_s9, 6144  ;;  %p3434_p11 = pneg %p3593_p8 }
   0xf   : > { %p3433_p10 = scmp.ne.s32.totalorder %s3600_s9, %s3432_s13  ;;  %s3437_s16 = scalar_lea.hbm %s5659_s2, 36864 }
  0x10   : > { %p3438_p0 = scmp.lt.u32.totalorder %s3600_s9, %s5659_s2  ;;  %p3439_p1 = scmp.lt.u32.totalorder %s3437_s16, %s3432_s13 }
  0x11   : > { %p3435_p12 = pnand %p3434_p11, %p3433_p10  ;;  %p3441_p3 = scmp.lt.u32.totalorder %s3432_s13, %s3600_s9 }
  0x12   : > { %p3440_p2 = por %p3439_p1, %p3438_p0 }
  0x13   : > { %p3436_p13 = pneg %p3435_p12 }
  0x14   : > { %p3442_p4 = por %p3441_p3, %p3440_p2 }
  0x16   : > { %p3443_p5 = pnand %p3442_p4, %p3436_p13 }
  0x18   : > { %3446 = shalt.err (!%p3443_p5)
}
  0x19   : > { %s3447_s24 = scalar_lea.vmem %s3602_s11, 6144  ;;  %s3514_s25 = smov [#allocation3]  }
  0x1a   : > { %p3448_p6 = scmp.ne.s32.totalorder %s3602_s11, %s3447_s24  ;;  %s3452_s28 = sshll.u32 %s3514_s25, 4  ;;  %s3453_s28 = int_to_ptr.vmem [resolvable:$false] %s3452_s28 }
  0x1b   : > { %s3454_s29 = scalar_lea.vmem %s3453_s28, 12288  ;;  %p3455_p9 = scmp.lt.s32.totalorder %s3602_s11, %s3453_s28 }
  0x1c   : > { %p3450_p10 = pnand %p3448_p6, %p3434_p11  ;;  %p3456_p0 = scmp.lt.s32.totalorder %s3454_s29, %s3447_s24 }
  0x1e   : > { %p3451_p12 = pneg %p3450_p10  ;;  %p3457_p1 = por %p3456_p0, %p3455_p9 }
  0x20   : > { %p3458_p2 = pnand %p3457_p1, %p3451_p12 }
  0x22   : > { %3461 = shalt.err (!%p3458_p2)
}
  0x23   : > { %s3515_s30 = smov 384   ;;  %s3516_s7 = smov 24  }
  0x24   : > { %3337 = dma.hbm_to_vmem [thread:$0]  (!%p3593_p8), %s3600_s9, 6144, %s3602_s11, %s3605_s12, %s3515_s30, %s3515_s30, %s3516_s7  }
  0x25   : > { %p226_p11 = scmp.lt.s32.totalorder %s3504_s21, 7  ;;  %p5665_p13 = scmp.ge.s32.totalorder %s3504_s21, 1 }
  0x27   : > { %p227_p3 = pnand %p5665_p13, %p226_p11 }
  0x28   : > { %s232_s8 = sand.u32 (!%p227_p3), 1, %s3496_s19  }
  0x29   : > { %230 = sbr.rel (%p227_p3) target bundleno = 1002 (0x3ea), region = 40  ;;  %s233_s13 = scalar_lea.sflag (!%p227_p3), [#allocation4], %s232_s8 }
  0x2a   : > { %s3329_s10 = smul.u32 (!%p227_p3), 384, %s232_s8 }
  0x2c   : > { %s3637_s14 = scalar_lea.vmem (!%p227_p3), [#allocation3], %s3329_s10 }
  0x30   : > { %3487 = dma.done.wait (%p3587_p7), %s233_s13, 6144  }
  0x31   : > { %3489 = vsyncadd (%p3587_p7), %s233_s13, 4294961152  ;;  %p271_p9 = scmp.lt.s32.totalorder %s3570_s22, 5  ;;  %p2793_p7 = scmp.ne.s32.totalorder %s3570_s22, 0 }
  0x32   : > { %v288_v0 = vld [vmem:[%s5657_s0] sm:$0xff] (!%p2793_p7)  ;;  %v289_v1 = vld [vmem:[%s5657_s0 + $0x8] sm:$0xff] (!%p2793_p7)  ;;  %v290_v2 = vld [vmem:[%s5657_s0 + $0x10] sm:$0xff] (!%p2793_p7) }
  0x33   : > { %s272_s6 = scalar_select %p271_p9, %s3570_s22, 5 }
  0x34   : > { %287 = sbr.rel (%p2793_p7) target bundleno = 110 (0x6e), region = 48  ;;  %404 = vst [vmem:[%s5662_s5] sm:$0xff] (!%p2793_p7), %v288_v0  ;;  %405 = vst [vmem:[%s5662_s5 + $0x8] sm:$0xff] (!%p2793_p7), %v289_v1  ;;  %v291_v3 = vld [vmem:[%s5657_s0 + $0x18] sm:$0xff] (!%p2793_p7)  ;;  %v292_v4 = vld [vmem:[%s5657_s0 + $0x20] sm:$0xff] (!%p2793_p7) }
  0x35   : > { %s3330_s9 = smul.u32 384, %s272_s6  ;;  %406 = vst [vmem:[%s5662_s5 + $0x10] sm:$0xff] (!%p2793_p7), %v290_v2  ;;  %v293_v5 = vld [vmem:[%s5657_s0 + $0x28] sm:$0xff] (!%p2793_p7)  ;;  %407 = vst [vmem:[%s5662_s5 + $0x18] sm:$0xff] (!%p2793_p7), %v291_v3  ;;  %v294_v6 = vld [vmem:[%s5657_s0 + $0x30] sm:$0xff] (!%p2793_p7) }
  0x36   : > { %s3331_s21 = smul.u32 3, %s272_s6  ;;  %408 = vst [vmem:[%s5662_s5 + $0x20] sm:$0xff] (!%p2793_p7), %v292_v4  ;;  %409 = vst [vmem:[%s5662_s5 + $0x28] sm:$0xff] (!%p2793_p7), %v293_v5  ;;  %v295_v7 = vld [vmem:[%s5657_s0 + $0x38] sm:$0xff] (!%p2793_p7)  ;;  %v296_v8 = vld [vmem:[%s5657_s0 + $0x40] sm:$0xff] (!%p2793_p7) }
  0x37   : > { %s3648_s15 = scalar_lea.vmem %s5658_s1, %s3330_s9  ;;  %410 = vst [vmem:[%s5662_s5 + $0x30] sm:$0xff] (!%p2793_p7), %v294_v6  ;;  %411 = vst [vmem:[%s5662_s5 + $0x38] sm:$0xff] (!%p2793_p7), %v295_v7  ;;  %v297_v9 = vld [vmem:[%s5657_s0 + $0x48] sm:$0xff] (!%p2793_p7)  ;;  %v298_v10 = vld [vmem:[%s5657_s0 + $0x50] sm:$0xff] (!%p2793_p7) }
  0x38   : > { %s3653_s18 = scalar_lea.vmem %s5660_s3, %s3331_s21  ;;  %s3658_s27 = scalar_lea.vmem %s5661_s4, %s3331_s21  ;;  %412 = vst [vmem:[%s5662_s5 + $0x40] sm:$0xff] (!%p2793_p7), %v296_v8  ;;  %v299_v11 = vld [vmem:[%s5657_s0 + $0x58] sm:$0xff] (!%p2793_p7)  ;;  %413 = vst [vmem:[%s5662_s5 + $0x48] sm:$0xff] (!%p2793_p7), %v297_v9  ;;  %v300_v12 = vld [vmem:[%s5657_s0 + $0x60] sm:$0xff] (!%p2793_p7) }
  0x39   : > { %414 = vst [vmem:[%s5662_s5 + $0x50] sm:$0xff] (!%p2793_p7), %v298_v10  ;;  %415 = vst [vmem:[%s5662_s5 + $0x58] sm:$0xff] (!%p2793_p7), %v299_v11  ;;  %v301_v13 = vld [vmem:[%s5657_s0 + $0x68] sm:$0xff] (!%p2793_p7)  ;;  %v302_v14 = vld [vmem:[%s5657_s0 + $0x70] sm:$0xff] (!%p2793_p7) }
  0x3a   : > { %416 = vst [vmem:[%s5662_s5 + $0x60] sm:$0xff] (!%p2793_p7), %v300_v12  ;;  %417 = vst [vmem:[%s5662_s5 + $0x68] sm:$0xff] (!%p2793_p7), %v301_v13  ;;  %v303_v15 = vld [vmem:[%s5657_s0 + $0x78] sm:$0xff] (!%p2793_p7)  ;;  %v304_v16 = vld [vmem:[%s5657_s0 + $0x80] sm:$0xff] (!%p2793_p7) }
  0x3b   : > { %418 = vst [vmem:[%s5662_s5 + $0x70] sm:$0xff] %v302_v14  ;;  %v305_v17 = vld [vmem:[%s5657_s0 + $0x88] sm:$0xff]  ;;  %419 = vst [vmem:[%s5662_s5 + $0x78] sm:$0xff] %v303_v15  ;;  %v306_v18 = vld [vmem:[%s5657_s0 + $0x90] sm:$0xff] }
  0x3c   : > { %420 = vst [vmem:[%s5662_s5 + $0x80] sm:$0xff] %v304_v16  ;;  %421 = vst [vmem:[%s5662_s5 + $0x88] sm:$0xff] %v305_v17  ;;  %v307_v19 = vld [vmem:[%s5657_s0 + $0x98] sm:$0xff]  ;;  %v308_v20 = vld [vmem:[%s5657_s0 + $0xa0] sm:$0xff] }
  0x3d   : > { %422 = vst [vmem:[%s5662_s5 + $0x90] sm:$0xff] %v306_v18  ;;  %423 = vst [vmem:[%s5662_s5 + $0x98] sm:$0xff] %v307_v19  ;;  %v309_v21 = vld [vmem:[%s5657_s0 + $0xa8] sm:$0xff]  ;;  %v310_v22 = vld [vmem:[%s5657_s0 + $0xb0] sm:$0xff] }
  0x3e   : > { %424 = vst [vmem:[%s5662_s5 + $0xa0] sm:$0xff] %v308_v20  ;;  %v311_v23 = vld [vmem:[%s5657_s0 + $0xb8] sm:$0xff]  ;;  %425 = vst [vmem:[%s5662_s5 + $0xa8] sm:$0xff] %v309_v21  ;;  %v312_v24 = vld [vmem:[%s5657_s0 + $0xc0] sm:$0xff] }
  0x3f   : > { %426 = vst [vmem:[%s5662_s5 + $0xb0] sm:$0xff] %v310_v22  ;;  %427 = vst [vmem:[%s5662_s5 + $0xb8] sm:$0xff] %v311_v23  ;;  %v313_v25 = vld [vmem:[%s5657_s0 + $0xc8] sm:$0xff]  ;;  %v314_v26 = vld [vmem:[%s5657_s0 + $0xd0] sm:$0xff] }
  0x40   : > { %428 = vst [vmem:[%s5662_s5 + $0xc0] sm:$0xff] %v312_v24  ;;  %429 = vst [vmem:[%s5662_s5 + $0xc8] sm:$0xff] %v313_v25  ;;  %v315_v27 = vld [vmem:[%s5657_s0 + $0xd8] sm:$0xff]  ;;  %v316_v28 = vld [vmem:[%s5657_s0 + $0xe0] sm:$0xff] }
  0x41   : > { %430 = vst [vmem:[%s5662_s5 + $0xd0] sm:$0xff] %v314_v26  ;;  %v317_v29 = vld [vmem:[%s5657_s0 + $0xe8] sm:$0xff]  ;;  %431 = vst [vmem:[%s5662_s5 + $0xd8] sm:$0xff] %v315_v27  ;;  %v318_v30 = vld [vmem:[%s5657_s0 + $0xf0] sm:$0xff] }
  0x42   : > { %432 = vst [vmem:[%s5662_s5 + $0xe0] sm:$0xff] %v316_v28  ;;  %433 = vst [vmem:[%s5662_s5 + $0xe8] sm:$0xff] %v317_v29  ;;  %v319_v31 = vld [vmem:[%s5657_s0 + $0xf8] sm:$0xff]  ;;  %v320_v32 = vld [vmem:[%s5657_s0 + $0x100] sm:$0xff] }
  0x43   : > { %434 = vst [vmem:[%s5662_s5 + $0xf0] sm:$0xff] %v318_v30  ;;  %435 = vst [vmem:[%s5662_s5 + $0xf8] sm:$0xff] %v319_v31  ;;  %v321_v33 = vld [vmem:[%s5657_s0 + $0x108] sm:$0xff]  ;;  %v322_v34 = vld [vmem:[%s5657_s0 + $0x110] sm:$0xff] }
  0x44   : > { %436 = vst [vmem:[%s5662_s5 + $0x100] sm:$0xff] %v320_v32  ;;  %v323_v35 = vld [vmem:[%s5657_s0 + $0x118] sm:$0xff]  ;;  %437 = vst [vmem:[%s5662_s5 + $0x108] sm:$0xff] %v321_v33  ;;  %v324_v36 = vld [vmem:[%s5657_s0 + $0x120] sm:$0xff] }
  0x45   : > { %438 = vst [vmem:[%s5662_s5 + $0x110] sm:$0xff] %v322_v34  ;;  %439 = vst [vmem:[%s5662_s5 + $0x118] sm:$0xff] %v323_v35  ;;  %v325_v37 = vld [vmem:[%s5657_s0 + $0x128] sm:$0xff]  ;;  %v326_v38 = vld [vmem:[%s5657_s0 + $0x130] sm:$0xff] }
  0x46   : > { %440 = vst [vmem:[%s5662_s5 + $0x120] sm:$0xff] %v324_v36  ;;  %441 = vst [vmem:[%s5662_s5 + $0x128] sm:$0xff] %v325_v37  ;;  %v327_v39 = vld [vmem:[%s5657_s0 + $0x138] sm:$0xff]  ;;  %v328_v40 = vld [vmem:[%s5657_s0 + $0x140] sm:$0xff] }
  0x47   : > { %442 = vst [vmem:[%s5662_s5 + $0x130] sm:$0xff] %v326_v38  ;;  %v329_v41 = vld [vmem:[%s5657_s0 + $0x148] sm:$0xff]  ;;  %443 = vst [vmem:[%s5662_s5 + $0x138] sm:$0xff] %v327_v39  ;;  %v330_v42 = vld [vmem:[%s5657_s0 + $0x150] sm:$0xff] }
  0x48   : > { %444 = vst [vmem:[%s5662_s5 + $0x140] sm:$0xff] %v328_v40  ;;  %445 = vst [vmem:[%s5662_s5 + $0x148] sm:$0xff] %v329_v41  ;;  %v331_v43 = vld [vmem:[%s5657_s0 + $0x158] sm:$0xff]  ;;  %v332_v44 = vld [vmem:[%s5657_s0 + $0x160] sm:$0xff] }
  0x49   : > { %446 = vst [vmem:[%s5662_s5 + $0x150] sm:$0xff] %v330_v42  ;;  %447 = vst [vmem:[%s5662_s5 + $0x158] sm:$0xff] %v331_v43  ;;  %v333_v45 = vld [vmem:[%s5657_s0 + $0x168] sm:$0xff]  ;;  %v334_v46 = vld [vmem:[%s5657_s0 + $0x170] sm:$0xff] }
  0x4a   : > { %448 = vst [vmem:[%s5662_s5 + $0x160] sm:$0xff] %v332_v44  ;;  %v335_v47 = vld [vmem:[%s5657_s0 + $0x178] sm:$0xff]  ;;  %449 = vst [vmem:[%s5662_s5 + $0x168] sm:$0xff] %v333_v45  ;;  %v336_v48 = vld [vmem:[%s5657_s0 + $0x180] sm:$0xff] }
  0x4b   : > { %450 = vst [vmem:[%s5662_s5 + $0x170] sm:$0xff] %v334_v46  ;;  %451 = vst [vmem:[%s5662_s5 + $0x178] sm:$0xff] %v335_v47  ;;  %v337_v49 = vld [vmem:[%s5657_s0 + $0x188] sm:$0xff]  ;;  %v338_v50 = vld [vmem:[%s5657_s0 + $0x190] sm:$0xff] }
  0x4c   : > { %452 = vst [vmem:[%s5662_s5 + $0x180] sm:$0xff] %v336_v48  ;;  %453 = vst [vmem:[%s5662_s5 + $0x188] sm:$0xff] %v337_v49  ;;  %v339_v51 = vld [vmem:[%s5657_s0 + $0x198] sm:$0xff]  ;;  %v340_v52 = vld [vmem:[%s5657_s0 + $0x1a0] sm:$0xff] }
  0x4d   : > { %454 = vst [vmem:[%s5662_s5 + $0x190] sm:$0xff] %v338_v50  ;;  %v341_v53 = vld [vmem:[%s5657_s0 + $0x1a8] sm:$0xff]  ;;  %455 = vst [vmem:[%s5662_s5 + $0x198] sm:$0xff] %v339_v51  ;;  %v342_v54 = vld [vmem:[%s5657_s0 + $0x1b0] sm:$0xff] }
  0x4e   : > { %456 = vst [vmem:[%s5662_s5 + $0x1a0] sm:$0xff] %v340_v52  ;;  %457 = vst [vmem:[%s5662_s5 + $0x1a8] sm:$0xff] %v341_v53  ;;  %v343_v55 = vld [vmem:[%s5657_s0 + $0x1b8] sm:$0xff]  ;;  %v344_v56 = vld [vmem:[%s5657_s0 + $0x1c0] sm:$0xff] }
  0x4f   : > { %458 = vst [vmem:[%s5662_s5 + $0x1b0] sm:$0xff] %v342_v54  ;;  %459 = vst [vmem:[%s5662_s5 + $0x1b8] sm:$0xff] %v343_v55  ;;  %v345_v57 = vld [vmem:[%s5657_s0 + $0x1c8] sm:$0xff]  ;;  %v346_v58 = vld [vmem:[%s5657_s0 + $0x1d0] sm:$0xff] }
  0x50   : > { %460 = vst [vmem:[%s5662_s5 + $0x1c0] sm:$0xff] %v344_v56  ;;  %v347_v59 = vld [vmem:[%s5657_s0 + $0x1d8] sm:$0xff]  ;;  %461 = vst [vmem:[%s5662_s5 + $0x1c8] sm:$0xff] %v345_v57  ;;  %v348_v60 = vld [vmem:[%s5657_s0 + $0x1e0] sm:$0xff] }
  0x51   : > { %462 = vst [vmem:[%s5662_s5 + $0x1d0] sm:$0xff] %v346_v58  ;;  %463 = vst [vmem:[%s5662_s5 + $0x1d8] sm:$0xff] %v347_v59  ;;  %v349_v61 = vld [vmem:[%s5657_s0 + $0x1e8] sm:$0xff]  ;;  %v350_v62 = vld [vmem:[%s5657_s0 + $0x1f0] sm:$0xff] }
  0x52   : > { %464 = vst [vmem:[%s5662_s5 + $0x1e0] sm:$0xff] %v348_v60  ;;  %465 = vst [vmem:[%s5662_s5 + $0x1e8] sm:$0xff] %v349_v61  ;;  %v351_v63 = vld [vmem:[%s5657_s0 + $0x1f8] sm:$0xff]  ;;  %v352_v0 = vld [vmem:[%s5657_s0 + $0x200] sm:$0xff] }
  0x53   : > { %466 = vst [vmem:[%s5662_s5 + $0x1f0] sm:$0xff] %v350_v62  ;;  %v353_v1 = vld [vmem:[%s5657_s0 + $0x208] sm:$0xff]  ;;  %467 = vst [vmem:[%s5662_s5 + $0x1f8] sm:$0xff] %v351_v63  ;;  %v354_v2 = vld [vmem:[%s5657_s0 + $0x210] sm:$0xff] }
  0x54   : > { %468 = vst [vmem:[%s5662_s5 + $0x200] sm:$0xff] %v352_v0  ;;  %469 = vst [vmem:[%s5662_s5 + $0x208] sm:$0xff] %v353_v1  ;;  %v355_v3 = vld [vmem:[%s5657_s0 + $0x218] sm:$0xff]  ;;  %v356_v4 = vld [vmem:[%s5657_s0 + $0x220] sm:$0xff] }
  0x55   : > { %470 = vst [vmem:[%s5662_s5 + $0x210] sm:$0xff] %v354_v2  ;;  %471 = vst [vmem:[%s5662_s5 + $0x218] sm:$0xff] %v355_v3  ;;  %v357_v5 = vld [vmem:[%s5657_s0 + $0x228] sm:$0xff]  ;;  %v358_v6 = vld [vmem:[%s5657_s0 + $0x230] sm:$0xff] }
  0x56   : > { %472 = vst [vmem:[%s5662_s5 + $0x220] sm:$0xff] %v356_v4  ;;  %v359_v7 = vld [vmem:[%s5657_s0 + $0x238] sm:$0xff]  ;;  %473 = vst [vmem:[%s5662_s5 + $0x228] sm:$0xff] %v357_v5  ;;  %v360_v8 = vld [vmem:[%s5657_s0 + $0x240] sm:$0xff] }
  0x57   : > { %474 = vst [vmem:[%s5662_s5 + $0x230] sm:$0xff] %v358_v6  ;;  %475 = vst [vmem:[%s5662_s5 + $0x238] sm:$0xff] %v359_v7  ;;  %v361_v9 = vld [vmem:[%s5657_s0 + $0x248] sm:$0xff]  ;;  %v362_v10 = vld [vmem:[%s5657_s0 + $0x250] sm:$0xff] }
  0x58   : > { %476 = vst [vmem:[%s5662_s5 + $0x240] sm:$0xff] %v360_v8  ;;  %477 = vst [vmem:[%s5662_s5 + $0x248] sm:$0xff] %v361_v9  ;;  %v363_v11 = vld [vmem:[%s5657_s0 + $0x258] sm:$0xff]  ;;  %v364_v12 = vld [vmem:[%s5657_s0 + $0x260] sm:$0xff] }
  0x59   : > { %478 = vst [vmem:[%s5662_s5 + $0x250] sm:$0xff] %v362_v10  ;;  %v365_v13 = vld [vmem:[%s5657_s0 + $0x268] sm:$0xff]  ;;  %479 = vst [vmem:[%s5662_s5 + $0x258] sm:$0xff] %v363_v11  ;;  %v366_v14 = vld [vmem:[%s5657_s0 + $0x270] sm:$0xff] }
  0x5a   : > { %480 = vst [vmem:[%s5662_s5 + $0x260] sm:$0xff] %v364_v12  ;;  %481 = vst [vmem:[%s5662_s5 + $0x268] sm:$0xff] %v365_v13  ;;  %v367_v15 = vld [vmem:[%s5657_s0 + $0x278] sm:$0xff]  ;;  %v368_v16 = vld [vmem:[%s5657_s0 + $0x280] sm:$0xff] }
  0x5b   : > { %482 = vst [vmem:[%s5662_s5 + $0x270] sm:$0xff] %v366_v14  ;;  %483 = vst [vmem:[%s5662_s5 + $0x278] sm:$0xff] %v367_v15  ;;  %v369_v17 = vld [vmem:[%s5657_s0 + $0x288] sm:$0xff]  ;;  %v370_v18 = vld [vmem:[%s5657_s0 + $0x290] sm:$0xff] }
  0x5c   : > { %484 = vst [vmem:[%s5662_s5 + $0x280] sm:$0xff] %v368_v16  ;;  %v371_v19 = vld [vmem:[%s5657_s0 + $0x298] sm:$0xff]  ;;  %485 = vst [vmem:[%s5662_s5 + $0x288] sm:$0xff] %v369_v17  ;;  %v372_v20 = vld [vmem:[%s5657_s0 + $0x2a0] sm:$0xff] }
  0x5d   : > { %486 = vst [vmem:[%s5662_s5 + $0x290] sm:$0xff] %v370_v18  ;;  %487 = vst [vmem:[%s5662_s5 + $0x298] sm:$0xff] %v371_v19  ;;  %v373_v21 = vld [vmem:[%s5657_s0 + $0x2a8] sm:$0xff]  ;;  %v374_v22 = vld [vmem:[%s5657_s0 + $0x2b0] sm:$0xff] }
  0x5e   : > { %488 = vst [vmem:[%s5662_s5 + $0x2a0] sm:$0xff] %v372_v20  ;;  %489 = vst [vmem:[%s5662_s5 + $0x2a8] sm:$0xff] %v373_v21  ;;  %v375_v23 = vld [vmem:[%s5657_s0 + $0x2b8] sm:$0xff]  ;;  %v376_v24 = vld [vmem:[%s5657_s0 + $0x2c0] sm:$0xff] }
  0x5f   : > { %490 = vst [vmem:[%s5662_s5 + $0x2b0] sm:$0xff] %v374_v22  ;;  %v377_v25 = vld [vmem:[%s5657_s0 + $0x2c8] sm:$0xff]  ;;  %491 = vst [vmem:[%s5662_s5 + $0x2b8] sm:$0xff] %v375_v23  ;;  %v378_v26 = vld [vmem:[%s5657_s0 + $0x2d0] sm:$0xff] }
  0x60   : > { %492 = vst [vmem:[%s5662_s5 + $0x2c0] sm:$0xff] %v376_v24  ;;  %493 = vst [vmem:[%s5662_s5 + $0x2c8] sm:$0xff] %v377_v25  ;;  %v379_v27 = vld [vmem:[%s5657_s0 + $0x2d8] sm:$0xff]  ;;  %v380_v28 = vld [vmem:[%s5657_s0 + $0x2e0] sm:$0xff] }
  0x61   : > { %494 = vst [vmem:[%s5662_s5 + $0x2d0] sm:$0xff] %v378_v26  ;;  %495 = vst [vmem:[%s5662_s5 + $0x2d8] sm:$0xff] %v379_v27  ;;  %v381_v29 = vld [vmem:[%s5657_s0 + $0x2e8] sm:$0xff]  ;;  %v382_v30 = vld [vmem:[%s5657_s0 + $0x2f0] sm:$0xff] }
  0x62   : > { %496 = vst [vmem:[%s5662_s5 + $0x2e0] sm:$0xff] %v380_v28  ;;  %v383_v31 = vld [vmem:[%s5657_s0 + $0x2f8] sm:$0xff]  ;;  %497 = vst [vmem:[%s5662_s5 + $0x2e8] sm:$0xff] %v381_v29  ;;  %v384_v32 = vld [vmem:[%s5657_s0 + $0x300] sm:$0xff] }
  0x63   : > { %498 = vst [vmem:[%s5662_s5 + $0x2f0] sm:$0xff] %v382_v30  ;;  %499 = vst [vmem:[%s5662_s5 + $0x2f8] sm:$0xff] %v383_v31  ;;  %v385_v33 = vld [vmem:[%s5657_s0 + $0x308] sm:$0xff]  ;;  %v386_v34 = vld [vmem:[%s5657_s0 + $0x310] sm:$0xff] }
  0x64   : > { %500 = vst [vmem:[%s5662_s5 + $0x300] sm:$0xff] %v384_v32  ;;  %501 = vst [vmem:[%s5662_s5 + $0x308] sm:$0xff] %v385_v33  ;;  %v387_v35 = vld [vmem:[%s5657_s0 + $0x318] sm:$0xff]  ;;  %v388_v36 = vld [vmem:[%s5657_s0 + $0x320] sm:$0xff] }
  0x65   : > { %502 = vst [vmem:[%s5662_s5 + $0x310] sm:$0xff] %v386_v34  ;;  %v389_v37 = vld [vmem:[%s5657_s0 + $0x328] sm:$0xff]  ;;  %503 = vst [vmem:[%s5662_s5 + $0x318] sm:$0xff] %v387_v35  ;;  %v390_v38 = vld [vmem:[%s5657_s0 + $0x330] sm:$0xff] }
  0x66   : > { %504 = vst [vmem:[%s5662_s5 + $0x320] sm:$0xff] %v388_v36  ;;  %505 = vst [vmem:[%s5662_s5 + $0x328] sm:$0xff] %v389_v37  ;;  %v391_v39 = vld [vmem:[%s5657_s0 + $0x338] sm:$0xff]  ;;  %v392_v40 = vld [vmem:[%s5657_s0 + $0x340] sm:$0xff] }
  0x67   : > { %506 = vst [vmem:[%s5662_s5 + $0x330] sm:$0xff] %v390_v38  ;;  %507 = vst [vmem:[%s5662_s5 + $0x338] sm:$0xff] %v391_v39  ;;  %v393_v41 = vld [vmem:[%s5657_s0 + $0x348] sm:$0xff]  ;;  %v394_v42 = vld [vmem:[%s5657_s0 + $0x350] sm:$0xff] }
  0x68   : > { %508 = vst [vmem:[%s5662_s5 + $0x340] sm:$0xff] %v392_v40  ;;  %v395_v43 = vld [vmem:[%s5657_s0 + $0x358] sm:$0xff]  ;;  %509 = vst [vmem:[%s5662_s5 + $0x348] sm:$0xff] %v393_v41  ;;  %v396_v44 = vld [vmem:[%s5657_s0 + $0x360] sm:$0xff] }
  0x69   : > { %510 = vst [vmem:[%s5662_s5 + $0x350] sm:$0xff] %v394_v42  ;;  %511 = vst [vmem:[%s5662_s5 + $0x358] sm:$0xff] %v395_v43  ;;  %v397_v45 = vld [vmem:[%s5657_s0 + $0x368] sm:$0xff]  ;;  %v398_v46 = vld [vmem:[%s5657_s0 + $0x370] sm:$0xff] }
  0x6a   : > { %512 = vst [vmem:[%s5662_s5 + $0x360] sm:$0xff] %v396_v44  ;;  %513 = vst [vmem:[%s5662_s5 + $0x368] sm:$0xff] %v397_v45  ;;  %v399_v47 = vld [vmem:[%s5657_s0 + $0x378] sm:$0xff]  ;;  %v400_v48 = vld [vmem:[%s5657_s0 + $0x380] sm:$0xff] }
  0x6b   : > { %514 = vst [vmem:[%s5662_s5 + $0x370] sm:$0xff] %v398_v46  ;;  %v401_v49 = vld [vmem:[%s5657_s0 + $0x388] sm:$0xff]  ;;  %515 = vst [vmem:[%s5662_s5 + $0x378] sm:$0xff] %v399_v47  ;;  %v402_v50 = vld [vmem:[%s5657_s0 + $0x390] sm:$0xff] }
  0x6c   : > { %516 = vst [vmem:[%s5662_s5 + $0x380] sm:$0xff] %v400_v48  ;;  %517 = vst [vmem:[%s5662_s5 + $0x388] sm:$0xff] %v401_v49  ;;  %v403_v51 = vld [vmem:[%s5657_s0 + $0x398] sm:$0xff] }
  0x6d   : > { %518 = vst [vmem:[%s5662_s5 + $0x390] sm:$0xff] %v402_v50  ;;  %519 = vst [vmem:[%s5662_s5 + $0x398] sm:$0xff] %v403_v51 }
  0x6e PF: > { %v637_v52 = vld [vmem:[%s3648_s15 + $0x8] sm:$0xff]  ;;  %v640_v53 = vld [vmem:[%s3648_s15 + $0x20] sm:$0xff]  ;;  %v639_v56 = vld [vmem:[%s3648_s15 + $0x18] sm:$0xff]  ;;  %v3517_v59 = vmov 0.0   ;;  %s5557_s29 = smov 0  }
  0x6f   : > { %v636_v54 = vld [vmem:[%s3648_s15] sm:$0xff]  ;;  %v3191_v55 = vpack.c.bf16 %v640_v53, %v637_v52  ;;  %v643_v57 = vld [vmem:[%s3648_s15 + $0x38] sm:$0xff]  ;;  %v646_v58 = vld [vmem:[%s3648_s15 + $0x50] sm:$0xff]  ;;  %765 = vmatprep.mubr.f32.mxu0 %v3517_v59  ;;  %1287 = vmatprep.mubr.f32.mxu1 %v3517_v59 }
  0x70   : > { %v3193_v60 = vpack.c.bf16 %v639_v56, %v636_v54  ;;  %v3195_v61 = vpack.c.bf16 %v646_v58, %v643_v57  ;;  %v642_v62 = vld [vmem:[%s3648_s15 + $0x30] sm:$0xff]  ;;  %v645_v63 = vld [vmem:[%s3648_s15 + $0x48] sm:$0xff]  ;;  %v652_v1 = vld [vmem:[%s3648_s15 + $0x80] sm:$0xff] }
  0x71   : > { %v649_v0 = vld [vmem:[%s3648_s15 + $0x68] sm:$0xff]  ;;  %3192 = vmatprep.subr.bf16.mxu0 %v3191_v55  ;;  %3311 = vmatprep.subr.bf16.mxu1 %v3191_v55  ;;  %v3197_v2 = vpack.c.bf16 %v645_v63, %v642_v62  ;;  %v648_v4 = vld [vmem:[%s3648_s15 + $0x60] sm:$0xff]  ;;  %v651_v5 = vld [vmem:[%s3648_s15 + $0x78] sm:$0xff] }
  0x72   : > { %3194 = vmatpush1.bf16.msra.mxu0 %v3193_v60  ;;  %3319 = vmatpush1.bf16.msra.mxu1 %v3193_v60  ;;  %v3199_v3 = vpack.c.bf16 %v652_v1, %v649_v0  ;;  %v655_v6 = vld [vmem:[%s3648_s15 + $0x98] sm:$0xff]  ;;  %v658_v7 = vld [vmem:[%s3648_s15 + $0xb0] sm:$0xff]  ;;  %v3201_v8 = vpack.c.bf16 %v651_v5, %v648_v4  ;;  %v657_v11 = vld [vmem:[%s3648_s15 + $0xa8] sm:$0xff] }
  0x73   : > { %3196 = vmatprep.subr.bf16.mxu0 %v3195_v61  ;;  %3312 = vmatprep.subr.bf16.mxu1 %v3195_v61  ;;  %v3203_v9 = vpack.c.bf16 %v658_v7, %v655_v6  ;;  %v654_v10 = vld [vmem:[%s3648_s15 + $0x90] sm:$0xff]  ;;  %v661_v12 = vld [vmem:[%s3648_s15 + $0xc8] sm:$0xff]  ;;  %v664_v13 = vld [vmem:[%s3648_s15 + $0xe0] sm:$0xff] }
  0x74   : > { %v3205_v14 = vpack.c.bf16 %v657_v11, %v654_v10  ;;  %v3207_v15 = vpack.c.bf16 %v664_v13, %v661_v12  ;;  %v660_v16 = vld [vmem:[%s3648_s15 + $0xc0] sm:$0xff]  ;;  %v663_v17 = vld [vmem:[%s3648_s15 + $0xd8] sm:$0xff]  ;;  %v670_v19 = vld [vmem:[%s3648_s15 + $0x110] sm:$0xff] }
  0x75   : > { %v667_v18 = vld [vmem:[%s3648_s15 + $0xf8] sm:$0xff]  ;;  %v3209_v20 = vpack.c.bf16 %v663_v17, %v660_v16  ;;  %v666_v22 = vld [vmem:[%s3648_s15 + $0xf0] sm:$0xff]  ;;  %v669_v23 = vld [vmem:[%s3648_s15 + $0x108] sm:$0xff] }
  0x76   : > { %3198 = vmatpush1.bf16.msra.mxu0 %v3197_v2  ;;  %3320 = vmatpush1.bf16.msra.mxu1 %v3197_v2  ;;  %v3211_v21 = vpack.c.bf16 %v670_v19, %v667_v18  ;;  %v673_v24 = vld [vmem:[%s3648_s15 + $0x128] sm:$0xff]  ;;  %v676_v25 = vld [vmem:[%s3648_s15 + $0x140] sm:$0xff]  ;;  %v3213_v26 = vpack.c.bf16 %v669_v23, %v666_v22  ;;  %v675_v29 = vld [vmem:[%s3648_s15 + $0x138] sm:$0xff] }
  0x77   : > { %3200 = vmatprep.subr.bf16.mxu0 %v3199_v3  ;;  %3313 = vmatprep.subr.bf16.mxu1 %v3199_v3  ;;  %v3215_v27 = vpack.c.bf16 %v676_v25, %v673_v24  ;;  %v672_v28 = vld [vmem:[%s3648_s15 + $0x120] sm:$0xff]  ;;  %v679_v30 = vld [vmem:[%s3648_s15 + $0x158] sm:$0xff]  ;;  %v682_v31 = vld [vmem:[%s3648_s15 + $0x170] sm:$0xff] }
  0x78   : > { %v3217_v32 = vpack.c.bf16 %v675_v29, %v672_v28  ;;  %v3219_v33 = vpack.c.bf16 %v682_v31, %v679_v30  ;;  %v678_v34 = vld [vmem:[%s3648_s15 + $0x150] sm:$0xff]  ;;  %v681_v35 = vld [vmem:[%s3648_s15 + $0x168] sm:$0xff]  ;;  %v644_v40 = vld [vmem:[%s3648_s15 + $0x40] sm:$0xff] }
  0x79   : > { %v638_v36 = vld [vmem:[%s3648_s15 + $0x10] sm:$0xff]  ;;  %v641_v37 = vld [vmem:[%s3648_s15 + $0x28] sm:$0xff]  ;;  %v3221_v38 = vpack.c.bf16 %v681_v35, %v678_v34  ;;  %v647_v41 = vld [vmem:[%s3648_s15 + $0x58] sm:$0xff] }
  0x7a   : > { %3202 = vmatpush1.bf16.msra.mxu0 %v3201_v8  ;;  %3321 = vmatpush1.bf16.msra.mxu1 %v3201_v8  ;;  %v3223_v39 = vpack.c.bf16 %v641_v37, %v638_v36  ;;  %v4398_v42 = vld [vmem:[%s5662_s5] sm:$0xff]  ;;  %v607_v43 = vld [vmem:[%s5662_s5 + $0x2b8] sm:$0xff]  ;;  %v3227_v44 = vpack.c.bf16 %v647_v41, %v644_v40  ;;  %v650_v45 = vld [vmem:[%s3648_s15 + $0x70] sm:$0xff] }
  0x7b   : > { %3204 = vmatprep.subr.bf16.mxu0 %v3203_v9  ;;  %3314 = vmatprep.subr.bf16.mxu1 %v3203_v9  ;;  %v653_v46 = vld [vmem:[%s3648_s15 + $0x88] sm:$0xff]  ;;  %v608_v48 = vld [vmem:[%s5662_s5 + $0x2c0] sm:$0xff]  ;;  %v659_v51 = vld [vmem:[%s3648_s15 + $0xb8] sm:$0xff] }
  0x7c   : > { %v4410_v47 = vld [vmem:[%s5662_s5 + $0x8] sm:$0xff]  ;;  %v3231_v49 = vpack.c.bf16 %v653_v46, %v650_v45  ;;  %v656_v50 = vld [vmem:[%s3648_s15 + $0xa0] sm:$0xff]  ;;  %v4424_v52 = vld [vmem:[%s5662_s5 + $0x10] sm:$0xff] }
  0x7d   : > { %v609_v53 = vld [vmem:[%s5662_s5 + $0x2c8] sm:$0xff]  ;;  %v3235_v54 = vpack.c.bf16 %v659_v51, %v656_v50  ;;  %v662_v55 = vld [vmem:[%s3648_s15 + $0xd0] sm:$0xff]  ;;  %v4437_v57 = vld [vmem:[%s5662_s5 + $0x18] sm:$0xff] }
  0x7e   : > { %3206 = vmatpush1.bf16.msra.mxu0 %v3205_v14  ;;  %3322 = vmatpush1.bf16.msra.mxu1 %v3205_v14  ;;  %v665_v56 = vld [vmem:[%s3648_s15 + $0xe8] sm:$0xff]  ;;  %v610_v58 = vld [vmem:[%s5662_s5 + $0x2d0] sm:$0xff]  ;;  %v668_v61 = vld [vmem:[%s3648_s15 + $0x100] sm:$0xff] }
  0x7f   : > { %3208 = vmatprep.subr.bf16.mxu0 %v3207_v15  ;;  %3315 = vmatprep.subr.bf16.mxu1 %v3207_v15  ;;  %v3239_v60 = vpack.c.bf16 %v665_v56, %v662_v55  ;;  %v671_v62 = vld [vmem:[%s3648_s15 + $0x118] sm:$0xff]  ;;  %v4450_v63 = vld [vmem:[%s5662_s5 + $0x20] sm:$0xff]  ;;  %v674_v2 = vld [vmem:[%s3648_s15 + $0x130] sm:$0xff] }
  0x80   : > { %v611_v0 = vld [vmem:[%s5662_s5 + $0x2d8] sm:$0xff]  ;;  %v3243_v1 = vpack.c.bf16 %v671_v62, %v668_v61  ;;  %v677_v3 = vld [vmem:[%s3648_s15 + $0x148] sm:$0xff]  ;;  %v612_v5 = vld [vmem:[%s5662_s5 + $0x2e0] sm:$0xff] }
  0x81   : > { %v4463_v4 = vld [vmem:[%s5662_s5 + $0x28] sm:$0xff]  ;;  %v3247_v6 = vpack.c.bf16 %v677_v3, %v674_v2  ;;  %v680_v7 = vld [vmem:[%s3648_s15 + $0x160] sm:$0xff]  ;;  %v683_v8 = vld [vmem:[%s3648_s15 + $0x178] sm:$0xff] }
  0x82   : > { %3210 = vmatpush1.bf16.msra.mxu0 %v3209_v20  ;;  %3323 = vmatpush1.bf16.msra.mxu1 %v3209_v20  ;;  %v4476_v9 = vld [vmem:[%s5662_s5 + $0x30] sm:$0xff]  ;;  %v613_v10 = vld [vmem:[%s5662_s5 + $0x2e8] sm:$0xff]  ;;  %v3251_v11 = vpack.c.bf16 %v683_v8, %v680_v7  ;;  %v4487_v12 = vld [vmem:[%s5662_s5 + $0x38] sm:$0xff] }
  0x83   : > { %3212 = vmatprep.subr.bf16.mxu0 %v3211_v21  ;;  %3316 = vmatprep.subr.bf16.mxu1 %v3211_v21  ;;  %v614_v13 = vld [vmem:[%s5662_s5 + $0x2f0] sm:$0xff]  ;;  %v4498_v14 = vld [vmem:[%s5662_s5 + $0x40] sm:$0xff]  ;;  %v615_v15 = vld [vmem:[%s5662_s5 + $0x2f8] sm:$0xff] }
  0x84   : > { %v4509_v16 = vld [vmem:[%s5662_s5 + $0x48] sm:$0xff]  ;;  %v616_v17 = vld [vmem:[%s5662_s5 + $0x300] sm:$0xff]  ;;  %v4520_v18 = vld [vmem:[%s5662_s5 + $0x50] sm:$0xff] }
  0x85   : > { %v617_v19 = vld [vmem:[%s5662_s5 + $0x308] sm:$0xff]  ;;  %v4531_v20 = vld [vmem:[%s5662_s5 + $0x58] sm:$0xff]  ;;  %v618_v21 = vld [vmem:[%s5662_s5 + $0x310] sm:$0xff] }
  0x86   : > { %3214 = vmatpush1.bf16.msra.mxu0 %v3213_v26  ;;  %3324 = vmatpush1.bf16.msra.mxu1 %v3213_v26  ;;  %v4542_v22 = vld [vmem:[%s5662_s5 + $0x60] sm:$0xff]  ;;  %v619_v23 = vld [vmem:[%s5662_s5 + $0x318] sm:$0xff]  ;;  %v4553_v24 = vld [vmem:[%s5662_s5 + $0x68] sm:$0xff] }
  0x87   : > { %3216 = vmatprep.subr.bf16.mxu0 %v3215_v27  ;;  %3317 = vmatprep.subr.bf16.mxu1 %v3215_v27  ;;  %v620_v25 = vld [vmem:[%s5662_s5 + $0x320] sm:$0xff]  ;;  %v4564_v26 = vld [vmem:[%s5662_s5 + $0x70] sm:$0xff]  ;;  %v621_v27 = vld [vmem:[%s5662_s5 + $0x328] sm:$0xff] }
  0x88   : > { %v4575_v28 = vld [vmem:[%s5662_s5 + $0x78] sm:$0xff]  ;;  %v622_v29 = vld [vmem:[%s5662_s5 + $0x330] sm:$0xff]  ;;  %v4586_v30 = vld [vmem:[%s5662_s5 + $0x80] sm:$0xff] }
  0x89   : > { %v623_v31 = vld [vmem:[%s5662_s5 + $0x338] sm:$0xff]  ;;  %v4608_v34 = vld [vmem:[%s5662_s5 + $0x90] sm:$0xff]  ;;  %v625_v35 = vld [vmem:[%s5662_s5 + $0x348] sm:$0xff] }
  0x8a   : > { %3218 = vmatpush1.bf16.msra.mxu0 %v3217_v32  ;;  %3325 = vmatpush1.bf16.msra.mxu1 %v3217_v32  ;;  %v4597_v32 = vld [vmem:[%s5662_s5 + $0x88] sm:$0xff]  ;;  %v4619_v36 = vld [vmem:[%s5662_s5 + $0x98] sm:$0xff]  ;;  %v626_v37 = vld [vmem:[%s5662_s5 + $0x350] sm:$0xff] }
  0x8b   : > { %3220 = vmatprep.subr.bf16.mxu0 %v3219_v33  ;;  %3318 = vmatprep.subr.bf16.mxu1 %v3219_v33  ;;  %v624_v33 = vld [vmem:[%s5662_s5 + $0x340] sm:$0xff]  ;;  %v4641_v40 = vld [vmem:[%s5662_s5 + $0xa8] sm:$0xff]  ;;  %v4663_v45 = vld [vmem:[%s5662_s5 + $0xb8] sm:$0xff] }
  0x8c   : > { %v628_v41 = vld [vmem:[%s5662_s5 + $0x360] sm:$0xff]  ;;  %v630_v46 = vld [vmem:[%s5662_s5 + $0x370] sm:$0xff]  ;;  %v4685_v50 = vld [vmem:[%s5662_s5 + $0xc8] sm:$0xff] }
  0x8d   : > { %v632_v51 = vld [vmem:[%s5662_s5 + $0x380] sm:$0xff]  ;;  %v4707_v55 = vld [vmem:[%s5662_s5 + $0xd8] sm:$0xff]  ;;  %v634_v56 = vld [vmem:[%s5662_s5 + $0x390] sm:$0xff] }
  0x8e   : > { %3222 = vmatpush1.bf16.msra.mxu0 %v3221_v38  ;;  %3326 = vmatpush1.bf16.msra.mxu1 %v3221_v38  ;;  %v4630_v38 = vld [vmem:[%s5662_s5 + $0xa0] sm:$0xff]  ;;  %v4729_v61 = vld [vmem:[%s5662_s5 + $0xe8] sm:$0xff]  ;;  %v4738_v62 = vld [vmem:[%s5662_s5 + $0xf0] sm:$0xff] }
  0x8f   : > { %3224 = vmatprep.subr.bf16.mxu1 %v3223_v39  ;;  %v558_v2 = vld [vmem:[%s5662_s5 + $0x130] sm:$0xff]  ;;  %v559_v3 = vld [vmem:[%s5662_s5 + $0x138] sm:$0xff]  ;;  %v564_v8 = vld [vmem:[%s5662_s5 + $0x160] sm:$0xff] }
  0x90   : > { %v563_v7 = vld [vmem:[%s5662_s5 + $0x158] sm:$0xff] }
  0x91   : > { %766 = vmatmul.mubr.f32.vlgmr.msra.gmra.mrb[0].mxu0 %v4398_v42  ;;  %1288 = vmatmul.mubr.f32.vlgmr.msra.gmra.mrb[0].mxu1 %v607_v43  ;;  %v4652_v43 = vld [vmem:[%s5662_s5 + $0xb0] sm:$0xff] }
  0x92   : > { %3226 = vmatpush3.bf16.msra.mxu1 %v3223_v39  ;;  %771 = vmatprep.mubr.f32.mxu0 %v3517_v59  ;;  %v627_v39 = vld [vmem:[%s5662_s5 + $0x358] sm:$0xff] }
  0x93   : > { %1293 = vmatprep.mubr.f32.mxu1 %v3517_v59  ;;  %3228 = vmatprep.subr.bf16.mxu1 %v3227_v44 }
  0x95   : > { %772 = vmatmul.mubr.f32.gmra.mrb[2].mxu0 %v4410_v47  ;;  %1294 = vmatmul.mubr.f32.gmra.mrb[2].mxu1 %v608_v48  ;;  %v4674_v48 = vld [vmem:[%s5662_s5 + $0xc0] sm:$0xff] }
  0x96   : > { %777 = vmatprep.mubr.f32.mxu0 %v3517_v59  ;;  %1299 = vmatprep.mubr.f32.mxu1 %v3517_v59 }
  0x97   : > { %3230 = vmatpush3.bf16.msra.mxu1 %v3227_v44  ;;  %v629_v44 = vld [vmem:[%s5662_s5 + $0x368] sm:$0xff] }
  0x98   : > { %3232 = vmatprep.subr.bf16.mxu1 %v3231_v49 }
  0x99   : > { %778 = vmatmul.mubr.f32.gmra.mrb[4].mxu0 %v4424_v52  ;;  %1300 = vmatmul.mubr.f32.gmra.mrb[4].mxu1 %v609_v53  ;;  %v4696_v53 = vld [vmem:[%s5662_s5 + $0xd0] sm:$0xff] }
  0x9a   : > { %783 = vmatprep.mubr.f32.mxu0 %v3517_v59  ;;  %1305 = vmatprep.mubr.f32.mxu1 %v3517_v59 }
  0x9b   : > { %3234 = vmatpush3.bf16.msra.mxu1 %v3231_v49  ;;  %v631_v49 = vld [vmem:[%s5662_s5 + $0x378] sm:$0xff] }
  0x9c   : > { %3236 = vmatprep.subr.bf16.mxu1 %v3235_v54 }
  0x9d   : > { %784 = vmatmul.mubr.f32.gmra.mrb[6].mxu0 %v4437_v57  ;;  %1306 = vmatmul.mubr.f32.gmra.mrb[6].mxu1 %v610_v58  ;;  %v4718_v58 = vld [vmem:[%s5662_s5 + $0xe0] sm:$0xff] }
  0x9e   : > { %789 = vmatprep.mubr.f32.mxu0 %v3517_v59  ;;  %1311 = vmatprep.mubr.f32.mxu1 %v3517_v59 }
  0x9f   : > { %3238 = vmatpush3.bf16.msra.mxu1 %v3235_v54  ;;  %v633_v54 = vld [vmem:[%s5662_s5 + $0x388] sm:$0xff] }
  0xa0   : > { %3240 = vmatprep.subr.bf16.mxu1 %v3239_v60 }
  0xa1   : > { %790 = vmatmul.mubr.f32.gmra.mrb[8].mxu0 %v4450_v63  ;;  %1312 = vmatmul.mubr.f32.gmra.mrb[8].mxu1 %v611_v0  ;;  %v556_v0 = vld [vmem:[%s5662_s5 + $0x120] sm:$0xff] }
  0xa2   : > { %795 = vmatprep.mubr.f32.mxu0 %v3517_v59  ;;  %1317 = vmatprep.mubr.f32.mxu1 %v3517_v59 }
  0xa3   : > { %3242 = vmatpush3.bf16.msra.mxu1 %v3239_v60  ;;  %v635_v60 = vld [vmem:[%s5662_s5 + $0x398] sm:$0xff] }
  0xa4   : > { %3244 = vmatprep.subr.bf16.mxu1 %v3243_v1 }
  0xa5   : > { %796 = vmatmul.mubr.f32.gmra.mrb[10].mxu0 %v4463_v4  ;;  %1318 = vmatmul.mubr.f32.gmra.mrb[10].mxu1 %v612_v5  ;;  %v561_v5 = vld [vmem:[%s5662_s5 + $0x148] sm:$0xff] }
  0xa6   : > { %801 = vmatprep.mubr.f32.mxu0 %v3517_v59  ;;  %1323 = vmatprep.mubr.f32.mxu1 %v3517_v59 }
  0xa7   : > { %3246 = vmatpush3.bf16.msra.mxu1 %v3243_v1  ;;  %v557_v1 = vld [vmem:[%s5662_s5 + $0x128] sm:$0xff] }
  0xa8   : > { %3248 = vmatprep.subr.bf16.mxu1 %v3247_v6 }
  0xa9   : > { %802 = vmatmul.mubr.f32.gmra.mrb[12].mxu0 %v4476_v9  ;;  %1324 = vmatmul.mubr.f32.gmra.mrb[12].mxu1 %v613_v10  ;;  %v566_v10 = vld [vmem:[%s5662_s5 + $0x170] sm:$0xff] }
  0xaa   : > { %807 = vmatprep.mubr.f32.mxu0 %v3517_v59  ;;  %1329 = vmatprep.mubr.f32.mxu1 %v3517_v59 }
  0xab   : > { %3250 = vmatpush3.bf16.msra.mxu1 %v3247_v6  ;;  %v562_v6 = vld [vmem:[%s5662_s5 + $0x150] sm:$0xff] }
  0xac   : > { %3252 = vmatprep.subr.bf16.mxu1 %v3251_v11 }
  0xad   : > { %808 = vmatmul.mubr.f32.gmra.mrb[14].mxu0 %v4487_v12  ;;  %1330 = vmatmul.mubr.f32.gmra.mrb[14].mxu1 %v614_v13  ;;  %v569_v13 = vld [vmem:[%s5662_s5 + $0x188] sm:$0xff] }
  0xae   : > { %813 = vmatprep.mubr.f32.mxu0 %v3517_v59  ;;  %1335 = vmatprep.mubr.f32.mxu1 %v3517_v59 }
  0xaf   : > { %3254 = vmatpush3.bf16.msra.mxu1 %v3251_v11  ;;  %v567_v11 = vld [vmem:[%s5662_s5 + $0x178] sm:$0xff] }
  0xb1   : > { %814 = vmatmul.mubr.f32.gmra.mrb[16].mxu0 %v4498_v14  ;;  %1336 = vmatmul.mubr.f32.gmra.mrb[16].mxu1 %v615_v15  ;;  %v570_v15 = vld [vmem:[%s5662_s5 + $0x190] sm:$0xff] }
  0xb2   : > { %819 = vmatprep.mubr.f32.mxu0 %v3517_v59  ;;  %1341 = vmatprep.mubr.f32.mxu1 %v3517_v59 }
  0xb5   : > { %820 = vmatmul.mubr.f32.gmra.mrb[18].mxu0 %v4509_v16  ;;  %1342 = vmatmul.mubr.f32.gmra.mrb[18].mxu1 %v616_v17  ;;  %v571_v17 = vld [vmem:[%s5662_s5 + $0x198] sm:$0xff] }
  0xb6   : > { %825 = vmatprep.mubr.f32.mxu0 %v3517_v59  ;;  %1347 = vmatprep.mubr.f32.mxu1 %v3517_v59 }
  0xb9   : > { %826 = vmatmul.mubr.f32.gmra.mrb[20].mxu0 %v4520_v18  ;;  %1348 = vmatmul.mubr.f32.gmra.mrb[20].mxu1 %v617_v19  ;;  %v572_v19 = vld [vmem:[%s5662_s5 + $0x1a0] sm:$0xff] }
  0xba   : > { %831 = vmatprep.mubr.f32.mxu0 %v3517_v59  ;;  %1353 = vmatprep.mubr.f32.mxu1 %v3517_v59 }
  0xbd   : > { %832 = vmatmul.mubr.f32.gmra.mrb[22].mxu0 %v4531_v20  ;;  %1354 = vmatmul.mubr.f32.gmra.mrb[22].mxu1 %v618_v21 }
  0xbe   : > { %837 = vmatprep.mubr.f32.mxu0 %v3517_v59  ;;  %1359 = vmatprep.mubr.f32.mxu1 %v3517_v59 }
  0xc1   : > { %838 = vmatmul.mubr.f32.gmra.mrb[24].mxu0 %v4542_v22  ;;  %1360 = vmatmul.mubr.f32.gmra.mrb[24].mxu1 %v619_v23 }
  0xc2   : > { %843 = vmatprep.mubr.f32.mxu0 %v3517_v59  ;;  %1365 = vmatprep.mubr.f32.mxu1 %v3517_v59 }
  0xc5   : > { %844 = vmatmul.mubr.f32.gmra.mrb[26].mxu0 %v4553_v24  ;;  %1366 = vmatmul.mubr.f32.gmra.mrb[26].mxu1 %v620_v25 }
  0xc6   : > { %849 = vmatprep.mubr.f32.mxu0 %v3517_v59  ;;  %1371 = vmatprep.mubr.f32.mxu1 %v3517_v59 }
  0xc9   : > { %850 = vmatmul.mubr.f32.gmra.mrb[28].mxu0 %v4564_v26  ;;  %1372 = vmatmul.mubr.f32.gmra.mrb[28].mxu1 %v621_v27 }
  0xca   : > { %855 = vmatprep.mubr.f32.mxu0 %v3517_v59  ;;  %1377 = vmatprep.mubr.f32.mxu1 %v3517_v59 }
  0xcd   : > { %856 = vmatmul.mubr.f32.gmra.mrb[30].mxu0 %v4575_v28  ;;  %1378 = vmatmul.mubr.f32.gmra.mrb[30].mxu1 %v622_v29 }
  0xce   : > { %861 = vmatprep.mubr.f32.mxu0 %v3517_v59  ;;  %1383 = vmatprep.mubr.f32.mxu1 %v3517_v59 }
  0xd1   : > { %862 = vmatmul.mubr.f32.gmra.mrb[32].mxu0 %v4586_v30  ;;  %1384 = vmatmul.mubr.f32.gmra.mrb[32].mxu1 %v623_v31 }
  0xd2   : > { %867 = vmatprep.mubr.f32.mxu0 %v3517_v59  ;;  %1389 = vmatprep.mubr.f32.mxu1 %v3517_v59 }
  0xd5   : > { %868 = vmatmul.mubr.f32.gmra.mrb[34].mxu0 %v4597_v32  ;;  %1390 = vmatmul.mubr.f32.gmra.mrb[34].mxu1 %v624_v33  ;;  %v574_v33 = vld [vmem:[%s5662_s5 + $0x1b0] sm:$0xff] }
  0xd6   : > { %873 = vmatprep.mubr.f32.mxu0 %v3517_v59  ;;  %1395 = vmatprep.mubr.f32.mxu1 %v3517_v59 }
  0xd9   : > { %874 = vmatmul.mubr.f32.gmra.mrb[36].mxu0 %v4608_v34  ;;  %1396 = vmatmul.mubr.f32.gmra.mrb[36].mxu1 %v625_v35 }
  0xda   : > { %879 = vmatprep.mubr.f32.mxu0 %v3517_v59  ;;  %1401 = vmatprep.mubr.f32.mxu1 %v3517_v59 }
  0xdd   : > { %880 = vmatmul.mubr.f32.gmra.mrb[38].mxu0 %v4619_v36  ;;  %1402 = vmatmul.mubr.f32.gmra.mrb[38].mxu1 %v626_v37 }
  0xde   : > { %885 = vmatprep.mubr.f32.mxu0 %v3517_v59  ;;  %1407 = vmatprep.mubr.f32.mxu1 %v3517_v59 }
  0xe1   : > { %886 = vmatmul.mubr.f32.gmra.mrb[40].mxu0 %v4630_v38  ;;  %1408 = vmatmul.mubr.f32.gmra.mrb[40].mxu1 %v627_v39 }
  0xe2   : > { %891 = vmatprep.mubr.f32.mxu0 %v3517_v59  ;;  %1413 = vmatprep.mubr.f32.mxu1 %v3517_v59 }
  0xe5   : > { %892 = vmatmul.mubr.f32.gmra.mrb[42].mxu0 %v4641_v40  ;;  %1414 = vmatmul.mubr.f32.gmra.mrb[42].mxu1 %v628_v41 }
  0xe6   : > { %897 = vmatprep.mubr.f32.mxu0 %v3517_v59  ;;  %1419 = vmatprep.mubr.f32.mxu1 %v3517_v59 }
  0xe9   : > { %898 = vmatmul.mubr.f32.gmra.mrb[44].mxu0 %v4652_v43  ;;  %1420 = vmatmul.mubr.f32.gmra.mrb[44].mxu1 %v629_v44 }
  0xea   : > { %903 = vmatprep.mubr.f32.mxu0 %v3517_v59  ;;  %1425 = vmatprep.mubr.f32.mxu1 %v3517_v59 }
  0xed   : > { %904 = vmatmul.mubr.f32.gmra.mrb[46].mxu0 %v4663_v45  ;;  %1426 = vmatmul.mubr.f32.gmra.mrb[46].mxu1 %v630_v46 }
  0xee   : > { %909 = vmatprep.mubr.f32.mxu0 %v3517_v59  ;;  %1431 = vmatprep.mubr.f32.mxu1 %v3517_v59 }
  0xf1   : > { %910 = vmatmul.mubr.f32.gmra.mrb[48].mxu0 %v4674_v48  ;;  %1432 = vmatmul.mubr.f32.gmra.mrb[48].mxu1 %v631_v49 }
  0xf2   : > { %915 = vmatprep.mubr.f32.mxu0 %v3517_v59  ;;  %1437 = vmatprep.mubr.f32.mxu1 %v3517_v59 }
  0xf5   : > { %916 = vmatmul.mubr.f32.gmra.mrb[50].mxu0 %v4685_v50  ;;  %1438 = vmatmul.mubr.f32.gmra.mrb[50].mxu1 %v632_v51 }
  0xf6   : > { %921 = vmatprep.mubr.f32.mxu0 %v3517_v59  ;;  %1443 = vmatprep.mubr.f32.mxu1 %v3517_v59 }
  0xf9   : > { %922 = vmatmul.mubr.f32.gmra.mrb[52].mxu0 %v4696_v53  ;;  %1444 = vmatmul.mubr.f32.gmra.mrb[52].mxu1 %v633_v54  ;;  %v576_v54 = vld [vmem:[%s5662_s5 + $0x1c0] sm:$0xff] }
  0xfa   : > { %927 = vmatprep.mubr.f32.mxu0 %v3517_v59  ;;  %1449 = vmatprep.mubr.f32.mxu1 %v3517_v59 }
  0xfd   : > { %928 = vmatmul.mubr.f32.gmra.mrb[54].mxu0 %v4707_v55  ;;  %1450 = vmatmul.mubr.f32.gmra.mrb[54].mxu1 %v634_v56 }
  0xfe   : > { %933 = vmatprep.mubr.f32.mxu0 %v3517_v59  ;;  %1455 = vmatprep.mubr.f32.mxu1 %v3517_v59 }
 0x101   : > { %934 = vmatmul.mubr.f32.gmra.mrb[56].mxu0 %v4718_v58  ;;  %1456 = vmatmul.mubr.f32.gmra.mrb[56].mxu1 %v635_v60 }
 0x102   : > { %939 = vmatprep.mubr.f32.mxu0 %v3517_v59  ;;  %2982 = vmatprep.mubr.f32.mxu1 %v4398_v42  ;;  %v4747_v42 = vld [vmem:[%s5662_s5 + $0xf8] sm:$0xff] }
 0x105   : > { %940 = vmatmul.mubr.f32.gmra.mrb[58].mxu0 %v4729_v61  ;;  %2983 = vmatmul.mubr.f32.vlgmr.msra.gmra.mrb[58].mxu1 %v4410_v47  ;;  %v4756_v47 = vld [vmem:[%s5662_s5 + $0x100] sm:$0xff] }
 0x106   : > { %945 = vmatprep.mubr.f32.mxu0 %v3517_v59  ;;  %2985 = vmatprep.mubr.f32.mxu1 %v4424_v52  ;;  %v553_v52 = vld [vmem:[%s5662_s5 + $0x108] sm:$0xff] }
 0x109   : > { %946 = vmatmul.mubr.f32.gmra.mrb[60].mxu0 %v4738_v62  ;;  %2986 = vmatmul.mubr.f32.gmra.mrb[60].mxu1 %v4437_v57  ;;  %v554_v57 = vld [vmem:[%s5662_s5 + $0x110] sm:$0xff] }
 0x10a   : > { %951 = vmatprep.mubr.f32.mxu0 %v3517_v59  ;;  %2988 = vmatprep.mubr.f32.mxu1 %v4450_v63  ;;  %v555_v63 = vld [vmem:[%s5662_s5 + $0x118] sm:$0xff] }
 0x10d   : > { %952 = vmatmul.mubr.f32.gmra.mrb[62].mxu0 %v4747_v42  ;;  %2989 = vmatmul.mubr.f32.gmra.mrb[62].mxu1 %v4463_v4  ;;  %v560_v4 = vld [vmem:[%s5662_s5 + $0x140] sm:$0xff] }
 0x10e   : > { %957 = vmatprep.mubr.f32.mxu0 %v3517_v59  ;;  %2991 = vmatprep.mubr.f32.mxu1 %v4476_v9  ;;  %v565_v9 = vld [vmem:[%s5662_s5 + $0x168] sm:$0xff] }
 0x111   : > { %958 = vmatmul.mubr.f32.gmra.mrb[64].mxu0 %v4756_v47  ;;  %2992 = vmatmul.mubr.f32.gmra.mrb[64].mxu1 %v4487_v12  ;;  %v568_v12 = vld [vmem:[%s5662_s5 + $0x180] sm:$0xff] }
 0x112   : > { %963 = vmatprep.mubr.f32.mxu0 %v3517_v59  ;;  %2994 = vmatprep.mubr.f32.mxu1 %v4498_v14  ;;  %v686_v14 = vlaneseq }
 0x115   : > { %964 = vmatmul.mubr.f32.gmra.mrb[66].mxu0 %v553_v52  ;;  %2995 = vmatmul.mubr.f32.gmra.mrb[66].mxu1 %v4509_v16  ;;  %v4857_v16 = vshrl.u32 %v686_v14, 7 }
 0x116   : > { %969 = vmatprep.mubr.f32.mxu0 %v3517_v59  ;;  %2997 = vmatprep.mubr.f32.mxu1 %v4520_v18 }
 0x117   : > { %v688_v18 = vsub.s32 0, %v4857_v16  ;;  %v692_v21 = vsub.s32 1, %v4857_v16 }
 0x119   : > { %970 = vmatmul.mubr.f32.gmra.mrb[68].mxu0 %v554_v57  ;;  %2998 = vmatmul.mubr.f32.gmra.mrb[68].mxu1 %v4531_v20  ;;  %v4869_v20 = vld [vmem:[%s3653_s18] sm:$0x7] }
 0x11a   : > { %975 = vmatprep.mubr.f32.mxu0 %v3517_v59  ;;  %3000 = vmatprep.mubr.f32.mxu1 %v4542_v22  ;;  %v4875_v22 = vrot.slane %v4869_v20, %v688_v18  ;;  %v4881_v23 = vrot.slane %v4869_v20, %v692_v21 }
 0x11d   : > { %976 = vmatmul.mubr.f32.gmra.mrb[70].mxu0 %v555_v63  ;;  %3001 = vmatmul.mubr.f32.gmra.mrb[70].mxu1 %v4553_v24  ;;  %v573_v24 = vld [vmem:[%s5662_s5 + $0x1a8] sm:$0xff] }
 0x11e   : > { %981 = vmatprep.mubr.f32.mxu0 %v3517_v59  ;;  %3003 = vmatprep.mubr.f32.mxu1 %v4564_v26 }
 0x121   : > { %982 = vmatmul.mubr.f32.gmra.mrb[72].mxu0 %v556_v0  ;;  %3004 = vmatmul.mubr.f32.gmra.mrb[72].mxu1 %v4575_v28 }
 0x122   : > { %987 = vmatprep.mubr.f32.mxu0 %v3517_v59  ;;  %3006 = vmatprep.mubr.f32.mxu1 %v4586_v30 }
 0x125   : > { %988 = vmatmul.mubr.f32.gmra.mrb[74].mxu0 %v557_v1  ;;  %3007 = vmatmul.mubr.f32.gmra.mrb[74].mxu1 %v4597_v32 }
 0x126   : > { %993 = vmatprep.mubr.f32.mxu0 %v3517_v59  ;;  %3009 = vmatprep.mubr.f32.mxu1 %v4608_v34 }
 0x129   : > { %994 = vmatmul.mubr.f32.gmra.mrb[76].mxu0 %v558_v2  ;;  %3010 = vmatmul.mubr.f32.gmra.mrb[76].mxu1 %v4619_v36 }
 0x12a   : > { %999 = vmatprep.mubr.f32.mxu0 %v3517_v59  ;;  %3012 = vmatprep.mubr.f32.mxu1 %v4630_v38 }
 0x12d   : > { %1000 = vmatmul.mubr.f32.gmra.mrb[78].mxu0 %v559_v3  ;;  %3013 = vmatmul.mubr.f32.gmra.mrb[78].mxu1 %v4641_v40 }
 0x12e   : > { %1005 = vmatprep.mubr.f32.mxu0 %v3517_v59  ;;  %3015 = vmatprep.mubr.f32.mxu1 %v4652_v43  ;;  %v575_v43 = vld [vmem:[%s5662_s5 + $0x1b8] sm:$0xff] }
 0x131   : > { %1006 = vmatmul.mubr.f32.gmra.mrb[80].mxu0 %v560_v4  ;;  %3016 = vmatmul.mubr.f32.gmra.mrb[80].mxu1 %v4663_v45 }
 0x132   : > { %1011 = vmatprep.mubr.f32.mxu0 %v3517_v59  ;;  %3018 = vmatprep.mubr.f32.mxu1 %v4674_v48 }
 0x135   : > { %1012 = vmatmul.mubr.f32.gmra.mrb[82].mxu0 %v561_v5  ;;  %3019 = vmatmul.mubr.f32.gmra.mrb[82].mxu1 %v4685_v50 }
 0x136   : > { %1017 = vmatprep.mubr.f32.mxu0 %v3517_v59  ;;  %3021 = vmatprep.mubr.f32.mxu1 %v4696_v53 }
 0x139   : > { %1018 = vmatmul.mubr.f32.gmra.mrb[84].mxu0 %v562_v6  ;;  %3022 = vmatmul.mubr.f32.gmra.mrb[84].mxu1 %v4707_v55 }
 0x13a   : > { %1023 = vmatprep.mubr.f32.mxu0 %v3517_v59  ;;  %3024 = vmatprep.mubr.f32.mxu1 %v4718_v58 }
 0x13d   : > { %1024 = vmatmul.mubr.f32.gmra.mrb[86].mxu0 %v563_v7  ;;  %3025 = vmatmul.mubr.f32.gmra.mrb[86].mxu1 %v4729_v61 }
 0x13e   : > { %1029 = vmatprep.mubr.f32.mxu0 %v3517_v59  ;;  %3027 = vmatprep.mubr.f32.mxu1 %v4738_v62 }
 0x141   : > { %1030 = vmatmul.mubr.f32.gmra.mrb[88].mxu0 %v564_v8  ;;  %3028 = vmatmul.mubr.f32.gmra.mrb[88].mxu1 %v4747_v42 }
 0x142   : > { %1035 = vmatprep.mubr.f32.mxu0 %v3517_v59  ;;  %3030 = vmatprep.mubr.f32.mxu1 %v4756_v47 }
 0x145   : > { %1036 = vmatmul.mubr.f32.gmra.mrb[90].mxu0 %v565_v9  ;;  %3031 = vmatmul.mubr.f32.gmra.mrb[90].mxu1 %v553_v52  ;;  %v577_v52 = vld [vmem:[%s5662_s5 + $0x1c8] sm:$0xff] }
 0x146   : > { %1041 = vmatprep.mubr.f32.mxu0 %v3517_v59  ;;  %3033 = vmatprep.mubr.f32.mxu1 %v554_v57  ;;  %v578_v57 = vld [vmem:[%s5662_s5 + $0x1d0] sm:$0xff] }
 0x149   : > { %1042 = vmatmul.mubr.f32.gmra.mrb[92].mxu0 %v566_v10  ;;  %3034 = vmatmul.mubr.f32.gmra.mrb[92].mxu1 %v555_v63 }
 0x14a   : > { %1047 = vmatprep.mubr.f32.mxu0 %v3517_v59  ;;  %3036 = vmatprep.mubr.f32.mxu1 %v556_v0 }
 0x14d   : > { %1048 = vmatmul.mubr.f32.gmra.mrb[94].mxu0 %v567_v11  ;;  %3037 = vmatmul.mubr.f32.gmra.mrb[94].mxu1 %v557_v1 }
 0x14e   : > { %1053 = vmatprep.mubr.f32.mxu0 %v3517_v59  ;;  %3039 = vmatprep.mubr.f32.mxu1 %v558_v2 }
 0x151   : > { %1054 = vmatmul.mubr.f32.gmra.mrb[96].mxu0 %v568_v12  ;;  %3040 = vmatmul.mubr.f32.gmra.mrb[96].mxu1 %v559_v3 }
 0x152   : > { %1059 = vmatprep.mubr.f32.mxu0 %v3517_v59  ;;  %3042 = vmatprep.mubr.f32.mxu1 %v560_v4 }
 0x155   : > { %1060 = vmatmul.mubr.f32.gmra.mrb[98].mxu0 %v569_v13  ;;  %3043 = vmatmul.mubr.f32.gmra.mrb[98].mxu1 %v561_v5 }
 0x156   : > { %1065 = vmatprep.mubr.f32.mxu0 %v3517_v59  ;;  %3045 = vmatprep.mubr.f32.mxu1 %v562_v6 }
 0x159   : > { %1066 = vmatmul.mubr.f32.gmra.mrb[100].mxu0 %v570_v15  ;;  %3046 = vmatmul.mubr.f32.gmra.mrb[100].mxu1 %v563_v7  ;;  %v579_v7 = vld [vmem:[%s5662_s5 + $0x1d8] sm:$0xff] }
 0x15a   : > { %1071 = vmatprep.mubr.f32.mxu0 %v3517_v59  ;;  %3048 = vmatprep.mubr.f32.mxu1 %v564_v8  ;;  %v580_v8 = vld [vmem:[%s5662_s5 + $0x1e0] sm:$0xff] }
 0x15d   : > { %1072 = vmatmul.mubr.f32.gmra.mrb[102].mxu0 %v571_v17  ;;  %3049 = vmatmul.mubr.f32.gmra.mrb[102].mxu1 %v565_v9 }
 0x15e   : > { %1077 = vmatprep.mubr.f32.mxu0 %v3517_v59  ;;  %3051 = vmatprep.mubr.f32.mxu1 %v566_v10 }
 0x161   : > { %1078 = vmatmul.mubr.f32.gmra.mrb[104].mxu0 %v572_v19  ;;  %3052 = vmatmul.mubr.f32.gmra.mrb[104].mxu1 %v567_v11 }
 0x162   : > { %1083 = vmatprep.mubr.f32.mxu0 %v3517_v59  ;;  %3054 = vmatprep.mubr.f32.mxu1 %v568_v12 }
 0x164   : > { %v767_v25 = vpop.f32.mrb[0].mxu0  ;;  %v1289_v26 = vpop.f32.mrb[0].mxu1 }
 0x165   : > { %v768_v27 = vadd.f32 %v767_v25, %v4875_v22  ;;  %v1290_v28 = vadd.f32 %v1289_v26, %v4875_v22  ;;  %v769_v29 = vpop.f32.mrb[1].mxu0  ;;  %1084 = vmatmul.mubr.f32.gmra.mrb[106].mxu0 %v573_v24  ;;  %v1291_v30 = vpop.f32.mrb[1].mxu1  ;;  %3055 = vmatmul.mubr.f32.gmra.mrb[106].mxu1 %v569_v13 }
 0x166   : > { %v770_v31 = vadd.f32 %v769_v29, %v4881_v23  ;;  %v1292_v32 = vadd.f32 %v1291_v30, %v4881_v23  ;;  %1089 = vmatprep.mubr.f32.mxu0 %v3517_v59  ;;  %3057 = vmatprep.mubr.f32.mxu1 %v570_v15 }
 0x167   : > { %2107 = vst [vmem:[#allocation2] sm:$0xff] %v768_v27  ;;  %2368 = vst [vmem:[#allocation2 + $0x828] sm:$0xff] %v1290_v28 }
 0x168   : > { %2108 = vst [vmem:[#allocation2 + $0x8] sm:$0xff] %v770_v31  ;;  %2369 = vst [vmem:[#allocation2 + $0x830] sm:$0xff] %v1292_v32  ;;  %v773_v34 = vpop.f32.mrb[2].mxu0  ;;  %v1295_v35 = vpop.f32.mrb[2].mxu1 }
 0x169   : > { %v774_v36 = vadd.f32 %v773_v34, %v4875_v22  ;;  %v1296_v37 = vadd.f32 %v1295_v35, %v4875_v22  ;;  %v775_v38 = vpop.f32.mrb[3].mxu0  ;;  %1090 = vmatmul.mubr.f32.gmra.mrb[108].mxu0 %v574_v33  ;;  %v1297_v39 = vpop.f32.mrb[3].mxu1  ;;  %3058 = vmatmul.mubr.f32.gmra.mrb[108].mxu1 %v571_v17  ;;  %v4956_v34 = vld [vmem:[%s5662_s5 + $0x200] sm:$0xff] }
 0x16a   : > { %v776_v40 = vadd.f32 %v775_v38, %v4881_v23  ;;  %v1298_v41 = vadd.f32 %v1297_v39, %v4881_v23  ;;  %1095 = vmatprep.mubr.f32.mxu0 %v3517_v59  ;;  %3060 = vmatprep.mubr.f32.mxu1 %v572_v19  ;;  %v581_v19 = vld [vmem:[%s5662_s5 + $0x1e8] sm:$0xff] }
 0x16b   : > { %2110 = vst [vmem:[#allocation2 + $0x18] sm:$0xff] %v774_v36  ;;  %2371 = vst [vmem:[#allocation2 + $0x840] sm:$0xff] %v1296_v37 }
 0x16c   : > { %2111 = vst [vmem:[#allocation2 + $0x20] sm:$0xff] %v776_v40  ;;  %2372 = vst [vmem:[#allocation2 + $0x848] sm:$0xff] %v1298_v41  ;;  %v779_v44 = vpop.f32.mrb[4].mxu0  ;;  %v1301_v45 = vpop.f32.mrb[4].mxu1 }
 0x16d   : > { %v780_v46 = vadd.f32 %v779_v44, %v4875_v22  ;;  %v1302_v48 = vadd.f32 %v1301_v45, %v4875_v22  ;;  %v781_v49 = vpop.f32.mrb[5].mxu0  ;;  %1096 = vmatmul.mubr.f32.gmra.mrb[110].mxu0 %v575_v43  ;;  %v1303_v50 = vpop.f32.mrb[5].mxu1  ;;  %3061 = vmatmul.mubr.f32.gmra.mrb[110].mxu1 %v573_v24  ;;  %v582_v24 = vld [vmem:[%s5662_s5 + $0x1f0] sm:$0xff]  ;;  %v4968_v44 = vld [vmem:[%s5662_s5 + $0x208] sm:$0xff] }
 0x16e   : > { %v782_v51 = vadd.f32 %v781_v49, %v4881_v23  ;;  %v1304_v53 = vadd.f32 %v1303_v50, %v4881_v23  ;;  %1101 = vmatprep.mubr.f32.mxu0 %v3517_v59  ;;  %3063 = vmatprep.mubr.f32.mxu1 %v574_v33  ;;  %v4951_v33 = vld [vmem:[%s5662_s5 + $0x1f8] sm:$0xff]  ;;  %v4973_v45 = vld [vmem:[%s5662_s5 + $0x210] sm:$0xff] }
 0x16f   : > { %2113 = vst [vmem:[#allocation2 + $0x30] sm:$0xff] %v780_v46  ;;  %2374 = vst [vmem:[#allocation2 + $0x858] sm:$0xff] %v1302_v48 }
 0x170   : > { %2114 = vst [vmem:[#allocation2 + $0x38] sm:$0xff] %v782_v51  ;;  %2375 = vst [vmem:[#allocation2 + $0x860] sm:$0xff] %v1304_v53  ;;  %v785_v55 = vpop.f32.mrb[6].mxu0  ;;  %v1307_v56 = vpop.f32.mrb[6].mxu1 }
 0x171   : > { %v786_v58 = vadd.f32 %v785_v55, %v4875_v22  ;;  %v1308_v60 = vadd.f32 %v1307_v56, %v4875_v22  ;;  %v787_v61 = vpop.f32.mrb[7].mxu0  ;;  %1102 = vmatmul.mubr.f32.gmra.mrb[112].mxu0 %v576_v54  ;;  %v1309_v62 = vpop.f32.mrb[7].mxu1  ;;  %3064 = vmatmul.mubr.f32.gmra.mrb[112].mxu1 %v575_v43  ;;  %v4985_v56 = vld [vmem:[%s5662_s5 + $0x218] sm:$0xff] }
 0x172   : > { %v788_v42 = vadd.f32 %v787_v61, %v4881_v23  ;;  %v1310_v47 = vadd.f32 %v1309_v62, %v4881_v23  ;;  %1107 = vmatprep.mubr.f32.mxu0 %v3517_v59  ;;  %3066 = vmatprep.mubr.f32.mxu1 %v576_v54 }
 0x173   : > { %2116 = vst [vmem:[#allocation2 + $0x48] sm:$0xff] %v786_v58  ;;  %2377 = vst [vmem:[#allocation2 + $0x870] sm:$0xff] %v1308_v60  ;;  %v4990_v58 = vld [vmem:[%s5662_s5 + $0x220] sm:$0xff] }
 0x174   : > { %2117 = vst [vmem:[#allocation2 + $0x50] sm:$0xff] %v788_v42  ;;  %2378 = vst [vmem:[#allocation2 + $0x878] sm:$0xff] %v1310_v47  ;;  %v791_v63 = vpop.f32.mrb[8].mxu0  ;;  %v1313_v0 = vpop.f32.mrb[8].mxu1 }
 0x175   : > { %v792_v1 = vadd.f32 %v791_v63, %v4875_v22  ;;  %v1314_v2 = vadd.f32 %v1313_v0, %v4875_v22  ;;  %v793_v3 = vpop.f32.mrb[9].mxu0  ;;  %1108 = vmatmul.mubr.f32.gmra.mrb[114].mxu0 %v577_v52  ;;  %v1315_v4 = vpop.f32.mrb[9].mxu1  ;;  %3067 = vmatmul.mubr.f32.gmra.mrb[114].mxu1 %v577_v52  ;;  %v5002_v0 = vld [vmem:[%s5662_s5 + $0x228] sm:$0xff] }
 0x176   : > { %v794_v5 = vadd.f32 %v793_v3, %v4881_v23  ;;  %v1316_v6 = vadd.f32 %v1315_v4, %v4881_v23  ;;  %1113 = vmatprep.mubr.f32.mxu0 %v3517_v59  ;;  %3069 = vmatprep.mubr.f32.mxu1 %v578_v57 }
 0x177   : > { %2119 = vst [vmem:[#allocation2 + $0x60] sm:$0xff] %v792_v1  ;;  %2380 = vst [vmem:[#allocation2 + $0x888] sm:$0xff] %v1314_v2  ;;  %v5007_v1 = vld [vmem:[%s5662_s5 + $0x230] sm:$0xff] }
 0x178   : > { %2120 = vst [vmem:[#allocation2 + $0x68] sm:$0xff] %v794_v5  ;;  %2381 = vst [vmem:[#allocation2 + $0x890] sm:$0xff] %v1316_v6  ;;  %v797_v9 = vpop.f32.mrb[10].mxu0  ;;  %v1319_v10 = vpop.f32.mrb[10].mxu1 }
 0x179   : > { %v798_v11 = vadd.f32 %v797_v9, %v4875_v22  ;;  %v1320_v12 = vadd.f32 %v1319_v10, %v4875_v22  ;;  %v799_v13 = vpop.f32.mrb[11].mxu0  ;;  %1114 = vmatmul.mubr.f32.gmra.mrb[116].mxu0 %v578_v57  ;;  %v1321_v14 = vpop.f32.mrb[11].mxu1  ;;  %3070 = vmatmul.mubr.f32.gmra.mrb[116].mxu1 %v579_v7  ;;  %v5020_v10 = vld [vmem:[%s5662_s5 + $0x238] sm:$0xff] }
 0x17a   : > { %v800_v15 = vadd.f32 %v799_v13, %v4881_v23  ;;  %v1322_v17 = vadd.f32 %v1321_v14, %v4881_v23  ;;  %1119 = vmatprep.mubr.f32.mxu0 %v3517_v59  ;;  %3072 = vmatprep.mubr.f32.mxu1 %v580_v8 }
 0x17b   : > { %2122 = vst [vmem:[#allocation2 + $0x78] sm:$0xff] %v798_v11  ;;  %2383 = vst [vmem:[#allocation2 + $0x8a0] sm:$0xff] %v1320_v12  ;;  %v5025_v11 = vld [vmem:[%s5662_s5 + $0x240] sm:$0xff] }
 0x17c   : > { %2123 = vst [vmem:[#allocation2 + $0x80] sm:$0xff] %v800_v15  ;;  %2384 = vst [vmem:[#allocation2 + $0x8a8] sm:$0xff] %v1322_v17  ;;  %v803_v25 = vpop.f32.mrb[12].mxu0  ;;  %v1325_v26 = vpop.f32.mrb[12].mxu1 }
 0x17d   : > { %v804_v27 = vadd.f32 %v803_v25, %v4875_v22  ;;  %v1326_v28 = vadd.f32 %v1325_v26, %v4875_v22  ;;  %v805_v29 = vpop.f32.mrb[13].mxu0  ;;  %1120 = vmatmul.mubr.f32.gmra.mrb[118].mxu0 %v579_v7  ;;  %v1327_v30 = vpop.f32.mrb[13].mxu1  ;;  %3073 = vmatmul.mubr.f32.gmra.mrb[118].mxu1 %v581_v19  ;;  %v5038_v26 = vld [vmem:[%s5662_s5 + $0x248] sm:$0xff] }
 0x17e   : > { %v806_v31 = vadd.f32 %v805_v29, %v4881_v23  ;;  %v1328_v32 = vadd.f32 %v1327_v30, %v4881_v23  ;;  %1125 = vmatprep.mubr.f32.mxu0 %v3517_v59  ;;  %3075 = vmatprep.mubr.f32.mxu1 %v582_v24 }
 0x17f   : > { %2125 = vst [vmem:[#allocation2 + $0x90] sm:$0xff] %v804_v27  ;;  %2386 = vst [vmem:[#allocation2 + $0x8b8] sm:$0xff] %v1326_v28  ;;  %v5043_v27 = vld [vmem:[%s5662_s5 + $0x250] sm:$0xff] }
 0x180   : > { %2126 = vst [vmem:[#allocation2 + $0x98] sm:$0xff] %v806_v31  ;;  %2387 = vst [vmem:[#allocation2 + $0x8c0] sm:$0xff] %v1328_v32  ;;  %v809_v35 = vpop.f32.mrb[14].mxu0  ;;  %v1331_v36 = vpop.f32.mrb[14].mxu1 }
 0x181   : > { %v810_v37 = vadd.f32 %v809_v35, %v4875_v22  ;;  %v1332_v38 = vadd.f32 %v1331_v36, %v4875_v22  ;;  %v811_v39 = vpop.f32.mrb[15].mxu0  ;;  %1126 = vmatmul.mubr.f32.gmra.mrb[120].mxu0 %v580_v8  ;;  %v1333_v40 = vpop.f32.mrb[15].mxu1  ;;  %3076 = vmatmul.mubr.f32.gmra.mrb[120].mxu1 %v4951_v33  ;;  %v5056_v36 = vld [vmem:[%s5662_s5 + $0x258] sm:$0xff] }
 0x182   : > { %v812_v41 = vadd.f32 %v811_v39, %v4881_v23  ;;  %v1334_v43 = vadd.f32 %v1333_v40, %v4881_v23  ;;  %1131 = vmatprep.mubr.f32.mxu0 %v3517_v59  ;;  %3078 = vmatprep.mubr.f32.mxu1 %v4956_v34 }
 0x183   : > { %2128 = vst [vmem:[#allocation2 + $0xa8] sm:$0xff] %v810_v37  ;;  %2389 = vst [vmem:[#allocation2 + $0x8d0] sm:$0xff] %v1332_v38  ;;  %v5061_v37 = vld [vmem:[%s5662_s5 + $0x260] sm:$0xff] }
 0x184   : > { %2129 = vst [vmem:[#allocation2 + $0xb0] sm:$0xff] %v812_v41  ;;  %2390 = vst [vmem:[#allocation2 + $0x8d8] sm:$0xff] %v1334_v43  ;;  %v815_v46 = vpop.f32.mrb[16].mxu0  ;;  %v1337_v48 = vpop.f32.mrb[16].mxu1 }
 0x185   : > { %v816_v49 = vadd.f32 %v815_v46, %v4875_v22  ;;  %v1338_v50 = vadd.f32 %v1337_v48, %v4875_v22  ;;  %v817_v51 = vpop.f32.mrb[17].mxu0  ;;  %1132 = vmatmul.mubr.f32.gmra.mrb[122].mxu0 %v581_v19  ;;  %v1339_v53 = vpop.f32.mrb[17].mxu1  ;;  %3079 = vmatmul.mubr.f32.gmra.mrb[122].mxu1 %v4968_v44 }
 0x186   : > { %v818_v54 = vadd.f32 %v817_v51, %v4881_v23  ;;  %v1340_v55 = vadd.f32 %v1339_v53, %v4881_v23  ;;  %1137 = vmatprep.mubr.f32.mxu0 %v3517_v59  ;;  %3081 = vmatprep.mubr.f32.mxu1 %v4973_v45 }
 0x187   : > { %2131 = vst [vmem:[#allocation2 + $0xc0] sm:$0xff] %v816_v49  ;;  %2392 = vst [vmem:[#allocation2 + $0x8e8] sm:$0xff] %v1338_v50  ;;  %v5074_v49 = vld [vmem:[%s5662_s5 + $0x268] sm:$0xff] }
 0x188   : > { %2132 = vst [vmem:[#allocation2 + $0xc8] sm:$0xff] %v818_v54  ;;  %2393 = vst [vmem:[#allocation2 + $0x8f0] sm:$0xff] %v1340_v55  ;;  %v821_v60 = vpop.f32.mrb[18].mxu0  ;;  %v1343_v61 = vpop.f32.mrb[18].mxu1 }
 0x189   : > { %v822_v62 = vadd.f32 %v821_v60, %v4875_v22  ;;  %v1344_v42 = vadd.f32 %v1343_v61, %v4875_v22  ;;  %v823_v47 = vpop.f32.mrb[19].mxu0  ;;  %1138 = vmatmul.mubr.f32.gmra.mrb[124].mxu0 %v582_v24  ;;  %v1345_v52 = vpop.f32.mrb[19].mxu1  ;;  %3082 = vmatmul.mubr.f32.gmra.mrb[124].mxu1 %v4985_v56 }
 0x18a   : > { %v824_v57 = vadd.f32 %v823_v47, %v4881_v23  ;;  %v1346_v63 = vadd.f32 %v1345_v52, %v4881_v23  ;;  %1143 = vmatprep.mubr.f32.mxu0 %v3517_v59  ;;  %3084 = vmatprep.mubr.f32.mxu1 %v4990_v58 }
 0x18b   : > { %2134 = vst [vmem:[#allocation2 + $0xd8] sm:$0xff] %v822_v62  ;;  %2395 = vst [vmem:[#allocation2 + $0x900] sm:$0xff] %v1344_v42  ;;  %v5092_v42 = vld [vmem:[%s5662_s5 + $0x278] sm:$0xff] }
 0x18c   : > { %2135 = vst [vmem:[#allocation2 + $0xe0] sm:$0xff] %v824_v57  ;;  %2396 = vst [vmem:[#allocation2 + $0x908] sm:$0xff] %v1346_v63  ;;  %v827_v2 = vpop.f32.mrb[20].mxu0  ;;  %v1349_v3 = vpop.f32.mrb[20].mxu1 }
 0x18d   : > { %v828_v4 = vadd.f32 %v827_v2, %v4875_v22  ;;  %v1350_v5 = vadd.f32 %v1349_v3, %v4875_v22  ;;  %v829_v6 = vpop.f32.mrb[21].mxu0  ;;  %1144 = vmatmul.mubr.f32.gmra.mrb[126].mxu0 %v4951_v33  ;;  %v1351_v7 = vpop.f32.mrb[21].mxu1  ;;  %3085 = vmatmul.mubr.f32.gmra.mrb[126].mxu1 %v5002_v0 }
 0x18e   : > { %v830_v8 = vadd.f32 %v829_v6, %v4881_v23  ;;  %v1352_v9 = vadd.f32 %v1351_v7, %v4881_v23  ;;  %1149 = vmatprep.mubr.f32.mxu0 %v3517_v59  ;;  %3087 = vmatprep.mubr.f32.mxu1 %v5007_v1  ;;  %v5110_v6 = vld [vmem:[%s5662_s5 + $0x288] sm:$0xff] }
 0x18f   : > { %2137 = vst [vmem:[#allocation2 + $0xf0] sm:$0xff] %v828_v4  ;;  %2398 = vst [vmem:[#allocation2 + $0x918] sm:$0xff] %v1350_v5 }
 0x190   : > { %2138 = vst [vmem:[#allocation2 + $0xf8] sm:$0xff] %v830_v8  ;;  %2399 = vst [vmem:[#allocation2 + $0x920] sm:$0xff] %v1352_v9  ;;  %v833_v12 = vpop.f32.mrb[22].mxu0  ;;  %v1355_v13 = vpop.f32.mrb[22].mxu1 }
 0x191   : > { %v834_v14 = vadd.f32 %v833_v12, %v4875_v22  ;;  %v1356_v15 = vadd.f32 %v1355_v13, %v4875_v22  ;;  %v835_v17 = vpop.f32.mrb[23].mxu0  ;;  %1150 = vmatmul.mubr.f32.gmra.mrb[128].mxu0 %v4956_v34  ;;  %v1357_v19 = vpop.f32.mrb[23].mxu1  ;;  %3088 = vmatmul.mubr.f32.gmra.mrb[128].mxu1 %v5020_v10 }
 0x192   : > { %v836_v24 = vadd.f32 %v835_v17, %v4881_v23  ;;  %v1358_v25 = vadd.f32 %v1357_v19, %v4881_v23  ;;  %1155 = vmatprep.mubr.f32.mxu0 %v3517_v59  ;;  %3090 = vmatprep.mubr.f32.mxu1 %v5025_v11  ;;  %v5128_v19 = vld [vmem:[%s5662_s5 + $0x298] sm:$0xff] }
 0x193   : > { %2140 = vst [vmem:[#allocation2 + $0x108] sm:$0xff] %v834_v14  ;;  %2401 = vst [vmem:[#allocation2 + $0x930] sm:$0xff] %v1356_v15 }
 0x194   : > { %2141 = vst [vmem:[#allocation2 + $0x110] sm:$0xff] %v836_v24  ;;  %2402 = vst [vmem:[#allocation2 + $0x938] sm:$0xff] %v1358_v25  ;;  %v839_v28 = vpop.f32.mrb[24].mxu0  ;;  %v1361_v29 = vpop.f32.mrb[24].mxu1 }
 0x195   : > { %v840_v30 = vadd.f32 %v839_v28, %v4875_v22  ;;  %v1362_v31 = vadd.f32 %v1361_v29, %v4875_v22  ;;  %v841_v32 = vpop.f32.mrb[25].mxu0  ;;  %1156 = vmatmul.mubr.f32.gmra.mrb[130].mxu0 %v4968_v44  ;;  %v1363_v33 = vpop.f32.mrb[25].mxu1  ;;  %3091 = vmatmul.mubr.f32.gmra.mrb[130].mxu1 %v5038_v26 }
 0x196   : > { %v842_v34 = vadd.f32 %v841_v32, %v4881_v23  ;;  %v1364_v35 = vadd.f32 %v1363_v33, %v4881_v23  ;;  %1161 = vmatprep.mubr.f32.mxu0 %v3517_v59  ;;  %3093 = vmatprep.mubr.f32.mxu1 %v5043_v27 }
 0x197   : > { %2143 = vst [vmem:[#allocation2 + $0x120] sm:$0xff] %v840_v30  ;;  %2404 = vst [vmem:[#allocation2 + $0x948] sm:$0xff] %v1362_v31 }
 0x198   : > { %2144 = vst [vmem:[#allocation2 + $0x128] sm:$0xff] %v842_v34  ;;  %2405 = vst [vmem:[#allocation2 + $0x950] sm:$0xff] %v1364_v35  ;;  %v845_v38 = vpop.f32.mrb[26].mxu0  ;;  %v1367_v39 = vpop.f32.mrb[26].mxu1  ;;  %v5146_v34 = vld [vmem:[%s5662_s5 + $0x2a8] sm:$0xff] }
 0x199   : > { %v846_v40 = vadd.f32 %v845_v38, %v4875_v22  ;;  %v1368_v41 = vadd.f32 %v1367_v39, %v4875_v22  ;;  %v847_v43 = vpop.f32.mrb[27].mxu0  ;;  %1162 = vmatmul.mubr.f32.gmra.mrb[132].mxu0 %v4973_v45  ;;  %v1369_v44 = vpop.f32.mrb[27].mxu1  ;;  %3094 = vmatmul.mubr.f32.gmra.mrb[132].mxu1 %v5056_v36  ;;  %v5079_v45 = vld [vmem:[%s5662_s5 + $0x270] sm:$0xff] }
 0x19a   : > { %v848_v46 = vadd.f32 %v847_v43, %v4881_v23  ;;  %v1370_v48 = vadd.f32 %v1369_v44, %v4881_v23  ;;  %1167 = vmatprep.mubr.f32.mxu0 %v3517_v59  ;;  %3096 = vmatprep.mubr.f32.mxu1 %v5061_v37 }
 0x19b   : > { %2146 = vst [vmem:[#allocation2 + $0x138] sm:$0xff] %v846_v40  ;;  %2407 = vst [vmem:[#allocation2 + $0x960] sm:$0xff] %v1368_v41 }
 0x19c   : > { %2147 = vst [vmem:[#allocation2 + $0x140] sm:$0xff] %v848_v46  ;;  %2408 = vst [vmem:[#allocation2 + $0x968] sm:$0xff] %v1370_v48  ;;  %v851_v50 = vpop.f32.mrb[28].mxu0  ;;  %v1373_v51 = vpop.f32.mrb[28].mxu1 }
 0x19d   : > { %v852_v53 = vadd.f32 %v851_v50, %v4875_v22  ;;  %v1374_v54 = vadd.f32 %v1373_v51, %v4875_v22  ;;  %v853_v55 = vpop.f32.mrb[29].mxu0  ;;  %1168 = vmatmul.mubr.f32.gmra.mrb[134].mxu0 %v4985_v56  ;;  %v1375_v60 = vpop.f32.mrb[29].mxu1  ;;  %3097 = vmatmul.mubr.f32.gmra.mrb[134].mxu1 %v5074_v49  ;;  %v5097_v56 = vld [vmem:[%s5662_s5 + $0x280] sm:$0xff] }
 0x19e   : > { %v854_v61 = vadd.f32 %v853_v55, %v4881_v23  ;;  %v1376_v62 = vadd.f32 %v1375_v60, %v4881_v23  ;;  %1173 = vmatprep.mubr.f32.mxu0 %v3517_v59  ;;  %3099 = vmatprep.mubr.f32.mxu1 %v5079_v45  ;;  %v3393_v55 = vld [vmem:[%s5662_s5 + $0x2b8] sm:$0xff] }
 0x19f   : > { %2149 = vst [vmem:[#allocation2 + $0x150] sm:$0xff] %v852_v53  ;;  %2410 = vst [vmem:[#allocation2 + $0x978] sm:$0xff] %v1374_v54 }
 0x1a0   : > { %2150 = vst [vmem:[#allocation2 + $0x158] sm:$0xff] %v854_v61  ;;  %2411 = vst [vmem:[#allocation2 + $0x980] sm:$0xff] %v1376_v62  ;;  %v857_v47 = vpop.f32.mrb[30].mxu0  ;;  %v1379_v52 = vpop.f32.mrb[30].mxu1  ;;  %v3394_v62 = vld [vmem:[%s5662_s5 + $0x2c0] sm:$0xff] }
 0x1a1   : > { %v858_v57 = vadd.f32 %v857_v47, %v4875_v22  ;;  %v1380_v63 = vadd.f32 %v1379_v52, %v4875_v22  ;;  %v859_v2 = vpop.f32.mrb[31].mxu0  ;;  %1174 = vmatmul.mubr.f32.gmra.mrb[136].mxu0 %v4990_v58  ;;  %v1381_v3 = vpop.f32.mrb[31].mxu1  ;;  %3100 = vmatmul.mubr.f32.gmra.mrb[136].mxu1 %v5092_v42  ;;  %v5115_v58 = vld [vmem:[%s5662_s5 + $0x290] sm:$0xff] }
 0x1a2   : > { %v860_v4 = vadd.f32 %v859_v2, %v4881_v23  ;;  %v1382_v5 = vadd.f32 %v1381_v3, %v4881_v23  ;;  %1179 = vmatprep.mubr.f32.mxu0 %v3517_v59  ;;  %3102 = vmatprep.mubr.f32.mxu1 %v5097_v56  ;;  %v3395_v3 = vld [vmem:[%s5662_s5 + $0x2c8] sm:$0xff] }
 0x1a3   : > { %2152 = vst [vmem:[#allocation2 + $0x168] sm:$0xff] %v858_v57  ;;  %2413 = vst [vmem:[#allocation2 + $0x990] sm:$0xff] %v1380_v63 }
 0x1a4   : > { %2153 = vst [vmem:[#allocation2 + $0x170] sm:$0xff] %v860_v4  ;;  %2414 = vst [vmem:[#allocation2 + $0x998] sm:$0xff] %v1382_v5  ;;  %v863_v7 = vpop.f32.mrb[32].mxu0  ;;  %v1385_v8 = vpop.f32.mrb[32].mxu1 }
 0x1a5   : > { %v864_v9 = vadd.f32 %v863_v7, %v4875_v22  ;;  %v1386_v12 = vadd.f32 %v1385_v8, %v4875_v22  ;;  %v865_v13 = vpop.f32.mrb[33].mxu0  ;;  %1180 = vmatmul.mubr.f32.gmra.mrb[138].mxu0 %v5002_v0  ;;  %v1387_v14 = vpop.f32.mrb[33].mxu1  ;;  %3103 = vmatmul.mubr.f32.gmra.mrb[138].mxu1 %v5110_v6  ;;  %v5133_v0 = vld [vmem:[%s5662_s5 + $0x2a0] sm:$0xff]  ;;  %v3396_v7 = vld [vmem:[%s5662_s5 + $0x2d0] sm:$0xff] }
 0x1a6   : > { %v866_v15 = vadd.f32 %v865_v13, %v4881_v23  ;;  %v1388_v17 = vadd.f32 %v1387_v14, %v4881_v23  ;;  %1185 = vmatprep.mubr.f32.mxu0 %v3517_v59  ;;  %3105 = vmatprep.mubr.f32.mxu1 %v5115_v58 }
 0x1a7   : > { %2155 = vst [vmem:[#allocation2 + $0x180] sm:$0xff] %v864_v9  ;;  %2416 = vst [vmem:[#allocation2 + $0x9a8] sm:$0xff] %v1386_v12 }
 0x1a8   : > { %2156 = vst [vmem:[#allocation2 + $0x188] sm:$0xff] %v866_v15  ;;  %2417 = vst [vmem:[#allocation2 + $0x9b0] sm:$0xff] %v1388_v17  ;;  %v869_v24 = vpop.f32.mrb[34].mxu0  ;;  %v1391_v25 = vpop.f32.mrb[34].mxu1  ;;  %v3397_v15 = vld [vmem:[%s5662_s5 + $0x2d8] sm:$0xff] }
 0x1a9   : > { %v870_v28 = vadd.f32 %v869_v24, %v4875_v22  ;;  %v1392_v29 = vadd.f32 %v1391_v25, %v4875_v22  ;;  %v871_v30 = vpop.f32.mrb[35].mxu0  ;;  %1186 = vmatmul.mubr.f32.gmra.mrb[140].mxu0 %v5007_v1  ;;  %v1393_v31 = vpop.f32.mrb[35].mxu1  ;;  %3106 = vmatmul.mubr.f32.gmra.mrb[140].mxu1 %v5128_v19  ;;  %v5151_v1 = vld [vmem:[%s5662_s5 + $0x2b0] sm:$0xff]  ;;  %v3398_v25 = vld [vmem:[%s5662_s5 + $0x2e0] sm:$0xff] }
 0x1aa   : > { %v872_v32 = vadd.f32 %v871_v30, %v4881_v23  ;;  %v1394_v33 = vadd.f32 %v1393_v31, %v4881_v23  ;;  %1191 = vmatprep.mubr.f32.mxu0 %v3517_v59  ;;  %3108 = vmatprep.mubr.f32.mxu1 %v5133_v0 }
 0x1ab   : > { %2158 = vst [vmem:[#allocation2 + $0x198] sm:$0xff] %v870_v28  ;;  %2419 = vst [vmem:[#allocation2 + $0x9c0] sm:$0xff] %v1392_v29 }
 0x1ac   : > { %2159 = vst [vmem:[#allocation2 + $0x1a0] sm:$0xff] %v872_v32  ;;  %2420 = vst [vmem:[#allocation2 + $0x9c8] sm:$0xff] %v1394_v33  ;;  %v875_v35 = vpop.f32.mrb[36].mxu0  ;;  %v1397_v38 = vpop.f32.mrb[36].mxu1  ;;  %v3399_v33 = vld [vmem:[%s5662_s5 + $0x2e8] sm:$0xff] }
 0x1ad   : > { %v876_v39 = vadd.f32 %v875_v35, %v4875_v22  ;;  %v1398_v40 = vadd.f32 %v1397_v38, %v4875_v22  ;;  %v877_v41 = vpop.f32.mrb[37].mxu0  ;;  %1192 = vmatmul.mubr.f32.gmra.mrb[142].mxu0 %v5020_v10  ;;  %v1399_v43 = vpop.f32.mrb[37].mxu1  ;;  %3109 = vmatmul.mubr.f32.gmra.mrb[142].mxu1 %v5146_v34 }
 0x1ae   : > { %v878_v44 = vadd.f32 %v877_v41, %v4881_v23  ;;  %v1400_v46 = vadd.f32 %v1399_v43, %v4881_v23  ;;  %1197 = vmatprep.mubr.f32.mxu0 %v3517_v59  ;;  %3111 = vmatprep.mubr.f32.mxu1 %v5151_v1 }
 0x1af   : > { %2161 = vst [vmem:[#allocation2 + $0x1b0] sm:$0xff] %v876_v39  ;;  %2422 = vst [vmem:[#allocation2 + $0x9d8] sm:$0xff] %v1398_v40  ;;  %v3400_v39 = vld [vmem:[%s5662_s5 + $0x2f0] sm:$0xff] }
 0x1b0   : > { %2162 = vst [vmem:[#allocation2 + $0x1b8] sm:$0xff] %v878_v44  ;;  %2423 = vst [vmem:[#allocation2 + $0x9e0] sm:$0xff] %v1400_v46  ;;  %v881_v48 = vpop.f32.mrb[38].mxu0  ;;  %v1403_v50 = vpop.f32.mrb[38].mxu1 }
 0x1b1   : > { %v882_v51 = vadd.f32 %v881_v48, %v4875_v22  ;;  %v1404_v10 = vadd.f32 %v1403_v50, %v4875_v22  ;;  %v883_v53 = vpop.f32.mrb[39].mxu0  ;;  %1198 = vmatmul.mubr.f32.gmra.mrb[144].mxu0 %v5025_v11  ;;  %v1405_v54 = vpop.f32.mrb[39].mxu1  ;;  %3112 = vmatmul.mubr.f32.gmra.mrb[144].mxu1 %v3393_v55  ;;  %v3401_v48 = vld [vmem:[%s5662_s5 + $0x2f8] sm:$0xff] }
 0x1b2   : > { %v884_v60 = vadd.f32 %v883_v53, %v4881_v23  ;;  %v1406_v61 = vadd.f32 %v1405_v54, %v4881_v23  ;;  %1203 = vmatprep.mubr.f32.mxu0 %v3517_v59  ;;  %3114 = vmatprep.mubr.f32.mxu1 %v3394_v62  ;;  %v3403_v62 = vld [vmem:[%s5662_s5 + $0x308] sm:$0xff] }
 0x1b3   : > { %2164 = vst [vmem:[#allocation2 + $0x1c8] sm:$0xff] %v882_v51  ;;  %2425 = vst [vmem:[#allocation2 + $0x9f0] sm:$0xff] %v1404_v10  ;;  %v3402_v10 = vld [vmem:[%s5662_s5 + $0x300] sm:$0xff] }
 0x1b4   : > { %2165 = vst [vmem:[#allocation2 + $0x1d0] sm:$0xff] %v884_v60  ;;  %2426 = vst [vmem:[#allocation2 + $0x9f8] sm:$0xff] %v1406_v61  ;;  %v887_v11 = vpop.f32.mrb[40].mxu0  ;;  %v1409_v47 = vpop.f32.mrb[40].mxu1 }
 0x1b5   : > { %v888_v52 = vadd.f32 %v887_v11, %v4875_v22  ;;  %v1410_v57 = vadd.f32 %v1409_v47, %v4875_v22  ;;  %v889_v63 = vpop.f32.mrb[41].mxu0  ;;  %1204 = vmatmul.mubr.f32.gmra.mrb[146].mxu0 %v5038_v26  ;;  %v1411_v2 = vpop.f32.mrb[41].mxu1  ;;  %3115 = vmatmul.mubr.f32.gmra.mrb[146].mxu1 %v3395_v3 }
 0x1b6   : > { %v890_v4 = vadd.f32 %v889_v63, %v4881_v23  ;;  %v1412_v5 = vadd.f32 %v1411_v2, %v4881_v23  ;;  %1209 = vmatprep.mubr.f32.mxu0 %v3517_v59  ;;  %3117 = vmatprep.mubr.f32.mxu1 %v3396_v7 }
 0x1b7   : > { %2167 = vst [vmem:[#allocation2 + $0x1e0] sm:$0xff] %v888_v52  ;;  %2428 = vst [vmem:[#allocation2 + $0xa08] sm:$0xff] %v1410_v57  ;;  %v3404_v52 = vld [vmem:[%s5662_s5 + $0x310] sm:$0xff] }
 0x1b8   : > { %2168 = vst [vmem:[#allocation2 + $0x1e8] sm:$0xff] %v890_v4  ;;  %2429 = vst [vmem:[#allocation2 + $0xa10] sm:$0xff] %v1412_v5  ;;  %v893_v26 = vpop.f32.mrb[42].mxu0  ;;  %v1415_v8 = vpop.f32.mrb[42].mxu1  ;;  %v3405_v5 = vld [vmem:[%s5662_s5 + $0x318] sm:$0xff] }
 0x1b9   : > { %v894_v9 = vadd.f32 %v893_v26, %v4875_v22  ;;  %v1416_v12 = vadd.f32 %v1415_v8, %v4875_v22  ;;  %v895_v13 = vpop.f32.mrb[43].mxu0  ;;  %1210 = vmatmul.mubr.f32.gmra.mrb[148].mxu0 %v5043_v27  ;;  %v1417_v14 = vpop.f32.mrb[43].mxu1  ;;  %3118 = vmatmul.mubr.f32.gmra.mrb[148].mxu1 %v3397_v15  ;;  %v3406_v8 = vld [vmem:[%s5662_s5 + $0x320] sm:$0xff] }
 0x1ba   : > { %v896_v17 = vadd.f32 %v895_v13, %v4881_v23  ;;  %v1418_v24 = vadd.f32 %v1417_v14, %v4881_v23  ;;  %1215 = vmatprep.mubr.f32.mxu0 %v3517_v59  ;;  %3120 = vmatprep.mubr.f32.mxu1 %v3398_v25 }
 0x1bb   : > { %2170 = vst [vmem:[#allocation2 + $0x1f8] sm:$0xff] %v894_v9  ;;  %2431 = vst [vmem:[#allocation2 + $0xa20] sm:$0xff] %v1416_v12 }
 0x1bc   : > { %2171 = vst [vmem:[#allocation2 + $0x200] sm:$0xff] %v896_v17  ;;  %2432 = vst [vmem:[#allocation2 + $0xa28] sm:$0xff] %v1418_v24  ;;  %v899_v27 = vpop.f32.mrb[44].mxu0  ;;  %v1421_v28 = vpop.f32.mrb[44].mxu1  ;;  %v3407_v17 = vld [vmem:[%s5662_s5 + $0x328] sm:$0xff] }
 0x1bd   : > { %v900_v29 = vadd.f32 %v899_v27, %v4875_v22  ;;  %v1422_v30 = vadd.f32 %v1421_v28, %v4875_v22  ;;  %v901_v31 = vpop.f32.mrb[45].mxu0  ;;  %1216 = vmatmul.mubr.f32.gmra.mrb[150].mxu0 %v5056_v36  ;;  %v1423_v32 = vpop.f32.mrb[45].mxu1  ;;  %3121 = vmatmul.mubr.f32.gmra.mrb[150].mxu1 %v3399_v33  ;;  %v3408_v27 = vld [vmem:[%s5662_s5 + $0x330] sm:$0xff]  ;;  %v3409_v33 = vld [vmem:[%s5662_s5 + $0x338] sm:$0xff] }
 0x1be   : > { %v902_v35 = vadd.f32 %v901_v31, %v4881_v23  ;;  %v1424_v38 = vadd.f32 %v1423_v32, %v4881_v23  ;;  %1221 = vmatprep.mubr.f32.mxu0 %v3517_v59  ;;  %3123 = vmatprep.mubr.f32.mxu1 %v3400_v39 }
 0x1bf   : > { %2173 = vst [vmem:[#allocation2 + $0x210] sm:$0xff] %v900_v29  ;;  %2434 = vst [vmem:[#allocation2 + $0xa38] sm:$0xff] %v1422_v30 }
 0x1c0   : > { %2174 = vst [vmem:[#allocation2 + $0x218] sm:$0xff] %v902_v35  ;;  %2435 = vst [vmem:[#allocation2 + $0xa40] sm:$0xff] %v1424_v38  ;;  %v905_v36 = vpop.f32.mrb[46].mxu0  ;;  %v1427_v40 = vpop.f32.mrb[46].mxu1  ;;  %v696_v35 = vsub.s32 2, %v4857_v16 }
 0x1c1   : > { %v906_v41 = vadd.f32 %v905_v36, %v4875_v22  ;;  %v1428_v43 = vadd.f32 %v1427_v40, %v4875_v22  ;;  %v907_v44 = vpop.f32.mrb[47].mxu0  ;;  %1222 = vmatmul.mubr.f32.gmra.mrb[152].mxu0 %v5061_v37  ;;  %v1429_v46 = vpop.f32.mrb[47].mxu1  ;;  %3124 = vmatmul.mubr.f32.gmra.mrb[152].mxu1 %v3401_v48  ;;  %v3410_v36 = vld [vmem:[%s5662_s5 + $0x340] sm:$0xff]  ;;  %v3411_v48 = vld [vmem:[%s5662_s5 + $0x348] sm:$0xff] }
 0x1c2   : > { %v908_v50 = vadd.f32 %v907_v44, %v4881_v23  ;;  %v1430_v51 = vadd.f32 %v1429_v46, %v4881_v23  ;;  %1227 = vmatprep.mubr.f32.mxu0 %v3517_v59  ;;  %3126 = vmatprep.mubr.f32.mxu1 %v3402_v10 }
 0x1c3   : > { %2176 = vst [vmem:[#allocation2 + $0x228] sm:$0xff] %v906_v41  ;;  %2437 = vst [vmem:[#allocation2 + $0xa50] sm:$0xff] %v1428_v43 }
 0x1c4   : > { %2177 = vst [vmem:[#allocation2 + $0x230] sm:$0xff] %v908_v50  ;;  %2438 = vst [vmem:[#allocation2 + $0xa58] sm:$0xff] %v1430_v51  ;;  %v911_v37 = vpop.f32.mrb[48].mxu0  ;;  %v1433_v53 = vpop.f32.mrb[48].mxu1  ;;  %v5279_v50 = vrot.slane %v4869_v20, %v696_v35 }
 0x1c5   : > { %v912_v54 = vadd.f32 %v911_v37, %v4875_v22  ;;  %v1434_v55 = vadd.f32 %v1433_v53, %v4875_v22  ;;  %v913_v60 = vpop.f32.mrb[49].mxu0  ;;  %1228 = vmatmul.mubr.f32.gmra.mrb[154].mxu0 %v5074_v49  ;;  %v1435_v61 = vpop.f32.mrb[49].mxu1  ;;  %3127 = vmatmul.mubr.f32.gmra.mrb[154].mxu1 %v3403_v62 }
 0x1c6   : > { %v914_v11 = vadd.f32 %v913_v60, %v4881_v23  ;;  %v1436_v47 = vadd.f32 %v1435_v61, %v4881_v23  ;;  %1233 = vmatprep.mubr.f32.mxu0 %v3517_v59  ;;  %3129 = vmatprep.mubr.f32.mxu1 %v3404_v52  ;;  %v3413_v61 = vld [vmem:[%s5662_s5 + $0x358] sm:$0xff] }
 0x1c7   : > { %2179 = vst [vmem:[#allocation2 + $0x240] sm:$0xff] %v912_v54  ;;  %2440 = vst [vmem:[#allocation2 + $0xa68] sm:$0xff] %v1434_v55 }
 0x1c8   : > { %2180 = vst [vmem:[#allocation2 + $0x248] sm:$0xff] %v914_v11  ;;  %2441 = vst [vmem:[#allocation2 + $0xa70] sm:$0xff] %v1436_v47  ;;  %v917_v49 = vpop.f32.mrb[50].mxu0  ;;  %v1439_v57 = vpop.f32.mrb[50].mxu1  ;;  %v3414_v47 = vld [vmem:[%s5662_s5 + $0x360] sm:$0xff] }
 0x1c9   : > { %v918_v63 = vadd.f32 %v917_v49, %v4875_v22  ;;  %v1440_v2 = vadd.f32 %v1439_v57, %v4875_v22  ;;  %v919_v3 = vpop.f32.mrb[51].mxu0  ;;  %1234 = vmatmul.mubr.f32.gmra.mrb[156].mxu0 %v5079_v45  ;;  %v1441_v4 = vpop.f32.mrb[51].mxu1  ;;  %3130 = vmatmul.mubr.f32.gmra.mrb[156].mxu1 %v3405_v5 }
 0x1ca   : > { %v920_v7 = vadd.f32 %v919_v3, %v4881_v23  ;;  %v1442_v26 = vadd.f32 %v1441_v4, %v4881_v23  ;;  %1239 = vmatprep.mubr.f32.mxu0 %v3517_v59  ;;  %3132 = vmatprep.mubr.f32.mxu1 %v3406_v8  ;;  %v3415_v3 = vld [vmem:[%s5662_s5 + $0x368] sm:$0xff] }
 0x1cb   : > { %2182 = vst [vmem:[#allocation2 + $0x258] sm:$0xff] %v918_v63  ;;  %2443 = vst [vmem:[#allocation2 + $0xa80] sm:$0xff] %v1440_v2 }
 0x1cc   : > { %2183 = vst [vmem:[#allocation2 + $0x260] sm:$0xff] %v920_v7  ;;  %2444 = vst [vmem:[#allocation2 + $0xa88] sm:$0xff] %v1442_v26  ;;  %v923_v45 = vpop.f32.mrb[52].mxu0  ;;  %v1445_v9 = vpop.f32.mrb[52].mxu1  ;;  %v3416_v7 = vld [vmem:[%s5662_s5 + $0x370] sm:$0xff] }
 0x1cd   : > { %v924_v12 = vadd.f32 %v923_v45, %v4875_v22  ;;  %v1446_v13 = vadd.f32 %v1445_v9, %v4875_v22  ;;  %v925_v14 = vpop.f32.mrb[53].mxu0  ;;  %1240 = vmatmul.mubr.f32.gmra.mrb[158].mxu0 %v5092_v42  ;;  %v1447_v15 = vpop.f32.mrb[53].mxu1  ;;  %3133 = vmatmul.mubr.f32.gmra.mrb[158].mxu1 %v3407_v17  ;;  %v3418_v17 = vld [vmem:[%s5662_s5 + $0x380] sm:$0xff] }
 0x1ce   : > { %v926_v24 = vadd.f32 %v925_v14, %v4881_v23  ;;  %v1448_v25 = vadd.f32 %v1447_v15, %v4881_v23  ;;  %1245 = vmatprep.mubr.f32.mxu0 %v3517_v59  ;;  %3135 = vmatprep.mubr.f32.mxu1 %v3408_v27 }
 0x1cf   : > { %2185 = vst [vmem:[#allocation2 + $0x270] sm:$0xff] %v924_v12  ;;  %2446 = vst [vmem:[#allocation2 + $0xa98] sm:$0xff] %v1446_v13  ;;  %v3417_v13 = vld [vmem:[%s5662_s5 + $0x378] sm:$0xff] }
 0x1d0   : > { %2186 = vst [vmem:[#allocation2 + $0x278] sm:$0xff] %v926_v24  ;;  %2447 = vst [vmem:[#allocation2 + $0xaa0] sm:$0xff] %v1448_v25  ;;  %v929_v42 = vpop.f32.mrb[54].mxu0  ;;  %v1451_v28 = vpop.f32.mrb[54].mxu1 }
 0x1d1   : > { %v930_v29 = vadd.f32 %v929_v42, %v4875_v22  ;;  %v1452_v30 = vadd.f32 %v1451_v28, %v4875_v22  ;;  %v931_v31 = vpop.f32.mrb[55].mxu0  ;;  %1246 = vmatmul.mubr.f32.gmra.mrb[160].mxu0 %v5097_v56  ;;  %v1453_v32 = vpop.f32.mrb[55].mxu1  ;;  %3136 = vmatmul.mubr.f32.gmra.mrb[160].mxu1 %v3409_v33 }
 0x1d2   : > { %v932_v38 = vadd.f32 %v931_v31, %v4881_v23  ;;  %v1454_v39 = vadd.f32 %v1453_v32, %v4881_v23  ;;  %1251 = vmatprep.mubr.f32.mxu0 %v3517_v59  ;;  %3138 = vmatprep.mubr.f32.mxu1 %v3410_v36  ;;  %v3420_v32 = vld [vmem:[%s5662_s5 + $0x390] sm:$0xff] }
 0x1d3   : > { %2188 = vst [vmem:[#allocation2 + $0x288] sm:$0xff] %v930_v29  ;;  %2449 = vst [vmem:[#allocation2 + $0xab0] sm:$0xff] %v1452_v30  ;;  %v3419_v29 = vld [vmem:[%s5662_s5 + $0x388] sm:$0xff] }
 0x1d4   : > { %2189 = vst [vmem:[#allocation2 + $0x290] sm:$0xff] %v932_v38  ;;  %2450 = vst [vmem:[#allocation2 + $0xab8] sm:$0xff] %v1454_v39  ;;  %v935_v56 = vpop.f32.mrb[56].mxu0  ;;  %v1457_v40 = vpop.f32.mrb[56].mxu1 }
 0x1d5   : > { %v936_v41 = vadd.f32 %v935_v56, %v4875_v22  ;;  %v1458_v43 = vadd.f32 %v1457_v40, %v4875_v22  ;;  %v937_v44 = vpop.f32.mrb[57].mxu0  ;;  %1252 = vmatmul.mubr.f32.gmra.mrb[162].mxu0 %v5110_v6  ;;  %v1459_v46 = vpop.f32.mrb[57].mxu1  ;;  %3139 = vmatmul.mubr.f32.gmra.mrb[162].mxu1 %v3411_v48  ;;  %v3412_v6 = vld [vmem:[%s5662_s5 + $0x350] sm:$0xff] }
 0x1d6   : > { %v938_v51 = vadd.f32 %v937_v44, %v4881_v23  ;;  %v1460_v10 = vadd.f32 %v1459_v46, %v4881_v23  ;;  %1257 = vmatprep.mubr.f32.mxu0 %v3517_v59  ;;  %3141 = vmatprep.mubr.f32.mxu1 %v3412_v6 }
 0x1d7   : > { %2191 = vst [vmem:[#allocation2 + $0x2a0] sm:$0xff] %v936_v41  ;;  %2452 = vst [vmem:[#allocation2 + $0xac8] sm:$0xff] %v1458_v43 }
 0x1d8   : > { %2192 = vst [vmem:[#allocation2 + $0x2a8] sm:$0xff] %v938_v51  ;;  %2453 = vst [vmem:[#allocation2 + $0xad0] sm:$0xff] %v1460_v10  ;;  %v941_v37 = vpop.f32.mrb[58].mxu0  ;;  %v2984_v53 = vpop.f32.mrb[58].mxu1 }
 0x1d9   : > { %v942_v20 = vadd.f32 %v941_v37, %v4875_v22  ;;  %v1534_v54 = vadd.f32 %v2984_v53, %v5279_v50  ;;  %v943_v55 = vpop.f32.mrb[59].mxu0  ;;  %1258 = vmatmul.mubr.f32.gmra.mrb[164].mxu0 %v5115_v58  ;;  %v1528_v60 = vpop.f32.mrb[59].mxu1  ;;  %3142 = vmatmul.mubr.f32.gmra.mrb[164].mxu1 %v3413_v61 }
 0x1da   : > { %v944_v62 = vadd.f32 %v943_v55, %v4881_v23  ;;  %v1529_v11 = vadd.f32 %v1528_v60, %v5279_v50  ;;  %1263 = vmatprep.mubr.f32.mxu0 %v3517_v59  ;;  %3144 = vmatprep.mubr.f32.mxu1 %v3414_v47 }
 0x1db   : > { %2194 = vst [vmem:[#allocation2 + $0x2b8] sm:$0xff] %v942_v20  ;;  %2112 = vst [vmem:[#allocation2 + $0x28] sm:$0xff] %v1534_v54 }
 0x1dc   : > { %2195 = vst [vmem:[#allocation2 + $0x2c0] sm:$0xff] %v944_v62  ;;  %2109 = vst [vmem:[#allocation2 + $0x10] sm:$0xff] %v1529_v11  ;;  %v947_v58 = vpop.f32.mrb[60].mxu0  ;;  %v2987_v52 = vpop.f32.mrb[60].mxu1 }
 0x1dd   : > { %v948_v49 = vadd.f32 %v947_v58, %v4875_v22  ;;  %v1544_v57 = vadd.f32 %v2987_v52, %v5279_v50  ;;  %v949_v63 = vpop.f32.mrb[61].mxu0  ;;  %1264 = vmatmul.mubr.f32.gmra.mrb[166].mxu0 %v5128_v19  ;;  %v1538_v2 = vpop.f32.mrb[61].mxu1  ;;  %3145 = vmatmul.mubr.f32.gmra.mrb[166].mxu1 %v3415_v3 }
 0x1de   : > { %v950_v4 = vadd.f32 %v949_v63, %v4881_v23  ;;  %v1539_v5 = vadd.f32 %v1538_v2, %v5279_v50  ;;  %1269 = vmatprep.mubr.f32.mxu0 %v3517_v59  ;;  %3147 = vmatprep.mubr.f32.mxu1 %v3416_v7 }
 0x1df   : > { %2197 = vst [vmem:[#allocation2 + $0x2d0] sm:$0xff] %v948_v49  ;;  %2118 = vst [vmem:[#allocation2 + $0x58] sm:$0xff] %v1544_v57 }
 0x1e0   : > { %2198 = vst [vmem:[#allocation2 + $0x2d8] sm:$0xff] %v950_v4  ;;  %2115 = vst [vmem:[#allocation2 + $0x40] sm:$0xff] %v1539_v5  ;;  %v953_v19 = vpop.f32.mrb[62].mxu0  ;;  %v2990_v26 = vpop.f32.mrb[62].mxu1 }
 0x1e1   : > { %v954_v8 = vadd.f32 %v953_v19, %v4875_v22  ;;  %v1554_v45 = vadd.f32 %v2990_v26, %v5279_v50  ;;  %v955_v9 = vpop.f32.mrb[63].mxu0  ;;  %1270 = vmatmul.mubr.f32.gmra.mrb[168].mxu0 %v5133_v0  ;;  %v1548_v12 = vpop.f32.mrb[63].mxu1  ;;  %3148 = vmatmul.mubr.f32.gmra.mrb[168].mxu1 %v3417_v13 }
 0x1e2   : > { %v956_v14 = vadd.f32 %v955_v9, %v4881_v23  ;;  %v1549_v15 = vadd.f32 %v1548_v12, %v5279_v50  ;;  %1275 = vmatprep.mubr.f32.mxu0 %v3517_v59  ;;  %3150 = vmatprep.mubr.f32.mxu1 %v3418_v17 }
 0x1e3   : > { %2200 = vst [vmem:[#allocation2 + $0x2e8] sm:$0xff] %v954_v8  ;;  %2124 = vst [vmem:[#allocation2 + $0x88] sm:$0xff] %v1554_v45 }
 0x1e4   : > { %2201 = vst [vmem:[#allocation2 + $0x2f0] sm:$0xff] %v956_v14  ;;  %2121 = vst [vmem:[#allocation2 + $0x70] sm:$0xff] %v1549_v15  ;;  %v959_v0 = vpop.f32.mrb[64].mxu0  ;;  %v2993_v24 = vpop.f32.mrb[64].mxu1 }
 0x1e5   : > { %v960_v25 = vadd.f32 %v959_v0, %v4875_v22  ;;  %v1564_v27 = vadd.f32 %v2993_v24, %v5279_v50  ;;  %v961_v42 = vpop.f32.mrb[65].mxu0  ;;  %1276 = vmatmul.mubr.f32.gmra.mrb[170].mxu0 %v5146_v34  ;;  %v1558_v28 = vpop.f32.mrb[65].mxu1  ;;  %3151 = vmatmul.mubr.f32.gmra.mrb[170].mxu1 %v3419_v29 }
 0x1e6   : > { %v962_v30 = vadd.f32 %v961_v42, %v4881_v23  ;;  %v1559_v31 = vadd.f32 %v1558_v28, %v5279_v50  ;;  %1281 = vmatprep.mubr.f32.mxu0 %v3517_v59  ;;  %3153 = vmatprep.mubr.f32.mxu1 %v3420_v32  ;;  %v3421_v59 = vld [vmem:[%s5662_s5 + $0x398] sm:$0xff] }
 0x1e7   : > { %2203 = vst [vmem:[#allocation2 + $0x300] sm:$0xff] %v960_v25  ;;  %2130 = vst [vmem:[#allocation2 + $0xb8] sm:$0xff] %v1564_v27 }
 0x1e8   : > { %2204 = vst [vmem:[#allocation2 + $0x308] sm:$0xff] %v962_v30  ;;  %2127 = vst [vmem:[#allocation2 + $0xa0] sm:$0xff] %v1559_v31  ;;  %v965_v34 = vpop.f32.mrb[66].mxu0  ;;  %v2996_v33 = vpop.f32.mrb[66].mxu1 }
 0x1e9   : > { %v966_v38 = vadd.f32 %v965_v34, %v4875_v22  ;;  %v1574_v39 = vadd.f32 %v2996_v33, %v5279_v50  ;;  %v967_v36 = vpop.f32.mrb[67].mxu0  ;;  %1282 = vmatmul.mubr.f32.gmra.mrb[172].mxu0 %v5151_v1  ;;  %v1568_v56 = vpop.f32.mrb[67].mxu1  ;;  %3154 = vmatmul.mubr.f32.gmra.mrb[172].mxu1 %v3421_v59 }
 0x1ea   : > { %v968_v40 = vadd.f32 %v967_v36, %v4881_v23  ;;  %v1569_v41 = vadd.f32 %v1568_v56, %v5279_v50 }
 0x1eb   : > { %2206 = vst [vmem:[#allocation2 + $0x318] sm:$0xff] %v966_v38  ;;  %2136 = vst [vmem:[#allocation2 + $0xe8] sm:$0xff] %v1574_v39 }
 0x1ec   : > { %2207 = vst [vmem:[#allocation2 + $0x320] sm:$0xff] %v968_v40  ;;  %2133 = vst [vmem:[#allocation2 + $0xd0] sm:$0xff] %v1569_v41  ;;  %v971_v43 = vpop.f32.mrb[68].mxu0  ;;  %v2999_v44 = vpop.f32.mrb[68].mxu1 }
 0x1ed   : > { %v972_v46 = vadd.f32 %v971_v43, %v4875_v22  ;;  %v1584_v1 = vadd.f32 %v2999_v44, %v5279_v50  ;;  %v973_v48 = vpop.f32.mrb[69].mxu0  ;;  %v1578_v51 = vpop.f32.mrb[69].mxu1 }
 0x1ee   : > { %v974_v10 = vadd.f32 %v973_v48, %v4881_v23  ;;  %v1579_v6 = vadd.f32 %v1578_v51, %v5279_v50 }
 0x1ef   : > { %2209 = vst [vmem:[#allocation2 + $0x330] sm:$0xff] %v972_v46  ;;  %2142 = vst [vmem:[#allocation2 + $0x118] sm:$0xff] %v1584_v1 }
 0x1f0   : > { %2210 = vst [vmem:[#allocation2 + $0x338] sm:$0xff] %v974_v10  ;;  %2139 = vst [vmem:[#allocation2 + $0x100] sm:$0xff] %v1579_v6  ;;  %v977_v37 = vpop.f32.mrb[70].mxu0  ;;  %v3002_v53 = vpop.f32.mrb[70].mxu1 }
 0x1f1   : > { %v978_v20 = vadd.f32 %v977_v37, %v4875_v22  ;;  %v1594_v54 = vadd.f32 %v3002_v53, %v5279_v50  ;;  %v979_v55 = vpop.f32.mrb[71].mxu0  ;;  %v1588_v60 = vpop.f32.mrb[71].mxu1 }
 0x1f2   : > { %v980_v61 = vadd.f32 %v979_v55, %v4881_v23  ;;  %v1589_v62 = vadd.f32 %v1588_v60, %v5279_v50 }
 0x1f3   : > { %2212 = vst [vmem:[#allocation2 + $0x348] sm:$0xff] %v978_v20  ;;  %2148 = vst [vmem:[#allocation2 + $0x148] sm:$0xff] %v1594_v54 }
 0x1f4   : > { %2213 = vst [vmem:[#allocation2 + $0x350] sm:$0xff] %v980_v61  ;;  %2145 = vst [vmem:[#allocation2 + $0x130] sm:$0xff] %v1589_v62  ;;  %v983_v11 = vpop.f32.mrb[72].mxu0  ;;  %v3005_v47 = vpop.f32.mrb[72].mxu1 }
 0x1f5   : > { %v984_v58 = vadd.f32 %v983_v11, %v4875_v22  ;;  %v1604_v52 = vadd.f32 %v3005_v47, %v5279_v50  ;;  %v985_v49 = vpop.f32.mrb[73].mxu0  ;;  %v1598_v57 = vpop.f32.mrb[73].mxu1 }
 0x1f6   : > { %v986_v63 = vadd.f32 %v985_v49, %v4881_v23  ;;  %v1599_v2 = vadd.f32 %v1598_v57, %v5279_v50 }
 0x1f7   : > { %2215 = vst [vmem:[#allocation2 + $0x360] sm:$0xff] %v984_v58  ;;  %2154 = vst [vmem:[#allocation2 + $0x178] sm:$0xff] %v1604_v52 }
 0x1f8   : > { %2216 = vst [vmem:[#allocation2 + $0x368] sm:$0xff] %v986_v63  ;;  %2151 = vst [vmem:[#allocation2 + $0x160] sm:$0xff] %v1599_v2  ;;  %v989_v3 = vpop.f32.mrb[74].mxu0  ;;  %v3008_v4 = vpop.f32.mrb[74].mxu1 }
 0x1f9   : > { %v990_v5 = vadd.f32 %v989_v3, %v4875_v22  ;;  %v1614_v7 = vadd.f32 %v3008_v4, %v5279_v50  ;;  %v991_v19 = vpop.f32.mrb[75].mxu0  ;;  %v1608_v26 = vpop.f32.mrb[75].mxu1 }
 0x1fa   : > { %v992_v8 = vadd.f32 %v991_v19, %v4881_v23  ;;  %v1609_v45 = vadd.f32 %v1608_v26, %v5279_v50 }
 0x1fb   : > { %2218 = vst [vmem:[#allocation2 + $0x378] sm:$0xff] %v990_v5  ;;  %2160 = vst [vmem:[#allocation2 + $0x1a8] sm:$0xff] %v1614_v7 }
 0x1fc   : > { %2219 = vst [vmem:[#allocation2 + $0x380] sm:$0xff] %v992_v8  ;;  %2157 = vst [vmem:[#allocation2 + $0x190] sm:$0xff] %v1609_v45  ;;  %v995_v9 = vpop.f32.mrb[76].mxu0  ;;  %v3011_v12 = vpop.f32.mrb[76].mxu1 }
 0x1fd   : > { %v996_v13 = vadd.f32 %v995_v9, %v4875_v22  ;;  %v1624_v14 = vadd.f32 %v3011_v12, %v5279_v50  ;;  %v997_v15 = vpop.f32.mrb[77].mxu0  ;;  %v1618_v17 = vpop.f32.mrb[77].mxu1 }
 0x1fe   : > { %v998_v0 = vadd.f32 %v997_v15, %v4881_v23  ;;  %v1619_v24 = vadd.f32 %v1618_v17, %v5279_v50 }
 0x1ff   : > { %2221 = vst [vmem:[#allocation2 + $0x390] sm:$0xff] %v996_v13  ;;  %2166 = vst [vmem:[#allocation2 + $0x1d8] sm:$0xff] %v1624_v14 }
 0x200   : > { %2222 = vst [vmem:[#allocation2 + $0x398] sm:$0xff] %v998_v0  ;;  %2163 = vst [vmem:[#allocation2 + $0x1c0] sm:$0xff] %v1619_v24  ;;  %v1001_v25 = vpop.f32.mrb[78].mxu0  ;;  %v3014_v27 = vpop.f32.mrb[78].mxu1 }
 0x201   : > { %v1002_v42 = vadd.f32 %v1001_v25, %v4875_v22  ;;  %v1634_v28 = vadd.f32 %v3014_v27, %v5279_v50  ;;  %v1003_v29 = vpop.f32.mrb[79].mxu0  ;;  %v1628_v30 = vpop.f32.mrb[79].mxu1 }
 0x202   : > { %v1004_v31 = vadd.f32 %v1003_v29, %v4881_v23  ;;  %v1629_v32 = vadd.f32 %v1628_v30, %v5279_v50 }
 0x203   : > { %2224 = vst [vmem:[#allocation2 + $0x3a8] sm:$0xff] %v1002_v42  ;;  %2172 = vst [vmem:[#allocation2 + $0x208] sm:$0xff] %v1634_v28 }
 0x204   : > { %2225 = vst [vmem:[#allocation2 + $0x3b0] sm:$0xff] %v1004_v31  ;;  %2169 = vst [vmem:[#allocation2 + $0x1f0] sm:$0xff] %v1629_v32  ;;  %v1007_v34 = vpop.f32.mrb[80].mxu0  ;;  %v3017_v33 = vpop.f32.mrb[80].mxu1 }
 0x205   : > { %v1008_v38 = vadd.f32 %v1007_v34, %v4875_v22  ;;  %v1644_v39 = vadd.f32 %v3017_v33, %v5279_v50  ;;  %v1009_v36 = vpop.f32.mrb[81].mxu0  ;;  %v1638_v56 = vpop.f32.mrb[81].mxu1 }
 0x206   : > { %v1010_v59 = vadd.f32 %v1009_v36, %v4881_v23  ;;  %v1639_v40 = vadd.f32 %v1638_v56, %v5279_v50 }
 0x207   : > { %2227 = vst [vmem:[#allocation2 + $0x3c0] sm:$0xff] %v1008_v38  ;;  %2178 = vst [vmem:[#allocation2 + $0x238] sm:$0xff] %v1644_v39 }
 0x208   : > { %2228 = vst [vmem:[#allocation2 + $0x3c8] sm:$0xff] %v1010_v59  ;;  %2175 = vst [vmem:[#allocation2 + $0x220] sm:$0xff] %v1639_v40  ;;  %v1013_v41 = vpop.f32.mrb[82].mxu0  ;;  %v3020_v43 = vpop.f32.mrb[82].mxu1 }
 0x209   : > { %v1014_v44 = vadd.f32 %v1013_v41, %v4875_v22  ;;  %v1654_v46 = vadd.f32 %v3020_v43, %v5279_v50  ;;  %v1015_v1 = vpop.f32.mrb[83].mxu0  ;;  %v1648_v48 = vpop.f32.mrb[83].mxu1 }
 0x20a   : > { %v1016_v51 = vadd.f32 %v1015_v1, %v4881_v23  ;;  %v1649_v10 = vadd.f32 %v1648_v48, %v5279_v50 }
 0x20b   : > { %2230 = vst [vmem:[#allocation2 + $0x3d8] sm:$0xff] %v1014_v44  ;;  %2184 = vst [vmem:[#allocation2 + $0x268] sm:$0xff] %v1654_v46 }
 0x20c   : > { %2231 = vst [vmem:[#allocation2 + $0x3e0] sm:$0xff] %v1016_v51  ;;  %2181 = vst [vmem:[#allocation2 + $0x250] sm:$0xff] %v1649_v10  ;;  %v1019_v6 = vpop.f32.mrb[84].mxu0  ;;  %v3023_v37 = vpop.f32.mrb[84].mxu1 }
 0x20d   : > { %v1020_v53 = vadd.f32 %v1019_v6, %v4875_v22  ;;  %v1664_v20 = vadd.f32 %v3023_v37, %v5279_v50  ;;  %v1021_v54 = vpop.f32.mrb[85].mxu0  ;;  %v1658_v55 = vpop.f32.mrb[85].mxu1 }
 0x20e   : > { %v1022_v60 = vadd.f32 %v1021_v54, %v4881_v23  ;;  %v1659_v61 = vadd.f32 %v1658_v55, %v5279_v50 }
 0x20f   : > { %2233 = vst [vmem:[#allocation2 + $0x3f0] sm:$0xff] %v1020_v53  ;;  %2190 = vst [vmem:[#allocation2 + $0x298] sm:$0xff] %v1664_v20 }
 0x210   : > { %2234 = vst [vmem:[#allocation2 + $0x3f8] sm:$0xff] %v1022_v60  ;;  %2187 = vst [vmem:[#allocation2 + $0x280] sm:$0xff] %v1659_v61  ;;  %v1025_v62 = vpop.f32.mrb[86].mxu0  ;;  %v3026_v11 = vpop.f32.mrb[86].mxu1 }
 0x211   : > { %v1026_v47 = vadd.f32 %v1025_v62, %v4875_v22  ;;  %v1674_v58 = vadd.f32 %v3026_v11, %v5279_v50  ;;  %v1027_v52 = vpop.f32.mrb[87].mxu0  ;;  %v1668_v49 = vpop.f32.mrb[87].mxu1 }
 0x212   : > { %v1028_v57 = vadd.f32 %v1027_v52, %v4881_v23  ;;  %v1669_v63 = vadd.f32 %v1668_v49, %v5279_v50 }
 0x213   : > { %2236 = vst [vmem:[#allocation2 + $0x408] sm:$0xff] %v1026_v47  ;;  %2196 = vst [vmem:[#allocation2 + $0x2c8] sm:$0xff] %v1674_v58 }
 0x214   : > { %2237 = vst [vmem:[#allocation2 + $0x410] sm:$0xff] %v1028_v57  ;;  %2193 = vst [vmem:[#allocation2 + $0x2b0] sm:$0xff] %v1669_v63  ;;  %v1031_v2 = vpop.f32.mrb[88].mxu0  ;;  %v3029_v3 = vpop.f32.mrb[88].mxu1 }
 0x215   : > { %v1032_v4 = vadd.f32 %v1031_v2, %v4875_v22  ;;  %v1684_v5 = vadd.f32 %v3029_v3, %v5279_v50  ;;  %v1033_v7 = vpop.f32.mrb[89].mxu0  ;;  %v1678_v19 = vpop.f32.mrb[89].mxu1 }
 0x216   : > { %v1034_v26 = vadd.f32 %v1033_v7, %v4881_v23  ;;  %v1679_v8 = vadd.f32 %v1678_v19, %v5279_v50 }
 0x217   : > { %2239 = vst [vmem:[#allocation2 + $0x420] sm:$0xff] %v1032_v4  ;;  %2202 = vst [vmem:[#allocation2 + $0x2f8] sm:$0xff] %v1684_v5 }
 0x218   : > { %2240 = vst [vmem:[#allocation2 + $0x428] sm:$0xff] %v1034_v26  ;;  %2199 = vst [vmem:[#allocation2 + $0x2e0] sm:$0xff] %v1679_v8  ;;  %v1037_v45 = vpop.f32.mrb[90].mxu0  ;;  %v3032_v9 = vpop.f32.mrb[90].mxu1 }
 0x219   : > { %v1038_v12 = vadd.f32 %v1037_v45, %v4875_v22  ;;  %v1694_v13 = vadd.f32 %v3032_v9, %v5279_v50  ;;  %v1039_v14 = vpop.f32.mrb[91].mxu0  ;;  %v1688_v15 = vpop.f32.mrb[91].mxu1 }
 0x21a   : > { %v1040_v17 = vadd.f32 %v1039_v14, %v4881_v23  ;;  %v1689_v0 = vadd.f32 %v1688_v15, %v5279_v50 }
 0x21b   : > { %2242 = vst [vmem:[#allocation2 + $0x438] sm:$0xff] %v1038_v12  ;;  %2208 = vst [vmem:[#allocation2 + $0x328] sm:$0xff] %v1694_v13 }
 0x21c   : > { %2243 = vst [vmem:[#allocation2 + $0x440] sm:$0xff] %v1040_v17  ;;  %2205 = vst [vmem:[#allocation2 + $0x310] sm:$0xff] %v1689_v0  ;;  %v1043_v24 = vpop.f32.mrb[92].mxu0  ;;  %v3035_v25 = vpop.f32.mrb[92].mxu1 }
 0x21d   : > { %v1044_v27 = vadd.f32 %v1043_v24, %v4875_v22  ;;  %v1704_v42 = vadd.f32 %v3035_v25, %v5279_v50  ;;  %v1045_v28 = vpop.f32.mrb[93].mxu0  ;;  %v1698_v29 = vpop.f32.mrb[93].mxu1 }
 0x21e   : > { %v1046_v30 = vadd.f32 %v1045_v28, %v4881_v23  ;;  %v1699_v31 = vadd.f32 %v1698_v29, %v5279_v50 }
 0x21f   : > { %2245 = vst [vmem:[#allocation2 + $0x450] sm:$0xff] %v1044_v27  ;;  %2214 = vst [vmem:[#allocation2 + $0x358] sm:$0xff] %v1704_v42 }
 0x220   : > { %2246 = vst [vmem:[#allocation2 + $0x458] sm:$0xff] %v1046_v30  ;;  %2211 = vst [vmem:[#allocation2 + $0x340] sm:$0xff] %v1699_v31  ;;  %v1049_v32 = vpop.f32.mrb[94].mxu0  ;;  %v3038_v34 = vpop.f32.mrb[94].mxu1 }
 0x221   : > { %v1050_v33 = vadd.f32 %v1049_v32, %v4875_v22  ;;  %v1714_v38 = vadd.f32 %v3038_v34, %v5279_v50  ;;  %v1051_v39 = vpop.f32.mrb[95].mxu0  ;;  %v1708_v36 = vpop.f32.mrb[95].mxu1 }
 0x222   : > { %v1052_v56 = vadd.f32 %v1051_v39, %v4881_v23  ;;  %v1709_v59 = vadd.f32 %v1708_v36, %v5279_v50 }
 0x223   : > { %2248 = vst [vmem:[#allocation2 + $0x468] sm:$0xff] %v1050_v33  ;;  %2220 = vst [vmem:[#allocation2 + $0x388] sm:$0xff] %v1714_v38 }
 0x224   : > { %2249 = vst [vmem:[#allocation2 + $0x470] sm:$0xff] %v1052_v56  ;;  %2217 = vst [vmem:[#allocation2 + $0x370] sm:$0xff] %v1709_v59  ;;  %v1055_v40 = vpop.f32.mrb[96].mxu0  ;;  %v3041_v41 = vpop.f32.mrb[96].mxu1 }
 0x225   : > { %v1056_v43 = vadd.f32 %v1055_v40, %v4875_v22  ;;  %v1724_v44 = vadd.f32 %v3041_v41, %v5279_v50  ;;  %v1057_v46 = vpop.f32.mrb[97].mxu0  ;;  %v1718_v1 = vpop.f32.mrb[97].mxu1 }
 0x226   : > { %v1058_v48 = vadd.f32 %v1057_v46, %v4881_v23  ;;  %v1719_v51 = vadd.f32 %v1718_v1, %v5279_v50 }
 0x227   : > { %2251 = vst [vmem:[#allocation2 + $0x480] sm:$0xff] %v1056_v43  ;;  %2226 = vst [vmem:[#allocation2 + $0x3b8] sm:$0xff] %v1724_v44 }
 0x228   : > { %2252 = vst [vmem:[#allocation2 + $0x488] sm:$0xff] %v1058_v48  ;;  %2223 = vst [vmem:[#allocation2 + $0x3a0] sm:$0xff] %v1719_v51  ;;  %v1061_v10 = vpop.f32.mrb[98].mxu0  ;;  %v3044_v6 = vpop.f32.mrb[98].mxu1 }
 0x229   : > { %v1062_v37 = vadd.f32 %v1061_v10, %v4875_v22  ;;  %v1734_v53 = vadd.f32 %v3044_v6, %v5279_v50  ;;  %v1063_v20 = vpop.f32.mrb[99].mxu0  ;;  %v1728_v54 = vpop.f32.mrb[99].mxu1 }
 0x22a   : > { %v1064_v55 = vadd.f32 %v1063_v20, %v4881_v23  ;;  %v1729_v60 = vadd.f32 %v1728_v54, %v5279_v50 }
 0x22b   : > { %2254 = vst [vmem:[#allocation2 + $0x498] sm:$0xff] %v1062_v37  ;;  %2232 = vst [vmem:[#allocation2 + $0x3e8] sm:$0xff] %v1734_v53 }
 0x22c   : > { %2255 = vst [vmem:[#allocation2 + $0x4a0] sm:$0xff] %v1064_v55  ;;  %2229 = vst [vmem:[#allocation2 + $0x3d0] sm:$0xff] %v1729_v60  ;;  %v1067_v61 = vpop.f32.mrb[100].mxu0  ;;  %v3047_v62 = vpop.f32.mrb[100].mxu1 }
 0x22d   : > { %v1068_v11 = vadd.f32 %v1067_v61, %v4875_v22  ;;  %v1744_v47 = vadd.f32 %v3047_v62, %v5279_v50  ;;  %v1069_v58 = vpop.f32.mrb[101].mxu0  ;;  %v1738_v52 = vpop.f32.mrb[101].mxu1 }
 0x22e   : > { %v1070_v49 = vadd.f32 %v1069_v58, %v4881_v23  ;;  %v1739_v57 = vadd.f32 %v1738_v52, %v5279_v50 }
 0x22f   : > { %2257 = vst [vmem:[#allocation2 + $0x4b0] sm:$0xff] %v1068_v11  ;;  %2238 = vst [vmem:[#allocation2 + $0x418] sm:$0xff] %v1744_v47 }
 0x230   : > { %2258 = vst [vmem:[#allocation2 + $0x4b8] sm:$0xff] %v1070_v49  ;;  %2235 = vst [vmem:[#allocation2 + $0x400] sm:$0xff] %v1739_v57  ;;  %v1073_v63 = vpop.f32.mrb[102].mxu0  ;;  %v3050_v2 = vpop.f32.mrb[102].mxu1 }
 0x231   : > { %v1074_v3 = vadd.f32 %v1073_v63, %v4875_v22  ;;  %v1754_v4 = vadd.f32 %v3050_v2, %v5279_v50  ;;  %v1075_v5 = vpop.f32.mrb[103].mxu0  ;;  %v1748_v7 = vpop.f32.mrb[103].mxu1 }
 0x232   : > { %v1076_v19 = vadd.f32 %v1075_v5, %v4881_v23  ;;  %v1749_v26 = vadd.f32 %v1748_v7, %v5279_v50 }
 0x233   : > { %2260 = vst [vmem:[#allocation2 + $0x4c8] sm:$0xff] %v1074_v3  ;;  %2244 = vst [vmem:[#allocation2 + $0x448] sm:$0xff] %v1754_v4 }
 0x234   : > { %2261 = vst [vmem:[#allocation2 + $0x4d0] sm:$0xff] %v1076_v19  ;;  %2241 = vst [vmem:[#allocation2 + $0x430] sm:$0xff] %v1749_v26  ;;  %v1079_v8 = vpop.f32.mrb[104].mxu0  ;;  %v3053_v45 = vpop.f32.mrb[104].mxu1 }
 0x235   : > { %v1080_v9 = vadd.f32 %v1079_v8, %v4875_v22  ;;  %v1764_v12 = vadd.f32 %v3053_v45, %v5279_v50  ;;  %v1081_v13 = vpop.f32.mrb[105].mxu0  ;;  %v1758_v14 = vpop.f32.mrb[105].mxu1 }
 0x236   : > { %v1082_v15 = vadd.f32 %v1081_v13, %v4881_v23  ;;  %v1759_v17 = vadd.f32 %v1758_v14, %v5279_v50 }
 0x237   : > { %2263 = vst [vmem:[#allocation2 + $0x4e0] sm:$0xff] %v1080_v9  ;;  %2250 = vst [vmem:[#allocation2 + $0x478] sm:$0xff] %v1764_v12 }
 0x238   : > { %2264 = vst [vmem:[#allocation2 + $0x4e8] sm:$0xff] %v1082_v15  ;;  %2247 = vst [vmem:[#allocation2 + $0x460] sm:$0xff] %v1759_v17  ;;  %v1085_v0 = vpop.f32.mrb[106].mxu0  ;;  %v3056_v24 = vpop.f32.mrb[106].mxu1 }
 0x239   : > { %v1086_v25 = vadd.f32 %v1085_v0, %v4875_v22  ;;  %v1774_v27 = vadd.f32 %v3056_v24, %v5279_v50  ;;  %v1087_v42 = vpop.f32.mrb[107].mxu0  ;;  %v1768_v28 = vpop.f32.mrb[107].mxu1 }
 0x23a   : > { %v1088_v29 = vadd.f32 %v1087_v42, %v4881_v23  ;;  %v1769_v30 = vadd.f32 %v1768_v28, %v5279_v50 }
 0x23b   : > { %2266 = vst [vmem:[#allocation2 + $0x4f8] sm:$0xff] %v1086_v25  ;;  %2256 = vst [vmem:[#allocation2 + $0x4a8] sm:$0xff] %v1774_v27 }
 0x23c   : > { %2267 = vst [vmem:[#allocation2 + $0x500] sm:$0xff] %v1088_v29  ;;  %2253 = vst [vmem:[#allocation2 + $0x490] sm:$0xff] %v1769_v30  ;;  %v1091_v31 = vpop.f32.mrb[108].mxu0  ;;  %v3059_v32 = vpop.f32.mrb[108].mxu1 }
 0x23d   : > { %v1092_v34 = vadd.f32 %v1091_v31, %v4875_v22  ;;  %v1784_v33 = vadd.f32 %v3059_v32, %v5279_v50  ;;  %v1093_v38 = vpop.f32.mrb[109].mxu0  ;;  %v1778_v39 = vpop.f32.mrb[109].mxu1 }
 0x23e   : > { %v1094_v36 = vadd.f32 %v1093_v38, %v4881_v23  ;;  %v1779_v56 = vadd.f32 %v1778_v39, %v5279_v50 }
 0x23f   : > { %2269 = vst [vmem:[#allocation2 + $0x510] sm:$0xff] %v1092_v34  ;;  %2262 = vst [vmem:[#allocation2 + $0x4d8] sm:$0xff] %v1784_v33 }
 0x240   : > { %2270 = vst [vmem:[#allocation2 + $0x518] sm:$0xff] %v1094_v36  ;;  %2259 = vst [vmem:[#allocation2 + $0x4c0] sm:$0xff] %v1779_v56  ;;  %v1097_v59 = vpop.f32.mrb[110].mxu0  ;;  %v3062_v40 = vpop.f32.mrb[110].mxu1 }
 0x241   : > { %v1098_v41 = vadd.f32 %v1097_v59, %v4875_v22  ;;  %v1794_v43 = vadd.f32 %v3062_v40, %v5279_v50  ;;  %v1099_v44 = vpop.f32.mrb[111].mxu0  ;;  %v1788_v46 = vpop.f32.mrb[111].mxu1 }
 0x242   : > { %v1100_v1 = vadd.f32 %v1099_v44, %v4881_v23  ;;  %v1789_v48 = vadd.f32 %v1788_v46, %v5279_v50 }
 0x243   : > { %2272 = vst [vmem:[#allocation2 + $0x528] sm:$0xff] %v1098_v41  ;;  %2268 = vst [vmem:[#allocation2 + $0x508] sm:$0xff] %v1794_v43 }
 0x244   : > { %2273 = vst [vmem:[#allocation2 + $0x530] sm:$0xff] %v1100_v1  ;;  %2265 = vst [vmem:[#allocation2 + $0x4f0] sm:$0xff] %v1789_v48  ;;  %v1103_v51 = vpop.f32.mrb[112].mxu0  ;;  %v3065_v10 = vpop.f32.mrb[112].mxu1 }
 0x245   : > { %v1104_v6 = vadd.f32 %v1103_v51, %v4875_v22  ;;  %v1804_v37 = vadd.f32 %v3065_v10, %v5279_v50  ;;  %v1105_v53 = vpop.f32.mrb[113].mxu0  ;;  %v1798_v20 = vpop.f32.mrb[113].mxu1 }
 0x246   : > { %v1106_v54 = vadd.f32 %v1105_v53, %v4881_v23  ;;  %v1799_v55 = vadd.f32 %v1798_v20, %v5279_v50 }
 0x247   : > { %2275 = vst [vmem:[#allocation2 + $0x540] sm:$0xff] %v1104_v6  ;;  %2274 = vst [vmem:[#allocation2 + $0x538] sm:$0xff] %v1804_v37 }
 0x248   : > { %2276 = vst [vmem:[#allocation2 + $0x548] sm:$0xff] %v1106_v54  ;;  %2271 = vst [vmem:[#allocation2 + $0x520] sm:$0xff] %v1799_v55  ;;  %v1109_v60 = vpop.f32.mrb[114].mxu0  ;;  %v3068_v61 = vpop.f32.mrb[114].mxu1 }
 0x249   : > { %v1110_v62 = vadd.f32 %v1109_v60, %v4875_v22  ;;  %v1814_v11 = vadd.f32 %v3068_v61, %v5279_v50  ;;  %v1111_v47 = vpop.f32.mrb[115].mxu0  ;;  %v1808_v58 = vpop.f32.mrb[115].mxu1 }
 0x24a   : > { %v1112_v52 = vadd.f32 %v1111_v47, %v4881_v23  ;;  %v1809_v49 = vadd.f32 %v1808_v58, %v5279_v50 }
 0x24b   : > { %2278 = vst [vmem:[#allocation2 + $0x558] sm:$0xff] %v1110_v62  ;;  %2280 = vst [vmem:[#allocation2 + $0x568] sm:$0xff] %v1814_v11 }
 0x24c   : > { %2279 = vst [vmem:[#allocation2 + $0x560] sm:$0xff] %v1112_v52  ;;  %2277 = vst [vmem:[#allocation2 + $0x550] sm:$0xff] %v1809_v49  ;;  %v1115_v57 = vpop.f32.mrb[116].mxu0  ;;  %v3071_v63 = vpop.f32.mrb[116].mxu1 }
 0x24d   : > { %v1116_v2 = vadd.f32 %v1115_v57, %v4875_v22  ;;  %v1824_v3 = vadd.f32 %v3071_v63, %v5279_v50  ;;  %v1117_v4 = vpop.f32.mrb[117].mxu0  ;;  %v1818_v5 = vpop.f32.mrb[117].mxu1 }
 0x24e   : > { %v1118_v7 = vadd.f32 %v1117_v4, %v4881_v23  ;;  %v1819_v19 = vadd.f32 %v1818_v5, %v5279_v50 }
 0x24f   : > { %2281 = vst [vmem:[#allocation2 + $0x570] sm:$0xff] %v1116_v2  ;;  %2286 = vst [vmem:[#allocation2 + $0x598] sm:$0xff] %v1824_v3 }
 0x250   : > { %2282 = vst [vmem:[#allocation2 + $0x578] sm:$0xff] %v1118_v7  ;;  %2283 = vst [vmem:[#allocation2 + $0x580] sm:$0xff] %v1819_v19  ;;  %v1121_v26 = vpop.f32.mrb[118].mxu0  ;;  %v3074_v8 = vpop.f32.mrb[118].mxu1 }
 0x251   : > { %v1122_v45 = vadd.f32 %v1121_v26, %v4875_v22  ;;  %v1834_v9 = vadd.f32 %v3074_v8, %v5279_v50  ;;  %v1123_v12 = vpop.f32.mrb[119].mxu0  ;;  %v1828_v13 = vpop.f32.mrb[119].mxu1 }
 0x252   : > { %v1124_v14 = vadd.f32 %v1123_v12, %v4881_v23  ;;  %v1829_v15 = vadd.f32 %v1828_v13, %v5279_v50 }
 0x253   : > { %2284 = vst [vmem:[#allocation2 + $0x588] sm:$0xff] %v1122_v45  ;;  %2292 = vst [vmem:[#allocation2 + $0x5c8] sm:$0xff] %v1834_v9 }
 0x254   : > { %2285 = vst [vmem:[#allocation2 + $0x590] sm:$0xff] %v1124_v14  ;;  %2289 = vst [vmem:[#allocation2 + $0x5b0] sm:$0xff] %v1829_v15  ;;  %v1127_v17 = vpop.f32.mrb[120].mxu0  ;;  %v3077_v0 = vpop.f32.mrb[120].mxu1 }
 0x255   : > { %v1128_v24 = vadd.f32 %v1127_v17, %v4875_v22  ;;  %v1844_v25 = vadd.f32 %v3077_v0, %v5279_v50  ;;  %v1129_v27 = vpop.f32.mrb[121].mxu0  ;;  %v1838_v42 = vpop.f32.mrb[121].mxu1 }
 0x256   : > { %v1130_v28 = vadd.f32 %v1129_v27, %v4881_v23  ;;  %v1839_v29 = vadd.f32 %v1838_v42, %v5279_v50 }
 0x257   : > { %2287 = vst [vmem:[#allocation2 + $0x5a0] sm:$0xff] %v1128_v24  ;;  %2298 = vst [vmem:[#allocation2 + $0x5f8] sm:$0xff] %v1844_v25 }
 0x258   : > { %2288 = vst [vmem:[#allocation2 + $0x5a8] sm:$0xff] %v1130_v28  ;;  %2295 = vst [vmem:[#allocation2 + $0x5e0] sm:$0xff] %v1839_v29  ;;  %v1133_v30 = vpop.f32.mrb[122].mxu0  ;;  %v3080_v31 = vpop.f32.mrb[122].mxu1 }
 0x259   : > { %v1134_v32 = vadd.f32 %v1133_v30, %v4875_v22  ;;  %v1854_v34 = vadd.f32 %v3080_v31, %v5279_v50  ;;  %v1135_v33 = vpop.f32.mrb[123].mxu0  ;;  %v1848_v38 = vpop.f32.mrb[123].mxu1 }
 0x25a   : > { %v1136_v39 = vadd.f32 %v1135_v33, %v4881_v23  ;;  %v1849_v36 = vadd.f32 %v1848_v38, %v5279_v50 }
 0x25b   : > { %2290 = vst [vmem:[#allocation2 + $0x5b8] sm:$0xff] %v1134_v32  ;;  %2304 = vst [vmem:[#allocation2 + $0x628] sm:$0xff] %v1854_v34 }
 0x25c   : > { %2291 = vst [vmem:[#allocation2 + $0x5c0] sm:$0xff] %v1136_v39  ;;  %2301 = vst [vmem:[#allocation2 + $0x610] sm:$0xff] %v1849_v36  ;;  %v1139_v56 = vpop.f32.mrb[124].mxu0  ;;  %v3083_v59 = vpop.f32.mrb[124].mxu1 }
 0x25d   : > { %v1140_v40 = vadd.f32 %v1139_v56, %v4875_v22  ;;  %v1864_v41 = vadd.f32 %v3083_v59, %v5279_v50  ;;  %v1141_v43 = vpop.f32.mrb[125].mxu0  ;;  %v1858_v44 = vpop.f32.mrb[125].mxu1 }
 0x25e   : > { %v1142_v46 = vadd.f32 %v1141_v43, %v4881_v23  ;;  %v1859_v1 = vadd.f32 %v1858_v44, %v5279_v50 }
 0x25f   : > { %2293 = vst [vmem:[#allocation2 + $0x5d0] sm:$0xff] %v1140_v40  ;;  %2310 = vst [vmem:[#allocation2 + $0x658] sm:$0xff] %v1864_v41 }
 0x260   : > { %2294 = vst [vmem:[#allocation2 + $0x5d8] sm:$0xff] %v1142_v46  ;;  %2307 = vst [vmem:[#allocation2 + $0x640] sm:$0xff] %v1859_v1  ;;  %v1145_v48 = vpop.f32.mrb[126].mxu0  ;;  %v3086_v51 = vpop.f32.mrb[126].mxu1 }
 0x261   : > { %v1146_v10 = vadd.f32 %v1145_v48, %v4875_v22  ;;  %v1874_v6 = vadd.f32 %v3086_v51, %v5279_v50  ;;  %v1147_v37 = vpop.f32.mrb[127].mxu0  ;;  %v1868_v53 = vpop.f32.mrb[127].mxu1 }
 0x262   : > { %v1148_v20 = vadd.f32 %v1147_v37, %v4881_v23  ;;  %v1869_v54 = vadd.f32 %v1868_v53, %v5279_v50 }
 0x263   : > { %2296 = vst [vmem:[#allocation2 + $0x5e8] sm:$0xff] %v1146_v10  ;;  %2316 = vst [vmem:[#allocation2 + $0x688] sm:$0xff] %v1874_v6 }
 0x264   : > { %2297 = vst [vmem:[#allocation2 + $0x5f0] sm:$0xff] %v1148_v20  ;;  %2313 = vst [vmem:[#allocation2 + $0x670] sm:$0xff] %v1869_v54  ;;  %v1151_v55 = vpop.f32.mrb[128].mxu0  ;;  %v3089_v60 = vpop.f32.mrb[128].mxu1 }
 0x265   : > { %v1152_v61 = vadd.f32 %v1151_v55, %v4875_v22  ;;  %v1884_v62 = vadd.f32 %v3089_v60, %v5279_v50  ;;  %v1153_v11 = vpop.f32.mrb[129].mxu0  ;;  %v1878_v47 = vpop.f32.mrb[129].mxu1 }
 0x266   : > { %v1154_v58 = vadd.f32 %v1153_v11, %v4881_v23  ;;  %v1879_v52 = vadd.f32 %v1878_v47, %v5279_v50 }
 0x267   : > { %2299 = vst [vmem:[#allocation2 + $0x600] sm:$0xff] %v1152_v61  ;;  %2322 = vst [vmem:[#allocation2 + $0x6b8] sm:$0xff] %v1884_v62 }
 0x268   : > { %2300 = vst [vmem:[#allocation2 + $0x608] sm:$0xff] %v1154_v58  ;;  %2319 = vst [vmem:[#allocation2 + $0x6a0] sm:$0xff] %v1879_v52  ;;  %v1157_v49 = vpop.f32.mrb[130].mxu0  ;;  %v3092_v57 = vpop.f32.mrb[130].mxu1 }
 0x269   : > { %v1158_v63 = vadd.f32 %v1157_v49, %v4875_v22  ;;  %v1894_v2 = vadd.f32 %v3092_v57, %v5279_v50  ;;  %v1159_v3 = vpop.f32.mrb[131].mxu0  ;;  %v1888_v4 = vpop.f32.mrb[131].mxu1 }
 0x26a   : > { %v1160_v5 = vadd.f32 %v1159_v3, %v4881_v23  ;;  %v1889_v7 = vadd.f32 %v1888_v4, %v5279_v50 }
 0x26b   : > { %2302 = vst [vmem:[#allocation2 + $0x618] sm:$0xff] %v1158_v63  ;;  %2328 = vst [vmem:[#allocation2 + $0x6e8] sm:$0xff] %v1894_v2 }
 0x26c   : > { %2303 = vst [vmem:[#allocation2 + $0x620] sm:$0xff] %v1160_v5  ;;  %2325 = vst [vmem:[#allocation2 + $0x6d0] sm:$0xff] %v1889_v7  ;;  %v1163_v19 = vpop.f32.mrb[132].mxu0  ;;  %v3095_v26 = vpop.f32.mrb[132].mxu1 }
 0x26d   : > { %v1164_v8 = vadd.f32 %v1163_v19, %v4875_v22  ;;  %v1904_v45 = vadd.f32 %v3095_v26, %v5279_v50  ;;  %v1165_v9 = vpop.f32.mrb[133].mxu0  ;;  %v1898_v12 = vpop.f32.mrb[133].mxu1 }
 0x26e   : > { %v1166_v13 = vadd.f32 %v1165_v9, %v4881_v23  ;;  %v1899_v14 = vadd.f32 %v1898_v12, %v5279_v50 }
 0x26f   : > { %2305 = vst [vmem:[#allocation2 + $0x630] sm:$0xff] %v1164_v8  ;;  %2334 = vst [vmem:[#allocation2 + $0x718] sm:$0xff] %v1904_v45 }
 0x270   : > { %2306 = vst [vmem:[#allocation2 + $0x638] sm:$0xff] %v1166_v13  ;;  %2331 = vst [vmem:[#allocation2 + $0x700] sm:$0xff] %v1899_v14  ;;  %v1169_v15 = vpop.f32.mrb[134].mxu0  ;;  %v3098_v17 = vpop.f32.mrb[134].mxu1 }
 0x271   : > { %v1170_v0 = vadd.f32 %v1169_v15, %v4875_v22  ;;  %v1914_v24 = vadd.f32 %v3098_v17, %v5279_v50  ;;  %v1171_v25 = vpop.f32.mrb[135].mxu0  ;;  %v1908_v27 = vpop.f32.mrb[135].mxu1 }
 0x272   : > { %v1172_v42 = vadd.f32 %v1171_v25, %v4881_v23  ;;  %v1909_v28 = vadd.f32 %v1908_v27, %v5279_v50 }
 0x273   : > { %2308 = vst [vmem:[#allocation2 + $0x648] sm:$0xff] %v1170_v0  ;;  %2340 = vst [vmem:[#allocation2 + $0x748] sm:$0xff] %v1914_v24 }
 0x274   : > { %2309 = vst [vmem:[#allocation2 + $0x650] sm:$0xff] %v1172_v42  ;;  %2337 = vst [vmem:[#allocation2 + $0x730] sm:$0xff] %v1909_v28  ;;  %v1175_v29 = vpop.f32.mrb[136].mxu0  ;;  %v3101_v30 = vpop.f32.mrb[136].mxu1 }
 0x275   : > { %v1176_v31 = vadd.f32 %v1175_v29, %v4875_v22  ;;  %v1924_v32 = vadd.f32 %v3101_v30, %v5279_v50  ;;  %v1177_v34 = vpop.f32.mrb[137].mxu0  ;;  %v1918_v33 = vpop.f32.mrb[137].mxu1 }
 0x276   : > { %v1178_v38 = vadd.f32 %v1177_v34, %v4881_v23  ;;  %v1919_v39 = vadd.f32 %v1918_v33, %v5279_v50 }
 0x277   : > { %2311 = vst [vmem:[#allocation2 + $0x660] sm:$0xff] %v1176_v31  ;;  %2346 = vst [vmem:[#allocation2 + $0x778] sm:$0xff] %v1924_v32 }
 0x278   : > { %2312 = vst [vmem:[#allocation2 + $0x668] sm:$0xff] %v1178_v38  ;;  %2343 = vst [vmem:[#allocation2 + $0x760] sm:$0xff] %v1919_v39  ;;  %v1181_v36 = vpop.f32.mrb[138].mxu0  ;;  %v3104_v56 = vpop.f32.mrb[138].mxu1 }
 0x279   : > { %v1182_v59 = vadd.f32 %v1181_v36, %v4875_v22  ;;  %v1934_v40 = vadd.f32 %v3104_v56, %v5279_v50  ;;  %v1183_v41 = vpop.f32.mrb[139].mxu0  ;;  %v1928_v43 = vpop.f32.mrb[139].mxu1 }
 0x27a   : > { %v1184_v44 = vadd.f32 %v1183_v41, %v4881_v23  ;;  %v1929_v46 = vadd.f32 %v1928_v43, %v5279_v50 }
 0x27b   : > { %2314 = vst [vmem:[#allocation2 + $0x678] sm:$0xff] %v1182_v59  ;;  %2352 = vst [vmem:[#allocation2 + $0x7a8] sm:$0xff] %v1934_v40 }
 0x27c   : > { %2315 = vst [vmem:[#allocation2 + $0x680] sm:$0xff] %v1184_v44  ;;  %2349 = vst [vmem:[#allocation2 + $0x790] sm:$0xff] %v1929_v46  ;;  %v1187_v1 = vpop.f32.mrb[140].mxu0  ;;  %v3107_v48 = vpop.f32.mrb[140].mxu1 }
 0x27d   : > { %v1188_v51 = vadd.f32 %v1187_v1, %v4875_v22  ;;  %v1944_v10 = vadd.f32 %v3107_v48, %v5279_v50  ;;  %v1189_v6 = vpop.f32.mrb[141].mxu0  ;;  %v1938_v37 = vpop.f32.mrb[141].mxu1 }
 0x27e   : > { %v1190_v53 = vadd.f32 %v1189_v6, %v4881_v23  ;;  %v1939_v20 = vadd.f32 %v1938_v37, %v5279_v50 }
 0x27f   : > { %2317 = vst [vmem:[#allocation2 + $0x690] sm:$0xff] %v1188_v51  ;;  %2358 = vst [vmem:[#allocation2 + $0x7d8] sm:$0xff] %v1944_v10 }
 0x280   : > { %2318 = vst [vmem:[#allocation2 + $0x698] sm:$0xff] %v1190_v53  ;;  %2355 = vst [vmem:[#allocation2 + $0x7c0] sm:$0xff] %v1939_v20  ;;  %v1193_v54 = vpop.f32.mrb[142].mxu0  ;;  %v3110_v55 = vpop.f32.mrb[142].mxu1 }
 0x281   : > { %v1194_v60 = vadd.f32 %v1193_v54, %v4875_v22  ;;  %v1954_v61 = vadd.f32 %v3110_v55, %v5279_v50  ;;  %v1195_v62 = vpop.f32.mrb[143].mxu0  ;;  %v1948_v11 = vpop.f32.mrb[143].mxu1 }
 0x282   : > { %v1196_v47 = vadd.f32 %v1195_v62, %v4881_v23  ;;  %v1949_v58 = vadd.f32 %v1948_v11, %v5279_v50 }
 0x283   : > { %2320 = vst [vmem:[#allocation2 + $0x6a8] sm:$0xff] %v1194_v60  ;;  %2364 = vst [vmem:[#allocation2 + $0x808] sm:$0xff] %v1954_v61 }
 0x284   : > { %2321 = vst [vmem:[#allocation2 + $0x6b0] sm:$0xff] %v1196_v47  ;;  %2361 = vst [vmem:[#allocation2 + $0x7f0] sm:$0xff] %v1949_v58  ;;  %v1199_v52 = vpop.f32.mrb[144].mxu0  ;;  %v3113_v49 = vpop.f32.mrb[144].mxu1 }
 0x285   : > { %v1200_v57 = vadd.f32 %v1199_v52, %v4875_v22  ;;  %v1964_v63 = vadd.f32 %v3113_v49, %v5279_v50  ;;  %v1201_v2 = vpop.f32.mrb[145].mxu0  ;;  %v1958_v3 = vpop.f32.mrb[145].mxu1 }
 0x286   : > { %v1202_v4 = vadd.f32 %v1201_v2, %v4881_v23  ;;  %v1959_v5 = vadd.f32 %v1958_v3, %v5279_v50 }
 0x287   : > { %2323 = vst [vmem:[#allocation2 + $0x6c0] sm:$0xff] %v1200_v57  ;;  %2370 = vst [vmem:[#allocation2 + $0x838] sm:$0xff] %v1964_v63 }
 0x288   : > { %2324 = vst [vmem:[#allocation2 + $0x6c8] sm:$0xff] %v1202_v4  ;;  %2367 = vst [vmem:[#allocation2 + $0x820] sm:$0xff] %v1959_v5  ;;  %v1205_v7 = vpop.f32.mrb[146].mxu0  ;;  %v3116_v19 = vpop.f32.mrb[146].mxu1 }
 0x289   : > { %v1206_v26 = vadd.f32 %v1205_v7, %v4875_v22  ;;  %v1974_v8 = vadd.f32 %v3116_v19, %v5279_v50  ;;  %v1207_v45 = vpop.f32.mrb[147].mxu0  ;;  %v1968_v9 = vpop.f32.mrb[147].mxu1 }
 0x28a   : > { %v1208_v12 = vadd.f32 %v1207_v45, %v4881_v23  ;;  %v1969_v13 = vadd.f32 %v1968_v9, %v5279_v50 }
 0x28b   : > { %2326 = vst [vmem:[#allocation2 + $0x6d8] sm:$0xff] %v1206_v26  ;;  %2376 = vst [vmem:[#allocation2 + $0x868] sm:$0xff] %v1974_v8 }
 0x28c   : > { %2327 = vst [vmem:[#allocation2 + $0x6e0] sm:$0xff] %v1208_v12  ;;  %2373 = vst [vmem:[#allocation2 + $0x850] sm:$0xff] %v1969_v13  ;;  %v1211_v14 = vpop.f32.mrb[148].mxu0  ;;  %v3119_v15 = vpop.f32.mrb[148].mxu1 }
 0x28d   : > { %v1212_v17 = vadd.f32 %v1211_v14, %v4875_v22  ;;  %v1984_v0 = vadd.f32 %v3119_v15, %v5279_v50  ;;  %v1213_v24 = vpop.f32.mrb[149].mxu0  ;;  %v1978_v25 = vpop.f32.mrb[149].mxu1 }
 0x28e   : > { %v1214_v27 = vadd.f32 %v1213_v24, %v4881_v23  ;;  %v1979_v42 = vadd.f32 %v1978_v25, %v5279_v50 }
 0x28f   : > { %2329 = vst [vmem:[#allocation2 + $0x6f0] sm:$0xff] %v1212_v17  ;;  %2382 = vst [vmem:[#allocation2 + $0x898] sm:$0xff] %v1984_v0 }
 0x290   : > { %2330 = vst [vmem:[#allocation2 + $0x6f8] sm:$0xff] %v1214_v27  ;;  %2379 = vst [vmem:[#allocation2 + $0x880] sm:$0xff] %v1979_v42  ;;  %v1217_v28 = vpop.f32.mrb[150].mxu0  ;;  %v3122_v29 = vpop.f32.mrb[150].mxu1 }
 0x291   : > { %v1218_v30 = vadd.f32 %v1217_v28, %v4875_v22  ;;  %v1994_v31 = vadd.f32 %v3122_v29, %v5279_v50  ;;  %v1219_v32 = vpop.f32.mrb[151].mxu0  ;;  %v1988_v34 = vpop.f32.mrb[151].mxu1 }
 0x292   : > { %v1220_v33 = vadd.f32 %v1219_v32, %v4881_v23  ;;  %v1989_v38 = vadd.f32 %v1988_v34, %v5279_v50 }
 0x293   : > { %2332 = vst [vmem:[#allocation2 + $0x708] sm:$0xff] %v1218_v30  ;;  %2388 = vst [vmem:[#allocation2 + $0x8c8] sm:$0xff] %v1994_v31 }
 0x294   : > { %2333 = vst [vmem:[#allocation2 + $0x710] sm:$0xff] %v1220_v33  ;;  %2385 = vst [vmem:[#allocation2 + $0x8b0] sm:$0xff] %v1989_v38  ;;  %v1223_v39 = vpop.f32.mrb[152].mxu0  ;;  %v3125_v36 = vpop.f32.mrb[152].mxu1 }
 0x295   : > { %v1224_v56 = vadd.f32 %v1223_v39, %v4875_v22  ;;  %v2004_v59 = vadd.f32 %v3125_v36, %v5279_v50  ;;  %v1225_v40 = vpop.f32.mrb[153].mxu0  ;;  %v1998_v41 = vpop.f32.mrb[153].mxu1 }
 0x296   : > { %v1226_v43 = vadd.f32 %v1225_v40, %v4881_v23  ;;  %v1999_v44 = vadd.f32 %v1998_v41, %v5279_v50 }
 0x297   : > { %2335 = vst [vmem:[#allocation2 + $0x720] sm:$0xff] %v1224_v56  ;;  %2394 = vst [vmem:[#allocation2 + $0x8f8] sm:$0xff] %v2004_v59 }
 0x298   : > { %2336 = vst [vmem:[#allocation2 + $0x728] sm:$0xff] %v1226_v43  ;;  %2391 = vst [vmem:[#allocation2 + $0x8e0] sm:$0xff] %v1999_v44  ;;  %v1229_v46 = vpop.f32.mrb[154].mxu0  ;;  %v3128_v1 = vpop.f32.mrb[154].mxu1 }
 0x299   : > { %v1230_v48 = vadd.f32 %v1229_v46, %v4875_v22  ;;  %v2014_v51 = vadd.f32 %v3128_v1, %v5279_v50  ;;  %v1231_v10 = vpop.f32.mrb[155].mxu0  ;;  %v2008_v6 = vpop.f32.mrb[155].mxu1 }
 0x29a   : > { %v1232_v37 = vadd.f32 %v1231_v10, %v4881_v23  ;;  %v2009_v53 = vadd.f32 %v2008_v6, %v5279_v50 }
 0x29b   : > { %2338 = vst [vmem:[#allocation2 + $0x738] sm:$0xff] %v1230_v48  ;;  %2400 = vst [vmem:[#allocation2 + $0x928] sm:$0xff] %v2014_v51 }
 0x29c   : > { %2339 = vst [vmem:[#allocation2 + $0x740] sm:$0xff] %v1232_v37  ;;  %2397 = vst [vmem:[#allocation2 + $0x910] sm:$0xff] %v2009_v53  ;;  %v1235_v20 = vpop.f32.mrb[156].mxu0  ;;  %v3131_v54 = vpop.f32.mrb[156].mxu1 }
 0x29d   : > { %v1236_v55 = vadd.f32 %v1235_v20, %v4875_v22  ;;  %v2024_v60 = vadd.f32 %v3131_v54, %v5279_v50  ;;  %v1237_v61 = vpop.f32.mrb[157].mxu0  ;;  %v2018_v62 = vpop.f32.mrb[157].mxu1 }
 0x29e   : > { %v1238_v11 = vadd.f32 %v1237_v61, %v4881_v23  ;;  %v2019_v47 = vadd.f32 %v2018_v62, %v5279_v50 }
 0x29f   : > { %2341 = vst [vmem:[#allocation2 + $0x750] sm:$0xff] %v1236_v55  ;;  %2406 = vst [vmem:[#allocation2 + $0x958] sm:$0xff] %v2024_v60 }
 0x2a0   : > { %2342 = vst [vmem:[#allocation2 + $0x758] sm:$0xff] %v1238_v11  ;;  %2403 = vst [vmem:[#allocation2 + $0x940] sm:$0xff] %v2019_v47  ;;  %v1241_v58 = vpop.f32.mrb[158].mxu0  ;;  %v3134_v52 = vpop.f32.mrb[158].mxu1 }
 0x2a1   : > { %v1242_v49 = vadd.f32 %v1241_v58, %v4875_v22  ;;  %v2034_v57 = vadd.f32 %v3134_v52, %v5279_v50  ;;  %v1243_v63 = vpop.f32.mrb[159].mxu0  ;;  %v2028_v2 = vpop.f32.mrb[159].mxu1 }
 0x2a2   : > { %v1244_v3 = vadd.f32 %v1243_v63, %v4881_v23  ;;  %v2029_v4 = vadd.f32 %v2028_v2, %v5279_v50 }
 0x2a3   : > { %2344 = vst [vmem:[#allocation2 + $0x768] sm:$0xff] %v1242_v49  ;;  %2412 = vst [vmem:[#allocation2 + $0x988] sm:$0xff] %v2034_v57 }
 0x2a4   : > { %2345 = vst [vmem:[#allocation2 + $0x770] sm:$0xff] %v1244_v3  ;;  %2409 = vst [vmem:[#allocation2 + $0x970] sm:$0xff] %v2029_v4  ;;  %v1247_v5 = vpop.f32.mrb[160].mxu0  ;;  %v3137_v7 = vpop.f32.mrb[160].mxu1  ;;  %v5555_v4 = vmov 0.0  }
 0x2a5   : > { %v1248_v19 = vadd.f32 %v1247_v5, %v4875_v22  ;;  %v2044_v26 = vadd.f32 %v3137_v7, %v5279_v50  ;;  %v1249_v8 = vpop.f32.mrb[161].mxu0  ;;  %v2038_v45 = vpop.f32.mrb[161].mxu1 }
 0x2a6   : > { %v1250_v9 = vadd.f32 %v1249_v8, %v4881_v23  ;;  %v2039_v12 = vadd.f32 %v2038_v45, %v5279_v50 }
 0x2a7   : > { %2347 = vst [vmem:[#allocation2 + $0x780] sm:$0xff] %v1248_v19  ;;  %2418 = vst [vmem:[#allocation2 + $0x9b8] sm:$0xff] %v2044_v26 }
 0x2a8   : > { %2348 = vst [vmem:[#allocation2 + $0x788] sm:$0xff] %v1250_v9  ;;  %2415 = vst [vmem:[#allocation2 + $0x9a0] sm:$0xff] %v2039_v12  ;;  %v1253_v13 = vpop.f32.mrb[162].mxu0  ;;  %v3140_v14 = vpop.f32.mrb[162].mxu1 }
 0x2a9   : > { %v1254_v15 = vadd.f32 %v1253_v13, %v4875_v22  ;;  %v2054_v17 = vadd.f32 %v3140_v14, %v5279_v50  ;;  %v1255_v0 = vpop.f32.mrb[163].mxu0  ;;  %v2048_v24 = vpop.f32.mrb[163].mxu1 }
 0x2aa   : > { %v1256_v25 = vadd.f32 %v1255_v0, %v4881_v23  ;;  %v2049_v27 = vadd.f32 %v2048_v24, %v5279_v50 }
 0x2ab   : > { %2350 = vst [vmem:[#allocation2 + $0x798] sm:$0xff] %v1254_v15  ;;  %2424 = vst [vmem:[#allocation2 + $0x9e8] sm:$0xff] %v2054_v17 }
 0x2ac   : > { %2351 = vst [vmem:[#allocation2 + $0x7a0] sm:$0xff] %v1256_v25  ;;  %2421 = vst [vmem:[#allocation2 + $0x9d0] sm:$0xff] %v2049_v27  ;;  %v1259_v42 = vpop.f32.mrb[164].mxu0  ;;  %v3143_v28 = vpop.f32.mrb[164].mxu1 }
 0x2ad   : > { %v1260_v29 = vadd.f32 %v1259_v42, %v4875_v22  ;;  %v2064_v30 = vadd.f32 %v3143_v28, %v5279_v50  ;;  %v1261_v31 = vpop.f32.mrb[165].mxu0  ;;  %v2058_v32 = vpop.f32.mrb[165].mxu1 }
 0x2ae   : > { %v1262_v34 = vadd.f32 %v1261_v31, %v4881_v23  ;;  %v2059_v33 = vadd.f32 %v2058_v32, %v5279_v50 }
 0x2af   : > { %2353 = vst [vmem:[#allocation2 + $0x7b0] sm:$0xff] %v1260_v29  ;;  %2430 = vst [vmem:[#allocation2 + $0xa18] sm:$0xff] %v2064_v30 }
 0x2b0   : > { %2354 = vst [vmem:[#allocation2 + $0x7b8] sm:$0xff] %v1262_v34  ;;  %2427 = vst [vmem:[#allocation2 + $0xa00] sm:$0xff] %v2059_v33  ;;  %v1265_v38 = vpop.f32.mrb[166].mxu0  ;;  %v3146_v39 = vpop.f32.mrb[166].mxu1 }
 0x2b1   : > { %v1266_v36 = vadd.f32 %v1265_v38, %v4875_v22  ;;  %v2074_v56 = vadd.f32 %v3146_v39, %v5279_v50  ;;  %v1267_v59 = vpop.f32.mrb[167].mxu0  ;;  %v2068_v40 = vpop.f32.mrb[167].mxu1 }
 0x2b2   : > { %v1268_v41 = vadd.f32 %v1267_v59, %v4881_v23  ;;  %v2069_v43 = vadd.f32 %v2068_v40, %v5279_v50 }
 0x2b3   : > { %2356 = vst [vmem:[#allocation2 + $0x7c8] sm:$0xff] %v1266_v36  ;;  %2436 = vst [vmem:[#allocation2 + $0xa48] sm:$0xff] %v2074_v56 }
 0x2b4   : > { %2357 = vst [vmem:[#allocation2 + $0x7d0] sm:$0xff] %v1268_v41  ;;  %2433 = vst [vmem:[#allocation2 + $0xa30] sm:$0xff] %v2069_v43  ;;  %v1271_v44 = vpop.f32.mrb[168].mxu0  ;;  %v3149_v46 = vpop.f32.mrb[168].mxu1 }
 0x2b5   : > { %v1272_v1 = vadd.f32 %v1271_v44, %v4875_v22  ;;  %v2084_v48 = vadd.f32 %v3149_v46, %v5279_v50  ;;  %v1273_v51 = vpop.f32.mrb[169].mxu0  ;;  %v2078_v10 = vpop.f32.mrb[169].mxu1 }
 0x2b6   : > { %v1274_v6 = vadd.f32 %v1273_v51, %v4881_v23  ;;  %v2079_v37 = vadd.f32 %v2078_v10, %v5279_v50 }
 0x2b7   : > { %2359 = vst [vmem:[#allocation2 + $0x7e0] sm:$0xff] %v1272_v1  ;;  %2442 = vst [vmem:[#allocation2 + $0xa78] sm:$0xff] %v2084_v48 }
 0x2b8   : > { %2360 = vst [vmem:[#allocation2 + $0x7e8] sm:$0xff] %v1274_v6  ;;  %2439 = vst [vmem:[#allocation2 + $0xa60] sm:$0xff] %v2079_v37  ;;  %v1277_v53 = vpop.f32.mrb[170].mxu0  ;;  %v3152_v20 = vpop.f32.mrb[170].mxu1 }
 0x2b9   : > { %v1278_v54 = vadd.f32 %v1277_v53, %v4875_v22  ;;  %v2094_v55 = vadd.f32 %v3152_v20, %v5279_v50  ;;  %v1279_v60 = vpop.f32.mrb[171].mxu0  ;;  %v2088_v61 = vpop.f32.mrb[171].mxu1 }
 0x2ba   : > { %v1280_v62 = vadd.f32 %v1279_v60, %v4881_v23  ;;  %v2089_v11 = vadd.f32 %v2088_v61, %v5279_v50 }
 0x2bb   : > { %2362 = vst [vmem:[#allocation2 + $0x7f8] sm:$0xff] %v1278_v54  ;;  %2448 = vst [vmem:[#allocation2 + $0xaa8] sm:$0xff] %v2094_v55 }
 0x2bc   : > { %2363 = vst [vmem:[#allocation2 + $0x800] sm:$0xff] %v1280_v62  ;;  %2445 = vst [vmem:[#allocation2 + $0xa90] sm:$0xff] %v2089_v11  ;;  %v1283_v47 = vpop.f32.mrb[172].mxu0  ;;  %v3155_v58 = vpop.f32.mrb[172].mxu1 }
 0x2bd   : > { %v1284_v52 = vadd.f32 %v1283_v47, %v4875_v22  ;;  %v2104_v49 = vadd.f32 %v3155_v58, %v5279_v50  ;;  %v1285_v57 = vpop.f32.mrb[173].mxu0  ;;  %v2098_v63 = vpop.f32.mrb[173].mxu1 }
 0x2be   : > { %v1286_v2 = vadd.f32 %v1285_v57, %v4881_v23  ;;  %v2099_v3 = vadd.f32 %v2098_v63, %v5279_v50 }
 0x2bf   : > { %2365 = vst [vmem:[#allocation2 + $0x810] sm:$0xff] %v1284_v52  ;;  %2454 = vst [vmem:[#allocation2 + $0xad8] sm:$0xff] %v2104_v49 }
 0x2c0   : > { %2366 = vst [vmem:[#allocation2 + $0x818] sm:$0xff] %v1286_v2  ;;  %2451 = vst [vmem:[#allocation2 + $0xac0] sm:$0xff] %v2099_v3 }
 0x2c1 LB: >> { %v2472_v22 = vld [vmem:[%s3637_s14 + $0x8] sm:$0xff]  ;;  %v2475_v23 = vld [vmem:[%s3637_s14 + $0x20] sm:$0xff]  ;;  %v2474_v7 = vld [vmem:[%s3637_s14 + $0x18] sm:$0xff]  ;;  %v3518_v8 = vmov 0.0|0.0   ;;  %v3519_v45 = vmov 0.0   ;;  %vm3520_vm0 = vmmov 0   ;;  %s3512_s29 = sphi %s5557_s29, %s2460_s29   ;;  %v3508_v4 = vphi %v5555_v4, %v2697_v4  }
 0x2c2   : >> { %v2471_v50 = vld [vmem:[%s3637_s14] sm:$0xff]  ;;  %v3255_v5 = vpack.c.bf16 %v2475_v23, %v2472_v22  ;;  %v2478_v19 = vld [vmem:[%s3637_s14 + $0x38] sm:$0xff]  ;;  %v2481_v26 = vld [vmem:[%s3637_s14 + $0x50] sm:$0xff]  ;;  %3287 = vmatprep.subr.bf16.mxu1 %v3518_v8  ;;  %2600 = vmatprep.mubr.f32.mxu0 %v3519_v45  ;;  %s2794_s30 = sshll.u32 %s3512_s29, 3  ;;  %s2460_s29 = sadd.s32 1, %s3512_s29  }
 0x2c3   : >> { %v3257_v9 = vpack.c.bf16 %v2474_v7, %v2471_v50  ;;  %v3259_v12 = vpack.c.bf16 %v2481_v26, %v2478_v19  ;;  %v2477_v13 = vld [vmem:[%s3637_s14 + $0x30] sm:$0xff]  ;;  %v2480_v14 = vld [vmem:[%s3637_s14 + $0x48] sm:$0xff]  ;;  %3188 = vmatprep.mubr.msk.f32.mxu1 %vm3520_vm0, %v3519_v45  ;;  %v2487_v17 = vld [vmem:[%s3637_s14 + $0x80] sm:$0xff]  ;;  %s2463_s7 = sshra.s32 %s2794_s30, 3  ;;  %s2698_s9 = scalar_lea.vmem %s5662_s5, %s2794_s30 }
 0x2c4   : >> { %v2484_v15 = vld [vmem:[%s3637_s14 + $0x68] sm:$0xff]  ;;  %3256 = vmatprep.subr.bf16.mxu0 %v3255_v5  ;;  %v3261_v0 = vpack.c.bf16 %v2480_v14, %v2477_v13  ;;  %v2483_v25 = vld [vmem:[%s3637_s14 + $0x60] sm:$0xff]  ;;  %v2486_v27 = vld [vmem:[%s3637_s14 + $0x78] sm:$0xff]  ;;  %s2800_s8 = smul.u32 24, %s2463_s7  ;;  %p2457_p8 = scmp.ge.s32.totalorder %s2460_s29, 116  }
 0x2c5   : >> { %3258 = vmatpush1.bf16.msra.mxu0 %v3257_v9  ;;  %v3263_v24 = vpack.c.bf16 %v2487_v17, %v2484_v15  ;;  %v2490_v42 = vld [vmem:[%s3637_s14 + $0x98] sm:$0xff]  ;;  %v2493_v28 = vld [vmem:[%s3637_s14 + $0xb0] sm:$0xff]  ;;  %v3265_v29 = vpack.c.bf16 %v2486_v27, %v2483_v25  ;;  %v2492_v32 = vld [vmem:[%s3637_s14 + $0xa8] sm:$0xff] }
 0x2c6   : >> { %3260 = vmatprep.subr.bf16.mxu0 %v3259_v12  ;;  %v3267_v30 = vpack.c.bf16 %v2493_v28, %v2490_v42  ;;  %v2489_v31 = vld [vmem:[%s3637_s14 + $0x90] sm:$0xff]  ;;  %v2496_v34 = vld [vmem:[%s3637_s14 + $0xc8] sm:$0xff]  ;;  %v2499_v33 = vld [vmem:[%s3637_s14 + $0xe0] sm:$0xff]  ;;  %s2467_s10 = scalar_lea.vmem [#allocation2], %s2800_s8 }
 0x2c7   : >> { %v2473_v38 = vld [vmem:[%s3637_s14 + $0x10] sm:$0xff]  ;;  %v2476_v39 = vld [vmem:[%s3637_s14 + $0x28] sm:$0xff]  ;;  %v2479_v56 = vld [vmem:[%s3637_s14 + $0x40] sm:$0xff]  ;;  %v3269_v40 = vpack.c.bf16 %v2492_v32, %v2489_v31  ;;  %v3271_v41 = vpack.c.bf16 %v2499_v33, %v2496_v34 }
 0x2c8   : >> { %v3288_v36 = vpack.c.bf16 %v2476_v39, %v2473_v38  ;;  %v2482_v59 = vld [vmem:[%s3637_s14 + $0x58] sm:$0xff]  ;;  %v2495_v43 = vld [vmem:[%s3637_s14 + $0xc0] sm:$0xff]  ;;  %v2505_v48 = vld [vmem:[%s3637_s14 + $0x110] sm:$0xff] }
 0x2c9   : >> { %3262 = vmatpush1.bf16.msra.mxu0 %v3261_v0  ;;  %v2498_v44 = vld [vmem:[%s3637_s14 + $0xd8] sm:$0xff]  ;;  %v3291_v1 = vpack.c.bf16 %v2482_v59, %v2479_v56  ;;  %v2485_v51 = vld [vmem:[%s3637_s14 + $0x70] sm:$0xff]  ;;  %v2488_v10 = vld [vmem:[%s3637_s14 + $0x88] sm:$0xff] }
 0x2ca   : >> { %3264 = vmatprep.subr.bf16.mxu0 %v3263_v24  ;;  %v2502_v46 = vld [vmem:[%s3637_s14 + $0xf8] sm:$0xff]  ;;  %3289 = vmatpush3.bf16.msra.mxu1 %v3288_v36  ;;  %v3273_v6 = vpack.c.bf16 %v2498_v44, %v2495_v43  ;;  %v2501_v53 = vld [vmem:[%s3637_s14 + $0xf0] sm:$0xff]  ;;  %v2504_v20 = vld [vmem:[%s3637_s14 + $0x108] sm:$0xff]  ;;  %v3294_v55 = vpack.c.bf16 %v2488_v10, %v2485_v51 }
 0x2cb   : >> { %3290 = vmatprep.subr.bf16.mxu1 %v3518_v8  ;;  %v3275_v37 = vpack.c.bf16 %v2505_v48, %v2502_v46  ;;  %v2508_v54 = vld [vmem:[%s3637_s14 + $0x128] sm:$0xff]  ;;  %v2511_v60 = vld [vmem:[%s3637_s14 + $0x140] sm:$0xff]  ;;  %v2494_v62 = vld [vmem:[%s3637_s14 + $0xb8] sm:$0xff]  ;;  %v3277_v11 = vpack.c.bf16 %v2504_v20, %v2501_v53 }
 0x2cc   : >> { %v2491_v61 = vld [vmem:[%s3637_s14 + $0xa0] sm:$0xff]  ;;  %v3279_v47 = vpack.c.bf16 %v2511_v60, %v2508_v54  ;;  %v2510_v52 = vld [vmem:[%s3637_s14 + $0x138] sm:$0xff]  ;;  %v2517_v63 = vld [vmem:[%s3637_s14 + $0x170] sm:$0xff] }
 0x2cd   : >> { %3266 = vmatpush1.bf16.msra.mxu0 %v3265_v29  ;;  %v2507_v58 = vld [vmem:[%s3637_s14 + $0x120] sm:$0xff]  ;;  %v2514_v49 = vld [vmem:[%s3637_s14 + $0x158] sm:$0xff]  ;;  %v3297_v57 = vpack.c.bf16 %v2494_v62, %v2491_v61  ;;  %v2497_v2 = vld [vmem:[%s3637_s14 + $0xd0] sm:$0xff] }
 0x2ce   : >> { %3268 = vmatprep.subr.bf16.mxu0 %v3267_v30  ;;  %3292 = vmatpush3.bf16.msra.mxu1 %v3291_v1  ;;  %v2500_v3 = vld [vmem:[%s3637_s14 + $0xe8] sm:$0xff]  ;;  %v3281_v22 = vpack.c.bf16 %v2510_v52, %v2507_v58  ;;  %v3283_v23 = vpack.c.bf16 %v2517_v63, %v2514_v49  ;;  %v2513_v50 = vld [vmem:[%s3637_s14 + $0x150] sm:$0xff]  ;;  %v2503_v19 = vld [vmem:[%s3637_s14 + $0x100] sm:$0xff] }
 0x2cf   : >> { %3293 = vmatprep.subr.bf16.mxu1 %v3518_v8  ;;  %v2516_v5 = vld [vmem:[%s3637_s14 + $0x168] sm:$0xff]  ;;  %v3300_v7 = vpack.c.bf16 %v2500_v3, %v2497_v2  ;;  %v2506_v26 = vld [vmem:[%s3637_s14 + $0x118] sm:$0xff]  ;;  %v2509_v12 = vld [vmem:[%s3637_s14 + $0x130] sm:$0xff] }
 0x2d0   : >> { %v3285_v45 = vpack.c.bf16 %v2516_v5, %v2513_v50  ;;  %v3303_v9 = vpack.c.bf16 %v2506_v26, %v2503_v19  ;;  %v2512_v13 = vld [vmem:[%s3637_s14 + $0x148] sm:$0xff]  ;;  %v2515_v15 = vld [vmem:[%s3637_s14 + $0x160] sm:$0xff]  ;;  %v2518_v17 = vld [vmem:[%s3637_s14 + $0x178] sm:$0xff] }
 0x2d1   : >> { %3270 = vmatpush1.bf16.msra.mxu0 %v3269_v40  ;;  %v3306_v14 = vpack.c.bf16 %v2512_v13, %v2509_v12  ;;  %v3309_v0 = vpack.c.bf16 %v2518_v17, %v2515_v15  ;;  %v2519_v24 = vld [vmem:[%s3658_s27] sm:$0x7]  ;;  %v2469_v32 = vld [vmem:[%s2467_s10 + $0x8] sm:$0xff]  ;;  %v2470_v1 = vld [vmem:[%s2467_s10 + $0x10] sm:$0xff] }
 0x2d2   : >> { %3272 = vmatprep.subr.bf16.mxu0 %v3271_v41  ;;  %3295 = vmatpush3.bf16.msra.mxu1 %v3294_v55  ;;  %v2524_v25 = vrot.slane %v2519_v24, %v688_v18  ;;  %v2528_v27 = vrot.slane %v2519_v24, %v692_v21  ;;  %v2468_v42 = vld [vmem:[%s2467_s10] sm:$0xff]  ;;  %v2532_v40 = vrot.slane %v2519_v24, %v696_v35 }
 0x2d3   : >> { %3296 = vmatprep.subr.bf16.mxu1 %v3518_v8 }
 0x2d5   : >> { %3274 = vmatpush1.bf16.msra.mxu0 %v3273_v6 }
 0x2d6   : >> { %3276 = vmatprep.subr.bf16.mxu0 %v3275_v37  ;;  %3298 = vmatpush3.bf16.msra.mxu1 %v3297_v57 }
 0x2d7   : >> { %3299 = vmatprep.subr.bf16.mxu1 %v3518_v8 }
 0x2d9   : >> { %3278 = vmatpush1.bf16.msra.mxu0 %v3277_v11 }
 0x2da   : >> { %3280 = vmatprep.subr.bf16.mxu0 %v3279_v47  ;;  %3301 = vmatpush3.bf16.msra.mxu1 %v3300_v7 }
 0x2db   : >> { %3302 = vmatprep.subr.bf16.mxu1 %v3518_v8 }
 0x2dd   : >> { %3282 = vmatpush1.bf16.msra.mxu0 %v3281_v22 }
 0x2de   : >> { %3284 = vmatprep.subr.bf16.mxu0 %v3283_v23  ;;  %3304 = vmatpush3.bf16.msra.mxu1 %v3303_v9 }
 0x2df   : >> { %3305 = vmatprep.subr.bf16.mxu1 %v3518_v8 }
 0x2e1   : >> { %3286 = vmatpush1.bf16.msra.mxu0 %v3285_v45 }
 0x2e2   : >> { %3307 = vmatpush3.bf16.msra.mxu1 %v3306_v14 }
 0x2e3   : >> { %3308 = vmatprep.subr.bf16.mxu1 %v3518_v8 }
 0x2e4   : >> { %2601 = vmatmul.mubr.f32.vlgmr.msra.gmra.mrb[0].mxu0 %v3508_v4 }
 0x2e6   : >> { %3310 = vmatpush3.bf16.msra.mxu1 %v3309_v0 }
 0x2e9   : >> { %3189 = vmatmul.mubr.f32.vlgmr.msra.gmra.mrb[0].mxu1 %v3508_v4 }
 0x3b7   : >> { %v2602_v28 = vpop.f32.mrb[0].mxu0 }
 0x3b8   : >> { %v2603_v29 = vadd.f32 %v2602_v28, %v2524_v25  ;;  %v2604_v30 = vpop.f32.mrb[1].mxu0 }
 0x3b9   : >> { %v2605_v8 = vadd.f32 %v2604_v30, %v2528_v27 }
 0x3ba   : >> { %v2677_v31 = vadd.f32 %v2603_v29, %v2468_v42 }
 0x3bb   : >> { %v2684_v33 = vadd.f32 %v2605_v8, %v2469_v32 }
 0x3bc   : >> { %v2796_v34 = vmul.f32 -1.442695, %v2677_v31  ;;  %v2673_v38 = vpop.f32.mrb[0].mxu1 }
 0x3bd   : >> { %v2797_v39 = vmul.f32 -1.442695, %v2684_v33  ;;  %v3190_v36 = vpop.f32.mrb[1].mxu1  ;;  %v2674_v44 = vadd.f32 %v2673_v38, %v2532_v40 }
 0x3be   : >> { %3422 = vpow2.f32 %v2796_v34 }
 0x3bf   : >> { %3424 = vpow2.f32 %v2797_v39 }
 0x3c8   : >> { %v3423_v56 = vpop.eup %3422 }
 0x3c9   : >> { %v2681_v59 = vadd.f32 1.0, %v3423_v56  ;;  %v3425_v41 = vpop.eup %3424 }
 0x3ca   : >> { %v2688_v43 = vadd.f32 1.0, %v3425_v41 }
 0x3cb   : >> { %3426 = vrcp.f32 %v2681_v59 }
 0x3cc   : >> { %3428 = vrcp.f32 %v2688_v43 }
 0x3d5   : >> { %v3427_v46 = vpop.eup %3426 }
 0x3d6   : >> { %v2691_v48 = vmul.f32 %v3427_v46, %v2674_v44  ;;  %v3429_v10 = vpop.eup %3428 }
 0x3d7   : >> { %v2694_v6 = vsub.f32 1.0, %v3429_v10  ;;  %v2696_v53 = vmul.f32 %v3508_v4, %v3429_v10 }
 0x3d8   : >> { %v2692_v51 = vadd.f32 %v2691_v48, %v2470_v1 }
 0x3da   : >> { %3430 = vtanh.f32 %v2692_v51 }
 0x3e3   : > { %2459 = sbr.rel (!%p2457_p8) target bundleno = 705 (0x2c1), region = 98 }
 0x3e4   : >> { %v3431_v37 = vpop.eup %3430 }
 0x3e5   : >> { %v2695_v20 = vmul.f32 %v3431_v37, %v2694_v6 }
 0x3e7   : >> { %v2697_v4 = vadd.f32 %v2696_v53, %v2695_v20  }
 0x3e9   : >> { %2699 = vst [vmem:[%s2698_s9] sm:$0xff] %v2697_v4 }
 0x3ea PF: > { %p15_p4 = scmp.ge.s32.totalorder %s3573_s23, 8   ;;  %s5666_s18 = smov %s3496_s19 }
 0x3eb   : > { %s5667_s19 = smov %s3500_s20  ;;  %s5668_s20 = smov %s3583_s26 }
 0x3ec   : > { %s5669_s21 = smov %s3573_s23  ;;  %17 = sbr.rel (!%p15_p4) target bundleno = 3 (0x3), region = 109 }
 0x3f3   :  { %2711 = vsyncpa [#allocation4], 1 }
 0x3f4   :  { %2713 = vsyncpa [#allocation4 + $0x1], 1 }

// kernel: lstm_net_forward.6
= control target key start
LH: loop header
LB: loop body
LE: loop exit
PB: predicated region body
PF: predicated region fallthrough
CT: control target
= control target key end

     0   :  { %8 = vsyncpa [#allocation3], 0  ;;  %s5736_s0 = inlined_call_operand.vmem [shape: f32[8,12288], index: 0, kind: input, shape index: {}]   ;;  %s5737_s1 = inlined_call_operand.hbm [shape: bf16[12288,2048], index: 1, kind: input, shape index: {}]   ;;  %s5738_s2 = inlined_call_operand.vmem [shape: f32[1,2048], index: 2, kind: input, shape index: {}]   ;;  %s5739_s3 = inlined_call_operand.vmem [shape: f32[8,2048], index: 3, kind: output, shape index: {}]  }
   0x1   :  { %10 = vsyncpa [#allocation3 + $0x1], 0  ;;  %s4944_s12 = smov 0   ;;  %s4946_s13 = smov 0  }
   0x2   :  { %s4948_s14 = smov 0   ;;  %s4950_s15 = smov 0  }
   0x3   :  { %s4952_s16 = smov 0   ;;  %s4954_s17 = smov 0  }
   0x4   :  { %s4956_s18 = smov 0   ;;  %s4958_s19 = smov 0  }
   0x5 LB: > { %s4213_s20 = sadd.s32 4294967295, %s4917_s19   ;;  %s25_s21 = sadd.s32 1, %s4909_s17  ;;  %s4917_s19 = sphi %s4958_s19, %s16_s19   ;;  %s4913_s18 = sphi %s4956_s18, %s5749_s18   ;;  %s4909_s17 = sphi %s4954_s17, %s5748_s17   ;;  %s4905_s16 = sphi %s4952_s16, %s5747_s16   ;;  %s4901_s15 = sphi %s4950_s15, %s5746_s15   ;;  %s4897_s14 = sphi %s4948_s14, %s5745_s14   ;;  %s4893_s13 = sphi %s4946_s13, %s5744_s13   ;;  %s4889_s12 = sphi %s4944_s12, %s5743_s12  }
   0x6   : > { %p26_p0 = scmp.ge.s32.totalorder %s25_s21, 12  ;;  %s28_s22 = sadd.s32 1, %s4913_s18 }
   0x7   : > { %s63_s23 = sadd.s32 1, %s4897_s14  ;;  %p70_p1 = scmp.ne.s32.totalorder %s4897_s14, %s4893_s13 }
   0x8   : > { %s5751_s21 = smov (%p26_p0, %s25_s21), 0  ;;  %s5753_s22 = smov (!%p26_p0, %s28_s22), %s4913_s18 }
   0x9   : > { %s58_s24 = ssub.s32 %s4909_s17, %s5751_s21  ;;  %p71_p2 = scmp.eq.s32.totalorder %s4917_s19, 0 }
   0xa   : > { %p30_p3 = scmp.ge.s32.totalorder %s5753_s22, 2  ;;  %p76_p4 = scmp.ne.s32.totalorder %s4893_s13, %s4889_s12 }
   0xb   : > { %p4995_p5 = por %p71_p2, %p70_p1  ;;  %p77_p6 = scmp.eq.s32.totalorder %s4213_s20, 0 }
   0xc   : > { %s5755_s22 = smov (%p30_p3, %s5753_s22), 0  ;;  %p4752_p8 = scmp.lt.s32.totalorder %s4917_s19, 24 }
   0xd   : > { %p5001_p7 = por %p77_p6, %p76_p4  ;;  %s59_s27 = ssub.s32 %s4913_s18, %s5755_s22 }
   0xe   : > { %s60_s28 = sor.u32 %s59_s27, %s58_s24  ;;  %s161_s29 = sand.u32 1, %s4897_s14  }
   0xf   : > { %p61_p9 = scmp.eq.s32.totalorder %s60_s28, 0  ;;  %s4217_s30 = sshll.u32 %s161_s29, 12 }
  0x10   : > { %s4219_s4 = sshll.u32 %s4913_s18, 3  ;;  %s4745_s6 = sshll.u32 %s4909_s17, 11 }
  0x11   : > { %s5011_s5 = scalar_select %p61_p9, %s4897_s14, %s63_s23  }
  0x12   : > { %s172_s7 = sadd.s32 %s4745_s6, %s4219_s4  ;;  %s165_s8 = scalar_lea.vmem [#allocation2], %s4217_s30 }
  0x13   : > { %s175_s9 = sshll.u32 %s165_s8, 4  ;;  %s4221_s10 = sshll.u32 %s172_s7, 6  ;;  %s5014_s9 = int_to_ptr.vmem [resolvable:$true] %s175_s9 }
  0x14   : > { %s5019_s20 = scalar_lea.hbm %s5737_s1, %s4221_s10  ;;  %p5025_p10 = pnand %p4752_p8, %p4995_p5 }
  0x15   : > { %s5029_s24 = scalar_lea.sflag [#allocation3], %s161_s29  ;;  %s4821_s27 = scalar_lea.hbm %s5019_s20, 65536 }
  0x16   : > { %p4822_p11 = scmp.ne.s32.totalorder %s5019_s20, %s4821_s27  ;;  %p4823_p12 = pneg %p5025_p10 }
  0x17   : > { %s4826_s30 = scalar_lea.hbm %s5737_s1, 1572864  ;;  %p4827_p1 = scmp.lt.u32.totalorder %s5019_s20, %s5737_s1 }
  0x18   : > { %p4824_p13 = pnand %p4823_p12, %p4822_p11  ;;  %p4828_p2 = scmp.lt.u32.totalorder %s4826_s30, %s4821_s27 }
  0x19   : > { %p4830_p4 = scmp.lt.u32.totalorder %s4821_s27, %s5019_s20 }
  0x1a   : > { %p4825_p0 = pneg %p4824_p13  ;;  %p4829_p3 = por %p4828_p2, %p4827_p1 }
  0x1c   : > { %p4831_p5 = por %p4830_p4, %p4829_p3 }
  0x1e   : > { %p4832_p6 = pnand %p4831_p5, %p4825_p0 }
  0x20   : > { %4835 = shalt.err (!%p4832_p6)
}
  0x21   : > { %s4836_s29 = scalar_lea.vmem %s5014_s9, 65536  ;;  %s4919_s7 = smov [#allocation2]  }
  0x22   : > { %p4837_p8 = scmp.ne.s32.totalorder %s5014_s9, %s4836_s29  ;;  %s4841_s8 = sshll.u32 %s4919_s7, 4  ;;  %s4842_s8 = int_to_ptr.vmem [resolvable:$false] %s4841_s8 }
  0x23   : > { %s4843_s10 = scalar_lea.vmem %s4842_s8, 131072  ;;  %p4844_p13 = scmp.lt.s32.totalorder %s5014_s9, %s4842_s8 }
  0x24   : > { %p4839_p9 = pnand %p4837_p8, %p4823_p12  ;;  %p4845_p1 = scmp.lt.s32.totalorder %s4843_s10, %s4836_s29 }
  0x26   : > { %p4840_p11 = pneg %p4839_p9  ;;  %p4846_p2 = por %p4845_p1, %p4844_p13 }
  0x28   : > { %p4847_p3 = pnand %p4846_p2, %p4840_p11 }
  0x2a   : > { %4850 = shalt.err (!%p4847_p3)
}
  0x2b   : > { %s4920_s11 = smov 1024   ;;  %s4921_s12 = smov 512  }
  0x2c   : > { %s4922_s27 = smov 32   ;;  %p4222_p12 = scmp.ge.s32.totalorder %s4917_s19, 1 }
  0x2d   : > { %4751 = dma.hbm_to_vmem [thread:$0]  (!%p5025_p10), %s5019_s20, 65536, %s5014_s9, %s5029_s24, %s4920_s11, %s4921_s12, %s4922_s27  }
  0x2e   : > { %p191_p0 = scmp.lt.s32.totalorder %s4917_s19, 25 }
  0x30   : > { %p192_p4 = pnand %p4222_p12, %p191_p0 }
  0x31   : > { %s197_s25 = sand.u32 (!%p192_p4), 1, %s4893_s13  }
  0x32   : > { %195 = sbr.rel (%p192_p4) target bundleno = 821 (0x335), region = 32  ;;  %s4223_s28 = sshll.u32 (!%p192_p4), %s197_s25, 12 }
  0x33   : > { %s198_s30 = scalar_lea.sflag (!%p192_p4), [#allocation3], %s197_s25  ;;  %s5060_s4 = scalar_lea.vmem (!%p192_p4), [#allocation2], %s4223_s28 }
  0x39   : > { %4884 = dma.done.wait (%p5001_p7), %s198_s30, 65536  }
  0x3a   : > { %4886 = vsyncadd (%p5001_p7), %s198_s30, 4294901760  ;;  %s4224_s23 = sshll.u32 %s4901_s15, 3  ;;  %s4226_s9 = sshll.u32 %s4905_s16, 3 }
  0x3b   : > { %p234_p10 = scmp.lt.s32.totalorder %s4224_s23, 95  ;;  %p242_p5 = scmp.lt.s32.totalorder %s4226_s9, 15 }
  0x3c   : > { %p4229_p7 = scmp.ne.s32.totalorder %s4901_s15, 0 }
  0x3d   : > { %s5757_s23 = smov (!%p234_p10, %s4224_s23), 95  ;;  %s5759_s9 = smov (!%p242_p5, %s4226_s9), 15 }
  0x3e   : > { %s4225_s20 = sshll.u32 %s5757_s23, 3  ;;  %s244_s8 = scalar_lea.vmem %s5738_s2, %s5759_s9  ;;  %v4923_v0 = vmov (!%p4229_p7), 0.0  }
  0x3f   : > { %s5073_s29 = scalar_lea.vmem %s5736_s0, %s4225_s20  ;;  %s4228_s10 = sshll.u32 %s5759_s9, 3 }
  0x40   : > { %s5083_s12 = scalar_lea.vmem %s5739_s3, %s4228_s10  ;;  %255 = sbr.rel (%p4229_p7) target bundleno = 71 (0x47), region = 40 }
  0x41   : > { %256 = vst [vmem:[%s5083_s12] sm:$0xff] (!%p4229_p7), %v4923_v0  ;;  %257 = vst [vmem:[%s5083_s12 + $0x8] sm:$0xff] (!%p4229_p7), %v4923_v0 }
  0x42   : > { %258 = vst [vmem:[%s5083_s12 + $0x10] sm:$0xff] (!%p4229_p7), %v4923_v0  ;;  %259 = vst [vmem:[%s5083_s12 + $0x18] sm:$0xff] (!%p4229_p7), %v4923_v0 }
  0x43   : > { %260 = vst [vmem:[%s5083_s12 + $0x20] sm:$0xff] (!%p4229_p7), %v4923_v0  ;;  %261 = vst [vmem:[%s5083_s12 + $0x28] sm:$0xff] (!%p4229_p7), %v4923_v0 }
  0x44   : > { %262 = vst [vmem:[%s5083_s12 + $0x30] sm:$0xff] (!%p4229_p7), %v4923_v0  ;;  %263 = vst [vmem:[%s5083_s12 + $0x38] sm:$0xff] (!%p4229_p7), %v4923_v0 }
  0x47 PF: > { %v288_v1 = vld [vmem:[%s5060_s4] sm:$0xff]  ;;  %v273_v54 = vld [vmem:[%s5073_s29 + $0x8] sm:$0xff]  ;;  %p4742_p6 = scmp.ne.s32.totalorder %s4901_s15, 11 }
  0x48   : > { %v292_v2 = vld [vmem:[%s5060_s4 + $0x20] sm:$0xff]  ;;  %v5126_v59 = vpack.c.bf16 %v273_v54, %v273_v54 }
  0x49   : > { %v416_v3 = vld [vmem:[%s5060_s4 + $0x400] sm:$0xff]  ;;  %v4231_v4 = vcombine.high %v288_v1, %v292_v2  ;;  %v4230_v6 = vcombine.low %v288_v1, %v292_v2 }
  0x4a   : > { %v420_v5 = vld [vmem:[%s5060_s4 + $0x420] sm:$0xff]  ;;  %3392 = vmatprep.mubr.bf16.mxu0 %v5126_v59 }
  0x4b   : > { %v296_v7 = vld [vmem:[%s5060_s4 + $0x40] sm:$0xff]  ;;  %v4359_v9 = vcombine.high %v416_v3, %v420_v5  ;;  %v4358_v10 = vcombine.low %v416_v3, %v420_v5  ;;  %3360 = vmatprep.subr.bf16.mxu0 %v4231_v4 }
  0x4c   : > { %v300_v8 = vld [vmem:[%s5060_s4 + $0x60] sm:$0xff]  ;;  %3361 = vmatpush1.bf16.msra.mxu0 %v4230_v6 }
  0x4d   : > { %v4239_v11 = vcombine.high %v296_v7, %v300_v8  ;;  %v424_v12 = vld [vmem:[%s5060_s4 + $0x440] sm:$0xff]  ;;  %3401 = vmatprep.subr.bf16.mxu1 %v4359_v9  ;;  %v4238_v19 = vcombine.low %v296_v7, %v300_v8 }
  0x4e   : > { %v428_v13 = vld [vmem:[%s5060_s4 + $0x460] sm:$0xff]  ;;  %3402 = vmatpush1.bf16.msra.mxu1 %v4358_v10 }
  0x4f   : > { %v304_v14 = vld [vmem:[%s5060_s4 + $0x80] sm:$0xff]  ;;  %v4367_v15 = vcombine.high %v424_v12, %v428_v13  ;;  %3362 = vmatprep.subr.bf16.mxu0 %v4239_v11  ;;  %v4366_v20 = vcombine.low %v424_v12, %v428_v13 }
  0x50   : > { %v308_v16 = vld [vmem:[%s5060_s4 + $0xa0] sm:$0xff]  ;;  %3363 = vmatpush1.bf16.msra.mxu0 %v4238_v19 }
  0x51   : > { %v432_v17 = vld [vmem:[%s5060_s4 + $0x480] sm:$0xff]  ;;  %v4247_v21 = vcombine.high %v304_v14, %v308_v16  ;;  %3403 = vmatprep.subr.bf16.mxu1 %v4367_v15  ;;  %v4246_v27 = vcombine.low %v304_v14, %v308_v16 }
  0x52   : > { %v436_v18 = vld [vmem:[%s5060_s4 + $0x4a0] sm:$0xff]  ;;  %3404 = vmatpush1.bf16.msra.mxu1 %v4366_v20 }
  0x53   : > { %v4375_v22 = vcombine.high %v432_v17, %v436_v18  ;;  %v312_v23 = vld [vmem:[%s5060_s4 + $0xc0] sm:$0xff]  ;;  %3364 = vmatprep.subr.bf16.mxu0 %v4247_v21  ;;  %v4374_v28 = vcombine.low %v432_v17, %v436_v18 }
  0x54   : > { %v316_v24 = vld [vmem:[%s5060_s4 + $0xe0] sm:$0xff]  ;;  %3365 = vmatpush1.bf16.msra.mxu0 %v4246_v27 }
  0x55   : > { %v440_v25 = vld [vmem:[%s5060_s4 + $0x4c0] sm:$0xff]  ;;  %v4255_v29 = vcombine.high %v312_v23, %v316_v24  ;;  %3405 = vmatprep.subr.bf16.mxu1 %v4375_v22  ;;  %v4254_v35 = vcombine.low %v312_v23, %v316_v24 }
  0x56   : > { %v444_v26 = vld [vmem:[%s5060_s4 + $0x4e0] sm:$0xff]  ;;  %3406 = vmatpush1.bf16.msra.mxu1 %v4374_v28 }
  0x57   : > { %v4383_v30 = vcombine.high %v440_v25, %v444_v26  ;;  %v320_v31 = vld [vmem:[%s5060_s4 + $0x100] sm:$0xff]  ;;  %3366 = vmatprep.subr.bf16.mxu0 %v4255_v29  ;;  %v4382_v36 = vcombine.low %v440_v25, %v444_v26 }
  0x58   : > { %v324_v32 = vld [vmem:[%s5060_s4 + $0x120] sm:$0xff]  ;;  %3367 = vmatpush1.bf16.msra.mxu0 %v4254_v35 }
  0x59   : > { %v448_v33 = vld [vmem:[%s5060_s4 + $0x500] sm:$0xff]  ;;  %v4263_v37 = vcombine.high %v320_v31, %v324_v32  ;;  %3407 = vmatprep.subr.bf16.mxu1 %v4383_v30  ;;  %v4262_v43 = vcombine.low %v320_v31, %v324_v32 }
  0x5a   : > { %v452_v34 = vld [vmem:[%s5060_s4 + $0x520] sm:$0xff]  ;;  %3408 = vmatpush1.bf16.msra.mxu1 %v4382_v36 }
  0x5b   : > { %v4391_v38 = vcombine.high %v448_v33, %v452_v34  ;;  %v328_v39 = vld [vmem:[%s5060_s4 + $0x140] sm:$0xff]  ;;  %3368 = vmatprep.subr.bf16.mxu0 %v4263_v37  ;;  %v4390_v44 = vcombine.low %v448_v33, %v452_v34 }
  0x5c   : > { %v332_v40 = vld [vmem:[%s5060_s4 + $0x160] sm:$0xff]  ;;  %3369 = vmatpush1.bf16.msra.mxu0 %v4262_v43 }
  0x5d   : > { %v456_v41 = vld [vmem:[%s5060_s4 + $0x540] sm:$0xff]  ;;  %v4271_v45 = vcombine.high %v328_v39, %v332_v40  ;;  %3409 = vmatprep.subr.bf16.mxu1 %v4391_v38  ;;  %v4270_v51 = vcombine.low %v328_v39, %v332_v40 }
  0x5e   : > { %v460_v42 = vld [vmem:[%s5060_s4 + $0x560] sm:$0xff]  ;;  %3410 = vmatpush1.bf16.msra.mxu1 %v4390_v44 }
  0x5f   : > { %v4399_v46 = vcombine.high %v456_v41, %v460_v42  ;;  %v336_v47 = vld [vmem:[%s5060_s4 + $0x180] sm:$0xff]  ;;  %3370 = vmatprep.subr.bf16.mxu0 %v4271_v45  ;;  %v4398_v52 = vcombine.low %v456_v41, %v460_v42 }
  0x60   : > { %v340_v48 = vld [vmem:[%s5060_s4 + $0x1a0] sm:$0xff]  ;;  %3371 = vmatpush1.bf16.msra.mxu0 %v4270_v51 }
  0x61   : > { %v464_v49 = vld [vmem:[%s5060_s4 + $0x580] sm:$0xff]  ;;  %v4279_v53 = vcombine.high %v336_v47, %v340_v48  ;;  %3411 = vmatprep.subr.bf16.mxu1 %v4399_v46  ;;  %v4278_v63 = vcombine.low %v336_v47, %v340_v48 }
  0x62   : > { %v468_v50 = vld [vmem:[%s5060_s4 + $0x5a0] sm:$0xff]  ;;  %3412 = vmatpush1.bf16.msra.mxu1 %v4398_v52 }
  0x63   : > { %v275_v55 = vld [vmem:[%s5073_s29 + $0x18] sm:$0xff]  ;;  %v4407_v56 = vcombine.high %v464_v49, %v468_v50  ;;  %3372 = vmatprep.subr.bf16.mxu0 %v4279_v53  ;;  %v4406_v0 = vcombine.low %v464_v49, %v468_v50 }
  0x64   : > { %v344_v57 = vld [vmem:[%s5060_s4 + $0x1c0] sm:$0xff]  ;;  %v5128_v60 = vpack.c.bf16 %v275_v55, %v275_v55  ;;  %3373 = vmatpush1.bf16.msra.mxu0 %v4278_v63 }
  0x65   : > { %v348_v58 = vld [vmem:[%s5060_s4 + $0x1e0] sm:$0xff]  ;;  %3413 = vmatprep.subr.bf16.mxu1 %v4407_v56 }
  0x66   : > { %v472_v61 = vld [vmem:[%s5060_s4 + $0x5c0] sm:$0xff]  ;;  %v4287_v1 = vcombine.high %v344_v57, %v348_v58  ;;  %3433 = vmatprep.mubr.bf16.mxu1 %v5128_v60  ;;  %v4286_v7 = vcombine.low %v344_v57, %v348_v58  ;;  %3414 = vmatpush1.bf16.msra.mxu1 %v4406_v0 }
  0x67   : > { %v476_v62 = vld [vmem:[%s5060_s4 + $0x5e0] sm:$0xff] }
  0x68   : > { %v4415_v2 = vcombine.high %v472_v61, %v476_v62  ;;  %v352_v3 = vld [vmem:[%s5060_s4 + $0x200] sm:$0xff]  ;;  %3374 = vmatprep.subr.bf16.mxu0 %v4287_v1  ;;  %v4414_v8 = vcombine.low %v472_v61, %v476_v62 }
  0x69   : > { %v356_v4 = vld [vmem:[%s5060_s4 + $0x220] sm:$0xff]  ;;  %3375 = vmatpush1.bf16.msra.mxu0 %v4286_v7 }
  0x6a   : > { %v480_v5 = vld [vmem:[%s5060_s4 + $0x600] sm:$0xff]  ;;  %v4295_v9 = vcombine.high %v352_v3, %v356_v4  ;;  %3415 = vmatprep.subr.bf16.mxu1 %v4415_v2  ;;  %v4294_v15 = vcombine.low %v352_v3, %v356_v4 }
  0x6b   : > { %v484_v6 = vld [vmem:[%s5060_s4 + $0x620] sm:$0xff]  ;;  %3416 = vmatpush1.bf16.msra.mxu1 %v4414_v8 }
  0x6c   : > { %v4423_v10 = vcombine.high %v480_v5, %v484_v6  ;;  %v360_v11 = vld [vmem:[%s5060_s4 + $0x240] sm:$0xff]  ;;  %3376 = vmatprep.subr.bf16.mxu0 %v4295_v9  ;;  %v4422_v16 = vcombine.low %v480_v5, %v484_v6 }
  0x6d   : > { %v364_v12 = vld [vmem:[%s5060_s4 + $0x260] sm:$0xff]  ;;  %3377 = vmatpush1.bf16.msra.mxu0 %v4294_v15 }
  0x6e   : > { %v488_v13 = vld [vmem:[%s5060_s4 + $0x640] sm:$0xff]  ;;  %v4303_v17 = vcombine.high %v360_v11, %v364_v12  ;;  %3417 = vmatprep.subr.bf16.mxu1 %v4423_v10  ;;  %v4302_v23 = vcombine.low %v360_v11, %v364_v12  ;;  %v272_v10 = vld [vmem:[%s5073_s29] sm:$0xff]  ;;  %v274_v12 = vld [vmem:[%s5073_s29 + $0x10] sm:$0xff] }
  0x6f   : > { %v492_v14 = vld [vmem:[%s5060_s4 + $0x660] sm:$0xff]  ;;  %3418 = vmatpush1.bf16.msra.mxu1 %v4422_v16 }
  0x70   : > { %v4431_v18 = vcombine.high %v488_v13, %v492_v14  ;;  %v368_v19 = vld [vmem:[%s5060_s4 + $0x280] sm:$0xff]  ;;  %3378 = vmatprep.subr.bf16.mxu0 %v4303_v17  ;;  %v4430_v24 = vcombine.low %v488_v13, %v492_v14  ;;  %v5174_v17 = vpack.c.bf16 %v272_v10, %v272_v10 }
  0x71   : > { %v372_v20 = vld [vmem:[%s5060_s4 + $0x2a0] sm:$0xff]  ;;  %3379 = vmatpush1.bf16.msra.mxu0 %v4302_v23 }
  0x72   : > { %v496_v21 = vld [vmem:[%s5060_s4 + $0x680] sm:$0xff]  ;;  %v4311_v25 = vcombine.high %v368_v19, %v372_v20  ;;  %3419 = vmatprep.subr.bf16.mxu1 %v4431_v18  ;;  %v4310_v31 = vcombine.low %v368_v19, %v372_v20  ;;  %v277_v20 = vld [vmem:[%s5073_s29 + $0x28] sm:$0xff] }
  0x73   : > { %v500_v22 = vld [vmem:[%s5060_s4 + $0x6a0] sm:$0xff]  ;;  %3420 = vmatpush1.bf16.msra.mxu1 %v4430_v24 }
  0x74   : > { %v4439_v26 = vcombine.high %v496_v21, %v500_v22  ;;  %v376_v27 = vld [vmem:[%s5060_s4 + $0x2c0] sm:$0xff]  ;;  %3380 = vmatprep.subr.bf16.mxu0 %v4311_v25  ;;  %v4438_v32 = vcombine.low %v496_v21, %v500_v22  ;;  %v5179_v21 = vpack.c.bf16 %v274_v12, %v274_v12 }
  0x75   : > { %v380_v28 = vld [vmem:[%s5060_s4 + $0x2e0] sm:$0xff]  ;;  %3381 = vmatpush1.bf16.msra.mxu0 %v4310_v31 }
  0x76   : > { %v504_v29 = vld [vmem:[%s5060_s4 + $0x6c0] sm:$0xff]  ;;  %v4319_v33 = vcombine.high %v376_v27, %v380_v28  ;;  %3421 = vmatprep.subr.bf16.mxu1 %v4439_v26  ;;  %v4318_v39 = vcombine.low %v376_v27, %v380_v28 }
  0x77   : > { %v508_v30 = vld [vmem:[%s5060_s4 + $0x6e0] sm:$0xff]  ;;  %3422 = vmatpush1.bf16.msra.mxu1 %v4438_v32 }
  0x78   : > { %v4447_v34 = vcombine.high %v504_v29, %v508_v30  ;;  %v384_v35 = vld [vmem:[%s5060_s4 + $0x300] sm:$0xff]  ;;  %3382 = vmatprep.subr.bf16.mxu0 %v4319_v33  ;;  %v4446_v40 = vcombine.low %v504_v29, %v508_v30  ;;  %v5184_v29 = vpack.c.bf16 %v277_v20, %v277_v20 }
  0x79   : > { %v388_v36 = vld [vmem:[%s5060_s4 + $0x320] sm:$0xff]  ;;  %3383 = vmatpush1.bf16.msra.mxu0 %v4318_v39 }
  0x7a   : > { %v512_v37 = vld [vmem:[%s5060_s4 + $0x700] sm:$0xff]  ;;  %v4327_v41 = vcombine.high %v384_v35, %v388_v36  ;;  %3423 = vmatprep.subr.bf16.mxu1 %v4447_v34  ;;  %v4326_v47 = vcombine.low %v384_v35, %v388_v36 }
  0x7b   : > { %v516_v38 = vld [vmem:[%s5060_s4 + $0x720] sm:$0xff]  ;;  %3424 = vmatpush1.bf16.msra.mxu1 %v4446_v40 }
  0x7c   : > { %v4455_v42 = vcombine.high %v512_v37, %v516_v38  ;;  %v392_v43 = vld [vmem:[%s5060_s4 + $0x340] sm:$0xff]  ;;  %3384 = vmatprep.subr.bf16.mxu0 %v4327_v41  ;;  %v4454_v48 = vcombine.low %v512_v37, %v516_v38 }
  0x7d   : > { %v396_v44 = vld [vmem:[%s5060_s4 + $0x360] sm:$0xff]  ;;  %3385 = vmatpush1.bf16.msra.mxu0 %v4326_v47 }
  0x7e   : > { %v520_v45 = vld [vmem:[%s5060_s4 + $0x740] sm:$0xff]  ;;  %v4335_v49 = vcombine.high %v392_v43, %v396_v44  ;;  %3425 = vmatprep.subr.bf16.mxu1 %v4455_v42  ;;  %v4334_v55 = vcombine.low %v392_v43, %v396_v44 }
  0x7f   : > { %v524_v46 = vld [vmem:[%s5060_s4 + $0x760] sm:$0xff]  ;;  %3426 = vmatpush1.bf16.msra.mxu1 %v4454_v48 }
  0x80   : > { %v4463_v50 = vcombine.high %v520_v45, %v524_v46  ;;  %v400_v51 = vld [vmem:[%s5060_s4 + $0x380] sm:$0xff]  ;;  %3386 = vmatprep.subr.bf16.mxu0 %v4335_v49  ;;  %v4462_v56 = vcombine.low %v520_v45, %v524_v46 }
  0x81   : > { %v404_v52 = vld [vmem:[%s5060_s4 + $0x3a0] sm:$0xff]  ;;  %3387 = vmatpush1.bf16.msra.mxu0 %v4334_v55 }
  0x82   : > { %v528_v53 = vld [vmem:[%s5060_s4 + $0x780] sm:$0xff]  ;;  %v4343_v57 = vcombine.high %v400_v51, %v404_v52  ;;  %3427 = vmatprep.subr.bf16.mxu1 %v4463_v50  ;;  %v4342_v1 = vcombine.low %v400_v51, %v404_v52 }
  0x83   : > { %v532_v54 = vld [vmem:[%s5060_s4 + $0x7a0] sm:$0xff]  ;;  %3428 = vmatpush1.bf16.msra.mxu1 %v4462_v56 }
  0x84   : > { %v4471_v58 = vcombine.high %v528_v53, %v532_v54  ;;  %v408_v61 = vld [vmem:[%s5060_s4 + $0x3c0] sm:$0xff]  ;;  %3388 = vmatprep.subr.bf16.mxu0 %v4343_v57  ;;  %v4470_v2 = vcombine.low %v528_v53, %v532_v54 }
  0x85   : > { %v412_v62 = vld [vmem:[%s5060_s4 + $0x3e0] sm:$0xff]  ;;  %3389 = vmatpush1.bf16.msra.mxu0 %v4342_v1 }
  0x86   : > { %v536_v63 = vld [vmem:[%s5060_s4 + $0x7c0] sm:$0xff]  ;;  %v4351_v3 = vcombine.high %v408_v61, %v412_v62  ;;  %3429 = vmatprep.subr.bf16.mxu1 %v4471_v58  ;;  %v4350_v9 = vcombine.low %v408_v61, %v412_v62 }
  0x87   : > { %v540_v0 = vld [vmem:[%s5060_s4 + $0x7e0] sm:$0xff]  ;;  %3430 = vmatpush1.bf16.msra.mxu1 %v4470_v2 }
  0x88   : > { %v4479_v4 = vcombine.high %v536_v63, %v540_v0  ;;  %v544_v5 = vld [vmem:[%s5060_s4 + $0x800] sm:$0xff]  ;;  %3390 = vmatprep.subr.bf16.mxu0 %v4351_v3  ;;  %v4478_v11 = vcombine.low %v536_v63, %v540_v0 }
  0x89   : > { %v548_v6 = vld [vmem:[%s5060_s4 + $0x820] sm:$0xff]  ;;  %3391 = vmatpush1.bf16.msra.mxu0 %v4350_v9 }
  0x8a   : > { %v672_v7 = vld [vmem:[%s5060_s4 + $0xc00] sm:$0xff]  ;;  %v4487_v13 = vcombine.high %v544_v5, %v548_v6  ;;  %3431 = vmatprep.subr.bf16.mxu1 %v4479_v4  ;;  %v4486_v22 = vcombine.low %v544_v5, %v548_v6 }
  0x8b   : > { %v676_v8 = vld [vmem:[%s5060_s4 + $0xc20] sm:$0xff]  ;;  %3432 = vmatpush1.bf16.msra.mxu1 %v4478_v11 }
  0x8c   : > { %v4615_v14 = vcombine.high %v672_v7, %v676_v8  ;;  %v552_v15 = vld [vmem:[%s5060_s4 + $0x840] sm:$0xff]  ;;  %3442 = vmatprep.subr.bf16.mxu0 %v4487_v13  ;;  %v4614_v24 = vcombine.low %v672_v7, %v676_v8  ;;  %3393 = vmatmul.mubr.bf16.vlgmr.msra.gmra.mrb[0].mxu0 %v5174_v17 }
  0x8d   : > { %v556_v16 = vld [vmem:[%s5060_s4 + $0x860] sm:$0xff]  ;;  %3443 = vmatpush1.bf16.msra.mxu0 %v4486_v22  ;;  %3474 = vmatprep.mubr.bf16.mxu0 %v5184_v29 }
  0x8e   : > { %v680_v18 = vld [vmem:[%s5060_s4 + $0xc40] sm:$0xff]  ;;  %v4495_v25 = vcombine.high %v552_v15, %v556_v16  ;;  %3483 = vmatprep.subr.bf16.mxu1 %v4615_v14  ;;  %3434 = vmatmul.mubr.bf16.vlgmr.msra.gmra.mrb[0].mxu1 %v5179_v21  ;;  %v4494_v33 = vcombine.low %v552_v15, %v556_v16 }
  0x8f   : > { %v684_v19 = vld [vmem:[%s5060_s4 + $0xc60] sm:$0xff]  ;;  %3484 = vmatpush1.bf16.msra.mxu1 %v4614_v24 }
  0x90   : > { %v279_v23 = vld [vmem:[%s5073_s29 + $0x38] sm:$0xff]  ;;  %v4623_v26 = vcombine.high %v680_v18, %v684_v19  ;;  %3444 = vmatprep.subr.bf16.mxu0 %v4495_v25  ;;  %v4622_v34 = vcombine.low %v680_v18, %v684_v19 }
  0x91   : > { %v560_v27 = vld [vmem:[%s5060_s4 + $0x880] sm:$0xff]  ;;  %v5189_v32 = vpack.c.bf16 %v279_v23, %v279_v23  ;;  %3445 = vmatpush1.bf16.msra.mxu0 %v4494_v33 }
  0x92   : > { %v564_v28 = vld [vmem:[%s5060_s4 + $0x8a0] sm:$0xff]  ;;  %3485 = vmatprep.subr.bf16.mxu1 %v4623_v26 }
  0x93   : > { %v688_v30 = vld [vmem:[%s5060_s4 + $0xc80] sm:$0xff]  ;;  %v4503_v35 = vcombine.high %v560_v27, %v564_v28  ;;  %3515 = vmatprep.mubr.bf16.mxu1 %v5189_v32  ;;  %v4502_v41 = vcombine.low %v560_v27, %v564_v28  ;;  %3486 = vmatpush1.bf16.msra.mxu1 %v4622_v34 }
  0x94   : > { %v692_v31 = vld [vmem:[%s5060_s4 + $0xca0] sm:$0xff] }
  0x95   : > { %v4631_v36 = vcombine.high %v688_v30, %v692_v31  ;;  %v568_v37 = vld [vmem:[%s5060_s4 + $0x8c0] sm:$0xff]  ;;  %3446 = vmatprep.subr.bf16.mxu0 %v4503_v35  ;;  %v4630_v42 = vcombine.low %v688_v30, %v692_v31 }
  0x96   : > { %v572_v38 = vld [vmem:[%s5060_s4 + $0x8e0] sm:$0xff]  ;;  %3447 = vmatpush1.bf16.msra.mxu0 %v4502_v41 }
  0x97   : > { %v696_v39 = vld [vmem:[%s5060_s4 + $0xcc0] sm:$0xff]  ;;  %v4511_v43 = vcombine.high %v568_v37, %v572_v38  ;;  %3487 = vmatprep.subr.bf16.mxu1 %v4631_v36  ;;  %v4510_v49 = vcombine.low %v568_v37, %v572_v38 }
  0x98   : > { %v700_v40 = vld [vmem:[%s5060_s4 + $0xce0] sm:$0xff]  ;;  %3488 = vmatpush1.bf16.msra.mxu1 %v4630_v42 }
  0x99   : > { %v4639_v44 = vcombine.high %v696_v39, %v700_v40  ;;  %v576_v45 = vld [vmem:[%s5060_s4 + $0x900] sm:$0xff]  ;;  %3448 = vmatprep.subr.bf16.mxu0 %v4511_v43  ;;  %v4638_v50 = vcombine.low %v696_v39, %v700_v40 }
  0x9a   : > { %v580_v46 = vld [vmem:[%s5060_s4 + $0x920] sm:$0xff]  ;;  %3449 = vmatpush1.bf16.msra.mxu0 %v4510_v49 }
  0x9b   : > { %v704_v47 = vld [vmem:[%s5060_s4 + $0xd00] sm:$0xff]  ;;  %v4519_v51 = vcombine.high %v576_v45, %v580_v46  ;;  %3489 = vmatprep.subr.bf16.mxu1 %v4639_v44  ;;  %v4518_v57 = vcombine.low %v576_v45, %v580_v46 }
  0x9c   : > { %v708_v48 = vld [vmem:[%s5060_s4 + $0xd20] sm:$0xff]  ;;  %3490 = vmatpush1.bf16.msra.mxu1 %v4638_v50 }
  0x9d   : > { %v4647_v52 = vcombine.high %v704_v47, %v708_v48  ;;  %v584_v53 = vld [vmem:[%s5060_s4 + $0x940] sm:$0xff]  ;;  %3450 = vmatprep.subr.bf16.mxu0 %v4519_v51  ;;  %v4646_v58 = vcombine.low %v704_v47, %v708_v48 }
  0x9e   : > { %v588_v54 = vld [vmem:[%s5060_s4 + $0x960] sm:$0xff]  ;;  %3451 = vmatpush1.bf16.msra.mxu0 %v4518_v57 }
  0x9f   : > { %v712_v55 = vld [vmem:[%s5060_s4 + $0xd40] sm:$0xff]  ;;  %v4527_v61 = vcombine.high %v584_v53, %v588_v54  ;;  %3491 = vmatprep.subr.bf16.mxu1 %v4647_v52  ;;  %v4526_v3 = vcombine.low %v584_v53, %v588_v54 }
  0xa0   : > { %v716_v56 = vld [vmem:[%s5060_s4 + $0xd60] sm:$0xff]  ;;  %3492 = vmatpush1.bf16.msra.mxu1 %v4646_v58 }
  0xa1   : > { %v4655_v62 = vcombine.high %v712_v55, %v716_v56  ;;  %v592_v63 = vld [vmem:[%s5060_s4 + $0x980] sm:$0xff]  ;;  %3452 = vmatprep.subr.bf16.mxu0 %v4527_v61  ;;  %v4654_v4 = vcombine.low %v712_v55, %v716_v56 }
  0xa2   : > { %v596_v0 = vld [vmem:[%s5060_s4 + $0x9a0] sm:$0xff]  ;;  %3453 = vmatpush1.bf16.msra.mxu0 %v4526_v3 }
  0xa3   : > { %v720_v1 = vld [vmem:[%s5060_s4 + $0xd80] sm:$0xff]  ;;  %v4535_v5 = vcombine.high %v592_v63, %v596_v0  ;;  %3493 = vmatprep.subr.bf16.mxu1 %v4655_v62  ;;  %v4534_v11 = vcombine.low %v592_v63, %v596_v0 }
  0xa4   : > { %v724_v2 = vld [vmem:[%s5060_s4 + $0xda0] sm:$0xff]  ;;  %3494 = vmatpush1.bf16.msra.mxu1 %v4654_v4 }
  0xa5   : > { %v4663_v6 = vcombine.high %v720_v1, %v724_v2  ;;  %v600_v7 = vld [vmem:[%s5060_s4 + $0x9c0] sm:$0xff]  ;;  %3454 = vmatprep.subr.bf16.mxu0 %v4535_v5  ;;  %v4662_v12 = vcombine.low %v720_v1, %v724_v2 }
  0xa6   : > { %v604_v8 = vld [vmem:[%s5060_s4 + $0x9e0] sm:$0xff]  ;;  %3455 = vmatpush1.bf16.msra.mxu0 %v4534_v11 }
  0xa7   : > { %v728_v9 = vld [vmem:[%s5060_s4 + $0xdc0] sm:$0xff]  ;;  %v4543_v13 = vcombine.high %v600_v7, %v604_v8  ;;  %3495 = vmatprep.subr.bf16.mxu1 %v4663_v6  ;;  %v4542_v20 = vcombine.low %v600_v7, %v604_v8 }
  0xa8   : > { %v732_v10 = vld [vmem:[%s5060_s4 + $0xde0] sm:$0xff]  ;;  %3496 = vmatpush1.bf16.msra.mxu1 %v4662_v12 }
  0xa9   : > { %v4671_v14 = vcombine.high %v728_v9, %v732_v10  ;;  %v608_v15 = vld [vmem:[%s5060_s4 + $0xa00] sm:$0xff]  ;;  %3456 = vmatprep.subr.bf16.mxu0 %v4543_v13  ;;  %v4670_v22 = vcombine.low %v728_v9, %v732_v10 }
  0xaa   : > { %v612_v16 = vld [vmem:[%s5060_s4 + $0xa20] sm:$0xff]  ;;  %3457 = vmatpush1.bf16.msra.mxu0 %v4542_v20 }
  0xab   : > { %v736_v18 = vld [vmem:[%s5060_s4 + $0xe00] sm:$0xff]  ;;  %v4551_v23 = vcombine.high %v608_v15, %v612_v16  ;;  %3497 = vmatprep.subr.bf16.mxu1 %v4671_v14  ;;  %v4550_v30 = vcombine.low %v608_v15, %v612_v16 }
  0xac   : > { %v740_v19 = vld [vmem:[%s5060_s4 + $0xe20] sm:$0xff]  ;;  %3498 = vmatpush1.bf16.msra.mxu1 %v4670_v22 }
  0xad   : > { %v4679_v24 = vcombine.high %v736_v18, %v740_v19  ;;  %v616_v25 = vld [vmem:[%s5060_s4 + $0xa40] sm:$0xff]  ;;  %3458 = vmatprep.subr.bf16.mxu0 %v4551_v23  ;;  %v4678_v31 = vcombine.low %v736_v18, %v740_v19  ;;  %v289_v23 = vld [vmem:[%s5060_s4 + $0x8] sm:$0xff] }
  0xae   : > { %v620_v26 = vld [vmem:[%s5060_s4 + $0xa60] sm:$0xff]  ;;  %3459 = vmatpush1.bf16.msra.mxu0 %v4550_v30 }
  0xaf   : > { %v744_v27 = vld [vmem:[%s5060_s4 + $0xe40] sm:$0xff]  ;;  %v4559_v33 = vcombine.high %v616_v25, %v620_v26  ;;  %3499 = vmatprep.subr.bf16.mxu1 %v4679_v24  ;;  %v4558_v39 = vcombine.low %v616_v25, %v620_v26  ;;  %v293_v24 = vld [vmem:[%s5060_s4 + $0x28] sm:$0xff] }
  0xb0   : > { %v748_v28 = vld [vmem:[%s5060_s4 + $0xe60] sm:$0xff]  ;;  %3500 = vmatpush1.bf16.msra.mxu1 %v4678_v31  ;;  %v417_v25 = vld [vmem:[%s5060_s4 + $0x408] sm:$0xff]  ;;  %v278_v31 = vld [vmem:[%s5073_s29 + $0x30] sm:$0xff] }
  0xb1   : > { %v4687_v34 = vcombine.high %v744_v27, %v748_v28  ;;  %v624_v35 = vld [vmem:[%s5060_s4 + $0xa80] sm:$0xff]  ;;  %3460 = vmatprep.subr.bf16.mxu0 %v4559_v33  ;;  %v4686_v40 = vcombine.low %v744_v27, %v748_v28  ;;  %v421_v26 = vld [vmem:[%s5060_s4 + $0x428] sm:$0xff]  ;;  %v4233_v33 = vcombine.high %v289_v23, %v293_v24 }
  0xb2   : > { %v628_v36 = vld [vmem:[%s5060_s4 + $0xaa0] sm:$0xff]  ;;  %3461 = vmatpush1.bf16.msra.mxu0 %v4558_v39  ;;  %v276_v28 = vld [vmem:[%s5073_s29 + $0x20] sm:$0xff] }
  0xb3   : > { %v752_v37 = vld [vmem:[%s5060_s4 + $0xe80] sm:$0xff]  ;;  %v4567_v41 = vcombine.high %v624_v35, %v628_v36  ;;  %3501 = vmatprep.subr.bf16.mxu1 %v4687_v34  ;;  %v4566_v47 = vcombine.low %v624_v35, %v628_v36  ;;  %v4361_v34 = vcombine.high %v417_v25, %v421_v26  ;;  %v297_v35 = vld [vmem:[%s5060_s4 + $0x48] sm:$0xff] }
  0xb4   : > { %v756_v38 = vld [vmem:[%s5060_s4 + $0xea0] sm:$0xff]  ;;  %3502 = vmatpush1.bf16.msra.mxu1 %v4686_v40  ;;  %v301_v36 = vld [vmem:[%s5060_s4 + $0x68] sm:$0xff]  ;;  %v5258_v40 = vpack.c.bf16 %v278_v31, %v278_v31 }
  0xb5   : > { %v4695_v42 = vcombine.high %v752_v37, %v756_v38  ;;  %v632_v43 = vld [vmem:[%s5060_s4 + $0xac0] sm:$0xff]  ;;  %3462 = vmatprep.subr.bf16.mxu0 %v4567_v41  ;;  %v4694_v48 = vcombine.low %v752_v37, %v756_v38  ;;  %v5254_v37 = vpack.c.bf16 %v276_v28, %v276_v28  ;;  %v425_v38 = vld [vmem:[%s5060_s4 + $0x448] sm:$0xff]  ;;  %v4232_v41 = vcombine.low %v289_v23, %v293_v24 }
  0xb6   : > { %v636_v44 = vld [vmem:[%s5060_s4 + $0xae0] sm:$0xff]  ;;  %3463 = vmatpush1.bf16.msra.mxu0 %v4566_v47  ;;  %v429_v39 = vld [vmem:[%s5060_s4 + $0x468] sm:$0xff] }
  0xb7   : > { %v760_v45 = vld [vmem:[%s5060_s4 + $0xec0] sm:$0xff]  ;;  %v4575_v49 = vcombine.high %v632_v43, %v636_v44  ;;  %3503 = vmatprep.subr.bf16.mxu1 %v4695_v42  ;;  %v4574_v55 = vcombine.low %v632_v43, %v636_v44  ;;  %v4360_v42 = vcombine.low %v417_v25, %v421_v26  ;;  %v4241_v43 = vcombine.high %v297_v35, %v301_v36  ;;  %v433_v47 = vld [vmem:[%s5060_s4 + $0x488] sm:$0xff] }
  0xb8   : > { %v764_v46 = vld [vmem:[%s5060_s4 + $0xee0] sm:$0xff]  ;;  %3504 = vmatpush1.bf16.msra.mxu1 %v4694_v48  ;;  %v4369_v44 = vcombine.high %v425_v38, %v429_v39  ;;  %v437_v48 = vld [vmem:[%s5060_s4 + $0x4a8] sm:$0xff] }
  0xb9   : > { %v4703_v50 = vcombine.high %v760_v45, %v764_v46  ;;  %v640_v51 = vld [vmem:[%s5060_s4 + $0xb00] sm:$0xff]  ;;  %3464 = vmatprep.subr.bf16.mxu0 %v4575_v49  ;;  %v4702_v56 = vcombine.low %v760_v45, %v764_v46  ;;  %v305_v45 = vld [vmem:[%s5060_s4 + $0x88] sm:$0xff]  ;;  %v4240_v49 = vcombine.low %v297_v35, %v301_v36 }
  0xba   : > { %v644_v52 = vld [vmem:[%s5060_s4 + $0xb20] sm:$0xff]  ;;  %3465 = vmatpush1.bf16.msra.mxu0 %v4574_v55  ;;  %v309_v46 = vld [vmem:[%s5060_s4 + $0xa8] sm:$0xff] }
  0xbb   : > { %v768_v53 = vld [vmem:[%s5060_s4 + $0xf00] sm:$0xff]  ;;  %v4583_v57 = vcombine.high %v640_v51, %v644_v52  ;;  %3505 = vmatprep.subr.bf16.mxu1 %v4703_v50  ;;  %v4582_v1 = vcombine.low %v640_v51, %v644_v52  ;;  %v4368_v50 = vcombine.low %v425_v38, %v429_v39  ;;  %v4249_v51 = vcombine.high %v305_v45, %v309_v46  ;;  %v441_v55 = vld [vmem:[%s5060_s4 + $0x4c8] sm:$0xff] }
  0xbc   : > { %v772_v54 = vld [vmem:[%s5060_s4 + $0xf20] sm:$0xff]  ;;  %3506 = vmatpush1.bf16.msra.mxu1 %v4702_v56  ;;  %v4377_v52 = vcombine.high %v433_v47, %v437_v48  ;;  %v445_v56 = vld [vmem:[%s5060_s4 + $0x4e8] sm:$0xff] }
  0xbd   : > { %v4711_v58 = vcombine.high %v768_v53, %v772_v54  ;;  %v648_v61 = vld [vmem:[%s5060_s4 + $0xb40] sm:$0xff]  ;;  %3466 = vmatprep.subr.bf16.mxu0 %v4583_v57  ;;  %v4710_v2 = vcombine.low %v768_v53, %v772_v54  ;;  %v313_v53 = vld [vmem:[%s5060_s4 + $0xc8] sm:$0xff]  ;;  %v4248_v57 = vcombine.low %v305_v45, %v309_v46 }
  0xbe   : > { %v652_v62 = vld [vmem:[%s5060_s4 + $0xb60] sm:$0xff]  ;;  %3467 = vmatpush1.bf16.msra.mxu0 %v4582_v1  ;;  %v317_v54 = vld [vmem:[%s5060_s4 + $0xe8] sm:$0xff] }
  0xbf   : > { %v776_v63 = vld [vmem:[%s5060_s4 + $0xf40] sm:$0xff]  ;;  %v4591_v3 = vcombine.high %v648_v61, %v652_v62  ;;  %3507 = vmatprep.subr.bf16.mxu1 %v4711_v58  ;;  %v4590_v9 = vcombine.low %v648_v61, %v652_v62  ;;  %v4376_v58 = vcombine.low %v433_v47, %v437_v48  ;;  %v4257_v61 = vcombine.high %v313_v53, %v317_v54  ;;  %v449_v1 = vld [vmem:[%s5060_s4 + $0x508] sm:$0xff] }
  0xc0   : > { %v780_v0 = vld [vmem:[%s5060_s4 + $0xf60] sm:$0xff]  ;;  %3508 = vmatpush1.bf16.msra.mxu1 %v4710_v2  ;;  %v4385_v62 = vcombine.high %v441_v55, %v445_v56  ;;  %v453_v2 = vld [vmem:[%s5060_s4 + $0x528] sm:$0xff] }
  0xc1   : > { %v4719_v4 = vcombine.high %v776_v63, %v780_v0  ;;  %v656_v5 = vld [vmem:[%s5060_s4 + $0xb80] sm:$0xff]  ;;  %3468 = vmatprep.subr.bf16.mxu0 %v4591_v3  ;;  %v4718_v10 = vcombine.low %v776_v63, %v780_v0  ;;  %v321_v63 = vld [vmem:[%s5060_s4 + $0x108] sm:$0xff]  ;;  %v4256_v3 = vcombine.low %v313_v53, %v317_v54 }
  0xc2   : > { %v660_v6 = vld [vmem:[%s5060_s4 + $0xba0] sm:$0xff]  ;;  %3469 = vmatpush1.bf16.msra.mxu0 %v4590_v9  ;;  %v325_v0 = vld [vmem:[%s5060_s4 + $0x128] sm:$0xff] }
  0xc3   : > { %v784_v7 = vld [vmem:[%s5060_s4 + $0xf80] sm:$0xff]  ;;  %v4599_v11 = vcombine.high %v656_v5, %v660_v6  ;;  %3509 = vmatprep.subr.bf16.mxu1 %v4719_v4  ;;  %v4598_v18 = vcombine.low %v656_v5, %v660_v6  ;;  %v4384_v4 = vcombine.low %v441_v55, %v445_v56  ;;  %v4265_v5 = vcombine.high %v321_v63, %v325_v0  ;;  %v457_v9 = vld [vmem:[%s5060_s4 + $0x548] sm:$0xff] }
  0xc4   : > { %v788_v8 = vld [vmem:[%s5060_s4 + $0xfa0] sm:$0xff]  ;;  %3510 = vmatpush1.bf16.msra.mxu1 %v4718_v10  ;;  %v4393_v6 = vcombine.high %v449_v1, %v453_v2  ;;  %v461_v10 = vld [vmem:[%s5060_s4 + $0x568] sm:$0xff] }
  0xc5   : > { %v4727_v12 = vcombine.high %v784_v7, %v788_v8  ;;  %v664_v13 = vld [vmem:[%s5060_s4 + $0xbc0] sm:$0xff]  ;;  %3470 = vmatprep.subr.bf16.mxu0 %v4599_v11  ;;  %v4726_v19 = vcombine.low %v784_v7, %v788_v8  ;;  %v329_v7 = vld [vmem:[%s5060_s4 + $0x148] sm:$0xff]  ;;  %v4264_v11 = vcombine.low %v321_v63, %v325_v0 }
  0xc6   : > { %v668_v14 = vld [vmem:[%s5060_s4 + $0xbe0] sm:$0xff]  ;;  %3471 = vmatpush1.bf16.msra.mxu0 %v4598_v18  ;;  %v333_v8 = vld [vmem:[%s5060_s4 + $0x168] sm:$0xff] }
  0xc7   : > { %v792_v15 = vld [vmem:[%s5060_s4 + $0xfc0] sm:$0xff]  ;;  %v4607_v20 = vcombine.high %v664_v13, %v668_v14  ;;  %3511 = vmatprep.subr.bf16.mxu1 %v4727_v12  ;;  %v4606_v27 = vcombine.low %v664_v13, %v668_v14  ;;  %v4392_v12 = vcombine.low %v449_v1, %v453_v2  ;;  %v4273_v13 = vcombine.high %v329_v7, %v333_v8  ;;  %v465_v18 = vld [vmem:[%s5060_s4 + $0x588] sm:$0xff] }
  0xc8   : > { %v796_v16 = vld [vmem:[%s5060_s4 + $0xfe0] sm:$0xff]  ;;  %3512 = vmatpush1.bf16.msra.mxu1 %v4726_v19  ;;  %v4401_v14 = vcombine.high %v457_v9, %v461_v10  ;;  %v469_v19 = vld [vmem:[%s5060_s4 + $0x5a8] sm:$0xff] }
  0xc9   : > { %v4735_v22 = vcombine.high %v792_v15, %v796_v16  ;;  %3472 = vmatprep.subr.bf16.mxu0 %v4607_v20  ;;  %v4734_v30 = vcombine.low %v792_v15, %v796_v16  ;;  %v337_v15 = vld [vmem:[%s5060_s4 + $0x188] sm:$0xff]  ;;  %v4272_v20 = vcombine.low %v329_v7, %v333_v8  ;;  %v4409_v24 = vcombine.high %v465_v18, %v469_v19 }
  0xca   : > { %3473 = vmatpush1.bf16.msra.mxu0 %v4606_v27  ;;  %v341_v16 = vld [vmem:[%s5060_s4 + $0x1a8] sm:$0xff]  ;;  %v4408_v31 = vcombine.low %v465_v18, %v469_v19 }
  0xcb   : > { %3513 = vmatprep.subr.bf16.mxu1 %v4735_v22  ;;  %3524 = vmatprep.subr.bf16.mxu0 %v4233_v33  ;;  %v4400_v22 = vcombine.low %v457_v9, %v461_v10  ;;  %v4281_v23 = vcombine.high %v337_v15, %v341_v16  ;;  %v345_v25 = vld [vmem:[%s5060_s4 + $0x1c8] sm:$0xff] }
  0xcc   : > { %3514 = vmatpush1.bf16.msra.mxu1 %v4734_v30  ;;  %v349_v26 = vld [vmem:[%s5060_s4 + $0x1e8] sm:$0xff]  ;;  %v4280_v30 = vcombine.low %v337_v15, %v341_v16 }
  0xcd   : > { %3565 = vmatprep.subr.bf16.mxu1 %v4361_v34  ;;  %3475 = vmatmul.mubr.bf16.vlgmr.msra.gmra.mrb[4].mxu0 %v5254_v37  ;;  %v473_v27 = vld [vmem:[%s5060_s4 + $0x5c8] sm:$0xff]  ;;  %v4289_v33 = vcombine.high %v345_v25, %v349_v26 }
  0xce   : > { %3525 = vmatpush1.bf16.msra.mxu0 %v4232_v41  ;;  %3556 = vmatprep.mubr.bf16.mxu0 %v5126_v59  ;;  %v477_v28 = vld [vmem:[%s5060_s4 + $0x5e8] sm:$0xff]  ;;  %v4288_v41 = vcombine.low %v345_v25, %v349_v26 }
  0xcf   : > { %3516 = vmatmul.mubr.bf16.vlgmr.msra.gmra.mrb[4].mxu1 %v5258_v40  ;;  %3526 = vmatprep.subr.bf16.mxu0 %v4241_v43  ;;  %v4417_v34 = vcombine.high %v473_v27, %v477_v28  ;;  %v353_v35 = vld [vmem:[%s5060_s4 + $0x208] sm:$0xff] }
  0xd0   : > { %3566 = vmatpush1.bf16.msra.mxu1 %v4360_v42  ;;  %3597 = vmatprep.mubr.bf16.mxu1 %v5128_v60  ;;  %v357_v36 = vld [vmem:[%s5060_s4 + $0x228] sm:$0xff]  ;;  %v4416_v42 = vcombine.low %v473_v27, %v477_v28 }
  0xd1   : > { %3567 = vmatprep.subr.bf16.mxu1 %v4369_v44  ;;  %v481_v38 = vld [vmem:[%s5060_s4 + $0x608] sm:$0xff]  ;;  %v4297_v43 = vcombine.high %v353_v35, %v357_v36 }
  0xd2   : > { %3527 = vmatpush1.bf16.msra.mxu0 %v4240_v49  ;;  %v485_v39 = vld [vmem:[%s5060_s4 + $0x628] sm:$0xff]  ;;  %v4296_v49 = vcombine.low %v353_v35, %v357_v36 }
  0xd3   : > { %3528 = vmatprep.subr.bf16.mxu0 %v4249_v51  ;;  %v4425_v44 = vcombine.high %v481_v38, %v485_v39  ;;  %v361_v45 = vld [vmem:[%s5060_s4 + $0x248] sm:$0xff] }
  0xd4   : > { %3568 = vmatpush1.bf16.msra.mxu1 %v4368_v50  ;;  %v365_v46 = vld [vmem:[%s5060_s4 + $0x268] sm:$0xff]  ;;  %v4424_v50 = vcombine.low %v481_v38, %v485_v39 }
  0xd5   : > { %3569 = vmatprep.subr.bf16.mxu1 %v4377_v52  ;;  %v489_v47 = vld [vmem:[%s5060_s4 + $0x648] sm:$0xff]  ;;  %v4305_v51 = vcombine.high %v361_v45, %v365_v46 }
  0xd6   : > { %3529 = vmatpush1.bf16.msra.mxu0 %v4248_v57  ;;  %v493_v48 = vld [vmem:[%s5060_s4 + $0x668] sm:$0xff]  ;;  %v4304_v57 = vcombine.low %v361_v45, %v365_v46 }
  0xd7   : > { %3530 = vmatprep.subr.bf16.mxu0 %v4257_v61  ;;  %v4433_v52 = vcombine.high %v489_v47, %v493_v48  ;;  %v369_v53 = vld [vmem:[%s5060_s4 + $0x288] sm:$0xff] }
  0xd8   : > { %3570 = vmatpush1.bf16.msra.mxu1 %v4376_v58  ;;  %v373_v54 = vld [vmem:[%s5060_s4 + $0x2a8] sm:$0xff]  ;;  %v4432_v58 = vcombine.low %v489_v47, %v493_v48 }
  0xd9   : > { %3571 = vmatprep.subr.bf16.mxu1 %v4385_v62  ;;  %v497_v55 = vld [vmem:[%s5060_s4 + $0x688] sm:$0xff]  ;;  %v4313_v61 = vcombine.high %v369_v53, %v373_v54 }
  0xda   : > { %3531 = vmatpush1.bf16.msra.mxu0 %v4256_v3  ;;  %v501_v56 = vld [vmem:[%s5060_s4 + $0x6a8] sm:$0xff]  ;;  %v4312_v3 = vcombine.low %v369_v53, %v373_v54 }
  0xdb   : > { %3532 = vmatprep.subr.bf16.mxu0 %v4265_v5  ;;  %v4441_v62 = vcombine.high %v497_v55, %v501_v56  ;;  %v377_v63 = vld [vmem:[%s5060_s4 + $0x2c8] sm:$0xff] }
  0xdc   : > { %3572 = vmatpush1.bf16.msra.mxu1 %v4384_v4  ;;  %v381_v0 = vld [vmem:[%s5060_s4 + $0x2e8] sm:$0xff]  ;;  %v4440_v4 = vcombine.low %v497_v55, %v501_v56 }
  0xdd   : > { %3573 = vmatprep.subr.bf16.mxu1 %v4393_v6  ;;  %v505_v1 = vld [vmem:[%s5060_s4 + $0x6c8] sm:$0xff]  ;;  %v4321_v5 = vcombine.high %v377_v63, %v381_v0 }
  0xde   : > { %3533 = vmatpush1.bf16.msra.mxu0 %v4264_v11  ;;  %v509_v2 = vld [vmem:[%s5060_s4 + $0x6e8] sm:$0xff]  ;;  %v4320_v11 = vcombine.low %v377_v63, %v381_v0 }
  0xdf   : > { %3534 = vmatprep.subr.bf16.mxu0 %v4273_v13  ;;  %v4449_v6 = vcombine.high %v505_v1, %v509_v2  ;;  %v385_v7 = vld [vmem:[%s5060_s4 + $0x308] sm:$0xff] }
  0xe0   : > { %3574 = vmatpush1.bf16.msra.mxu1 %v4392_v12  ;;  %v389_v8 = vld [vmem:[%s5060_s4 + $0x328] sm:$0xff]  ;;  %v4448_v12 = vcombine.low %v505_v1, %v509_v2 }
  0xe1   : > { %3575 = vmatprep.subr.bf16.mxu1 %v4401_v14  ;;  %v513_v9 = vld [vmem:[%s5060_s4 + $0x708] sm:$0xff]  ;;  %v4329_v13 = vcombine.high %v385_v7, %v389_v8 }
  0xe2   : > { %3535 = vmatpush1.bf16.msra.mxu0 %v4272_v20  ;;  %v517_v10 = vld [vmem:[%s5060_s4 + $0x728] sm:$0xff]  ;;  %v4328_v20 = vcombine.low %v385_v7, %v389_v8 }
  0xe3   : > { %3536 = vmatprep.subr.bf16.mxu0 %v4281_v23  ;;  %v4457_v14 = vcombine.high %v513_v9, %v517_v10  ;;  %v393_v15 = vld [vmem:[%s5060_s4 + $0x348] sm:$0xff] }
  0xe4   : > { %3576 = vmatpush1.bf16.msra.mxu1 %v4400_v22  ;;  %v397_v16 = vld [vmem:[%s5060_s4 + $0x368] sm:$0xff]  ;;  %v4456_v22 = vcombine.low %v513_v9, %v517_v10 }
  0xe5   : > { %3577 = vmatprep.subr.bf16.mxu1 %v4409_v24  ;;  %v521_v18 = vld [vmem:[%s5060_s4 + $0x748] sm:$0xff]  ;;  %v4337_v23 = vcombine.high %v393_v15, %v397_v16 }
  0xe6   : > { %3537 = vmatpush1.bf16.msra.mxu0 %v4280_v30  ;;  %v525_v19 = vld [vmem:[%s5060_s4 + $0x768] sm:$0xff]  ;;  %v4336_v30 = vcombine.low %v393_v15, %v397_v16 }
  0xe7   : > { %3538 = vmatprep.subr.bf16.mxu0 %v4289_v33  ;;  %v4465_v24 = vcombine.high %v521_v18, %v525_v19  ;;  %v401_v25 = vld [vmem:[%s5060_s4 + $0x388] sm:$0xff] }
  0xe8   : > { %3578 = vmatpush1.bf16.msra.mxu1 %v4408_v31  ;;  %v405_v26 = vld [vmem:[%s5060_s4 + $0x3a8] sm:$0xff]  ;;  %v4464_v31 = vcombine.low %v521_v18, %v525_v19 }
  0xe9   : > { %3579 = vmatprep.subr.bf16.mxu1 %v4417_v34  ;;  %v529_v27 = vld [vmem:[%s5060_s4 + $0x788] sm:$0xff]  ;;  %v4345_v33 = vcombine.high %v401_v25, %v405_v26 }
  0xea   : > { %3539 = vmatpush1.bf16.msra.mxu0 %v4288_v41  ;;  %v533_v28 = vld [vmem:[%s5060_s4 + $0x7a8] sm:$0xff]  ;;  %v4344_v41 = vcombine.low %v401_v25, %v405_v26 }
  0xeb   : > { %3540 = vmatprep.subr.bf16.mxu0 %v4297_v43  ;;  %v4473_v34 = vcombine.high %v529_v27, %v533_v28  ;;  %v409_v35 = vld [vmem:[%s5060_s4 + $0x3c8] sm:$0xff] }
  0xec   : > { %3580 = vmatpush1.bf16.msra.mxu1 %v4416_v42  ;;  %v413_v36 = vld [vmem:[%s5060_s4 + $0x3e8] sm:$0xff]  ;;  %v4472_v42 = vcombine.low %v529_v27, %v533_v28 }
  0xed   : > { %3581 = vmatprep.subr.bf16.mxu1 %v4425_v44  ;;  %v537_v38 = vld [vmem:[%s5060_s4 + $0x7c8] sm:$0xff]  ;;  %v4353_v43 = vcombine.high %v409_v35, %v413_v36 }
  0xee   : > { %3541 = vmatpush1.bf16.msra.mxu0 %v4296_v49  ;;  %v541_v39 = vld [vmem:[%s5060_s4 + $0x7e8] sm:$0xff]  ;;  %v4352_v49 = vcombine.low %v409_v35, %v413_v36 }
  0xef   : > { %3542 = vmatprep.subr.bf16.mxu0 %v4305_v51  ;;  %v4481_v44 = vcombine.high %v537_v38, %v541_v39  ;;  %v545_v45 = vld [vmem:[%s5060_s4 + $0x808] sm:$0xff] }
  0xf0   : > { %3582 = vmatpush1.bf16.msra.mxu1 %v4424_v50  ;;  %v549_v46 = vld [vmem:[%s5060_s4 + $0x828] sm:$0xff]  ;;  %v4480_v50 = vcombine.low %v537_v38, %v541_v39 }
  0xf1   : > { %3583 = vmatprep.subr.bf16.mxu1 %v4433_v52  ;;  %v673_v47 = vld [vmem:[%s5060_s4 + $0xc08] sm:$0xff]  ;;  %v4489_v51 = vcombine.high %v545_v45, %v549_v46 }
  0xf2   : > { %3543 = vmatpush1.bf16.msra.mxu0 %v4304_v57  ;;  %v677_v48 = vld [vmem:[%s5060_s4 + $0xc28] sm:$0xff]  ;;  %v4488_v57 = vcombine.low %v545_v45, %v549_v46 }
  0xf3   : > { %3544 = vmatprep.subr.bf16.mxu0 %v4313_v61  ;;  %v4617_v52 = vcombine.high %v673_v47, %v677_v48  ;;  %v553_v53 = vld [vmem:[%s5060_s4 + $0x848] sm:$0xff] }
  0xf4   : > { %3584 = vmatpush1.bf16.msra.mxu1 %v4432_v58  ;;  %v557_v54 = vld [vmem:[%s5060_s4 + $0x868] sm:$0xff]  ;;  %v4616_v58 = vcombine.low %v673_v47, %v677_v48 }
  0xf5   : > { %3585 = vmatprep.subr.bf16.mxu1 %v4441_v62  ;;  %v681_v55 = vld [vmem:[%s5060_s4 + $0xc48] sm:$0xff]  ;;  %v4497_v61 = vcombine.high %v553_v53, %v557_v54 }
  0xf6   : > { %3545 = vmatpush1.bf16.msra.mxu0 %v4312_v3  ;;  %v685_v56 = vld [vmem:[%s5060_s4 + $0xc68] sm:$0xff]  ;;  %v4496_v3 = vcombine.low %v553_v53, %v557_v54 }
  0xf7   : > { %3546 = vmatprep.subr.bf16.mxu0 %v4321_v5  ;;  %v4625_v62 = vcombine.high %v681_v55, %v685_v56  ;;  %v561_v63 = vld [vmem:[%s5060_s4 + $0x888] sm:$0xff] }
  0xf8   : > { %3586 = vmatpush1.bf16.msra.mxu1 %v4440_v4  ;;  %v565_v0 = vld [vmem:[%s5060_s4 + $0x8a8] sm:$0xff]  ;;  %v4624_v4 = vcombine.low %v681_v55, %v685_v56 }
  0xf9   : > { %3587 = vmatprep.subr.bf16.mxu1 %v4449_v6  ;;  %v689_v1 = vld [vmem:[%s5060_s4 + $0xc88] sm:$0xff]  ;;  %v4505_v5 = vcombine.high %v561_v63, %v565_v0 }
  0xfa   : > { %3547 = vmatpush1.bf16.msra.mxu0 %v4320_v11  ;;  %v693_v2 = vld [vmem:[%s5060_s4 + $0xca8] sm:$0xff]  ;;  %v4504_v11 = vcombine.low %v561_v63, %v565_v0 }
  0xfb   : > { %3548 = vmatprep.subr.bf16.mxu0 %v4329_v13  ;;  %v4633_v6 = vcombine.high %v689_v1, %v693_v2  ;;  %v569_v7 = vld [vmem:[%s5060_s4 + $0x8c8] sm:$0xff] }
  0xfc   : > { %3588 = vmatpush1.bf16.msra.mxu1 %v4448_v12  ;;  %v573_v8 = vld [vmem:[%s5060_s4 + $0x8e8] sm:$0xff]  ;;  %v4632_v12 = vcombine.low %v689_v1, %v693_v2 }
  0xfd   : > { %3589 = vmatprep.subr.bf16.mxu1 %v4457_v14  ;;  %v697_v9 = vld [vmem:[%s5060_s4 + $0xcc8] sm:$0xff]  ;;  %v4513_v13 = vcombine.high %v569_v7, %v573_v8 }
  0xfe   : > { %3549 = vmatpush1.bf16.msra.mxu0 %v4328_v20  ;;  %v701_v10 = vld [vmem:[%s5060_s4 + $0xce8] sm:$0xff]  ;;  %v4512_v20 = vcombine.low %v569_v7, %v573_v8 }
  0xff   : > { %3550 = vmatprep.subr.bf16.mxu0 %v4337_v23  ;;  %v4641_v14 = vcombine.high %v697_v9, %v701_v10  ;;  %v577_v15 = vld [vmem:[%s5060_s4 + $0x908] sm:$0xff] }
 0x100   : > { %3590 = vmatpush1.bf16.msra.mxu1 %v4456_v22  ;;  %v581_v16 = vld [vmem:[%s5060_s4 + $0x928] sm:$0xff]  ;;  %v4640_v22 = vcombine.low %v697_v9, %v701_v10 }
 0x101   : > { %3591 = vmatprep.subr.bf16.mxu1 %v4465_v24  ;;  %v705_v18 = vld [vmem:[%s5060_s4 + $0xd08] sm:$0xff]  ;;  %v4521_v23 = vcombine.high %v577_v15, %v581_v16 }
 0x102   : > { %3551 = vmatpush1.bf16.msra.mxu0 %v4336_v30  ;;  %v709_v19 = vld [vmem:[%s5060_s4 + $0xd28] sm:$0xff]  ;;  %v4520_v30 = vcombine.low %v577_v15, %v581_v16 }
 0x103   : > { %3552 = vmatprep.subr.bf16.mxu0 %v4345_v33  ;;  %v4649_v24 = vcombine.high %v705_v18, %v709_v19  ;;  %v585_v25 = vld [vmem:[%s5060_s4 + $0x948] sm:$0xff] }
 0x104   : > { %3592 = vmatpush1.bf16.msra.mxu1 %v4464_v31  ;;  %v589_v26 = vld [vmem:[%s5060_s4 + $0x968] sm:$0xff]  ;;  %v4648_v31 = vcombine.low %v705_v18, %v709_v19 }
 0x105   : > { %3593 = vmatprep.subr.bf16.mxu1 %v4473_v34  ;;  %v713_v27 = vld [vmem:[%s5060_s4 + $0xd48] sm:$0xff]  ;;  %v4529_v33 = vcombine.high %v585_v25, %v589_v26 }
 0x106   : > { %3553 = vmatpush1.bf16.msra.mxu0 %v4344_v41  ;;  %v717_v28 = vld [vmem:[%s5060_s4 + $0xd68] sm:$0xff]  ;;  %v4528_v41 = vcombine.low %v585_v25, %v589_v26 }
 0x107   : > { %3554 = vmatprep.subr.bf16.mxu0 %v4353_v43  ;;  %v4657_v34 = vcombine.high %v713_v27, %v717_v28  ;;  %v593_v35 = vld [vmem:[%s5060_s4 + $0x988] sm:$0xff] }
 0x108   : > { %3594 = vmatpush1.bf16.msra.mxu1 %v4472_v42  ;;  %v597_v36 = vld [vmem:[%s5060_s4 + $0x9a8] sm:$0xff]  ;;  %v4656_v42 = vcombine.low %v713_v27, %v717_v28 }
 0x109   : > { %3595 = vmatprep.subr.bf16.mxu1 %v4481_v44  ;;  %v721_v38 = vld [vmem:[%s5060_s4 + $0xd88] sm:$0xff]  ;;  %v4537_v43 = vcombine.high %v593_v35, %v597_v36 }
 0x10a   : > { %3555 = vmatpush1.bf16.msra.mxu0 %v4352_v49  ;;  %v725_v39 = vld [vmem:[%s5060_s4 + $0xda8] sm:$0xff]  ;;  %v4536_v49 = vcombine.low %v593_v35, %v597_v36 }
 0x10b   : > { %3606 = vmatprep.subr.bf16.mxu0 %v4489_v51  ;;  %v4665_v44 = vcombine.high %v721_v38, %v725_v39  ;;  %v601_v45 = vld [vmem:[%s5060_s4 + $0x9c8] sm:$0xff] }
 0x10c   : > { %3596 = vmatpush1.bf16.msra.mxu1 %v4480_v50  ;;  %v605_v46 = vld [vmem:[%s5060_s4 + $0x9e8] sm:$0xff]  ;;  %v4664_v50 = vcombine.low %v721_v38, %v725_v39 }
 0x10d   : > { %3647 = vmatprep.subr.bf16.mxu1 %v4617_v52  ;;  %3557 = vmatmul.mubr.bf16.vlgmr.msra.gmra.mrb[8].mxu0 %v5174_v17  ;;  %v729_v47 = vld [vmem:[%s5060_s4 + $0xdc8] sm:$0xff]  ;;  %v4545_v51 = vcombine.high %v601_v45, %v605_v46 }
 0x10e   : > { %3607 = vmatpush1.bf16.msra.mxu0 %v4488_v57  ;;  %3638 = vmatprep.mubr.bf16.mxu0 %v5184_v29  ;;  %v733_v48 = vld [vmem:[%s5060_s4 + $0xde8] sm:$0xff]  ;;  %v4544_v57 = vcombine.low %v601_v45, %v605_v46 }
 0x10f   : > { %3598 = vmatmul.mubr.bf16.vlgmr.msra.gmra.mrb[8].mxu1 %v5179_v21  ;;  %3608 = vmatprep.subr.bf16.mxu0 %v4497_v61  ;;  %v4673_v52 = vcombine.high %v729_v47, %v733_v48  ;;  %v609_v53 = vld [vmem:[%s5060_s4 + $0xa08] sm:$0xff] }
 0x110   : > { %3648 = vmatpush1.bf16.msra.mxu1 %v4616_v58  ;;  %3679 = vmatprep.mubr.bf16.mxu1 %v5189_v32  ;;  %v613_v54 = vld [vmem:[%s5060_s4 + $0xa28] sm:$0xff]  ;;  %v4672_v58 = vcombine.low %v729_v47, %v733_v48 }
 0x111   : > { %3649 = vmatprep.subr.bf16.mxu1 %v4625_v62  ;;  %v737_v55 = vld [vmem:[%s5060_s4 + $0xe08] sm:$0xff]  ;;  %v4553_v61 = vcombine.high %v609_v53, %v613_v54 }
 0x112   : > { %3609 = vmatpush1.bf16.msra.mxu0 %v4496_v3  ;;  %v741_v56 = vld [vmem:[%s5060_s4 + $0xe28] sm:$0xff]  ;;  %v4552_v3 = vcombine.low %v609_v53, %v613_v54 }
 0x113   : > { %3610 = vmatprep.subr.bf16.mxu0 %v4505_v5  ;;  %v4681_v62 = vcombine.high %v737_v55, %v741_v56  ;;  %v617_v63 = vld [vmem:[%s5060_s4 + $0xa48] sm:$0xff] }
 0x114   : > { %3650 = vmatpush1.bf16.msra.mxu1 %v4624_v4  ;;  %v621_v0 = vld [vmem:[%s5060_s4 + $0xa68] sm:$0xff]  ;;  %v4680_v4 = vcombine.low %v737_v55, %v741_v56 }
 0x115   : > { %3651 = vmatprep.subr.bf16.mxu1 %v4633_v6  ;;  %v745_v1 = vld [vmem:[%s5060_s4 + $0xe48] sm:$0xff]  ;;  %v4561_v5 = vcombine.high %v617_v63, %v621_v0 }
 0x116   : > { %3611 = vmatpush1.bf16.msra.mxu0 %v4504_v11  ;;  %v749_v2 = vld [vmem:[%s5060_s4 + $0xe68] sm:$0xff]  ;;  %v4560_v11 = vcombine.low %v617_v63, %v621_v0  ;;  %v290_v63 = vld [vmem:[%s5060_s4 + $0x10] sm:$0xff] }
 0x117   : > { %3612 = vmatprep.subr.bf16.mxu0 %v4513_v13  ;;  %v4689_v6 = vcombine.high %v745_v1, %v749_v2  ;;  %v625_v7 = vld [vmem:[%s5060_s4 + $0xa88] sm:$0xff]  ;;  %v294_v0 = vld [vmem:[%s5060_s4 + $0x30] sm:$0xff] }
 0x118   : > { %3652 = vmatpush1.bf16.msra.mxu1 %v4632_v12  ;;  %v629_v8 = vld [vmem:[%s5060_s4 + $0xaa8] sm:$0xff]  ;;  %v4688_v12 = vcombine.low %v745_v1, %v749_v2  ;;  %v418_v1 = vld [vmem:[%s5060_s4 + $0x410] sm:$0xff] }
 0x119   : > { %3653 = vmatprep.subr.bf16.mxu1 %v4641_v14  ;;  %v753_v9 = vld [vmem:[%s5060_s4 + $0xe88] sm:$0xff]  ;;  %v4569_v13 = vcombine.high %v625_v7, %v629_v8  ;;  %v422_v2 = vld [vmem:[%s5060_s4 + $0x430] sm:$0xff] }
 0x11a   : > { %3613 = vmatpush1.bf16.msra.mxu0 %v4512_v20  ;;  %v757_v10 = vld [vmem:[%s5060_s4 + $0xea8] sm:$0xff]  ;;  %v4568_v20 = vcombine.low %v625_v7, %v629_v8  ;;  %v298_v7 = vld [vmem:[%s5060_s4 + $0x50] sm:$0xff] }
 0x11b   : > { %3614 = vmatprep.subr.bf16.mxu0 %v4521_v23  ;;  %v4697_v14 = vcombine.high %v753_v9, %v757_v10  ;;  %v633_v15 = vld [vmem:[%s5060_s4 + $0xac8] sm:$0xff]  ;;  %v302_v8 = vld [vmem:[%s5060_s4 + $0x70] sm:$0xff] }
 0x11c   : > { %3654 = vmatpush1.bf16.msra.mxu1 %v4640_v22  ;;  %v637_v16 = vld [vmem:[%s5060_s4 + $0xae8] sm:$0xff]  ;;  %v4696_v22 = vcombine.low %v753_v9, %v757_v10  ;;  %v426_v9 = vld [vmem:[%s5060_s4 + $0x450] sm:$0xff] }
 0x11d   : > { %3655 = vmatprep.subr.bf16.mxu1 %v4649_v24  ;;  %v761_v18 = vld [vmem:[%s5060_s4 + $0xec8] sm:$0xff]  ;;  %v4577_v23 = vcombine.high %v633_v15, %v637_v16  ;;  %v430_v10 = vld [vmem:[%s5060_s4 + $0x470] sm:$0xff] }
 0x11e   : > { %3615 = vmatpush1.bf16.msra.mxu0 %v4520_v30  ;;  %v765_v19 = vld [vmem:[%s5060_s4 + $0xee8] sm:$0xff]  ;;  %v4576_v30 = vcombine.low %v633_v15, %v637_v16  ;;  %v306_v15 = vld [vmem:[%s5060_s4 + $0x90] sm:$0xff] }
 0x11f   : > { %3616 = vmatprep.subr.bf16.mxu0 %v4529_v33  ;;  %v4705_v24 = vcombine.high %v761_v18, %v765_v19  ;;  %v641_v25 = vld [vmem:[%s5060_s4 + $0xb08] sm:$0xff]  ;;  %v310_v16 = vld [vmem:[%s5060_s4 + $0xb0] sm:$0xff] }
 0x120   : > { %3656 = vmatpush1.bf16.msra.mxu1 %v4648_v31  ;;  %v645_v26 = vld [vmem:[%s5060_s4 + $0xb28] sm:$0xff]  ;;  %v4704_v31 = vcombine.low %v761_v18, %v765_v19  ;;  %v434_v18 = vld [vmem:[%s5060_s4 + $0x490] sm:$0xff] }
 0x121   : > { %3657 = vmatprep.subr.bf16.mxu1 %v4657_v34  ;;  %v769_v27 = vld [vmem:[%s5060_s4 + $0xf08] sm:$0xff]  ;;  %v4585_v33 = vcombine.high %v641_v25, %v645_v26  ;;  %v438_v19 = vld [vmem:[%s5060_s4 + $0x4b0] sm:$0xff] }
 0x122   : > { %3617 = vmatpush1.bf16.msra.mxu0 %v4528_v41  ;;  %v773_v28 = vld [vmem:[%s5060_s4 + $0xf28] sm:$0xff]  ;;  %v4584_v41 = vcombine.low %v641_v25, %v645_v26  ;;  %v314_v25 = vld [vmem:[%s5060_s4 + $0xd0] sm:$0xff] }
 0x123   : > { %3618 = vmatprep.subr.bf16.mxu0 %v4537_v43  ;;  %v4713_v34 = vcombine.high %v769_v27, %v773_v28  ;;  %v649_v35 = vld [vmem:[%s5060_s4 + $0xb48] sm:$0xff]  ;;  %v318_v26 = vld [vmem:[%s5060_s4 + $0xf0] sm:$0xff] }
 0x124   : > { %3658 = vmatpush1.bf16.msra.mxu1 %v4656_v42  ;;  %v653_v36 = vld [vmem:[%s5060_s4 + $0xb68] sm:$0xff]  ;;  %v4712_v42 = vcombine.low %v769_v27, %v773_v28  ;;  %v442_v27 = vld [vmem:[%s5060_s4 + $0x4d0] sm:$0xff] }
 0x125   : > { %3659 = vmatprep.subr.bf16.mxu1 %v4665_v44  ;;  %v777_v38 = vld [vmem:[%s5060_s4 + $0xf48] sm:$0xff]  ;;  %v4593_v43 = vcombine.high %v649_v35, %v653_v36  ;;  %v446_v28 = vld [vmem:[%s5060_s4 + $0x4f0] sm:$0xff] }
 0x126   : > { %3619 = vmatpush1.bf16.msra.mxu0 %v4536_v49  ;;  %v781_v39 = vld [vmem:[%s5060_s4 + $0xf68] sm:$0xff]  ;;  %v4592_v49 = vcombine.low %v649_v35, %v653_v36  ;;  %v322_v35 = vld [vmem:[%s5060_s4 + $0x110] sm:$0xff] }
 0x127   : > { %3620 = vmatprep.subr.bf16.mxu0 %v4545_v51  ;;  %v4721_v44 = vcombine.high %v777_v38, %v781_v39  ;;  %v657_v45 = vld [vmem:[%s5060_s4 + $0xb88] sm:$0xff]  ;;  %v326_v36 = vld [vmem:[%s5060_s4 + $0x130] sm:$0xff] }
 0x128   : > { %3660 = vmatpush1.bf16.msra.mxu1 %v4664_v50  ;;  %v661_v46 = vld [vmem:[%s5060_s4 + $0xba8] sm:$0xff]  ;;  %v4720_v50 = vcombine.low %v777_v38, %v781_v39  ;;  %v450_v38 = vld [vmem:[%s5060_s4 + $0x510] sm:$0xff] }
 0x129   : > { %3661 = vmatprep.subr.bf16.mxu1 %v4673_v52  ;;  %v785_v47 = vld [vmem:[%s5060_s4 + $0xf88] sm:$0xff]  ;;  %v4601_v51 = vcombine.high %v657_v45, %v661_v46  ;;  %v454_v39 = vld [vmem:[%s5060_s4 + $0x530] sm:$0xff] }
 0x12a   : > { %3621 = vmatpush1.bf16.msra.mxu0 %v4544_v57  ;;  %v789_v48 = vld [vmem:[%s5060_s4 + $0xfa8] sm:$0xff]  ;;  %v4600_v57 = vcombine.low %v657_v45, %v661_v46  ;;  %v330_v45 = vld [vmem:[%s5060_s4 + $0x150] sm:$0xff] }
 0x12b   : > { %3622 = vmatprep.subr.bf16.mxu0 %v4553_v61  ;;  %v4729_v52 = vcombine.high %v785_v47, %v789_v48  ;;  %v665_v53 = vld [vmem:[%s5060_s4 + $0xbc8] sm:$0xff]  ;;  %v334_v46 = vld [vmem:[%s5060_s4 + $0x170] sm:$0xff] }
 0x12c   : > { %3662 = vmatpush1.bf16.msra.mxu1 %v4672_v58  ;;  %v669_v54 = vld [vmem:[%s5060_s4 + $0xbe8] sm:$0xff]  ;;  %v4728_v58 = vcombine.low %v785_v47, %v789_v48  ;;  %v458_v47 = vld [vmem:[%s5060_s4 + $0x550] sm:$0xff] }
 0x12d   : > { %3663 = vmatprep.subr.bf16.mxu1 %v4681_v62  ;;  %v793_v55 = vld [vmem:[%s5060_s4 + $0xfc8] sm:$0xff]  ;;  %v4609_v61 = vcombine.high %v665_v53, %v669_v54  ;;  %v462_v48 = vld [vmem:[%s5060_s4 + $0x570] sm:$0xff] }
 0x12e   : > { %3623 = vmatpush1.bf16.msra.mxu0 %v4552_v3  ;;  %v797_v56 = vld [vmem:[%s5060_s4 + $0xfe8] sm:$0xff]  ;;  %v4608_v3 = vcombine.low %v665_v53, %v669_v54  ;;  %v338_v53 = vld [vmem:[%s5060_s4 + $0x190] sm:$0xff] }
 0x12f   : > { %3624 = vmatprep.subr.bf16.mxu0 %v4561_v5  ;;  %v4737_v62 = vcombine.high %v793_v55, %v797_v56  ;;  %v4235_v5 = vcombine.high %v290_v63, %v294_v0  ;;  %v342_v54 = vld [vmem:[%s5060_s4 + $0x1b0] sm:$0xff] }
 0x130   : > { %3664 = vmatpush1.bf16.msra.mxu1 %v4680_v4  ;;  %v4736_v4 = vcombine.low %v793_v55, %v797_v56  ;;  %v466_v55 = vld [vmem:[%s5060_s4 + $0x590] sm:$0xff] }
 0x131   : > { %3665 = vmatprep.subr.bf16.mxu1 %v4689_v6  ;;  %v4363_v6 = vcombine.high %v418_v1, %v422_v2  ;;  %v470_v56 = vld [vmem:[%s5060_s4 + $0x5b0] sm:$0xff] }
 0x132   : > { %3625 = vmatpush1.bf16.msra.mxu0 %v4560_v11  ;;  %v4234_v11 = vcombine.low %v290_v63, %v294_v0  ;;  %v4411_v63 = vcombine.high %v466_v55, %v470_v56  ;;  %v346_v0 = vld [vmem:[%s5060_s4 + $0x1d0] sm:$0xff] }
 0x133   : > { %3626 = vmatprep.subr.bf16.mxu0 %v4569_v13  ;;  %v4243_v13 = vcombine.high %v298_v7, %v302_v8 }
 0x134   : > { %3666 = vmatpush1.bf16.msra.mxu1 %v4688_v12  ;;  %v4362_v12 = vcombine.low %v418_v1, %v422_v2  ;;  %v350_v1 = vld [vmem:[%s5060_s4 + $0x1f0] sm:$0xff] }
 0x135   : > { %3667 = vmatprep.subr.bf16.mxu1 %v4697_v14  ;;  %v4371_v14 = vcombine.high %v426_v9, %v430_v10 }
 0x136   : > { %3627 = vmatpush1.bf16.msra.mxu0 %v4568_v20  ;;  %v4242_v20 = vcombine.low %v298_v7, %v302_v8 }
 0x137   : > { %3628 = vmatprep.subr.bf16.mxu0 %v4577_v23  ;;  %v4251_v23 = vcombine.high %v306_v15, %v310_v16 }
 0x138   : > { %3668 = vmatpush1.bf16.msra.mxu1 %v4696_v22  ;;  %v4370_v22 = vcombine.low %v426_v9, %v430_v10  ;;  %v4282_v9 = vcombine.low %v338_v53, %v342_v54 }
 0x139   : > { %3669 = vmatprep.subr.bf16.mxu1 %v4705_v24  ;;  %v4379_v24 = vcombine.high %v434_v18, %v438_v19 }
 0x13a   : > { %3629 = vmatpush1.bf16.msra.mxu0 %v4576_v30  ;;  %v4250_v30 = vcombine.low %v306_v15, %v310_v16 }
 0x13b   : > { %3630 = vmatprep.subr.bf16.mxu0 %v4585_v33  ;;  %v4259_v33 = vcombine.high %v314_v25, %v318_v26 }
 0x13c   : > { %3670 = vmatpush1.bf16.msra.mxu1 %v4704_v31  ;;  %v4378_v31 = vcombine.low %v434_v18, %v438_v19  ;;  %v354_v18 = vld [vmem:[%s5060_s4 + $0x210] sm:$0xff] }
 0x13d   : > { %3671 = vmatprep.subr.bf16.mxu1 %v4713_v34  ;;  %v4387_v34 = vcombine.high %v442_v27, %v446_v28  ;;  %v358_v19 = vld [vmem:[%s5060_s4 + $0x230] sm:$0xff] }
 0x13e   : > { %3631 = vmatpush1.bf16.msra.mxu0 %v4584_v41  ;;  %v4258_v41 = vcombine.low %v314_v25, %v318_v26  ;;  %v4299_v25 = vcombine.high %v354_v18, %v358_v19 }
 0x13f   : > { %3632 = vmatprep.subr.bf16.mxu0 %v4593_v43  ;;  %v4267_v43 = vcombine.high %v322_v35, %v326_v36 }
 0x140   : > { %3672 = vmatpush1.bf16.msra.mxu1 %v4712_v42  ;;  %v4386_v42 = vcombine.low %v442_v27, %v446_v28  ;;  %v362_v27 = vld [vmem:[%s5060_s4 + $0x250] sm:$0xff] }
 0x141   : > { %3673 = vmatprep.subr.bf16.mxu1 %v4721_v44  ;;  %v4395_v44 = vcombine.high %v450_v38, %v454_v39  ;;  %v366_v28 = vld [vmem:[%s5060_s4 + $0x270] sm:$0xff] }
 0x142   : > { %3633 = vmatpush1.bf16.msra.mxu0 %v4592_v49  ;;  %v4266_v49 = vcombine.low %v322_v35, %v326_v36  ;;  %v4307_v35 = vcombine.high %v362_v27, %v366_v28 }
 0x143   : > { %3634 = vmatprep.subr.bf16.mxu0 %v4601_v51  ;;  %v4275_v51 = vcombine.high %v330_v45, %v334_v46 }
 0x144   : > { %3674 = vmatpush1.bf16.msra.mxu1 %v4720_v50  ;;  %v4394_v50 = vcombine.low %v450_v38, %v454_v39  ;;  %v370_v38 = vld [vmem:[%s5060_s4 + $0x290] sm:$0xff] }
 0x145   : > { %3675 = vmatprep.subr.bf16.mxu1 %v4729_v52  ;;  %v4403_v52 = vcombine.high %v458_v47, %v462_v48  ;;  %v374_v39 = vld [vmem:[%s5060_s4 + $0x2b0] sm:$0xff] }
 0x146   : > { %3635 = vmatpush1.bf16.msra.mxu0 %v4600_v57  ;;  %v4274_v57 = vcombine.low %v330_v45, %v334_v46  ;;  %v4315_v45 = vcombine.high %v370_v38, %v374_v39 }
 0x147   : > { %3636 = vmatprep.subr.bf16.mxu0 %v4609_v61  ;;  %v4283_v61 = vcombine.high %v338_v53, %v342_v54 }
 0x148   : > { %3676 = vmatpush1.bf16.msra.mxu1 %v4728_v58  ;;  %v4402_v58 = vcombine.low %v458_v47, %v462_v48  ;;  %v378_v47 = vld [vmem:[%s5060_s4 + $0x2d0] sm:$0xff] }
 0x149   : > { %3677 = vmatprep.subr.bf16.mxu1 %v4737_v62  ;;  %v382_v48 = vld [vmem:[%s5060_s4 + $0x2f0] sm:$0xff] }
 0x14a   : > { %3637 = vmatpush1.bf16.msra.mxu0 %v4608_v3  ;;  %v4323_v53 = vcombine.high %v378_v47, %v382_v48 }
 0x14b   : > { %3688 = vmatprep.subr.bf16.mxu0 %v4235_v5  ;;  %v478_v5 = vld [vmem:[%s5060_s4 + $0x5f0] sm:$0xff] }
 0x14c   : > { %3678 = vmatpush1.bf16.msra.mxu1 %v4736_v4  ;;  %v474_v4 = vld [vmem:[%s5060_s4 + $0x5d0] sm:$0xff] }
 0x14d   : > { %3729 = vmatprep.subr.bf16.mxu1 %v4363_v6  ;;  %3639 = vmatmul.mubr.bf16.vlgmr.msra.gmra.mrb[12].mxu0 %v5254_v37  ;;  %v4419_v16 = vcombine.high %v474_v4, %v478_v5 }
 0x14e   : > { %3689 = vmatpush1.bf16.msra.mxu0 %v4234_v11  ;;  %3720 = vmatprep.mubr.bf16.mxu0 %v5126_v59 }
 0x14f   : > { %3680 = vmatmul.mubr.bf16.vlgmr.msra.gmra.mrb[12].mxu1 %v5258_v40  ;;  %3690 = vmatprep.subr.bf16.mxu0 %v4243_v13  ;;  %v4410_v13 = vcombine.low %v466_v55, %v470_v56  ;;  %v386_v55 = vld [vmem:[%s5060_s4 + $0x310] sm:$0xff] }
 0x150   : > { %3730 = vmatpush1.bf16.msra.mxu1 %v4362_v12  ;;  %3761 = vmatprep.mubr.bf16.mxu1 %v5128_v60  ;;  %v390_v56 = vld [vmem:[%s5060_s4 + $0x330] sm:$0xff] }
 0x151   : > { %3731 = vmatprep.subr.bf16.mxu1 %v4371_v14  ;;  %v4291_v14 = vcombine.high %v346_v0, %v350_v1 }
 0x152   : > { %3691 = vmatpush1.bf16.msra.mxu0 %v4242_v20  ;;  %v482_v20 = vld [vmem:[%s5060_s4 + $0x610] sm:$0xff] }
 0x153   : > { %3692 = vmatprep.subr.bf16.mxu0 %v4251_v23  ;;  %v4290_v23 = vcombine.low %v346_v0, %v350_v1  ;;  %v394_v1 = vld [vmem:[%s5060_s4 + $0x350] sm:$0xff] }
 0x154   : > { %3732 = vmatpush1.bf16.msra.mxu1 %v4370_v22  ;;  %v486_v22 = vld [vmem:[%s5060_s4 + $0x630] sm:$0xff] }
 0x155   : > { %3733 = vmatprep.subr.bf16.mxu1 %v4379_v24  ;;  %v4418_v24 = vcombine.low %v474_v4, %v478_v5  ;;  %v4427_v26 = vcombine.high %v482_v20, %v486_v22  ;;  %v526_v4 = vld [vmem:[%s5060_s4 + $0x770] sm:$0xff]  ;;  %v4330_v5 = vcombine.low %v386_v55, %v390_v56 }
 0x156   : > { %3693 = vmatpush1.bf16.msra.mxu0 %v4250_v30  ;;  %v490_v30 = vld [vmem:[%s5060_s4 + $0x650] sm:$0xff] }
 0x157   : > { %3694 = vmatprep.subr.bf16.mxu0 %v4259_v33  ;;  %v4298_v33 = vcombine.low %v354_v18, %v358_v19 }
 0x158   : > { %3734 = vmatpush1.bf16.msra.mxu1 %v4378_v31  ;;  %v494_v31 = vld [vmem:[%s5060_s4 + $0x670] sm:$0xff] }
 0x159   : > { %3735 = vmatprep.subr.bf16.mxu1 %v4387_v34  ;;  %v4426_v34 = vcombine.low %v482_v20, %v486_v22  ;;  %v4435_v36 = vcombine.high %v490_v30, %v494_v31  ;;  %v410_v20 = vld [vmem:[%s5060_s4 + $0x3d0] sm:$0xff] }
 0x15a   : > { %3695 = vmatpush1.bf16.msra.mxu0 %v4258_v41  ;;  %v498_v41 = vld [vmem:[%s5060_s4 + $0x690] sm:$0xff] }
 0x15b   : > { %3696 = vmatprep.subr.bf16.mxu0 %v4267_v43  ;;  %v4306_v43 = vcombine.low %v362_v27, %v366_v28  ;;  %v414_v22 = vld [vmem:[%s5060_s4 + $0x3f0] sm:$0xff] }
 0x15c   : > { %3736 = vmatpush1.bf16.msra.mxu1 %v4386_v42  ;;  %v502_v42 = vld [vmem:[%s5060_s4 + $0x6b0] sm:$0xff]  ;;  %v4355_v27 = vcombine.high %v410_v20, %v414_v22 }
 0x15d   : > { %3737 = vmatprep.subr.bf16.mxu1 %v4395_v44  ;;  %v4434_v44 = vcombine.low %v490_v30, %v494_v31  ;;  %v4443_v46 = vcombine.high %v498_v41, %v502_v42  ;;  %v546_v30 = vld [vmem:[%s5060_s4 + $0x810] sm:$0xff] }
 0x15e   : > { %3697 = vmatpush1.bf16.msra.mxu0 %v4266_v49  ;;  %v506_v49 = vld [vmem:[%s5060_s4 + $0x6d0] sm:$0xff] }
 0x15f   : > { %3698 = vmatprep.subr.bf16.mxu0 %v4275_v51  ;;  %v3394_v62 = vpop.f32.mrb[0].mxu0  ;;  %v4314_v51 = vcombine.low %v370_v38, %v374_v39  ;;  %v550_v31 = vld [vmem:[%s5060_s4 + $0x830] sm:$0xff] }
 0x160   : > { %3738 = vmatpush1.bf16.msra.mxu1 %v4394_v50  ;;  %v3396_v3 = vpop.f32.mrb[1].mxu0  ;;  %v510_v50 = vld [vmem:[%s5060_s4 + $0x6f0] sm:$0xff]  ;;  %v4491_v38 = vcombine.high %v546_v30, %v550_v31 }
 0x161   : > { %3739 = vmatprep.subr.bf16.mxu1 %v4403_v52  ;;  %v3435_v2 = vpop.f32.mrb[0].mxu1  ;;  %v3398_v8 = vpop.f32.mrb[2].mxu0  ;;  %v4442_v52 = vcombine.low %v498_v41, %v502_v42  ;;  %v4451_v54 = vcombine.high %v506_v49, %v510_v50  ;;  %v554_v41 = vld [vmem:[%s5060_s4 + $0x850] sm:$0xff] }
 0x162   : > { %v5424_v6 = vadd.f32 %v3435_v2, %v3394_v62  ;;  %v3437_v7 = vpop.f32.mrb[1].mxu1  ;;  %3699 = vmatpush1.bf16.msra.mxu0 %v4274_v57  ;;  %v3399_v12 = vpop.f32.mrb[3].mxu0  ;;  %v514_v57 = vld [vmem:[%s5060_s4 + $0x710] sm:$0xff]  ;;  %v4450_v62 = vcombine.low %v506_v49, %v510_v50 }
 0x163   : > { %v5426_v10 = vadd.f32 %v3437_v7, %v3396_v3  ;;  %v3439_v11 = vpop.f32.mrb[2].mxu1  ;;  %3700 = vmatprep.subr.bf16.mxu0 %v4283_v61  ;;  %v4322_v61 = vcombine.low %v378_v47, %v382_v48  ;;  %v398_v2 = vld [vmem:[%s5060_s4 + $0x370] sm:$0xff] }
 0x164   : > { %3740 = vmatpush1.bf16.msra.mxu1 %v4402_v58  ;;  %v3440_v15 = vpop.f32.mrb[3].mxu1  ;;  %v518_v58 = vld [vmem:[%s5060_s4 + $0x730] sm:$0xff]  ;;  %v4339_v8 = vcombine.high %v394_v1, %v398_v2 }
 0x165   : > { %3741 = vmatprep.subr.bf16.mxu1 %v4411_v63  ;;  %v4331_v63 = vcombine.high %v386_v55, %v390_v56  ;;  %v4459_v0 = vcombine.high %v514_v57, %v518_v58  ;;  %v522_v3 = vld [vmem:[%s5060_s4 + $0x750] sm:$0xff]  ;;  %v4458_v7 = vcombine.low %v514_v57, %v518_v58  ;;  %v4338_v15 = vcombine.low %v394_v1, %v398_v2 }
 0x166   : > { %3701 = vmatpush1.bf16.msra.mxu0 %v4282_v9  ;;  %v4467_v9 = vcombine.high %v522_v3, %v526_v4  ;;  %v402_v11 = vld [vmem:[%s5060_s4 + $0x390] sm:$0xff] }
 0x167   : > { %3702 = vmatprep.subr.bf16.mxu0 %v4291_v14  ;;  %v406_v12 = vld [vmem:[%s5060_s4 + $0x3b0] sm:$0xff] }
 0x168   : > { %3742 = vmatpush1.bf16.msra.mxu1 %v4410_v13  ;;  %v530_v13 = vld [vmem:[%s5060_s4 + $0x790] sm:$0xff]  ;;  %v4347_v18 = vcombine.high %v402_v11, %v406_v12 }
 0x169   : > { %3743 = vmatprep.subr.bf16.mxu1 %v4419_v16  ;;  %v534_v14 = vld [vmem:[%s5060_s4 + $0x7b0] sm:$0xff]  ;;  %v4466_v16 = vcombine.low %v522_v3, %v526_v4 }
 0x16a   : > { %3703 = vmatpush1.bf16.msra.mxu0 %v4290_v23  ;;  %v4475_v19 = vcombine.high %v530_v13, %v534_v14  ;;  %v538_v23 = vld [vmem:[%s5060_s4 + $0x7d0] sm:$0xff] }
 0x16b   : > { %3704 = vmatprep.subr.bf16.mxu0 %v4299_v25  ;;  %v4346_v25 = vcombine.low %v402_v11, %v406_v12  ;;  %v558_v42 = vld [vmem:[%s5060_s4 + $0x870] sm:$0xff] }
 0x16c   : > { %3744 = vmatpush1.bf16.msra.mxu1 %v4418_v24  ;;  %v542_v24 = vld [vmem:[%s5060_s4 + $0x7f0] sm:$0xff]  ;;  %v4499_v47 = vcombine.high %v554_v41, %v558_v42 }
 0x16d   : > { %3745 = vmatprep.subr.bf16.mxu1 %v4427_v26  ;;  %v4474_v26 = vcombine.low %v530_v13, %v534_v14  ;;  %v4483_v28 = vcombine.high %v538_v23, %v542_v24  ;;  %v562_v49 = vld [vmem:[%s5060_s4 + $0x890] sm:$0xff] }
 0x16e   : > { %3705 = vmatpush1.bf16.msra.mxu0 %v4298_v33  ;;  %v674_v33 = vld [vmem:[%s5060_s4 + $0xc10] sm:$0xff] }
 0x16f   : > { %3706 = vmatprep.subr.bf16.mxu0 %v4307_v35  ;;  %v4354_v35 = vcombine.low %v410_v20, %v414_v22  ;;  %v566_v50 = vld [vmem:[%s5060_s4 + $0x8b0] sm:$0xff] }
 0x170   : > { %3746 = vmatpush1.bf16.msra.mxu1 %v4426_v34  ;;  %v678_v34 = vld [vmem:[%s5060_s4 + $0xc30] sm:$0xff]  ;;  %v4507_v55 = vcombine.high %v562_v49, %v566_v50 }
 0x171   : > { %3747 = vmatprep.subr.bf16.mxu1 %v4435_v36  ;;  %v4482_v36 = vcombine.low %v538_v23, %v542_v24  ;;  %v4619_v39 = vcombine.high %v674_v33, %v678_v34  ;;  %v570_v57 = vld [vmem:[%s5060_s4 + $0x8d0] sm:$0xff] }
 0x172   : > { %3707 = vmatpush1.bf16.msra.mxu0 %v4306_v43  ;;  %v682_v43 = vld [vmem:[%s5060_s4 + $0xc50] sm:$0xff] }
 0x173   : > { %3708 = vmatprep.subr.bf16.mxu0 %v4315_v45  ;;  %v4490_v45 = vcombine.low %v546_v30, %v550_v31  ;;  %v574_v58 = vld [vmem:[%s5060_s4 + $0x8f0] sm:$0xff] }
 0x174   : > { %3748 = vmatpush1.bf16.msra.mxu1 %v4434_v44  ;;  %v686_v44 = vld [vmem:[%s5060_s4 + $0xc70] sm:$0xff]  ;;  %v4515_v1 = vcombine.high %v570_v57, %v574_v58 }
 0x175   : > { %3749 = vmatprep.subr.bf16.mxu1 %v4443_v46  ;;  %v4618_v46 = vcombine.low %v674_v33, %v678_v34  ;;  %v4627_v48 = vcombine.high %v682_v43, %v686_v44  ;;  %v578_v3 = vld [vmem:[%s5060_s4 + $0x910] sm:$0xff] }
 0x176   : > { %3709 = vmatpush1.bf16.msra.mxu0 %v4314_v51  ;;  %v690_v51 = vld [vmem:[%s5060_s4 + $0xc90] sm:$0xff] }
 0x177   : > { %3710 = vmatprep.subr.bf16.mxu0 %v4323_v53  ;;  %v4498_v53 = vcombine.low %v554_v41, %v558_v42  ;;  %v582_v4 = vld [vmem:[%s5060_s4 + $0x930] sm:$0xff] }
 0x178   : > { %3750 = vmatpush1.bf16.msra.mxu1 %v4442_v52  ;;  %v694_v52 = vld [vmem:[%s5060_s4 + $0xcb0] sm:$0xff]  ;;  %v4523_v11 = vcombine.high %v578_v3, %v582_v4 }
 0x179   : > { %3751 = vmatprep.subr.bf16.mxu1 %v4451_v54  ;;  %v4626_v54 = vcombine.low %v682_v43, %v686_v44  ;;  %v4635_v56 = vcombine.high %v690_v51, %v694_v52  ;;  %v586_v13 = vld [vmem:[%s5060_s4 + $0x950] sm:$0xff]  ;;  %v264_v43 = vld [vmem:[%s5083_s12] sm:$0xff] }
 0x17a   : > { %3711 = vmatpush1.bf16.msra.mxu0 %v4322_v61  ;;  %v698_v61 = vld [vmem:[%s5060_s4 + $0xcd0] sm:$0xff] }
 0x17b   : > { %3712 = vmatprep.subr.bf16.mxu0 %v4331_v63  ;;  %v4506_v63 = vcombine.low %v562_v49, %v566_v50  ;;  %v590_v14 = vld [vmem:[%s5060_s4 + $0x970] sm:$0xff] }
 0x17c   : > { %3752 = vmatpush1.bf16.msra.mxu1 %v4450_v62  ;;  %v702_v62 = vld [vmem:[%s5060_s4 + $0xcf0] sm:$0xff]  ;;  %v4531_v20 = vcombine.high %v586_v13, %v590_v14 }
 0x17d   : > { %3753 = vmatprep.subr.bf16.mxu1 %v4459_v0  ;;  %v4634_v0 = vcombine.low %v690_v51, %v694_v52  ;;  %v4643_v2 = vcombine.high %v698_v61, %v702_v62  ;;  %v594_v23 = vld [vmem:[%s5060_s4 + $0x990] sm:$0xff] }
 0x17e   : > { %3713 = vmatpush1.bf16.msra.mxu0 %v4330_v5  ;;  %v706_v5 = vld [vmem:[%s5060_s4 + $0xd10] sm:$0xff] }
 0x17f   : > { %3714 = vmatprep.subr.bf16.mxu0 %v4339_v8  ;;  %v4514_v8 = vcombine.low %v570_v57, %v574_v58  ;;  %v598_v24 = vld [vmem:[%s5060_s4 + $0x9b0] sm:$0xff] }
 0x180   : > { %3754 = vmatpush1.bf16.msra.mxu1 %v4458_v7  ;;  %v710_v7 = vld [vmem:[%s5060_s4 + $0xd30] sm:$0xff]  ;;  %v4539_v30 = vcombine.high %v594_v23, %v598_v24 }
 0x181   : > { %3755 = vmatprep.subr.bf16.mxu1 %v4467_v9  ;;  %v4642_v9 = vcombine.low %v698_v61, %v702_v62  ;;  %v4651_v12 = vcombine.high %v706_v5, %v710_v7  ;;  %v602_v34 = vld [vmem:[%s5060_s4 + $0x9d0] sm:$0xff] }
 0x182   : > { %3715 = vmatpush1.bf16.msra.mxu0 %v4338_v15  ;;  %v714_v15 = vld [vmem:[%s5060_s4 + $0xd50] sm:$0xff] }
 0x183   : > { %3716 = vmatprep.subr.bf16.mxu0 %v4347_v18  ;;  %v4522_v18 = vcombine.low %v578_v3, %v582_v4  ;;  %v730_v41 = vld [vmem:[%s5060_s4 + $0xdd0] sm:$0xff] }
 0x184   : > { %3756 = vmatpush1.bf16.msra.mxu1 %v4466_v16  ;;  %v718_v16 = vld [vmem:[%s5060_s4 + $0xd70] sm:$0xff] }
 0x185   : > { %3757 = vmatprep.subr.bf16.mxu1 %v4475_v19  ;;  %v4650_v19 = vcombine.low %v706_v5, %v710_v7  ;;  %v4659_v22 = vcombine.high %v714_v15, %v718_v16  ;;  %v734_v42 = vld [vmem:[%s5060_s4 + $0xdf0] sm:$0xff] }
 0x186   : > { %3717 = vmatpush1.bf16.msra.mxu0 %v4346_v25  ;;  %v722_v25 = vld [vmem:[%s5060_s4 + $0xd90] sm:$0xff] }
 0x187   : > { %3718 = vmatprep.subr.bf16.mxu0 %v4355_v27  ;;  %v4530_v27 = vcombine.low %v586_v13, %v590_v14  ;;  %v265_v49 = vld [vmem:[%s5083_s12 + $0x8] sm:$0xff] }
 0x188   : > { %3758 = vmatpush1.bf16.msra.mxu1 %v4474_v26  ;;  %v726_v26 = vld [vmem:[%s5060_s4 + $0xdb0] sm:$0xff] }
 0x189   : > { %3759 = vmatprep.subr.bf16.mxu1 %v4483_v28  ;;  %v4658_v28 = vcombine.low %v714_v15, %v718_v16  ;;  %v4667_v33 = vcombine.high %v722_v25, %v726_v26  ;;  %v4666_v51 = vcombine.low %v722_v25, %v726_v26  ;;  %v738_v58 = vld [vmem:[%s5060_s4 + $0xe10] sm:$0xff] }
 0x18a   : > { %3719 = vmatpush1.bf16.msra.mxu0 %v4354_v35  ;;  %v606_v35 = vld [vmem:[%s5060_s4 + $0x9f0] sm:$0xff] }
 0x18b   : > { %3770 = vmatprep.subr.bf16.mxu0 %v4491_v38  ;;  %v4547_v52 = vcombine.high %v602_v34, %v606_v35  ;;  %v742_v61 = vld [vmem:[%s5060_s4 + $0xe30] sm:$0xff] }
 0x18c   : > { %3760 = vmatpush1.bf16.msra.mxu1 %v4482_v36  ;;  %v618_v3 = vld [vmem:[%s5060_s4 + $0xa50] sm:$0xff] }
 0x18d   : > { %3811 = vmatprep.subr.bf16.mxu1 %v4619_v39  ;;  %3721 = vmatmul.mubr.bf16.vlgmr.msra.gmra.mrb[16].mxu0 %v5174_v17  ;;  %v622_v4 = vld [vmem:[%s5060_s4 + $0xa70] sm:$0xff] }
 0x18e   : > { %3771 = vmatpush1.bf16.msra.mxu0 %v4490_v45  ;;  %3802 = vmatprep.mubr.bf16.mxu0 %v5184_v29  ;;  %v746_v5 = vld [vmem:[%s5060_s4 + $0xe50] sm:$0xff] }
 0x18f   : > { %3762 = vmatmul.mubr.bf16.vlgmr.msra.gmra.mrb[16].mxu1 %v5179_v21  ;;  %3772 = vmatprep.subr.bf16.mxu0 %v4499_v47  ;;  %v4538_v47 = vcombine.low %v594_v23, %v598_v24  ;;  %v750_v7 = vld [vmem:[%s5060_s4 + $0xe70] sm:$0xff] }
 0x190   : > { %3812 = vmatpush1.bf16.msra.mxu1 %v4618_v46  ;;  %3843 = vmatprep.mubr.bf16.mxu1 %v5189_v32  ;;  %v626_v13 = vld [vmem:[%s5060_s4 + $0xa90] sm:$0xff] }
 0x191   : > { %3813 = vmatprep.subr.bf16.mxu1 %v4627_v48  ;;  %v630_v14 = vld [vmem:[%s5060_s4 + $0xab0] sm:$0xff] }
 0x192   : > { %3773 = vmatpush1.bf16.msra.mxu0 %v4498_v53  ;;  %v754_v15 = vld [vmem:[%s5060_s4 + $0xe90] sm:$0xff] }
 0x193   : > { %3774 = vmatprep.subr.bf16.mxu0 %v4507_v55  ;;  %v610_v55 = vld [vmem:[%s5060_s4 + $0xa10] sm:$0xff] }
 0x194   : > { %3814 = vmatpush1.bf16.msra.mxu1 %v4626_v54  ;;  %v758_v16 = vld [vmem:[%s5060_s4 + $0xeb0] sm:$0xff] }
 0x195   : > { %3815 = vmatprep.subr.bf16.mxu1 %v4635_v56  ;;  %v614_v56 = vld [vmem:[%s5060_s4 + $0xa30] sm:$0xff] }
 0x196   : > { %3775 = vmatpush1.bf16.msra.mxu0 %v4506_v63  ;;  %v4546_v63 = vcombine.low %v602_v34, %v606_v35  ;;  %v634_v23 = vld [vmem:[%s5060_s4 + $0xad0] sm:$0xff] }
 0x197   : > { %3776 = vmatprep.subr.bf16.mxu0 %v4515_v1  ;;  %v4555_v1 = vcombine.high %v610_v55, %v614_v56  ;;  %v638_v24 = vld [vmem:[%s5060_s4 + $0xaf0] sm:$0xff] }
 0x198   : > { %3816 = vmatpush1.bf16.msra.mxu1 %v4634_v0  ;;  %v4674_v0 = vcombine.low %v730_v41, %v734_v42  ;;  %v762_v25 = vld [vmem:[%s5060_s4 + $0xed0] sm:$0xff] }
 0x199   : > { %3817 = vmatprep.subr.bf16.mxu1 %v4643_v2  ;;  %v4683_v2 = vcombine.high %v738_v58, %v742_v61  ;;  %v766_v26 = vld [vmem:[%s5060_s4 + $0xef0] sm:$0xff] }
 0x19a   : > { %3777 = vmatpush1.bf16.msra.mxu0 %v4514_v8  ;;  %v4554_v8 = vcombine.low %v610_v55, %v614_v56  ;;  %v646_v34 = vld [vmem:[%s5060_s4 + $0xb30] sm:$0xff] }
 0x19b   : > { %3778 = vmatprep.subr.bf16.mxu0 %v4523_v11  ;;  %v4563_v11 = vcombine.high %v618_v3, %v622_v4  ;;  %v770_v35 = vld [vmem:[%s5060_s4 + $0xf10] sm:$0xff] }
 0x19c   : > { %3818 = vmatpush1.bf16.msra.mxu1 %v4642_v9  ;;  %v4682_v9 = vcombine.low %v738_v58, %v742_v61  ;;  %v670_v58 = vld [vmem:[%s5060_s4 + $0xbf0] sm:$0xff] }
 0x19d   : > { %3819 = vmatprep.subr.bf16.mxu1 %v4651_v12  ;;  %v4691_v12 = vcombine.high %v746_v5, %v750_v7  ;;  %v794_v61 = vld [vmem:[%s5060_s4 + $0xfd0] sm:$0xff] }
 0x19e   : > { %3779 = vmatpush1.bf16.msra.mxu0 %v4522_v18  ;;  %v4562_v18 = vcombine.low %v618_v3, %v622_v4  ;;  %v291_v3 = vld [vmem:[%s5060_s4 + $0x18] sm:$0xff] }
 0x19f   : > { %3780 = vmatprep.subr.bf16.mxu0 %v4531_v20  ;;  %v4571_v20 = vcombine.high %v626_v13, %v630_v14  ;;  %v295_v4 = vld [vmem:[%s5060_s4 + $0x38] sm:$0xff] }
 0x1a0   : > { %3820 = vmatpush1.bf16.msra.mxu1 %v4650_v19  ;;  %v3476_v31 = vpop.f32.mrb[4].mxu0  ;;  %v4690_v19 = vcombine.low %v746_v5, %v750_v7  ;;  %v419_v5 = vld [vmem:[%s5060_s4 + $0x418] sm:$0xff] }
 0x1a1   : > { %3821 = vmatprep.subr.bf16.mxu1 %v4659_v22  ;;  %v3477_v36 = vadd.f32 %v3476_v31, %v5424_v6  ;;  %v3478_v39 = vpop.f32.mrb[5].mxu0  ;;  %v4699_v22 = vcombine.high %v754_v15, %v758_v16  ;;  %v4707_v31 = vcombine.high %v762_v25, %v766_v26  ;;  %v423_v7 = vld [vmem:[%s5060_s4 + $0x438] sm:$0xff] }
 0x1a2   : > { %v3517_v38 = vpop.f32.mrb[4].mxu1  ;;  %v3479_v44 = vadd.f32 %v3478_v39, %v5426_v10  ;;  %v3480_v46 = vpop.f32.mrb[6].mxu0  ;;  %3781 = vmatpush1.bf16.msra.mxu0 %v4530_v27  ;;  %v4675_v10 = vcombine.high %v730_v41, %v734_v42  ;;  %v4570_v27 = vcombine.low %v626_v13, %v630_v14  ;;  %v4706_v39 = vcombine.low %v762_v25, %v766_v26  ;;  %v299_v13 = vld [vmem:[%s5060_s4 + $0x58] sm:$0xff] }
 0x1a3   : > { %v3519_v45 = vpop.f32.mrb[5].mxu1  ;;  %v3518_v48 = vadd.f32 %v3517_v38, %v3477_v36  ;;  %v3481_v6 = vpop.f32.mrb[7].mxu0  ;;  %3782 = vmatprep.subr.bf16.mxu0 %v4539_v30  ;;  %v4579_v30 = vcombine.high %v634_v23, %v638_v24  ;;  %v774_v36 = vld [vmem:[%s5060_s4 + $0xf30] sm:$0xff]  ;;  %v4578_v38 = vcombine.low %v634_v23, %v638_v24  ;;  %v303_v14 = vld [vmem:[%s5060_s4 + $0x78] sm:$0xff] }
 0x1a4   : > { %v3521_v50 = vpop.f32.mrb[6].mxu1  ;;  %3822 = vmatpush1.bf16.msra.mxu1 %v4658_v28  ;;  %v3520_v53 = vadd.f32 %v3519_v45, %v3479_v44  ;;  %v4698_v28 = vcombine.low %v754_v15, %v758_v16  ;;  %v4715_v42 = vcombine.high %v770_v35, %v774_v36  ;;  %v654_v44 = vld [vmem:[%s5060_s4 + $0xb70] sm:$0xff]  ;;  %v427_v15 = vld [vmem:[%s5060_s4 + $0x458] sm:$0xff] }
 0x1a5   : > { %v3522_v54 = vpop.f32.mrb[7].mxu1  ;;  %3823 = vmatprep.subr.bf16.mxu1 %v4667_v33  ;;  %v4016_v57 = vadd.f32 %v3518_v48, %v264_v43  ;;  %v642_v33 = vld [vmem:[%s5060_s4 + $0xb10] sm:$0xff]  ;;  %v4714_v48 = vcombine.low %v770_v35, %v774_v36  ;;  %v431_v16 = vld [vmem:[%s5060_s4 + $0x478] sm:$0xff] }
 0x1a6   : > { %v4017_v62 = vadd.f32 %v3520_v53, %v265_v49  ;;  %3783 = vmatpush1.bf16.msra.mxu0 %v4538_v47  ;;  %v4587_v41 = vcombine.high %v642_v33, %v646_v34  ;;  %v650_v43 = vld [vmem:[%s5060_s4 + $0xb50] sm:$0xff]  ;;  %v4586_v47 = vcombine.low %v642_v33, %v646_v34  ;;  %v307_v23 = vld [vmem:[%s5060_s4 + $0x98] sm:$0xff] }
 0x1a7   : > { %4024 = vst [vmem:[%s5083_s12] sm:$0xff] %v4016_v57  ;;  %3784 = vmatprep.subr.bf16.mxu0 %v4547_v52  ;;  %v778_v45 = vld [vmem:[%s5060_s4 + $0xf50] sm:$0xff]  ;;  %v4595_v49 = vcombine.high %v650_v43, %v654_v44  ;;  %v4594_v54 = vcombine.low %v650_v43, %v654_v44  ;;  %v311_v24 = vld [vmem:[%s5060_s4 + $0xb8] sm:$0xff] }
 0x1a8   : > { %3824 = vmatpush1.bf16.msra.mxu1 %v4666_v51  ;;  %4025 = vst [vmem:[%s5083_s12 + $0x8] sm:$0xff] %v4017_v62  ;;  %v782_v46 = vld [vmem:[%s5060_s4 + $0xf70] sm:$0xff]  ;;  %v435_v25 = vld [vmem:[%s5060_s4 + $0x498] sm:$0xff] }
 0x1a9   : > { %3825 = vmatprep.subr.bf16.mxu1 %v4675_v10  ;;  %v4723_v50 = vcombine.high %v778_v45, %v782_v46  ;;  %v658_v6 = vld [vmem:[%s5060_s4 + $0xb90] sm:$0xff]  ;;  %v4722_v10 = vcombine.low %v778_v45, %v782_v46  ;;  %v439_v26 = vld [vmem:[%s5060_s4 + $0x4b8] sm:$0xff] }
 0x1aa   : > { %3785 = vmatpush1.bf16.msra.mxu0 %v4546_v63  ;;  %v662_v51 = vld [vmem:[%s5060_s4 + $0xbb0] sm:$0xff]  ;;  %v315_v33 = vld [vmem:[%s5060_s4 + $0xd8] sm:$0xff] }
 0x1ab   : > { %3786 = vmatprep.subr.bf16.mxu0 %v4555_v1  ;;  %v786_v52 = vld [vmem:[%s5060_s4 + $0xf90] sm:$0xff]  ;;  %v4603_v55 = vcombine.high %v658_v6, %v662_v51  ;;  %v4602_v63 = vcombine.low %v658_v6, %v662_v51  ;;  %v319_v34 = vld [vmem:[%s5060_s4 + $0xf8] sm:$0xff] }
 0x1ac   : > { %3826 = vmatpush1.bf16.msra.mxu1 %v4674_v0  ;;  %v790_v53 = vld [vmem:[%s5060_s4 + $0xfb0] sm:$0xff]  ;;  %v443_v35 = vld [vmem:[%s5060_s4 + $0x4d8] sm:$0xff]  ;;  %v4260_v46 = vcombine.low %v315_v33, %v319_v34 }
 0x1ad   : > { %3827 = vmatprep.subr.bf16.mxu1 %v4683_v2  ;;  %v4731_v56 = vcombine.high %v786_v52, %v790_v53  ;;  %v666_v57 = vld [vmem:[%s5060_s4 + $0xbd0] sm:$0xff]  ;;  %v4730_v0 = vcombine.low %v786_v52, %v790_v53  ;;  %v447_v36 = vld [vmem:[%s5060_s4 + $0x4f8] sm:$0xff] }
 0x1ae   : > { %3787 = vmatpush1.bf16.msra.mxu0 %v4554_v8  ;;  %v798_v62 = vld [vmem:[%s5060_s4 + $0xff0] sm:$0xff]  ;;  %v4611_v1 = vcombine.high %v666_v57, %v670_v58  ;;  %v4610_v8 = vcombine.low %v666_v57, %v670_v58  ;;  %v323_v43 = vld [vmem:[%s5060_s4 + $0x118] sm:$0xff] }
 0x1af   : > { %3788 = vmatprep.subr.bf16.mxu0 %v4563_v11  ;;  %v4739_v2 = vcombine.high %v794_v61, %v798_v62  ;;  %v4237_v11 = vcombine.high %v291_v3, %v295_v4  ;;  %v327_v44 = vld [vmem:[%s5060_s4 + $0x138] sm:$0xff] }
 0x1b0   : > { %3828 = vmatpush1.bf16.msra.mxu1 %v4682_v9  ;;  %v4738_v9 = vcombine.low %v794_v61, %v798_v62  ;;  %v451_v45 = vld [vmem:[%s5060_s4 + $0x518] sm:$0xff]  ;;  %v4268_v52 = vcombine.low %v323_v43, %v327_v44 }
 0x1b1   : > { %3829 = vmatprep.subr.bf16.mxu1 %v4691_v12  ;;  %v4365_v12 = vcombine.high %v419_v5, %v423_v7  ;;  %v459_v6 = vld [vmem:[%s5060_s4 + $0x558] sm:$0xff] }
 0x1b2   : > { %3789 = vmatpush1.bf16.msra.mxu0 %v4562_v18  ;;  %v4236_v18 = vcombine.low %v291_v3, %v295_v4  ;;  %v463_v51 = vld [vmem:[%s5060_s4 + $0x578] sm:$0xff] }
 0x1b3   : > { %3790 = vmatprep.subr.bf16.mxu0 %v4571_v20  ;;  %v4245_v20 = vcombine.high %v299_v13, %v303_v14  ;;  %v467_v57 = vld [vmem:[%s5060_s4 + $0x598] sm:$0xff]  ;;  %v4404_v62 = vcombine.low %v459_v6, %v463_v51 }
 0x1b4   : > { %3830 = vmatpush1.bf16.msra.mxu1 %v4690_v19  ;;  %v4364_v19 = vcombine.low %v419_v5, %v423_v7  ;;  %v471_v58 = vld [vmem:[%s5060_s4 + $0x5b8] sm:$0xff] }
 0x1b5   : > { %3831 = vmatprep.subr.bf16.mxu1 %v4699_v22  ;;  %v4373_v22 = vcombine.high %v427_v15, %v431_v16  ;;  %v351_v3 = vld [vmem:[%s5060_s4 + $0x1f8] sm:$0xff] }
 0x1b6   : > { %3791 = vmatpush1.bf16.msra.mxu0 %v4570_v27  ;;  %v4244_v27 = vcombine.low %v299_v13, %v303_v14  ;;  %v475_v7 = vld [vmem:[%s5060_s4 + $0x5d8] sm:$0xff] }
 0x1b7   : > { %3792 = vmatprep.subr.bf16.mxu0 %v4579_v30  ;;  %v4253_v30 = vcombine.high %v307_v23, %v311_v24 }
 0x1b8   : > { %3832 = vmatpush1.bf16.msra.mxu1 %v4698_v28  ;;  %v4372_v28 = vcombine.low %v427_v15, %v431_v16 }
 0x1b9   : > { %3833 = vmatprep.subr.bf16.mxu1 %v4707_v31  ;;  %v4381_v31 = vcombine.high %v435_v25, %v439_v26 }
 0x1ba   : > { %3793 = vmatpush1.bf16.msra.mxu0 %v4578_v38  ;;  %v4252_v38 = vcombine.low %v307_v23, %v311_v24  ;;  %v355_v23 = vld [vmem:[%s5060_s4 + $0x218] sm:$0xff] }
 0x1bb   : > { %3794 = vmatprep.subr.bf16.mxu0 %v4587_v41  ;;  %v4261_v41 = vcombine.high %v315_v33, %v319_v34  ;;  %v359_v24 = vld [vmem:[%s5060_s4 + $0x238] sm:$0xff] }
 0x1bc   : > { %3834 = vmatpush1.bf16.msra.mxu1 %v4706_v39  ;;  %v4380_v39 = vcombine.low %v435_v25, %v439_v26  ;;  %v483_v25 = vld [vmem:[%s5060_s4 + $0x618] sm:$0xff] }
 0x1bd   : > { %3835 = vmatprep.subr.bf16.mxu1 %v4715_v42  ;;  %v4389_v42 = vcombine.high %v443_v35, %v447_v36  ;;  %v487_v26 = vld [vmem:[%s5060_s4 + $0x638] sm:$0xff] }
 0x1be   : > { %3795 = vmatpush1.bf16.msra.mxu0 %v4586_v47  ;;  %v4269_v47 = vcombine.high %v323_v43, %v327_v44  ;;  %v363_v33 = vld [vmem:[%s5060_s4 + $0x258] sm:$0xff] }
 0x1bf   : > { %3796 = vmatprep.subr.bf16.mxu0 %v4595_v49  ;;  %v331_v49 = vld [vmem:[%s5060_s4 + $0x158] sm:$0xff] }
 0x1c0   : > { %3836 = vmatpush1.bf16.msra.mxu1 %v4714_v48  ;;  %v367_v34 = vld [vmem:[%s5060_s4 + $0x278] sm:$0xff] }
 0x1c1   : > { %3837 = vmatprep.subr.bf16.mxu1 %v4723_v50  ;;  %v335_v50 = vld [vmem:[%s5060_s4 + $0x178] sm:$0xff] }
 0x1c2   : > { %3797 = vmatpush1.bf16.msra.mxu0 %v4594_v54  ;;  %v4277_v54 = vcombine.high %v331_v49, %v335_v50  ;;  %v4276_v61 = vcombine.low %v331_v49, %v335_v50  ;;  %v371_v43 = vld [vmem:[%s5060_s4 + $0x298] sm:$0xff] }
 0x1c3   : > { %3798 = vmatprep.subr.bf16.mxu0 %v4603_v55  ;;  %v339_v55 = vld [vmem:[%s5060_s4 + $0x198] sm:$0xff] }
 0x1c4   : > { %3838 = vmatpush1.bf16.msra.mxu1 %v4722_v10  ;;  %v4405_v10 = vcombine.high %v459_v6, %v463_v51  ;;  %v375_v44 = vld [vmem:[%s5060_s4 + $0x2b8] sm:$0xff] }
 0x1c5   : > { %3839 = vmatprep.subr.bf16.mxu1 %v4731_v56  ;;  %v343_v56 = vld [vmem:[%s5060_s4 + $0x1b8] sm:$0xff] }
 0x1c6   : > { %3799 = vmatpush1.bf16.msra.mxu0 %v4602_v63  ;;  %v4285_v63 = vcombine.high %v339_v55, %v343_v56  ;;  %v4284_v13 = vcombine.low %v339_v55, %v343_v56  ;;  %v379_v49 = vld [vmem:[%s5060_s4 + $0x2d8] sm:$0xff] }
 0x1c7   : > { %3800 = vmatprep.subr.bf16.mxu0 %v4611_v1  ;;  %v4413_v1 = vcombine.high %v467_v57, %v471_v58  ;;  %v383_v50 = vld [vmem:[%s5060_s4 + $0x2f8] sm:$0xff] }
 0x1c8   : > { %3840 = vmatpush1.bf16.msra.mxu1 %v4730_v0  ;;  %v507_v6 = vld [vmem:[%s5060_s4 + $0x6d8] sm:$0xff] }
 0x1c9   : > { %3841 = vmatprep.subr.bf16.mxu1 %v4739_v2  ;;  %v347_v2 = vld [vmem:[%s5060_s4 + $0x1d8] sm:$0xff] }
 0x1ca   : > { %3801 = vmatpush1.bf16.msra.mxu0 %v4610_v8  ;;  %v479_v8 = vld [vmem:[%s5060_s4 + $0x5f8] sm:$0xff] }
 0x1cb   : > { %3852 = vmatprep.subr.bf16.mxu0 %v4237_v11  ;;  %v511_v51 = vld [vmem:[%s5060_s4 + $0x6f8] sm:$0xff] }
 0x1cc   : > { %3842 = vmatpush1.bf16.msra.mxu1 %v4738_v9  ;;  %v387_v55 = vld [vmem:[%s5060_s4 + $0x318] sm:$0xff] }
 0x1cd   : > { %3893 = vmatprep.subr.bf16.mxu1 %v4365_v12  ;;  %3803 = vmatmul.mubr.bf16.vlgmr.msra.gmra.mrb[20].mxu0 %v5254_v37  ;;  %v391_v56 = vld [vmem:[%s5060_s4 + $0x338] sm:$0xff] }
 0x1ce   : > { %3853 = vmatpush1.bf16.msra.mxu0 %v4236_v18  ;;  %3884 = vmatprep.mubr.bf16.mxu0 %v5126_v59  ;;  %v455_v59 = vld [vmem:[%s5060_s4 + $0x538] sm:$0xff]  ;;  %v4412_v18 = vcombine.low %v467_v57, %v471_v58 }
 0x1cf   : > { %3844 = vmatmul.mubr.bf16.vlgmr.msra.gmra.mrb[20].mxu1 %v5258_v40  ;;  %3854 = vmatprep.subr.bf16.mxu0 %v4245_v20  ;;  %v4397_v48 = vcombine.high %v451_v45, %v455_v59  ;;  %v4396_v53 = vcombine.low %v451_v45, %v455_v59  ;;  %v499_v45 = vld [vmem:[%s5060_s4 + $0x698] sm:$0xff] }
 0x1d0   : > { %3894 = vmatpush1.bf16.msra.mxu1 %v4364_v19  ;;  %3925 = vmatprep.mubr.bf16.mxu1 %v5128_v60  ;;  %v4388_v60 = vcombine.low %v443_v35, %v447_v36  ;;  %v4293_v19 = vcombine.high %v347_v2, %v351_v3  ;;  %v491_v35 = vld [vmem:[%s5060_s4 + $0x658] sm:$0xff] }
 0x1d1   : > { %3895 = vmatprep.subr.bf16.mxu1 %v4373_v22  ;;  %v4421_v22 = vcombine.high %v475_v7, %v479_v8  ;;  %v495_v36 = vld [vmem:[%s5060_s4 + $0x678] sm:$0xff] }
 0x1d2   : > { %3855 = vmatpush1.bf16.msra.mxu0 %v4244_v27  ;;  %v4292_v27 = vcombine.low %v347_v2, %v351_v3  ;;  %v503_v59 = vld [vmem:[%s5060_s4 + $0x6b8] sm:$0xff] }
 0x1d3   : > { %3856 = vmatprep.subr.bf16.mxu0 %v4253_v30  ;;  %v4301_v30 = vcombine.high %v355_v23, %v359_v24  ;;  %v515_v57 = vld [vmem:[%s5060_s4 + $0x718] sm:$0xff] }
 0x1d4   : > { %3896 = vmatpush1.bf16.msra.mxu1 %v4372_v28  ;;  %v4420_v28 = vcombine.low %v475_v7, %v479_v8  ;;  %v519_v58 = vld [vmem:[%s5060_s4 + $0x738] sm:$0xff] }
 0x1d5   : > { %3897 = vmatprep.subr.bf16.mxu1 %v4381_v31  ;;  %v4429_v31 = vcombine.high %v483_v25, %v487_v26  ;;  %v399_v2 = vld [vmem:[%s5060_s4 + $0x378] sm:$0xff]  ;;  %v4460_v7 = vcombine.low %v515_v57, %v519_v58 }
 0x1d6   : > { %3857 = vmatpush1.bf16.msra.mxu0 %v4252_v38  ;;  %v4300_v38 = vcombine.low %v355_v23, %v359_v24  ;;  %v523_v3 = vld [vmem:[%s5060_s4 + $0x758] sm:$0xff] }
 0x1d7   : > { %3858 = vmatprep.subr.bf16.mxu0 %v4261_v41  ;;  %v4309_v41 = vcombine.high %v363_v33, %v367_v34  ;;  %v411_v23 = vld [vmem:[%s5060_s4 + $0x3d8] sm:$0xff] }
 0x1d8   : > { %3898 = vmatpush1.bf16.msra.mxu1 %v4380_v39  ;;  %v4428_v39 = vcombine.low %v483_v25, %v487_v26  ;;  %v415_v24 = vld [vmem:[%s5060_s4 + $0x3f8] sm:$0xff] }
 0x1d9   : > { %3899 = vmatprep.subr.bf16.mxu1 %v4389_v42  ;;  %v4437_v42 = vcombine.high %v491_v35, %v495_v36  ;;  %v539_v25 = vld [vmem:[%s5060_s4 + $0x7d8] sm:$0xff] }
 0x1da   : > { %3859 = vmatpush1.bf16.msra.mxu0 %v4260_v46  ;;  %v4308_v46 = vcombine.low %v363_v33, %v367_v34  ;;  %v543_v26 = vld [vmem:[%s5060_s4 + $0x7f8] sm:$0xff] }
 0x1db   : > { %3860 = vmatprep.subr.bf16.mxu0 %v4269_v47  ;;  %v4317_v47 = vcombine.high %v371_v43, %v375_v44  ;;  %v547_v33 = vld [vmem:[%s5060_s4 + $0x818] sm:$0xff] }
 0x1dc   : > { %3900 = vmatpush1.bf16.msra.mxu1 %v4388_v60  ;;  %v4436_v60 = vcombine.low %v491_v35, %v495_v36  ;;  %v551_v34 = vld [vmem:[%s5060_s4 + $0x838] sm:$0xff] }
 0x1dd   : > { %3901 = vmatprep.subr.bf16.mxu1 %v4397_v48  ;;  %v4445_v48 = vcombine.high %v499_v45, %v503_v59  ;;  %v675_v35 = vld [vmem:[%s5060_s4 + $0xc18] sm:$0xff] }
 0x1de   : > { %3861 = vmatpush1.bf16.msra.mxu0 %v4268_v52  ;;  %v4316_v52 = vcombine.low %v371_v43, %v375_v44  ;;  %v679_v36 = vld [vmem:[%s5060_s4 + $0xc38] sm:$0xff] }
 0x1df   : > { %3862 = vmatprep.subr.bf16.mxu0 %v4277_v54  ;;  %v4325_v54 = vcombine.high %v379_v49, %v383_v50  ;;  %v555_v43 = vld [vmem:[%s5060_s4 + $0x858] sm:$0xff] }
 0x1e0   : > { %3902 = vmatpush1.bf16.msra.mxu1 %v4396_v53  ;;  %v3558_v0 = vpop.f32.mrb[8].mxu0  ;;  %v4444_v53 = vcombine.low %v499_v45, %v503_v59  ;;  %v559_v44 = vld [vmem:[%s5060_s4 + $0x878] sm:$0xff] }
 0x1e1   : > { %3903 = vmatprep.subr.bf16.mxu1 %v4405_v10  ;;  %v3560_v5 = vpop.f32.mrb[9].mxu0  ;;  %v4453_v10 = vcombine.high %v507_v6, %v511_v51  ;;  %v683_v45 = vld [vmem:[%s5060_s4 + $0xc58] sm:$0xff] }
 0x1e2   : > { %v3599_v4 = vpop.f32.mrb[8].mxu1  ;;  %v3562_v12 = vpop.f32.mrb[10].mxu0  ;;  %3863 = vmatpush1.bf16.msra.mxu0 %v4276_v61  ;;  %v4324_v61 = vcombine.low %v379_v49, %v383_v50  ;;  %v687_v59 = vld [vmem:[%s5060_s4 + $0xc78] sm:$0xff] }
 0x1e3   : > { %v5570_v9 = vadd.f32 %v3599_v4, %v3558_v0  ;;  %v3601_v11 = vpop.f32.mrb[9].mxu1  ;;  %v3563_v16 = vpop.f32.mrb[11].mxu0  ;;  %3864 = vmatprep.subr.bf16.mxu0 %v4285_v63  ;;  %v4333_v63 = vcombine.high %v387_v55, %v391_v56  ;;  %v4461_v0 = vcombine.high %v515_v57, %v519_v58  ;;  %v527_v4 = vld [vmem:[%s5060_s4 + $0x778] sm:$0xff] }
 0x1e4   : > { %v5572_v14 = vadd.f32 %v3601_v11, %v3560_v5  ;;  %v3603_v15 = vpop.f32.mrb[10].mxu1  ;;  %3904 = vmatpush1.bf16.msra.mxu1 %v4404_v62  ;;  %v4452_v62 = vcombine.low %v507_v6, %v511_v51  ;;  %v4332_v5 = vcombine.low %v387_v55, %v391_v56  ;;  %v4469_v11 = vcombine.high %v523_v3, %v527_v4  ;;  %v403_v12 = vld [vmem:[%s5060_s4 + $0x398] sm:$0xff] }
 0x1e5   : > { %v3604_v20 = vpop.f32.mrb[11].mxu1  ;;  %3905 = vmatprep.subr.bf16.mxu1 %v4413_v1  ;;  %v395_v1 = vld [vmem:[%s5060_s4 + $0x358] sm:$0xff] }
 0x1e6   : > { %3865 = vmatpush1.bf16.msra.mxu0 %v4284_v13  ;;  %v4341_v8 = vcombine.high %v395_v1, %v399_v2  ;;  %v407_v13 = vld [vmem:[%s5060_s4 + $0x3b8] sm:$0xff] }
 0x1e7   : > { %3866 = vmatprep.subr.bf16.mxu0 %v4293_v19  ;;  %v531_v15 = vld [vmem:[%s5060_s4 + $0x798] sm:$0xff]  ;;  %v4468_v19 = vcombine.low %v523_v3, %v527_v4  ;;  %v4349_v20 = vcombine.high %v403_v12, %v407_v13 }
 0x1e8   : > { %3906 = vmatpush1.bf16.msra.mxu1 %v4412_v18  ;;  %v535_v16 = vld [vmem:[%s5060_s4 + $0x7b8] sm:$0xff]  ;;  %v4340_v18 = vcombine.low %v395_v1, %v399_v2 }
 0x1e9   : > { %3907 = vmatprep.subr.bf16.mxu1 %v4421_v22  ;;  %v4477_v22 = vcombine.high %v531_v15, %v535_v16  ;;  %v563_v49 = vld [vmem:[%s5060_s4 + $0x898] sm:$0xff] }
 0x1ea   : > { %3867 = vmatpush1.bf16.msra.mxu0 %v4292_v27  ;;  %v4348_v27 = vcombine.low %v403_v12, %v407_v13  ;;  %v567_v50 = vld [vmem:[%s5060_s4 + $0x8b8] sm:$0xff] }
 0x1eb   : > { %3868 = vmatprep.subr.bf16.mxu0 %v4301_v30  ;;  %v4357_v30 = vcombine.high %v411_v23, %v415_v24  ;;  %v691_v6 = vld [vmem:[%s5060_s4 + $0xc98] sm:$0xff] }
 0x1ec   : > { %3908 = vmatpush1.bf16.msra.mxu1 %v4420_v28  ;;  %v4476_v28 = vcombine.low %v531_v15, %v535_v16  ;;  %v695_v51 = vld [vmem:[%s5060_s4 + $0xcb8] sm:$0xff] }
 0x1ed   : > { %3909 = vmatprep.subr.bf16.mxu1 %v4429_v31  ;;  %v4485_v31 = vcombine.high %v539_v25, %v543_v26  ;;  %v571_v55 = vld [vmem:[%s5060_s4 + $0x8d8] sm:$0xff]  ;;  %v4636_v58 = vcombine.low %v691_v6, %v695_v51 }
 0x1ee   : > { %3869 = vmatpush1.bf16.msra.mxu0 %v4300_v38  ;;  %v4356_v38 = vcombine.low %v411_v23, %v415_v24  ;;  %v575_v56 = vld [vmem:[%s5060_s4 + $0x8f8] sm:$0xff] }
 0x1ef   : > { %3870 = vmatprep.subr.bf16.mxu0 %v4309_v41  ;;  %v4493_v41 = vcombine.high %v547_v33, %v551_v34  ;;  %v703_v57 = vld [vmem:[%s5060_s4 + $0xcf8] sm:$0xff]  ;;  %v4516_v2 = vcombine.low %v571_v55, %v575_v56 }
 0x1f0   : > { %3910 = vmatpush1.bf16.msra.mxu1 %v4428_v39  ;;  %v4484_v39 = vcombine.low %v539_v25, %v543_v26  ;;  %v707_v1 = vld [vmem:[%s5060_s4 + $0xd18] sm:$0xff] }
 0x1f1   : > { %3911 = vmatprep.subr.bf16.mxu1 %v4437_v42  ;;  %v4621_v42 = vcombine.high %v675_v35, %v679_v36 }
 0x1f2   : > { %3871 = vmatpush1.bf16.msra.mxu0 %v4308_v46  ;;  %v4492_v46 = vcombine.low %v547_v33, %v551_v34 }
 0x1f3   : > { %3872 = vmatprep.subr.bf16.mxu0 %v4317_v47  ;;  %v4501_v47 = vcombine.high %v555_v43, %v559_v44 }
 0x1f4   : > { %3912 = vmatpush1.bf16.msra.mxu1 %v4436_v60  ;;  %v4620_v60 = vcombine.low %v675_v35, %v679_v36  ;;  %v731_v35 = vld [vmem:[%s5060_s4 + $0xdd8] sm:$0xff] }
 0x1f5   : > { %3913 = vmatprep.subr.bf16.mxu1 %v4445_v48  ;;  %v4629_v48 = vcombine.high %v683_v45, %v687_v59  ;;  %v735_v36 = vld [vmem:[%s5060_s4 + $0xdf8] sm:$0xff] }
 0x1f6   : > { %3873 = vmatpush1.bf16.msra.mxu0 %v4316_v52  ;;  %v4500_v52 = vcombine.low %v555_v43, %v559_v44 }
 0x1f7   : > { %3874 = vmatprep.subr.bf16.mxu0 %v4325_v54  ;;  %v4509_v54 = vcombine.high %v563_v49, %v567_v50 }
 0x1f8   : > { %3914 = vmatpush1.bf16.msra.mxu1 %v4444_v53  ;;  %v4628_v53 = vcombine.low %v683_v45, %v687_v59  ;;  %v267_v45 = vld [vmem:[%s5083_s12 + $0x18] sm:$0xff] }
 0x1f9   : > { %3915 = vmatprep.subr.bf16.mxu1 %v4453_v10  ;;  %v4637_v10 = vcombine.high %v691_v6, %v695_v51  ;;  %v739_v51 = vld [vmem:[%s5060_s4 + $0xe18] sm:$0xff] }
 0x1fa   : > { %3875 = vmatpush1.bf16.msra.mxu0 %v4324_v61  ;;  %v4517_v61 = vcombine.high %v571_v55, %v575_v56 }
 0x1fb   : > { %3876 = vmatprep.subr.bf16.mxu0 %v4333_v63  ;;  %v579_v63 = vld [vmem:[%s5060_s4 + $0x918] sm:$0xff] }
 0x1fc   : > { %3916 = vmatpush1.bf16.msra.mxu1 %v4452_v62 }
 0x1fd   : > { %3917 = vmatprep.subr.bf16.mxu1 %v4461_v0  ;;  %v583_v0 = vld [vmem:[%s5060_s4 + $0x938] sm:$0xff] }
 0x1fe   : > { %3877 = vmatpush1.bf16.msra.mxu0 %v4332_v5  ;;  %v4525_v3 = vcombine.high %v579_v63, %v583_v0  ;;  %v587_v5 = vld [vmem:[%s5060_s4 + $0x958] sm:$0xff]  ;;  %v4524_v12 = vcombine.low %v579_v63, %v583_v0 }
 0x1ff   : > { %3878 = vmatprep.subr.bf16.mxu0 %v4341_v8  ;;  %v715_v8 = vld [vmem:[%s5060_s4 + $0xd58] sm:$0xff] }
 0x200   : > { %3918 = vmatpush1.bf16.msra.mxu1 %v4460_v7  ;;  %v591_v7 = vld [vmem:[%s5060_s4 + $0x978] sm:$0xff] }
 0x201   : > { %3919 = vmatprep.subr.bf16.mxu1 %v4469_v11  ;;  %v719_v11 = vld [vmem:[%s5060_s4 + $0xd78] sm:$0xff]  ;;  %v4533_v15 = vcombine.high %v587_v5, %v591_v7  ;;  %v4532_v23 = vcombine.low %v587_v5, %v591_v7 }
 0x202   : > { %3879 = vmatpush1.bf16.msra.mxu0 %v4340_v18  ;;  %v4661_v16 = vcombine.high %v715_v8, %v719_v11  ;;  %v595_v18 = vld [vmem:[%s5060_s4 + $0x998] sm:$0xff]  ;;  %v4660_v24 = vcombine.low %v715_v8, %v719_v11 }
 0x203   : > { %3880 = vmatprep.subr.bf16.mxu0 %v4349_v20  ;;  %v723_v20 = vld [vmem:[%s5060_s4 + $0xd98] sm:$0xff] }
 0x204   : > { %3920 = vmatpush1.bf16.msra.mxu1 %v4468_v19  ;;  %v599_v19 = vld [vmem:[%s5060_s4 + $0x9b8] sm:$0xff] }
 0x205   : > { %3921 = vmatprep.subr.bf16.mxu1 %v4477_v22  ;;  %v727_v22 = vld [vmem:[%s5060_s4 + $0xdb8] sm:$0xff]  ;;  %v4541_v25 = vcombine.high %v595_v18, %v599_v19  ;;  %v4540_v43 = vcombine.low %v595_v18, %v599_v19 }
 0x206   : > { %3881 = vmatpush1.bf16.msra.mxu0 %v4348_v27  ;;  %v4669_v27 = vcombine.high %v723_v20, %v727_v22  ;;  %v635_v8 = vld [vmem:[%s5060_s4 + $0xad8] sm:$0xff] }
 0x207   : > { %3882 = vmatprep.subr.bf16.mxu0 %v4357_v30  ;;  %v607_v30 = vld [vmem:[%s5060_s4 + $0x9f8] sm:$0xff] }
 0x208   : > { %3922 = vmatpush1.bf16.msra.mxu1 %v4476_v28  ;;  %v603_v28 = vld [vmem:[%s5060_s4 + $0x9d8] sm:$0xff] }
 0x209   : > { %3923 = vmatprep.subr.bf16.mxu1 %v4485_v31  ;;  %v639_v11 = vld [vmem:[%s5060_s4 + $0xaf8] sm:$0xff] }
 0x20a   : > { %3883 = vmatpush1.bf16.msra.mxu0 %v4356_v38  ;;  %v266_v38 = vld [vmem:[%s5083_s12 + $0x10] sm:$0xff]  ;;  %v4581_v18 = vcombine.high %v635_v8, %v639_v11 }
 0x20b   : > { %3934 = vmatprep.subr.bf16.mxu0 %v4493_v41 }
 0x20c   : > { %3924 = vmatpush1.bf16.msra.mxu1 %v4484_v39 }
 0x20d   : > { %3975 = vmatprep.subr.bf16.mxu1 %v4621_v42  ;;  %3885 = vmatmul.mubr.bf16.vlgmr.msra.gmra.mrb[24].mxu0 %v5174_v17  ;;  %v699_v17 = vld [vmem:[%s5060_s4 + $0xcd8] sm:$0xff] }
 0x20e   : > { %3935 = vmatpush1.bf16.msra.mxu0 %v4492_v46  ;;  %3966 = vmatprep.mubr.bf16.mxu0 %v5184_v29  ;;  %v4645_v62 = vcombine.high %v699_v17, %v703_v57  ;;  %v711_v29 = vld [vmem:[%s5060_s4 + $0xd38] sm:$0xff]  ;;  %v4668_v46 = vcombine.low %v723_v20, %v727_v22 }
 0x20f   : > { %3926 = vmatmul.mubr.bf16.vlgmr.msra.gmra.mrb[24].mxu1 %v5179_v21  ;;  %3936 = vmatprep.subr.bf16.mxu0 %v4501_v47  ;;  %v4508_v21 = vcombine.low %v563_v49, %v567_v50  ;;  %v4653_v4 = vcombine.high %v707_v1, %v711_v29  ;;  %v4652_v13 = vcombine.low %v707_v1, %v711_v29  ;;  %v611_v49 = vld [vmem:[%s5060_s4 + $0xa18] sm:$0xff] }
 0x210   : > { %3976 = vmatpush1.bf16.msra.mxu1 %v4620_v60  ;;  %4007 = vmatprep.mubr.bf16.mxu1 %v5189_v32  ;;  %v4644_v32 = vcombine.low %v699_v17, %v703_v57  ;;  %v4549_v60 = vcombine.high %v603_v28, %v607_v30  ;;  %v615_v50 = vld [vmem:[%s5060_s4 + $0xa38] sm:$0xff] }
 0x211   : > { %3977 = vmatprep.subr.bf16.mxu1 %v4629_v48  ;;  %v4557_v55 = vcombine.high %v611_v49, %v615_v50  ;;  %v619_v17 = vld [vmem:[%s5060_s4 + $0xa58] sm:$0xff] }
 0x212   : > { %3937 = vmatpush1.bf16.msra.mxu0 %v4500_v52  ;;  %v743_v52 = vld [vmem:[%s5060_s4 + $0xe38] sm:$0xff] }
 0x213   : > { %3938 = vmatprep.subr.bf16.mxu0 %v4509_v54  ;;  %v4548_v54 = vcombine.low %v603_v28, %v607_v30  ;;  %v4685_v56 = vcombine.high %v739_v51, %v743_v52  ;;  %v623_v57 = vld [vmem:[%s5060_s4 + $0xa78] sm:$0xff] }
 0x214   : > { %3978 = vmatpush1.bf16.msra.mxu1 %v4628_v53  ;;  %v4565_v63 = vcombine.high %v619_v17, %v623_v57  ;;  %v627_v1 = vld [vmem:[%s5060_s4 + $0xa98] sm:$0xff] }
 0x215   : > { %3979 = vmatprep.subr.bf16.mxu1 %v4637_v10  ;;  %v4676_v10 = vcombine.low %v731_v35, %v735_v36  ;;  %v631_v29 = vld [vmem:[%s5060_s4 + $0xab8] sm:$0xff] }
 0x216   : > { %3939 = vmatpush1.bf16.msra.mxu0 %v4508_v21  ;;  %v747_v21 = vld [vmem:[%s5060_s4 + $0xe58] sm:$0xff]  ;;  %v4573_v5 = vcombine.high %v627_v1, %v631_v29 }
 0x217   : > { %3940 = vmatprep.subr.bf16.mxu0 %v4517_v61  ;;  %v4556_v61 = vcombine.low %v611_v49, %v615_v50  ;;  %v643_v20 = vld [vmem:[%s5060_s4 + $0xb18] sm:$0xff] }
 0x218   : > { %3980 = vmatpush1.bf16.msra.mxu1 %v4636_v58  ;;  %v751_v58 = vld [vmem:[%s5060_s4 + $0xe78] sm:$0xff] }
 0x219   : > { %3981 = vmatprep.subr.bf16.mxu1 %v4645_v62  ;;  %v4684_v62 = vcombine.low %v739_v51, %v743_v52  ;;  %v4693_v0 = vcombine.high %v747_v21, %v751_v58  ;;  %v647_v22 = vld [vmem:[%s5060_s4 + $0xb38] sm:$0xff] }
 0x21a   : > { %3941 = vmatpush1.bf16.msra.mxu0 %v4516_v2  ;;  %v755_v2 = vld [vmem:[%s5060_s4 + $0xe98] sm:$0xff] }
 0x21b   : > { %3942 = vmatprep.subr.bf16.mxu0 %v4525_v3  ;;  %v4564_v3 = vcombine.low %v619_v17, %v623_v57  ;;  %v651_v30 = vld [vmem:[%s5060_s4 + $0xb58] sm:$0xff] }
 0x21c   : > { %3982 = vmatpush1.bf16.msra.mxu1 %v4644_v32  ;;  %v759_v32 = vld [vmem:[%s5060_s4 + $0xeb8] sm:$0xff] }
 0x21d   : > { %3983 = vmatprep.subr.bf16.mxu1 %v4653_v4  ;;  %v4692_v4 = vcombine.low %v747_v21, %v751_v58  ;;  %v4701_v7 = vcombine.high %v755_v2, %v759_v32 }
 0x21e   : > { %3943 = vmatpush1.bf16.msra.mxu0 %v4524_v12  ;;  %v763_v12 = vld [vmem:[%s5060_s4 + $0xed8] sm:$0xff] }
 0x21f   : > { %3944 = vmatprep.subr.bf16.mxu0 %v4533_v15  ;;  %v4572_v15 = vcombine.low %v627_v1, %v631_v29  ;;  %v268_v29 = vld [vmem:[%s5083_s12 + $0x20] sm:$0xff] }
 0x220   : > { %3984 = vmatpush1.bf16.msra.mxu1 %v4652_v13  ;;  %v3640_v26 = vpop.f32.mrb[12].mxu0  ;;  %v767_v13 = vld [vmem:[%s5060_s4 + $0xef8] sm:$0xff] }
 0x221   : > { %3985 = vmatprep.subr.bf16.mxu1 %v4661_v16  ;;  %v3641_v31 = vadd.f32 %v3640_v26, %v5570_v9  ;;  %v3642_v34 = vpop.f32.mrb[13].mxu0  ;;  %v4700_v16 = vcombine.low %v755_v2, %v759_v32  ;;  %v4709_v19 = vcombine.high %v763_v12, %v767_v13  ;;  %v4708_v26 = vcombine.low %v763_v12, %v767_v13 }
 0x222   : > { %v3681_v33 = vpop.f32.mrb[12].mxu1  ;;  %v3643_v39 = vadd.f32 %v3642_v34, %v5572_v14  ;;  %v3644_v42 = vpop.f32.mrb[14].mxu0  ;;  %3945 = vmatpush1.bf16.msra.mxu0 %v4532_v23  ;;  %v4677_v14 = vcombine.high %v731_v35, %v735_v36  ;;  %v771_v23 = vld [vmem:[%s5060_s4 + $0xf18] sm:$0xff]  ;;  %v4588_v35 = vcombine.low %v643_v20, %v647_v22 }
 0x223   : > { %v3683_v41 = vpop.f32.mrb[13].mxu1  ;;  %v3682_v44 = vadd.f32 %v3681_v33, %v3641_v31  ;;  %v3645_v9 = vpop.f32.mrb[15].mxu0  ;;  %3946 = vmatprep.subr.bf16.mxu0 %v4541_v25  ;;  %v4580_v25 = vcombine.low %v635_v8, %v639_v11  ;;  %v655_v31 = vld [vmem:[%s5060_s4 + $0xb78] sm:$0xff] }
 0x224   : > { %v3685_v59 = vpop.f32.mrb[14].mxu1  ;;  %3986 = vmatpush1.bf16.msra.mxu1 %v4660_v24  ;;  %v3684_v47 = vadd.f32 %v3683_v41, %v3643_v39  ;;  %v775_v24 = vld [vmem:[%s5060_s4 + $0xf38] sm:$0xff] }
 0x225   : > { %v3686_v48 = vpop.f32.mrb[15].mxu1  ;;  %3987 = vmatprep.subr.bf16.mxu1 %v4669_v27  ;;  %v4018_v6 = vadd.f32 %v3682_v44, %v266_v38  ;;  %v4589_v27 = vcombine.high %v643_v20, %v647_v22  ;;  %v4717_v28 = vcombine.high %v771_v23, %v775_v24  ;;  %v779_v33 = vld [vmem:[%s5060_s4 + $0xf58] sm:$0xff]  ;;  %v4716_v36 = vcombine.low %v771_v23, %v775_v24 }
 0x226   : > { %v4019_v53 = vadd.f32 %v3684_v47, %v267_v45  ;;  %3947 = vmatpush1.bf16.msra.mxu0 %v4540_v43  ;;  %v783_v34 = vld [vmem:[%s5060_s4 + $0xf78] sm:$0xff]  ;;  %v4597_v38 = vcombine.high %v651_v30, %v655_v31  ;;  %v4596_v45 = vcombine.low %v651_v30, %v655_v31 }
 0x227   : > { %4026 = vst [vmem:[%s5083_s12 + $0x10] sm:$0xff] %v4018_v6  ;;  %3948 = vmatprep.subr.bf16.mxu0 %v4549_v60  ;;  %v4725_v39 = vcombine.high %v779_v33, %v783_v34  ;;  %v659_v41 = vld [vmem:[%s5060_s4 + $0xb98] sm:$0xff]  ;;  %v4724_v59 = vcombine.low %v779_v33, %v783_v34 }
 0x228   : > { %3988 = vmatpush1.bf16.msra.mxu1 %v4668_v46  ;;  %4027 = vst [vmem:[%s5083_s12 + $0x18] sm:$0xff] %v4019_v53  ;;  %v663_v42 = vld [vmem:[%s5060_s4 + $0xbb8] sm:$0xff] }
 0x229   : > { %3989 = vmatprep.subr.bf16.mxu1 %v4677_v14  ;;  %v787_v43 = vld [vmem:[%s5060_s4 + $0xf98] sm:$0xff]  ;;  %v4605_v9 = vcombine.high %v659_v41, %v663_v42  ;;  %v4604_v49 = vcombine.low %v659_v41, %v663_v42 }
 0x22a   : > { %3949 = vmatpush1.bf16.msra.mxu0 %v4548_v54  ;;  %v791_v44 = vld [vmem:[%s5060_s4 + $0xfb8] sm:$0xff] }
 0x22b   : > { %3950 = vmatprep.subr.bf16.mxu0 %v4557_v55  ;;  %v4733_v46 = vcombine.high %v787_v43, %v791_v44  ;;  %v667_v60 = vld [vmem:[%s5060_s4 + $0xbd8] sm:$0xff]  ;;  %v4732_v50 = vcombine.low %v787_v43, %v791_v44 }
 0x22c   : > { %3990 = vmatpush1.bf16.msra.mxu1 %v4676_v10  ;;  %v671_v47 = vld [vmem:[%s5060_s4 + $0xbf8] sm:$0xff] }
 0x22d   : > { %3991 = vmatprep.subr.bf16.mxu1 %v4685_v56  ;;  %v795_v48 = vld [vmem:[%s5060_s4 + $0xfd8] sm:$0xff]  ;;  %v4613_v6 = vcombine.high %v667_v60, %v671_v47  ;;  %v4612_v52 = vcombine.low %v667_v60, %v671_v47  ;;  %v4036_v60 = vld [vmem:[%s5083_s12] sm:$0xff] (!%p4742_p6) }
 0x22e   : > { %3951 = vmatpush1.bf16.msra.mxu0 %v4556_v61  ;;  %v799_v14 = vld [vmem:[%s5060_s4 + $0xff8] sm:$0xff]  ;;  %v4044_v47 = vld [vmem:[%s244_s8] sm:$0xff] (!%p4742_p6) }
 0x22f   : > { %3952 = vmatprep.subr.bf16.mxu0 %v4565_v63  ;;  %v4741_v51 = vcombine.high %v795_v48, %v799_v14  ;;  %v4740_v53 = vcombine.low %v795_v48, %v799_v14  ;;  %v270_v33 = vld [vmem:[%s5083_s12 + $0x30] sm:$0xff]  ;;  %v4037_v14 = vld [vmem:[%s5083_s12 + $0x8] sm:$0xff] (!%p4742_p6) }
 0x230   : > { %3992 = vmatpush1.bf16.msra.mxu1 %v4684_v62 }
 0x231   : > { %3993 = vmatprep.subr.bf16.mxu1 %v4693_v0 }
 0x232   : > { %3953 = vmatpush1.bf16.msra.mxu0 %v4564_v3 }
 0x233   : > { %3954 = vmatprep.subr.bf16.mxu0 %v4573_v5 }
 0x234   : > { %3994 = vmatpush1.bf16.msra.mxu1 %v4692_v4  ;;  %v269_v4 = vld [vmem:[%s5083_s12 + $0x28] sm:$0xff] }
 0x235   : > { %3995 = vmatprep.subr.bf16.mxu1 %v4701_v7 }
 0x236   : > { %3955 = vmatpush1.bf16.msra.mxu0 %v4572_v15 }
 0x237   : > { %3956 = vmatprep.subr.bf16.mxu0 %v4581_v18 }
 0x238   : > { %3996 = vmatpush1.bf16.msra.mxu1 %v4700_v16 }
 0x239   : > { %3997 = vmatprep.subr.bf16.mxu1 %v4709_v19 }
 0x23a   : > { %3957 = vmatpush1.bf16.msra.mxu0 %v4580_v25 }
 0x23b   : > { %3958 = vmatprep.subr.bf16.mxu0 %v4589_v27 }
 0x23c   : > { %3998 = vmatpush1.bf16.msra.mxu1 %v4708_v26 }
 0x23d   : > { %3999 = vmatprep.subr.bf16.mxu1 %v4717_v28 }
 0x23e   : > { %3959 = vmatpush1.bf16.msra.mxu0 %v4588_v35 }
 0x23f   : > { %3960 = vmatprep.subr.bf16.mxu0 %v4597_v38 }
 0x240   : > { %4000 = vmatpush1.bf16.msra.mxu1 %v4716_v36 }
 0x241   : > { %4001 = vmatprep.subr.bf16.mxu1 %v4725_v39  ;;  %v271_v39 = vld [vmem:[%s5083_s12 + $0x38] sm:$0xff] }
 0x242   : > { %3961 = vmatpush1.bf16.msra.mxu0 %v4596_v45 }
 0x243   : > { %3962 = vmatprep.subr.bf16.mxu0 %v4605_v9  ;;  %v4046_v9 = vlaneseq (!%p4742_p6) }
 0x244   : > { %4002 = vmatpush1.bf16.msra.mxu1 %v4724_v59 }
 0x245   : > { %4003 = vmatprep.subr.bf16.mxu1 %v4733_v46  ;;  %v4047_v46 = vshrl.u32 (!%p4742_p6), %v4046_v9, 7 }
 0x246   : > { %3963 = vmatpush1.bf16.msra.mxu0 %v4604_v49 }
 0x247   : > { %3964 = vmatprep.subr.bf16.mxu0 %v4613_v6  ;;  %v4048_v48 = vsub.s32 (!%p4742_p6), 0, %v4047_v46  ;;  %v4052_v49 = vsub.s32 (!%p4742_p6), 1, %v4047_v46  ;;  %v4056_v6 = vsub.s32 (!%p4742_p6), 2, %v4047_v46 }
 0x248   : > { %4004 = vmatpush1.bf16.msra.mxu1 %v4732_v50  ;;  %v4038_v50 = vld [vmem:[%s5083_s12 + $0x10] sm:$0xff] (!%p4742_p6) }
 0x249   : > { %4005 = vmatprep.subr.bf16.mxu1 %v4741_v51  ;;  %v4060_v51 = vsub.s32 (!%p4742_p6), 3, %v4047_v46 }
 0x24a   : > { %3965 = vmatpush1.bf16.msra.mxu0 %v4612_v52  ;;  %v4039_v52 = vld [vmem:[%s5083_s12 + $0x18] sm:$0xff] (!%p4742_p6) }
 0x24c   : > { %4006 = vmatpush1.bf16.msra.mxu1 %v4740_v53 }
 0x24d   : > { %3967 = vmatmul.mubr.bf16.vlgmr.msra.gmra.mrb[28].mxu0 %v5254_v37 }
 0x24f   : > { %4008 = vmatmul.mubr.bf16.vlgmr.msra.gmra.mrb[28].mxu1 %v5258_v40 }
 0x260   : > { %v3722_v54 = vpop.f32.mrb[16].mxu0 }
 0x261   : > { %v3724_v55 = vpop.f32.mrb[17].mxu0 }
 0x262   : > { %v3763_v10 = vpop.f32.mrb[16].mxu1  ;;  %v3726_v57 = vpop.f32.mrb[18].mxu0 }
 0x263   : > { %v3764_v56 = vadd.f32 %v3763_v10, %v3722_v54  ;;  %v3765_v17 = vpop.f32.mrb[17].mxu1  ;;  %v3727_v61 = vpop.f32.mrb[19].mxu0  ;;  %v4064_v54 = vsub.s32 (!%p4742_p6), 4, %v4047_v46  ;;  %v4068_v10 = vsub.s32 (!%p4742_p6), 5, %v4047_v46  ;;  %v4053_v57 = vrot.slane (!%p4742_p6), %v4044_v47, %v4052_v49 }
 0x264   : > { %v3766_v21 = vadd.f32 %v3765_v17, %v3724_v55  ;;  %v3767_v58 = vpop.f32.mrb[18].mxu1  ;;  %v4072_v55 = vsub.s32 (!%p4742_p6), 6, %v4047_v46  ;;  %v4049_v17 = vrot.slane (!%p4742_p6), %v4044_v47, %v4048_v48 }
 0x265   : > { %v3768_v62 = vpop.f32.mrb[19].mxu1  ;;  %v4061_v58 = vrot.slane (!%p4742_p6), %v4044_v47, %v4060_v51 }
 0x2a0   : > { %v3804_v63 = vpop.f32.mrb[20].mxu0 }
 0x2a1   : > { %v3805_v0 = vadd.f32 %v3804_v63, %v3764_v56  ;;  %v3806_v37 = vpop.f32.mrb[21].mxu0  ;;  %v4076_v56 = vsub.s32 (!%p4742_p6), 7, %v4047_v46 }
 0x2a2   : > { %v3845_v1 = vpop.f32.mrb[20].mxu1  ;;  %v3807_v2 = vadd.f32 %v3806_v37, %v3766_v21  ;;  %v3808_v32 = vpop.f32.mrb[22].mxu0  ;;  %v4057_v21 = vrot.slane (!%p4742_p6), %v4044_v47, %v4056_v6  ;;  %v4073_v37 = vrot.slane (!%p4742_p6), %v4044_v47, %v4072_v55 }
 0x2a3   : > { %v3847_v40 = vpop.f32.mrb[21].mxu1  ;;  %v3846_v3 = vadd.f32 %v3845_v1, %v3805_v0  ;;  %v3809_v7 = vpop.f32.mrb[23].mxu0  ;;  %v4065_v0 = vrot.slane (!%p4742_p6), %v4044_v47, %v4064_v54  ;;  %v4069_v1 = vrot.slane (!%p4742_p6), %v4044_v47, %v4068_v10 }
 0x2a4   : > { %v3849_v5 = vpop.f32.mrb[22].mxu1  ;;  %v3848_v8 = vadd.f32 %v3847_v40, %v3807_v2  ;;  %v4086_v2 = vadd.f32 (!%p4742_p6), %v4049_v17, %v4036_v60  ;;  %v4087_v40 = vadd.f32 (!%p4742_p6), %v4053_v57, %v4037_v14  ;;  %v4088_v32 = vadd.f32 (!%p4742_p6), %v4057_v21, %v4038_v50 }
 0x2a5   : > { %v3850_v11 = vpop.f32.mrb[23].mxu1  ;;  %v4020_v12 = vadd.f32 %v3846_v3, %v268_v29  ;;  %v4077_v29 = vrot.slane (!%p4742_p6), %v4044_v47, %v4076_v56  ;;  %v4089_v3 = vadd.f32 (!%p4742_p6), %v4061_v58, %v4039_v52 }
 0x2a6   : > { %v4021_v13 = vadd.f32 %v3848_v8, %v269_v4  ;;  %v4094_v11 = vmax.f32 (!%p4742_p6), %v4086_v2, 0.0 }
 0x2a7   : > { %4028 = vst [vmem:[%s5083_s12 + $0x20] sm:$0xff] %v4020_v12  ;;  %v4095_v12 = vmax.f32 (!%p4742_p6), %v4087_v40, 0.0 }
 0x2a8   : > { %4029 = vst [vmem:[%s5083_s12 + $0x28] sm:$0xff] %v4021_v13  ;;  %v4096_v13 = vmax.f32 (!%p4742_p6), %v4088_v32, 0.0  ;;  %4102 = vst [vmem:[%s5083_s12] sm:$0xff] (!%p4742_p6), %v4094_v11 }
 0x2a9   : > { %4103 = vst [vmem:[%s5083_s12 + $0x8] sm:$0xff] (!%p4742_p6), %v4095_v12 }
 0x2aa   : > { %4104 = vst [vmem:[%s5083_s12 + $0x10] sm:$0xff] (!%p4742_p6), %v4096_v13 }
 0x2ae   : > { %v4040_v53 = vld [vmem:[%s5083_s12 + $0x20] sm:$0xff] (!%p4742_p6) }
 0x2af   : > { %v4041_v61 = vld [vmem:[%s5083_s12 + $0x28] sm:$0xff] (!%p4742_p6)  ;;  %v4090_v4 = vadd.f32 (!%p4742_p6), %v4065_v0, %v4040_v53 }
 0x2b0   : > { %v4091_v5 = vadd.f32 (!%p4742_p6), %v4069_v1, %v4041_v61 }
 0x2e0   : > { %v3886_v15 = vpop.f32.mrb[24].mxu0 }
 0x2e1   : > { %v3888_v18 = vpop.f32.mrb[25].mxu0 }
 0x2e2   : > { %v3927_v16 = vpop.f32.mrb[24].mxu1  ;;  %v3890_v22 = vpop.f32.mrb[26].mxu0 }
 0x2e3   : > { %v3928_v19 = vadd.f32 %v3927_v16, %v3886_v15  ;;  %v3929_v20 = vpop.f32.mrb[25].mxu1  ;;  %v3891_v25 = vpop.f32.mrb[27].mxu0  ;;  %v4097_v15 = vmax.f32 (!%p4742_p6), %v4089_v3, 0.0  ;;  %v4098_v16 = vmax.f32 (!%p4742_p6), %v4090_v4, 0.0 }
 0x2e4   : > { %v3930_v23 = vadd.f32 %v3929_v20, %v3888_v18  ;;  %v3931_v24 = vpop.f32.mrb[26].mxu1  ;;  %v4099_v18 = vmax.f32 (!%p4742_p6), %v4091_v5, 0.0 }
 0x2e5   : > { %v3932_v26 = vpop.f32.mrb[27].mxu1  ;;  %4105 = vst [vmem:[%s5083_s12 + $0x18] sm:$0xff] (!%p4742_p6), %v4097_v15  ;;  %4106 = vst [vmem:[%s5083_s12 + $0x20] sm:$0xff] (!%p4742_p6), %v4098_v16 }
 0x2e6   : > { %4107 = vst [vmem:[%s5083_s12 + $0x28] sm:$0xff] (!%p4742_p6), %v4099_v18 }
 0x320   : > { %v3968_v27 = vpop.f32.mrb[28].mxu0 }
 0x321   : > { %v3969_v28 = vadd.f32 %v3968_v27, %v3928_v19  ;;  %v3970_v31 = vpop.f32.mrb[29].mxu0 }
 0x322   : > { %v4009_v30 = vpop.f32.mrb[28].mxu1  ;;  %v3971_v34 = vadd.f32 %v3970_v31, %v3930_v23  ;;  %v3972_v36 = vpop.f32.mrb[30].mxu0  ;;  %4035 = sbr.rel (%p4742_p6) target bundleno = 821 (0x335), region = 44 }
 0x323   : > { %v4011_v35 = vpop.f32.mrb[29].mxu1  ;;  %v4010_v38 = vadd.f32 %v4009_v30, %v3969_v28  ;;  %v3973_v42 = vpop.f32.mrb[31].mxu0 }
 0x324   : > { %v4013_v41 = vpop.f32.mrb[30].mxu1  ;;  %v4012_v43 = vadd.f32 %v4011_v35, %v3971_v34 }
 0x325   : > { %v4014_v44 = vpop.f32.mrb[31].mxu1  ;;  %v4022_v45 = vadd.f32 %v4010_v38, %v270_v33 }
 0x326   : > { %v4023_v59 = vadd.f32 %v4012_v43, %v271_v39 }
 0x327   : > { %4030 = vst [vmem:[%s5083_s12 + $0x30] sm:$0xff] %v4022_v45 }
 0x328   : > { %4031 = vst [vmem:[%s5083_s12 + $0x38] sm:$0xff] %v4023_v59 }
 0x32e   : > { %v4042_v62 = vld [vmem:[%s5083_s12 + $0x30] sm:$0xff] }
 0x32f   : > { %v4043_v63 = vld [vmem:[%s5083_s12 + $0x38] sm:$0xff]  ;;  %v4092_v7 = vadd.f32 %v4073_v37, %v4042_v62 }
 0x330   : > { %v4093_v8 = vadd.f32 %v4077_v29, %v4043_v63 }
 0x331   : > { %v4100_v19 = vmax.f32 %v4092_v7, 0.0 }
 0x332   : > { %v4101_v20 = vmax.f32 %v4093_v8, 0.0 }
 0x333   : > { %4108 = vst [vmem:[%s5083_s12 + $0x30] sm:$0xff] %v4100_v19 }
 0x334   : > { %4109 = vst [vmem:[%s5083_s12 + $0x38] sm:$0xff] %v4101_v20 }
 0x335 PF: > { %s16_s19 = sadd.s32 1, %s4917_s19   ;;  %s5743_s12 = smov %s4893_s13 }
 0x336   : > { %p13_p8 = scmp.ge.s32.totalorder %s16_s19, 26   ;;  %s5744_s13 = smov %s4897_s14 }
 0x337   : > { %s5745_s14 = smov %s5011_s5  ;;  %s5746_s15 = smov %s4909_s17 }
 0x338   : > { %s5747_s16 = smov %s4913_s18  ;;  %s5748_s17 = smov %s5751_s21 }
 0x339   : > { %s5749_s18 = smov %s5755_s22  ;;  %15 = sbr.rel (!%p13_p8) target bundleno = 5 (0x5), region = 86 }
 0x340   :  { %4132 = vsyncpa [#allocation3], 1 }
 0x341   :  { %4134 = vsyncpa [#allocation3 + $0x1], 1 }

// kernel: lstm_net_forward.8
= control target key start
LH: loop header
LB: loop body
LE: loop exit
PB: predicated region body
PF: predicated region fallthrough
CT: control target
= control target key end

     0   :  { %vm19_vm0 = vcmask 261120   ;;  %v271_v20 = vmov 0.0   ;;  %s367_s1 = inlined_call_operand.vmem [shape: bf16[256,32], index: 1, kind: input, shape index: {}]   ;;  %s368_s0 = inlined_call_operand.vmem [shape: f32[8,256], index: 0, kind: input, shape index: {}]   ;;  %s369_s3 = inlined_call_operand.vmem [shape: f32[8,32], index: 3, kind: output, shape index: {}]   ;;  %s370_s2 = inlined_call_operand.vmem [shape: f32[1,32], index: 2, kind: input, shape index: {}]  }
   0x1   :  { %v255_v0 = vld [vmem:[%s367_s1 + $0x40] sm:$0xff]   ;;  %v257_v2 = vld [vmem:[%s367_s1 + $0x48] sm:$0xff]   ;;  %v259_v4 = vld [vmem:[%s367_s1 + $0x50] sm:$0xff]   ;;  %20 = vst.msk [vmem:[%s369_s3] sm:$0xff] %vm19_vm0, %v271_v20 }
   0x2   :  { %v256_v1 = vld [vmem:[%s367_s1] sm:$0xff]   ;;  %232 = vmatprep.subr.bf16.mxu0 %v255_v0  ;;  %v258_v3 = vld [vmem:[%s367_s1 + $0x8] sm:$0xff]   ;;  %v260_v5 = vld [vmem:[%s367_s1 + $0x10] sm:$0xff]  }
   0x3   :  { %233 = vmatpush3.bf16.msra.mxu0 %v256_v1  ;;  %v261_v6 = vld [vmem:[%s367_s1 + $0x58] sm:$0xff]   ;;  %v263_v8 = vld [vmem:[%s367_s1 + $0x60] sm:$0xff]   ;;  %v265_v10 = vld [vmem:[%s367_s1 + $0x68] sm:$0xff]  }
   0x4   :  { %234 = vmatprep.subr.bf16.mxu0 %v257_v2  ;;  %v262_v7 = vld [vmem:[%s367_s1 + $0x18] sm:$0xff]   ;;  %v264_v9 = vld [vmem:[%s367_s1 + $0x20] sm:$0xff]   ;;  %v23_v11 = vld [vmem:[%s368_s0 + $0x8] sm:$0xff] }
   0x5   :  { %v25_v12 = vpack.c.bf16 %v23_v11, %v23_v11  ;;  %v266_v13 = vld [vmem:[%s367_s1 + $0x28] sm:$0xff]   ;;  %v267_v14 = vld [vmem:[%s367_s1 + $0x70] sm:$0xff]   ;;  %v269_v16 = vld [vmem:[%s367_s1 + $0x78] sm:$0xff]  }
   0x6   :  { %v268_v15 = vld [vmem:[%s367_s1 + $0x30] sm:$0xff]   ;;  %v270_v17 = vld [vmem:[%s367_s1 + $0x38] sm:$0xff]   ;;  %v22_v18 = vld [vmem:[%s368_s0] sm:$0xff] }
   0x7   :  { %235 = vmatpush3.bf16.msra.mxu0 %v258_v3  ;;  %186 = vmatprep.mubr.bf16.mxu0 %v25_v12  ;;  %v24_v19 = vpack.c.bf16 %v22_v18, %v22_v18  ;;  %v231_v28 = vld [vmem:[%s370_s2] ss:$0 sm:$0xff] }
   0x8   :  { %236 = vmatprep.subr.bf16.mxu0 %v259_v4  ;;  %v21_v22 = vld [vmem:[%s369_s3] sm:$0xff] }
   0xb   :  { %237 = vmatpush3.bf16.msra.mxu0 %v260_v5 }
   0xc   :  { %238 = vmatprep.subr.bf16.mxu0 %v261_v6 }
   0xf   :  { %239 = vmatpush3.bf16.msra.mxu0 %v262_v7 }
  0x10   :  { %240 = vmatprep.subr.bf16.mxu0 %v263_v8 }
  0x13   :  { %241 = vmatpush3.bf16.msra.mxu0 %v264_v9 }
  0x14   :  { %242 = vmatprep.subr.bf16.mxu0 %v265_v10 }
  0x17   :  { %243 = vmatpush3.bf16.msra.mxu0 %v266_v13 }
  0x18   :  { %244 = vmatprep.subr.bf16.mxu0 %v267_v14 }
  0x1b   :  { %245 = vmatpush3.bf16.msra.mxu0 %v268_v15 }
  0x1c   :  { %246 = vmatprep.subr.bf16.mxu0 %v269_v16 }
  0x1f   :  { %247 = vmatpush3.bf16.msra.mxu0 %v270_v17 }
  0x22   :  { %187 = vmatmul.mubr.bf16.vlgmr.msra.gmra.mrb[0].mxu0 %v24_v19 }
  0xf5   :  { %v248_v21 = vpop.f32.mrb[0].mxu0 }
  0xf6   :  { %v249_v23 = vpop.f32.mrb[1].mxu0 }
  0xf7   :  { %v250_v24 = vadd.f32 %v249_v23, %v248_v21  ;;  %v251_v25 = vpop.f32.mrb[2].mxu0 }
  0xf8   :  { %v252_v26 = vpop.f32.mrb[3].mxu0 }
  0xf9   :  { %v194_v27 = vadd.f32 %v250_v24, %v21_v22 }
  0xfb   :  { %196 = vst.msk [vmem:[%s369_s3] sm:$0xff] %vm19_vm0, %v194_v27 }
 0x102   :  { %v200_v29 = vld [vmem:[%s369_s3] sm:$0xff] }
 0x103   :  { %v208_v30 = vadd.f32 %v231_v28, %v200_v29 }
 0x105   :  { %v209_v31 = vmax.f32 %v208_v30, 0.0 }
 0x107   :  { %210 = vst.msk [vmem:[%s369_s3] sm:$0xff] %vm19_vm0, %v209_v31 }

// kernel: lstm_net_forward.9
= control target key start
LH: loop header
LB: loop body
LE: loop exit
PB: predicated region body
PF: predicated region fallthrough
CT: control target
= control target key end

     0   :  { %vm19_vm0 = vcmask 15360   ;;  %v138_v0 = vmov 0.0   ;;  %vm139_vm1 = vmmov 0   ;;  %vm40_vm2 = vcmask 261120   ;;  %s192_s1 = inlined_call_operand.vmem [shape: bf16[32,2], index: 1, kind: input, shape index: {}]   ;;  %s193_s0 = inlined_call_operand.vmem [shape: f32[8,32], index: 0, kind: input, shape index: {}]   ;;  %s194_s3 = inlined_call_operand.vmem [shape: f32[8,2], index: 3, kind: output, shape index: {}]   ;;  %s195_s2 = inlined_call_operand.vmem [shape: f32[1,2], index: 2, kind: input, shape index: {}]  }
   0x1   :  { %122 = vmatprep.subr.bf16.mxu0 %v138_v0  ;;  %v132_v1 = vld [vmem:[%s192_s1] sm:$0xff]   ;;  %126 = vmatprep.mubr.msk.bf16.mxu0 %vm139_vm1, %v138_v0  ;;  %20 = vst.msk [vmem:[%s194_s3] sm:$0xff] %vm19_vm0, %v138_v0  ;;  %v133_v2 = vld [vmem:[%s192_s1 + $0x8] sm:$0xff]  }
   0x2   :  { %123 = vmatpush3.bf16.msra.mxu0 %v132_v1  ;;  %v22_v3 = vld [vmem:[%s193_s0] sm:$0xff] }
   0x3   :  { %124 = vmatprep.subr.bf16.mxu0 %v138_v0  ;;  %v23_v4 = vpack.c.bf16 %v22_v3, %v22_v3  ;;  %v118_v11 = vld [vmem:[%s195_s2] ss:$0 sm:$0xff] }
   0x6   :  { %125 = vmatpush3.bf16.msra.mxu0 %v133_v2 }
   0x8   :  { %v21_v5 = vld [vmem:[%s194_s3] sm:$0xff] }
   0x9   :  { %127 = vmatmul.mubr.msk.bf16.vlgmr.msra.gmra.mrb[0].mxu0 %vm40_vm2, %v23_v4 }
  0xdc   :  { %v78_v6 = vpop.f32.mrb[0].mxu0 }
  0xdd   :  { %v84_v7 = vadd.f32 %v78_v6, %v21_v5  ;;  %v128_v8 = vpop.f32.mrb[1].mxu0 }
  0xde   :  { %v81_v9 = vpop.f32.mrb[2].mxu0 }
  0xdf   :  { %86 = vst.msk [vmem:[%s194_s3] sm:$0xff] %vm19_vm0, %v84_v7  ;;  %v129_v10 = vpop.f32.mrb[3].mxu0 }
  0xe6   :  { %v90_v12 = vld [vmem:[%s194_s3] sm:$0xff] }
  0xe7   :  { %v98_v13 = vadd.f32 %v118_v11, %v90_v12 }
  0xe9   :  { %v99_v14 = vsel %vm19_vm0, %v98_v13, -inf }
  0xea   :  { %100 = vmax.xlane.f32.xlu0 %v99_v14 }
 0x177   :  { %v101_v15 = vpop.xlane.xlu0 %100 }
 0x178   :  { %v102_v16 = vsub.f32 %v98_v13, %v101_v15 }
 0x17a   :  { %v103_v17 = vmul.f32 1.442695, %v102_v16 }
 0x17c   :  { %134 = vpow2.f32 %v103_v17 }
 0x186   :  { %v135_v18 = vpop.eup %134 }
 0x187   :  { %v105_v19 = vsel %vm19_vm0, %v135_v18, 0.0 }
 0x188   :  { %106 = vadd.xlane.f32.xlu0 %v105_v19 }
 0x215   :  { %v107_v20 = vpop.xlane.xlu0 %106 }
 0x216   :  { %136 = vrcp.f32 %v107_v20 }
 0x220   :  { %v137_v21 = vpop.eup %136 }
 0x221   :  { %v109_v22 = vmul.f32 %v137_v21, %v135_v18 }
 0x223   :  { %110 = vst.msk [vmem:[%s194_s3] sm:$0xff] %vm19_vm0, %v109_v22 }

</bundles_post_ra>
